<compile_context>
chip_gen: v5e
topology: v5e:2x2
jax: 0.10.0
libtpu: 0.0.40
codegen_flags: <defaults>
</compile_context>

<pallas_src>
import functools

import jax
import jax.numpy as jnp
from jax.experimental import pallas as pl
from jax.experimental.pallas import tpu as pltpu


def _nais_kernel(p_ref, q_ref, w_ref, b_ref, h_ref, bias_ref, out_ref, *,
                 beta, mul_in_f32):
    """One grid step scores TB user/target pairs.

    p_ref    : [TB, N*K]       bf16  history embeddings, flattened (n-major, k-minor)
    q_ref    : [TB, K]         bf16  target embedding (un-tiled; replicated here)
    w_ref    : [N*K, N*Wd+N]   bf16  [ kron(I_N, W) | kron(I_N, ones(K,1)) ]
    b_ref    : [1, N*Wd]       f32   attention-MLP bias, tiled N times
    h_ref    : [N*Wd, N]       bf16  kron(I_N, h)
    bias_ref : [TB, 1]         f32   per-target item bias
    out_ref  : [TB, 1]         f32   sigmoid scores
    """
    n_hist = h_ref.shape[1]          # N
    nw = h_ref.shape[0]              # N * Wd

    # Replicate the K-wide target embedding N times along lanes so it lines up
    # with p's per-user [n, k] row-major flattening.  Only K bf16 values/user
    # were streamed from HBM; the replication is a cheap in-vreg lane concat.
    q_rep = jnp.concatenate([q_ref[...]] * n_hist, axis=-1)          # [TB, N*K]

    # 'prod' algorithm: element-wise p_i * q_j for every history slot (VPU).
    if mul_in_f32:
        # v5-class VPUs have no native bf16 VALU; multiply explicitly in f32
        # (avoids implicit pack/unpack), then drop back to bf16 for the MXU.
        prod = (p_ref[...].astype(jnp.float32)
                * q_rep.astype(jnp.float32)).astype(jnp.bfloat16)
    else:
        prod = p_ref[...] * q_rep                                     # bf16 VPU

    # Single fused MXU matmul (bf16 x bf16, f32 accumulation):
    #   columns [:N*Wd] -> per-slot attention-MLP pre-activation
    #   columns [N*Wd:] -> per-slot  sum_k p_ik * q_jk  (similarity dot)
    acts = jnp.dot(prod, w_ref[...], preferred_element_type=jnp.float32)
    pq_dot = acts[:, nw:]                                             # [TB, N]
    e = jnp.maximum(acts[:, :nw] + b_ref[...], 0.0)                   # [TB, N*Wd]

    # Attention logits via the block-diagonal h projection (bf16 MXU, f32 acc).
    logits = jnp.dot(e.astype(jnp.bfloat16), h_ref[...],
                     preferred_element_type=jnp.float32)              # [TB, N]

    # beta-smoothed softmax over the history axis, max-stabilised:
    #   coeff_i = exp(l_i) / (sum_j exp(l_j))**beta
    #           = exp(l_i - m) * exp((1-beta)*m - beta*log(sum_j exp(l_j - m)))
    m = jnp.max(logits, axis=-1, keepdims=True)                       # [TB, 1]
    a = jnp.exp(logits - m)                                           # [TB, N]
    denom = jnp.sum(a, axis=-1, keepdims=True)                        # [TB, 1] >= 1
    scale = jnp.exp((1.0 - beta) * m - beta * jnp.log(denom))         # [TB, 1]

    score = jnp.sum(a * pq_dot, axis=-1, keepdims=True) * scale + bias_ref[...]
    out_ref[...] = 1.0 / (1.0 + jnp.exp(-score))                      # sigmoid


def _padded_block_bytes(shape, itemsize):
    """VMEM footprint of one block with the last two dims padded to (8, 128)."""
    s = (1, 1) + tuple(int(d) for d in shape)
    lead = 1
    for d in s[:-2]:
        lead *= d
    sub = -(-s[-2] // 8) * 8
    lane = -(-s[-1] // 128) * 128
    return lead * sub * lane * itemsize


def nais_forward(p, q, W, b, h, bias_j, *, beta, block_users=256, mul_in_f32=None):
    """p:[B,N,K]  q:[B,K]  W:[K,Wd]  b:[1,Wd]  h:[1,Wd]  bias_j:[B,1] -> [B,1] f32."""
    B, N, K = p.shape
    Wd = W.shape[-1]
    TB = block_users
    num_tiles = -(-B // TB)
    B_pad = num_tiles * TB
    if B_pad != B:
        pad = B_pad - B
        p = jnp.pad(p, ((0, pad), (0, 0), (0, 0)))
        q = jnp.pad(q, ((0, pad), (0, 0)))
        bias_j = jnp.pad(bias_j, ((0, pad), (0, 0)))

    if mul_in_f32 is None:
        try:  # v5-class chips have no native bf16 VALU.
            mul_in_f32 = "v5" in jax.devices()[0].device_kind.lower()
        except Exception:
            mul_in_f32 = False

    # Host-side layout prep (cheap XLA glue).  Large operands stream as bf16.
    p_flat = p.reshape(B_pad, N * K).astype(jnp.bfloat16)             # [B, N*K]
    q_bf = q.astype(jnp.bfloat16)                                     # [B, K]
    eye_n = jnp.eye(N, dtype=jnp.float32)
    # Block-diagonal weight fuses the attention MLP and the p.q row-sums into
    # one MXU matmul (no in-kernel cross-lane reductions besides the softmax).
    # TODO(synk): if a v5e deployment flips to MXU-bound after the byte diet,
    # revisit this kron (it wastes 15/16 of MXU MACs there).
    w_blk = jnp.concatenate(
        [jnp.kron(eye_n, W.astype(jnp.float32)),                      # MLP weights
         jnp.kron(eye_n, jnp.ones((K, 1), jnp.float32))],             # ones -> p.q
        axis=1).astype(jnp.bfloat16)                                  # [N*K, N*Wd+N]
    b_tiled = jnp.tile(jnp.reshape(b, (1, Wd)).astype(jnp.float32), (1, N))
    h_blk = jnp.kron(eye_n, jnp.reshape(h, (Wd, 1)).astype(jnp.float32)
                     ).astype(jnp.bfloat16)                           # [N*Wd, N]
    bias_j = bias_j.astype(jnp.float32)

    # Right-size the scoped-VMEM request from the actual block sizes
    # (double-buffered) plus spill/fragmentation headroom.  v7x: 64 MiB phys.
    blocks = (
        _padded_block_bytes((TB, N * K), 2)            # p
        + _padded_block_bytes((TB, K), 2)              # q
        + _padded_block_bytes((N * K, N * Wd + N), 2)  # w_blk (grid-invariant)
        + _padded_block_bytes((1, N * Wd), 4)          # b_tiled
        + _padded_block_bytes((N * Wd, N), 2)          # h_blk
        + _padded_block_bytes((TB, 1), 4)              # item bias
        + _padded_block_bytes((TB, 1), 4))             # output
    vmem_limit = int(2 * blocks + (8 << 20))

    kernel = functools.partial(_nais_kernel, beta=float(beta),
                               mul_in_f32=bool(mul_in_f32))
    out = pl.pallas_call(
        kernel,
        out_shape=jax.ShapeDtypeStruct((B_pad, 1), jnp.float32),
        grid_spec=pltpu.PrefetchScalarGridSpec(
            num_scalar_prefetch=0,
            grid=(num_tiles,),
            in_specs=[
                pl.BlockSpec((TB, N * K), lambda i: (i, 0)),          # p (streamed)
                pl.BlockSpec((TB, K), lambda i: (i, 0)),              # q (streamed)
                pl.BlockSpec((N * K, N * Wd + N), lambda i: (0, 0)),  # w_blk
                pl.BlockSpec((1, N * Wd), lambda i: (0, 0)),          # b_tiled
                pl.BlockSpec((N * Wd, N), lambda i: (0, 0)),          # h_blk
                pl.BlockSpec((TB, 1), lambda i: (i, 0)),              # item bias
            ],
            out_specs=pl.BlockSpec((TB, 1), lambda i: (i, 0)),
        ),
        compiler_params=pltpu.CompilerParams(
            dimension_semantics=("parallel",),     # shards users over v7x's 2 TCs
            vmem_limit_bytes=vmem_limit,
        ),
    )(p_flat, q_bf, w_blk, b_tiled, h_blk, bias_j)
    return out[:B]


def nais_reference(p, q, W, b, h, bias_j, *, beta):
    prod = p * q[:, None, :]                                          # [B,N,K]
    mlp = jnp.maximum(jnp.einsum("bnk,kw->bnw", prod, W)
                      + jnp.reshape(b, (1, 1, -1)), 0.0)
    logits = jnp.sum(mlp * jnp.reshape(h, (1, 1, -1)), axis=-1)       # [B,N]
    a = jnp.exp(logits)
    coeff = a / (jnp.sum(a, axis=-1, keepdims=True) ** beta)
    score = jnp.sum(coeff * jnp.sum(prod, -1), axis=-1, keepdims=True) + bias_j
    return jax.nn.sigmoid(score)


if __name__ == "__main__":
    # Hyper-params implied by NAISNet.__init__ (synthetic, deterministic).
    num_items = 200
    embed_size = 32     # args.embed_size
    weight_size = 32    # args.weight_size
    beta = 0.5          # args.beta (softmax smoothing exponent)
    B, N = 1024, 16     # 4 grid steps of 256 users -> >= 2 steps per v7x TC

    key = jax.random.PRNGKey(0)
    k1, k2, k3, k4, k5, k6, k7, k8 = jax.random.split(key, 8)

    # Model parameters (embedding tables + attention MLP).
    Q_hist = 0.01 * jax.random.normal(k1, (num_items + 1, embed_size), jnp.float32)
    Q_tgt = 0.01 * jax.random.normal(k2, (num_items + 1, embed_size), jnp.float32)
    item_bias = 0.01 * jax.random.normal(k3, (num_items + 1,), jnp.float32)
    W_attn = 0.1 * jax.random.normal(k4, (embed_size, weight_size), jnp.float32)
    b_attn = 0.1 * jax.random.normal(k5, (1, weight_size), jnp.float32)
    h_attn = 0.1 * jax.random.normal(k6, (1, weight_size), jnp.float32)

    # Inputs: per-user history item ids and target item ids.
    hist_ids = jax.random.randint(k7, (B, N), 0, num_items)
    tgt_ids = jax.random.randint(k8, (B,), 0, num_items)

    # Embedding gather is glue in plain JAX; the hot path runs in the kernel.
    p = Q_hist[hist_ids]                      # [B, N, K]
    q = Q_tgt[tgt_ids]                        # [B, K]
    bias_j = item_bias[tgt_ids][:, None]      # [B, 1]

    out = nais_forward(p, q, W_attn, b_attn, h_attn, bias_j,
                       beta=beta, block_users=256)
    out = jax.block_until_ready(out)

    # Reference evaluated on the same bf16-quantised operands the kernel
    # streams (only MXU bf16 rounding / reordering remains as a difference).
    bf = lambda x: x.astype(jnp.bfloat16).astype(jnp.float32)
    ref = nais_reference(bf(p), bf(q), bf(W_attn), b_attn, bf(h_attn),
                         bias_j, beta=beta)
    assert out.shape == (B, 1)
    assert jnp.allclose(out, ref, rtol=5e-3, atol=1e-3), (
        float(jnp.max(jnp.abs(out - ref))))

    print("KERNEL_OK")
</pallas_src>

<mosaic_0001>
module attributes {stable_mosaic.version = 11 : i64} {
  func.func @_nais_kernel(%arg0: i32, %arg1: memref<256x512xbf16, #tpu.memory_space<vmem>>, %arg2: memref<256x32xbf16, #tpu.memory_space<vmem>>, %arg3: memref<512x528xbf16, #tpu.memory_space<vmem>>, %arg4: memref<1x512xf32, #tpu.memory_space<vmem>>, %arg5: memref<512x16xbf16, #tpu.memory_space<vmem>>, %arg6: memref<256x1xf32, #tpu.memory_space<vmem>>, %arg7: memref<256x1xf32, #tpu.memory_space<vmem>>) attributes {dimension_semantics = [#tpu.dimension_semantics<parallel>], iteration_bounds = array<i64: 4>, scalar_prefetch = 0 : i64, scratch_operands = 0 : i64, tpu.core_type = #tpu.core_type<tc>, window_params = [{transform_indices = @transform_0, window_bounds = array<i64: 256, 512>}, {transform_indices = @transform_1, window_bounds = array<i64: 256, 32>}, {pipeline_mode = #tpu.pipeline_mode<synchronous>, transform_indices = @transform_2, window_bounds = array<i64: 512, 528>}, {pipeline_mode = #tpu.pipeline_mode<synchronous>, transform_indices = @transform_3, window_bounds = array<i64: 1, 512>}, {pipeline_mode = #tpu.pipeline_mode<synchronous>, transform_indices = @transform_4, window_bounds = array<i64: 512, 16>}, {transform_indices = @transform_5, window_bounds = array<i64: 256, 1>}, {transform_indices = @transform_6, window_bounds = array<i64: 256, 1>}]} {
    %c0 = arith.constant 0 : index
    %c0_0 = arith.constant 0 : index
    %0 = vector.load %arg2[%c0, %c0_0] : memref<256x32xbf16, #tpu.memory_space<vmem>>, vector<256x32xbf16>
    %1 = tpu.concatenate %0, %0, %0, %0, %0, %0, %0, %0, %0, %0, %0, %0, %0, %0, %0, %0 in 1 : vector<256x32xbf16>, vector<256x32xbf16>, vector<256x32xbf16>, vector<256x32xbf16>, vector<256x32xbf16>, vector<256x32xbf16>, vector<256x32xbf16>, vector<256x32xbf16>, vector<256x32xbf16>, vector<256x32xbf16>, vector<256x32xbf16>, vector<256x32xbf16>, vector<256x32xbf16>, vector<256x32xbf16>, vector<256x32xbf16>, vector<256x32xbf16> -> vector<256x512xbf16>
    %c0_1 = arith.constant 0 : index
    %c0_2 = arith.constant 0 : index
    %2 = vector.load %arg1[%c0_1, %c0_2] : memref<256x512xbf16, #tpu.memory_space<vmem>>, vector<256x512xbf16>
    %3 = arith.mulf %2, %1 : vector<256x512xbf16>
    %c0_3 = arith.constant 0 : index
    %c0_4 = arith.constant 0 : index
    %4 = vector.load %arg3[%c0_3, %c0_4] : memref<512x528xbf16, #tpu.memory_space<vmem>>, vector<512x528xbf16>
    %cst = arith.constant dense<0.000000e+00> : vector<256x528xf32>
    %5 = tpu.matmul %3, %4, %cst {dimension_numbers = #tpu.dot_dimension_numbers<[1], [0], [0], [1], [0, 0, 1, 1], [], []>} : vector<256x512xbf16>, vector<512x528xbf16>, vector<256x528xf32> -> vector<256x528xf32>
    %6 = vector.extract_strided_slice %5 {offsets = [0, 512], sizes = [256, 16], strides = [1, 1]} : vector<256x528xf32> to vector<256x16xf32>
    %7 = vector.extract_strided_slice %5 {offsets = [0, 0], sizes = [256, 512], strides = [1, 1]} : vector<256x528xf32> to vector<256x512xf32>
    %c0_5 = arith.constant 0 : index
    %c0_6 = arith.constant 0 : index
    %8 = vector.load %arg4[%c0_5, %c0_6] : memref<1x512xf32, #tpu.memory_space<vmem>>, vector<1x512xf32>
    %9 = vector.broadcast %8 : vector<1x512xf32> to vector<256x512xf32>
    %10 = arith.addf %7, %9 : vector<256x512xf32>
    %cst_7 = arith.constant 0.000000e+00 : f32
    %11 = vector.broadcast %cst_7 : f32 to vector<256x512xf32>
    %12 = arith.maximumf %10, %11 : vector<256x512xf32>
    %13 = arith.truncf %12 : vector<256x512xf32> to vector<256x512xbf16>
    %c0_8 = arith.constant 0 : index
    %c0_9 = arith.constant 0 : index
    %14 = vector.load %arg5[%c0_8, %c0_9] : memref<512x16xbf16, #tpu.memory_space<vmem>>, vector<512x16xbf16>
    %cst_10 = arith.constant dense<0.000000e+00> : vector<256x16xf32>
    %15 = tpu.matmul %13, %14, %cst_10 {dimension_numbers = #tpu.dot_dimension_numbers<[1], [0], [0], [1], [0, 0, 1, 1], [], []>} : vector<256x512xbf16>, vector<512x16xbf16>, vector<256x16xf32> -> vector<256x16xf32>
    %cst_11 = arith.constant dense<0xFF800000> : vector<256xf32>
    %16 = vector.multi_reduction <maximumf>, %15, %cst_11 [1] : vector<256x16xf32> to vector<256xf32>
    %17 = vector.shape_cast %16 : vector<256xf32> to vector<256x1xf32>
    %18 = vector.broadcast %17 : vector<256x1xf32> to vector<256x16xf32>
    %19 = arith.subf %15, %18 : vector<256x16xf32>
    %20 = math.exp %19 : vector<256x16xf32>
    %cst_12 = arith.constant dense<0.000000e+00> : vector<256xf32>
    %21 = vector.multi_reduction <add>, %20, %cst_12 [1] : vector<256x16xf32> to vector<256xf32>
    %22 = vector.shape_cast %21 : vector<256xf32> to vector<256x1xf32>
    %cst_13 = arith.constant 5.000000e-01 : f32
    %23 = vector.broadcast %cst_13 : f32 to vector<256x1xf32>
    %24 = arith.mulf %23, %17 : vector<256x1xf32>
    %25 = math.log %22 : vector<256x1xf32>
    %cst_14 = arith.constant 5.000000e-01 : f32
    %26 = vector.broadcast %cst_14 : f32 to vector<256x1xf32>
    %27 = arith.mulf %26, %25 : vector<256x1xf32>
    %28 = arith.subf %24, %27 : vector<256x1xf32>
    %29 = math.exp %28 : vector<256x1xf32>
    %30 = arith.mulf %20, %6 : vector<256x16xf32>
    %cst_15 = arith.constant dense<0.000000e+00> : vector<256xf32>
    %31 = vector.multi_reduction <add>, %30, %cst_15 [1] : vector<256x16xf32> to vector<256xf32>
    %32 = vector.shape_cast %31 : vector<256xf32> to vector<256x1xf32>
    %33 = arith.mulf %32, %29 : vector<256x1xf32>
    %c0_16 = arith.constant 0 : index
    %c0_17 = arith.constant 0 : index
    %34 = vector.load %arg6[%c0_16, %c0_17] : memref<256x1xf32, #tpu.memory_space<vmem>>, vector<256x1xf32>
    %35 = arith.addf %33, %34 : vector<256x1xf32>
    %cst_18 = arith.constant 0.000000e+00 : f32
    %36 = vector.broadcast %cst_18 : f32 to vector<256x1xf32>
    %37 = arith.subf %36, %35 : vector<256x1xf32>
    %38 = math.exp %37 : vector<256x1xf32>
    %cst_19 = arith.constant 1.000000e+00 : f32
    %39 = vector.broadcast %cst_19 : f32 to vector<256x1xf32>
    %40 = arith.addf %39, %38 : vector<256x1xf32>
    %cst_20 = arith.constant 1.000000e+00 : f32
    %41 = vector.broadcast %cst_20 : f32 to vector<256x1xf32>
    %42 = arith.divf %41, %40 : vector<256x1xf32>
    %c0_21 = arith.constant 0 : index
    %c0_22 = arith.constant 0 : index
    %43 = vector.load %arg7[%c0_21, %c0_22] : memref<256x1xf32, #tpu.memory_space<vmem>>, vector<256x1xf32>
    tpu.vector_store %arg7[%c0_21, %c0_22], %42 {strides = array<i32>} : memref<256x1xf32, #tpu.memory_space<vmem>>, vector<256x1xf32>,
    return
  }
  func.func @transform_0(%arg0: i32) -> (i32, i32) {
    %c0_i32 = arith.constant 0 : i32
    %c0_i32_0 = arith.constant 0 : i32
    return %arg0, %c0_i32 : i32, i32
  }
  func.func @transform_1(%arg0: i32) -> (i32, i32) {
    %c0_i32 = arith.constant 0 : i32
    %c0_i32_0 = arith.constant 0 : i32
    return %arg0, %c0_i32 : i32, i32
  }
  func.func @transform_2(%arg0: i32) -> (i32, i32) {
    %c0_i32 = arith.constant 0 : i32
    %c0_i32_0 = arith.constant 0 : i32
    %c0_i32_1 = arith.constant 0 : i32
    return %c0_i32, %c0_i32_0 : i32, i32
  }
  func.func @transform_3(%arg0: i32) -> (i32, i32) {
    %c0_i32 = arith.constant 0 : i32
    %c0_i32_0 = arith.constant 0 : i32
    %c0_i32_1 = arith.constant 0 : i32
    return %c0_i32, %c0_i32_0 : i32, i32
  }
  func.func @transform_4(%arg0: i32) -> (i32, i32) {
    %c0_i32 = arith.constant 0 : i32
    %c0_i32_0 = arith.constant 0 : i32
    %c0_i32_1 = arith.constant 0 : i32
    return %c0_i32, %c0_i32_0 : i32, i32
  }
  func.func @transform_5(%arg0: i32) -> (i32, i32) {
    %c0_i32 = arith.constant 0 : i32
    %c0_i32_0 = arith.constant 0 : i32
    return %arg0, %c0_i32 : i32, i32
  }
  func.func @transform_6(%arg0: i32) -> (i32, i32) {
    %c0_i32 = arith.constant 0 : i32
    %c0_i32_0 = arith.constant 0 : i32
    return %arg0, %c0_i32 : i32, i32
  }
}

</mosaic_0001>

<bundles_post_ra>
// kernel: tpu_custom_call.1
= control target key start
LH: loop header
LB: loop body
LE: loop exit
PB: predicated region body
PF: predicated region fallthrough
CT: control target
= control target key end

     0   :  { %s7697_s21 = smov 0   ;;  %s10717_s0 = inlined_call_operand.vmem [shape: bf16[1024,512], index: 0, kind: input, shape index: {}]   ;;  %s10718_s1 = inlined_call_operand.vmem [shape: bf16[1024,32], index: 1, kind: input, shape index: {}]   ;;  %s10719_s2 = inlined_call_operand.vmem [shape: bf16[512,528], index: 2, kind: input, shape index: {}]   ;;  %s10720_s3 = inlined_call_operand.vmem [shape: f32[1,512], index: 3, kind: input, shape index: {}]   ;;  %s10721_s4 = inlined_call_operand.vmem [shape: bf16[512,16], index: 4, kind: input, shape index: {}]   ;;  %s10722_s5 = inlined_call_operand.vmem [shape: f32[1024,1], index: 5, kind: input, shape index: {}]   ;;  %s10723_s6 = inlined_call_operand.vmem [shape: f32[1024,1], index: 6, kind: output, shape index: {}]  }
   0x1 LB: > { %s6261_s22 = sadd.s32 4294967295, %s7657_s21   ;;  %p6265_p0 = scmp.ge.s32.totalorder %s7657_s21, 1  ;;  %s7657_s21 = sphi %s7697_s21, %s16_s21  }
   0x2   : > { %p236_p1 = scmp.lt.s32.totalorder %s7657_s21, 5 }
   0x4   : > { %p237_p2 = pnand %p6265_p0, %p236_p1 }
   0x6   : > { %240 = sbr.rel (%p237_p2) target bundleno = 2126 (0x84e), region = 44 }
   0xb   : > { %s6266_s23 = sshll.u32 %s6261_s22, 5  ;;  %s7659_s28 = smov 32   ;;  %v6481_v2 = vld [vmem:[%s10719_s2 + $0x118] sm:$0xf]  ;;  %v7163_v3 = vld [vmem:[%s10719_s2 + $0x128] sm:$0xf0] }
   0xc   : > { %p278_p3 = scmp.lt.s32.totalorder %s6266_s23, 127  ;;  %s7660_s29 = smov 96   ;;  %v6482_v4 = vor.u32 %v7163_v3, %v6481_v2  ;;  %v6641_v5 = vld [vmem:[%s10719_s2 + $0x258] sm:$0xf]  ;;  %v7203_v6 = vld [vmem:[%s10719_s2 + $0x268] sm:$0xf0] }
   0xd   : > { %s7661_s30 = smov 64   ;;  %v6801_v7 = vld [vmem:[%s10719_s2 + $0x398] sm:$0xf]  ;;  %v6642_v8 = vor.u32 %v7203_v6, %v6641_v5  ;;  %v7243_v9 = vld [vmem:[%s10719_s2 + $0x3a8] sm:$0xf0]  ;;  %vm510_vm0 = vcmask 261120  }
   0xe   : > { %s11069_s23 = smov (!%p278_p3, %s6266_s23), 127  ;;  %v6961_v10 = vld [vmem:[%s10719_s2 + $0x4d8] sm:$0xf]  ;;  %v7283_v11 = vld [vmem:[%s10719_s2 + $0x4e8] sm:$0xf0]  ;;  %2081 = vmatpush.bf16.msra.mxu0 %v6482_v4  ;;  %v6802_v12 = vor.u32 %v7243_v9, %v6801_v7  ;;  %vm559_vm1 = vcmask 523264  }
   0xf   : > { %s6270_s24 = sshll.u32 %s11069_s23, 2  ;;  %v6962_v13 = vor.u32 %v7283_v11, %v6961_v10  ;;  %2170 = vmatpush.bf16.msra.mxu1 %v6642_v8  ;;  %v6461_v15 = vld [vmem:[%s10719_s2 + $0xf0] sm:$0xf]  ;;  %v7158_v16 = vld [vmem:[%s10719_s2 + $0x100] sm:$0xf0]  ;;  %s7109_s7 = sshll.u32 %s11069_s23, 4 }
  0x10   : > { %s7711_s27 = scalar_lea.vmem %s10718_s1, %s6270_s24  ;;  %2259 = vmatpush.bf16.msra.mxu2 %v6802_v12  ;;  %v6462_v17 = vor.u32 %v7158_v16, %v6461_v15  ;;  %v6621_v18 = vld [vmem:[%s10719_s2 + $0x230] sm:$0xf]  ;;  %v7198_v19 = vld [vmem:[%s10719_s2 + $0x240] sm:$0xf0]  ;;  %v6441_v28 = vld [vmem:[%s10719_s2 + $0xc8] sm:$0xf]  ;;  %s8014_s10 = scalar_lea.vmem %s10717_s0, %s7109_s7 }
  0x11   : > { %v7714_v0 = vld [vmem:[%s7711_s27] sm:$0xff]  ;;  %v7717_v1 = vld [vmem:[%s7711_s27 + $0x8] sm:$0xff]  ;;  %v7756_v14 = vld [vmem:[%s7711_s27 + $0x10] sm:$0xff]  ;;  %2348 = vmatpush.bf16.msra.mxu3 %v6962_v13  ;;  %v6622_v22 = vor.u32 %v7198_v19, %v6621_v18  ;;  %vm592_vm2 = vcmask 785408   ;;  %vm4803_vm3 = vcmask 130048   ;;  %s6272_s18 = sshll.u32 %s11069_s23, 3 }
  0x12   : > { %414 = vrot.lane.b32.xlu0 %v7714_v0, %s7659_s28  ;;  %478 = vrot.lane.b32.xlu1 %v7714_v0, %s7660_s29  ;;  %v6781_v20 = vld [vmem:[%s10719_s2 + $0x370] sm:$0xf]  ;;  %v7780_v21 = vld [vmem:[%s7711_s27 + $0x18] sm:$0xff]  ;;  %s10163_s22 = scalar_lea.vmem %s10722_s5, %s6272_s18  ;;  %vm6148_vm5 = vcmask 7168   ;;  %s10225_s26 = scalar_lea.vmem %s10723_s6, %s6272_s18 }
  0x13   : > { %448 = vrot.lane.b32.xlu2 %v7717_v1, %s7661_s30  ;;  %v7238_v23 = vld [vmem:[%s10719_s2 + $0x380] sm:$0xf0]  ;;  %v6941_v24 = vld [vmem:[%s10719_s2 + $0x4b0] sm:$0xf]  ;;  %2082 = vmatpush.bf16.msra.mxu0 %v6462_v17  ;;  %v7153_v29 = vld [vmem:[%s10719_s2 + $0xd8] sm:$0xf0] }
  0x14   : > { %v7278_v25 = vld [vmem:[%s10719_s2 + $0x4c0] sm:$0xf0]  ;;  %v6782_v26 = vor.u32 %v7238_v23, %v6781_v20  ;;  %v6601_v30 = vld [vmem:[%s10719_s2 + $0x208] sm:$0xf]  ;;  %2171 = vmatpush.bf16.msra.mxu1 %v6622_v22  ;;  %v6442_v31 = vor.u32 %v7153_v29, %v6441_v28  ;;  %v7193_v32 = vld [vmem:[%s10719_s2 + $0x218] sm:$0xf0] }
  0x15   : > { %v6942_v27 = vor.u32 %v7278_v25, %v6941_v24  ;;  %v6761_v33 = vld [vmem:[%s10719_s2 + $0x348] sm:$0xf]  ;;  %v7233_v34 = vld [vmem:[%s10719_s2 + $0x358] sm:$0xf0]  ;;  %v6602_v35 = vor.u32 %v7193_v32, %v6601_v30  ;;  %v6421_v38 = vld [vmem:[%s10719_s2 + $0xa0] sm:$0xf] }
  0x16   : > { %2260 = vmatpush.bf16.msra.mxu2 %v6782_v26  ;;  %v6921_v36 = vld [vmem:[%s10719_s2 + $0x488] sm:$0xf]  ;;  %v7273_v37 = vld [vmem:[%s10719_s2 + $0x498] sm:$0xf0]  ;;  %v6762_v39 = vor.u32 %v7233_v34, %v6761_v33  ;;  %v7148_v41 = vld [vmem:[%s10719_s2 + $0xb0] sm:$0xf0] }
  0x17   : > { %2349 = vmatpush.bf16.msra.mxu3 %v6942_v27  ;;  %v6922_v40 = vor.u32 %v7273_v37, %v6921_v36  ;;  %v6581_v42 = vld [vmem:[%s10719_s2 + $0x1e0] sm:$0xf]  ;;  %v7188_v43 = vld [vmem:[%s10719_s2 + $0x1f0] sm:$0xf0]  ;;  %2083 = vmatpush.bf16.msra.mxu0 %v6442_v31  ;;  %v6422_v44 = vor.u32 %v7148_v41, %v6421_v38  ;;  %v7855_v53 = vld [vmem:[%s7711_s27 + $0x28] sm:$0xff] }
  0x18   : > { %v6741_v45 = vld [vmem:[%s10719_s2 + $0x320] sm:$0xf]  ;;  %v7228_v46 = vld [vmem:[%s10719_s2 + $0x330] sm:$0xf0]  ;;  %2172 = vmatpush.bf16.msra.mxu1 %v6602_v35  ;;  %v6582_v49 = vor.u32 %v7188_v43, %v6581_v42  ;;  %v6401_v55 = vld [vmem:[%s10719_s2 + $0x78] sm:$0xf] }
  0x19   : > { %v6901_v47 = vld [vmem:[%s10719_s2 + $0x460] sm:$0xf]  ;;  %v7268_v48 = vld [vmem:[%s10719_s2 + $0x470] sm:$0xf0]  ;;  %v6742_v50 = vor.u32 %v7228_v46, %v6741_v45  ;;  %v7143_v56 = vld [vmem:[%s10719_s2 + $0x88] sm:$0xf0] }
  0x1a   : > { %446 = vrot.lane.b32.xlu0 %v7714_v0, %s7661_s30  ;;  %416 = vrot.lane.b32.xlu1 %v7717_v1, %s7659_s28  ;;  %v6902_v51 = vor.u32 %v7268_v48, %v6901_v47  ;;  %v7846_v52 = vld [vmem:[%s7711_s27 + $0x20] sm:$0xff]  ;;  %v7864_v54 = vld [vmem:[%s7711_s27 + $0x30] sm:$0xff]  ;;  %v6402_v58 = vor.u32 %v7143_v56, %v6401_v55 }
  0x1b   : > { %480 = vrot.lane.b32.xlu2 %v7717_v1, %s7660_s29  ;;  %2261 = vmatpush.bf16.msra.mxu2 %v6762_v39  ;;  %v6561_v57 = vld [vmem:[%s10719_s2 + $0x1b8] sm:$0xf]  ;;  %v7183_v59 = vld [vmem:[%s10719_s2 + $0x1c8] sm:$0xf0]  ;;  %v6381_v6 = vld [vmem:[%s10719_s2 + $0x50] sm:$0xf] }
  0x1c   : > { %2350 = vmatpush.bf16.msra.mxu3 %v6922_v40  ;;  %2084 = vmatpush.bf16.msra.mxu0 %v6422_v44  ;;  %v6721_v60 = vld [vmem:[%s10719_s2 + $0x2f8] sm:$0xf]  ;;  %v7223_v61 = vld [vmem:[%s10719_s2 + $0x308] sm:$0xf0]  ;;  %v6562_v62 = vor.u32 %v7183_v59, %v6561_v57  ;;  %v7138_v7 = vld [vmem:[%s10719_s2 + $0x60] sm:$0xf0] }
  0x1d   : > { %2173 = vmatpush.bf16.msra.mxu1 %v6582_v49  ;;  %v6722_v63 = vor.u32 %v7223_v61, %v6721_v60  ;;  %v6881_v2 = vld [vmem:[%s10719_s2 + $0x438] sm:$0xf]  ;;  %v7263_v3 = vld [vmem:[%s10719_s2 + $0x448] sm:$0xf0]  ;;  %v6541_v8 = vld [vmem:[%s10719_s2 + $0x190] sm:$0xf]  ;;  %v6382_v9 = vor.u32 %v7138_v7, %v6381_v6 }
  0x1e   : > { %v7897_v4 = vld [vmem:[%s7711_s27 + $0x38] sm:$0xff]  ;;  %v6882_v5 = vor.u32 %v7263_v3, %v6881_v2  ;;  %v7178_v10 = vld [vmem:[%s10719_s2 + $0x1a0] sm:$0xf0]  ;;  %v6701_v11 = vld [vmem:[%s10719_s2 + $0x2d0] sm:$0xf] }
  0x1f   : > { %2262 = vmatpush.bf16.msra.mxu2 %v6742_v50  ;;  %v7218_v12 = vld [vmem:[%s10719_s2 + $0x2e0] sm:$0xf0]  ;;  %v6542_v13 = vor.u32 %v7178_v10, %v6541_v8  ;;  %v6861_v16 = vld [vmem:[%s10719_s2 + $0x410] sm:$0xf]  ;;  %v6361_v19 = vld [vmem:[%s10719_s2 + $0x28] sm:$0xf] }
  0x20   : > { %2351 = vmatpush.bf16.msra.mxu3 %v6902_v51  ;;  %2085 = vmatpush.bf16.msra.mxu0 %v6402_v58  ;;  %v6702_v15 = vor.u32 %v7218_v12, %v6701_v11  ;;  %v7258_v17 = vld [vmem:[%s10719_s2 + $0x420] sm:$0xf0]  ;;  %v7133_v20 = vld [vmem:[%s10719_s2 + $0x38] sm:$0xf0]  ;;  %v6521_v22 = vld [vmem:[%s10719_s2 + $0x168] sm:$0xf] }
  0x21   : > { %2174 = vmatpush.bf16.msra.mxu1 %v6562_v62  ;;  %v6862_v18 = vor.u32 %v7258_v17, %v6861_v16  ;;  %v6362_v23 = vor.u32 %v7133_v20, %v6361_v19  ;;  %v7173_v24 = vld [vmem:[%s10719_s2 + $0x178] sm:$0xf0]  ;;  %v6681_v25 = vld [vmem:[%s10719_s2 + $0x2a8] sm:$0xf]  ;;  %v6341_v31 = vld [vmem:[%s10719_s2] sm:$0xf] }
  0x22   : > { %418 = vrot.lane.b32.xlu0 %v7756_v14, %s7659_s28  ;;  %450 = vrot.lane.b32.xlu1 %v7756_v14, %s7661_s30  ;;  %v7213_v26 = vld [vmem:[%s10719_s2 + $0x2b8] sm:$0xf0]  ;;  %v6522_v27 = vor.u32 %v7173_v24, %v6521_v22  ;;  %v6841_v29 = vld [vmem:[%s10719_s2 + $0x3e8] sm:$0xf] }
  0x23   : > { %482 = vrot.lane.b32.xlu2 %v7756_v14, %s7660_s29  ;;  %2263 = vmatpush.bf16.msra.mxu2 %v6722_v63  ;;  %v6682_v28 = vor.u32 %v7213_v26, %v6681_v25  ;;  %v7253_v30 = vld [vmem:[%s10719_s2 + $0x3f8] sm:$0xf0]  ;;  %v7128_v32 = vld [vmem:[%s10719_s2 + $0x10] sm:$0xf0]  ;;  %v6501_v33 = vld [vmem:[%s10719_s2 + $0x140] sm:$0xf] }
  0x24   : > { %2352 = vmatpush.bf16.msra.mxu3 %v6882_v5  ;;  %2086 = vmatpush.bf16.msra.mxu0 %v6382_v9  ;;  %v6842_v34 = vor.u32 %v7253_v30, %v6841_v29  ;;  %v6342_v35 = vor.u32 %v7128_v32, %v6341_v31  ;;  %v7168_v36 = vld [vmem:[%s10719_s2 + $0x150] sm:$0xf0]  ;;  %v6661_v37 = vld [vmem:[%s10719_s2 + $0x280] sm:$0xf]  ;;  %v7241_v44 = vld [vmem:[%s10719_s2 + $0x39c] sm:$0xf] }
  0x25   : > { %2175 = vmatpush.bf16.msra.mxu1 %v6542_v13  ;;  %v7208_v38 = vld [vmem:[%s10719_s2 + $0x290] sm:$0xf0]  ;;  %v6502_v39 = vor.u32 %v7168_v36, %v6501_v33  ;;  %v6821_v41 = vld [vmem:[%s10719_s2 + $0x3c0] sm:$0xf]  ;;  %v6803_v45 = vld [vmem:[%s10719_s2 + $0x3ac] sm:$0xf0] }
  0x26   : > { %v6662_v40 = vor.u32 %v7208_v38, %v6661_v37  ;;  %v7248_v42 = vld [vmem:[%s10719_s2 + $0x3d0] sm:$0xf0]  ;;  %v6806_v46 = vor.u32 %v7241_v44, %v6803_v45  ;;  %v7281_v47 = vld [vmem:[%s10719_s2 + $0x4dc] sm:$0xf]  ;;  %v6963_v48 = vld [vmem:[%s10719_s2 + $0x4ec] sm:$0xf0] }
  0x27   : > { %2264 = vmatpush.bf16.msra.mxu2 %v6702_v15  ;;  %v6822_v43 = vor.u32 %v7248_v42, %v6821_v41  ;;  %v7161_v49 = vld [vmem:[%s10719_s2 + $0x11c] sm:$0xf]  ;;  %v6966_v50 = vor.u32 %v7281_v47, %v6963_v48  ;;  %v6483_v51 = vld [vmem:[%s10719_s2 + $0x12c] sm:$0xf0]  ;;  %v8002_v59 = vld [vmem:[%s7711_s27 + $0x40] sm:$0xff] }
  0x28   : > { %2353 = vmatpush.bf16.msra.mxu3 %v6862_v18  ;;  %2087 = vmatpush.bf16.msra.mxu0 %v6362_v23  ;;  %v7201_v55 = vld [vmem:[%s10719_s2 + $0x25c] sm:$0xf]  ;;  %v6643_v56 = vld [vmem:[%s10719_s2 + $0x26c] sm:$0xf0]  ;;  %v6486_v57 = vor.u32 %v7161_v49, %v6483_v51  ;;  %v8017_v62 = vld [vmem:[%s7711_s27 + $0x48] sm:$0xff] }
  0x29   : > { %2176 = vmatpush.bf16.msra.mxu1 %v6522_v27  ;;  %v6646_v58 = vor.u32 %v7201_v55, %v6643_v56  ;;  %v641_v63 = vld [vmem:[%s8014_s10] sm:$0xff]  ;;  %v642_v2 = vld [vmem:[%s8014_s10 + $0x8] sm:$0xff]  ;;  %v643_v3 = vld [vmem:[%s8014_s10 + $0x10] sm:$0xff] }
  0x2a   : > { %420 = vrot.lane.b32.xlu0 %v7780_v21, %s7659_s28  ;;  %452 = vrot.lane.b32.xlu1 %v7780_v21, %s7661_s30  ;;  %v644_v5 = vld [vmem:[%s8014_s10 + $0x18] sm:$0xff]  ;;  %v705_v9 = vunpack.c.l.bf16 %v641_v63  ;;  %v706_v10 = vunpack.c.h.bf16 %v641_v63  ;;  %v707_v12 = vunpack.c.l.bf16 %v642_v2  ;;  %v708_v13 = vunpack.c.h.bf16 %v642_v2  ;;  %v645_v37 = vld [vmem:[%s8014_s10 + $0x20] sm:$0xff] }
  0x2b   : > { %484 = vrot.lane.b32.xlu2 %v7780_v21, %s7660_s29  ;;  %2265 = vmatpush.bf16.msra.mxu2 %v6682_v28  ;;  %v709_v15 = vunpack.c.l.bf16 %v643_v3  ;;  %v710_v18 = vunpack.c.h.bf16 %v643_v3  ;;  %v711_v19 = vunpack.c.l.bf16 %v644_v5  ;;  %v712_v20 = vunpack.c.h.bf16 %v644_v5  ;;  %v646_v38 = vld [vmem:[%s8014_s10 + $0x28] sm:$0xff]  ;;  %v7276_v42 = vld [vmem:[%s10719_s2 + $0x4b4] sm:$0xf]  ;;  %v648_v56 = vld [vmem:[%s8014_s10 + $0x38] sm:$0xff] }
  0x2c   : > { %2354 = vmatpush.bf16.msra.mxu3 %v6842_v34  ;;  %2088 = vmatpush.bf16.msra.mxu0 %v6342_v35  ;;  %v6783_v41 = vld [vmem:[%s10719_s2 + $0x384] sm:$0xf0]  ;;  %v8077_v55 = vld [vmem:[%s7711_s27 + $0x50] sm:$0xff]  ;;  %v715_v63 = vunpack.c.l.bf16 %v646_v38 }
  0x2d   : > { %2177 = vmatpush.bf16.msra.mxu1 %v6502_v39  ;;  %v647_v39 = vld [vmem:[%s8014_s10 + $0x30] sm:$0xff]  ;;  %v6943_v45 = vld [vmem:[%s10719_s2 + $0x4c4] sm:$0xf0] }
  0x2e   : > { %v6463_v47 = vld [vmem:[%s10719_s2 + $0x104] sm:$0xf0]  ;;  %v6946_v48 = vor.u32 %v7276_v42, %v6943_v45  ;;  %v717_v2 = vunpack.c.l.bf16 %v647_v39  ;;  %v718_v3 = vunpack.c.h.bf16 %v647_v39 }
  0x2f   : > { %2266 = vmatpush.bf16.msra.mxu2 %v6662_v40  ;;  %v7236_v40 = vld [vmem:[%s10719_s2 + $0x374] sm:$0xf]  ;;  %v6623_v51 = vld [vmem:[%s10719_s2 + $0x244] sm:$0xf0] }
  0x30   : > { %2355 = vmatpush.bf16.msra.mxu3 %v6822_v43  ;;  %2437 = vmatpush.bf16.msrb.mxu0 %v6486_v57  ;;  %v6786_v44 = vor.u32 %v7236_v40, %v6783_v41 }
  0x31   : > { %2526 = vmatpush.bf16.msrb.mxu1 %v6646_v58  ;;  %v713_v58 = vunpack.c.l.bf16 %v645_v37 }
  0x32   : > { %422 = vrot.lane.b32.xlu0 %v7846_v52, %s7659_s28  ;;  %454 = vrot.lane.b32.xlu1 %v7846_v52, %s7661_s30 }
  0x33   : > { %486 = vrot.lane.b32.xlu2 %v7846_v52, %s7660_s29  ;;  %2615 = vmatpush.bf16.msrb.mxu2 %v6806_v46  ;;  %v7156_v46 = vld [vmem:[%s10719_s2 + $0xf4] sm:$0xf] }
  0x34   : > { %2704 = vmatpush.bf16.msrb.mxu3 %v6966_v50  ;;  %v6466_v49 = vor.u32 %v7156_v46, %v6463_v47  ;;  %v7196_v50 = vld [vmem:[%s10719_s2 + $0x234] sm:$0xf] }
  0x35   : > { %v6626_v57 = vor.u32 %v7196_v50, %v6623_v51 }
  0x36   : > { %2438 = vmatpush.bf16.msrb.mxu0 %v6466_v49 }
  0x37   : > { %2616 = vmatpush.bf16.msrb.mxu2 %v6786_v44  ;;  %2527 = vmatpush.bf16.msrb.mxu1 %v6626_v57 }
  0x38   : > { %2705 = vmatpush.bf16.msrb.mxu3 %v6946_v48 }
  0x3a   : > { %424 = vrot.lane.b32.xlu0 %v7855_v53, %s7659_s28  ;;  %456 = vrot.lane.b32.xlu1 %v7855_v53, %s7661_s30 }
  0x3b   : > { %488 = vrot.lane.b32.xlu2 %v7855_v53, %s7660_s29 }
  0x42   : > { %426 = vrot.lane.b32.xlu0 %v7864_v54, %s7659_s28  ;;  %458 = vrot.lane.b32.xlu1 %v7864_v54, %s7661_s30 }
  0x43   : > { %490 = vrot.lane.b32.xlu2 %v7864_v54, %s7660_s29 }
  0x4a   : > { %428 = vrot.lane.b32.xlu0 %v7897_v4, %s7659_s28  ;;  %460 = vrot.lane.b32.xlu1 %v7897_v4, %s7661_s30 }
  0x4b   : > { %492 = vrot.lane.b32.xlu2 %v7897_v4, %s7660_s29 }
  0x52   : > { %430 = vrot.lane.b32.xlu0 %v8002_v59, %s7659_s28  ;;  %462 = vrot.lane.b32.xlu1 %v8002_v59, %s7661_s30 }
  0x53   : > { %494 = vrot.lane.b32.xlu2 %v8002_v59, %s7660_s29 }
  0x5a   : > { %432 = vrot.lane.b32.xlu0 %v8017_v62, %s7659_s28  ;;  %464 = vrot.lane.b32.xlu1 %v8017_v62, %s7661_s30 }
  0x5b   : > { %496 = vrot.lane.b32.xlu2 %v8017_v62, %s7660_s29 }
  0x62   : > { %434 = vrot.lane.b32.xlu0 %v8077_v55, %s7659_s28  ;;  %466 = vrot.lane.b32.xlu1 %v8077_v55, %s7661_s30 }
  0x63   : > { %498 = vrot.lane.b32.xlu2 %v8077_v55, %s7660_s29 }
  0x6d   : > { %v449_v6 = vpop.permute.xlu2 %448 }
  0x84   : > { %v415_v60 = vpop.permute.xlu0 %414  ;;  %v479_v61 = vpop.permute.xlu1 %478 }
  0x85   : > { %v513_v7 = vsel %vm510_vm0, %v7714_v0, %v415_v60  ;;  %v714_v60 = vunpack.c.h.bf16 %v645_v37 }
  0x8c   : > { %v447_v8 = vpop.permute.xlu0 %446  ;;  %v417_v16 = vpop.permute.xlu1 %416 }
  0x8d   : > { %v561_v11 = vsel %vm559_vm1, %v513_v7, %v447_v8  ;;  %v516_v24 = vsel %vm510_vm0, %v7717_v1, %v417_v16  ;;  %v481_v1 = vpop.permute.xlu2 %480  ;;  %v719_v7 = vunpack.c.l.bf16 %v648_v56  ;;  %v720_v8 = vunpack.c.h.bf16 %v648_v56 }
  0x8e   : > { %v594_v17 = vsel %vm592_vm2, %v561_v11, %v479_v61  ;;  %v563_v36 = vsel %vm559_vm1, %v516_v24, %v449_v6  ;;  %v716_v6 = vunpack.c.h.bf16 %v646_v38 }
  0x8f   : > { %v833_v22 = vunpack.c.l.bf16 %v594_v17  ;;  %v834_v23 = vunpack.c.h.bf16 %v594_v17  ;;  %v597_v43 = vsel %vm592_vm2, %v563_v36, %v481_v1 }
  0x90   : > { %v835_v61 = vunpack.c.l.bf16 %v597_v43  ;;  %v836_v5 = vunpack.c.h.bf16 %v597_v43 }
  0x91   : > { %v865_v0 = vmul.f32 %v833_v22, %v705_v9  ;;  %v866_v25 = vmul.f32 %v833_v22, %v706_v10  ;;  %v867_v26 = vmul.f32 %v833_v22, %v707_v12  ;;  %v868_v27 = vmul.f32 %v833_v22, %v708_v13 }
  0x92   : > { %v869_v28 = vmul.f32 %v834_v23, %v709_v15  ;;  %v870_v29 = vmul.f32 %v834_v23, %v710_v18  ;;  %v871_v30 = vmul.f32 %v834_v23, %v711_v19  ;;  %v872_v31 = vmul.f32 %v834_v23, %v712_v20 }
  0x93   : > { %v873_v10 = vmul.f32 %v835_v61, %v713_v58  ;;  %v874_v11 = vmul.f32 %v835_v61, %v714_v60  ;;  %v875_v12 = vmul.f32 %v835_v61, %v715_v63  ;;  %v877_v13 = vmul.f32 %v836_v5, %v717_v2 }
  0x94   : > { %v8035_v32 = vpack.c.bf16 %v869_v28, %v865_v0  ;;  %v8037_v33 = vpack.c.bf16 %v870_v29, %v866_v25  ;;  %v8039_v34 = vpack.c.bf16 %v871_v30, %v867_v26  ;;  %v8041_v35 = vpack.c.bf16 %v872_v31, %v868_v27  ;;  %v419_v9 = vpop.permute.xlu0 %418  ;;  %v451_v20 = vpop.permute.xlu1 %450  ;;  %v649_v27 = vld [vmem:[%s8014_s10 + $0x40] sm:$0xff]  ;;  %v651_v28 = vld [vmem:[%s8014_s10 + $0x50] sm:$0xff]  ;;  %v8105_v29 = vld [vmem:[%s7711_s27 + $0x58] sm:$0xff] }
  0x95   : > { %v878_v15 = vmul.f32 %v836_v5, %v718_v3  ;;  %v876_v16 = vmul.f32 %v835_v61, %v716_v6  ;;  %v879_v17 = vmul.f32 %v836_v5, %v719_v7  ;;  %v880_v18 = vmul.f32 %v836_v5, %v720_v8  ;;  %v483_v0 = vpop.permute.xlu2 %482  ;;  %v650_v30 = vld [vmem:[%s8014_s10 + $0x48] sm:$0xff]  ;;  %v652_v31 = vld [vmem:[%s8014_s10 + $0x58] sm:$0xff]  ;;  %436 = vrot.lane.b32.xlu0 %v8105_v29, %s7659_s28  ;;  %v653_v7 = vld [vmem:[%s8014_s10 + $0x60] sm:$0xff] }
  0x96   : > { %2089 = vmatmul.bf16.vlgmr.msra.gmra.mxu0 %v8035_v32  ;;  %2178 = vmatmul.bf16.vlgmr.msra.gmra.mxu1 %v8037_v33  ;;  %v519_v19 = vsel %vm510_vm0, %v7756_v14, %v419_v9  ;;  %v8088_v22 = vpack.c.bf16 %v877_v13, %v873_v10  ;;  %v721_v1 = vunpack.c.l.bf16 %v649_v27  ;;  %v722_v36 = vunpack.c.h.bf16 %v649_v27  ;;  %v654_v8 = vld [vmem:[%s8014_s10 + $0x68] sm:$0xff]  ;;  %v655_v9 = vld [vmem:[%s8014_s10 + $0x70] sm:$0xff] }
  0x97   : > { %2267 = vmatmul.bf16.vlgmr.msra.gmra.mxu2 %v8039_v34  ;;  %2356 = vmatmul.bf16.vlgmr.msra.gmra.mxu3 %v8041_v35  ;;  %v8090_v23 = vpack.c.bf16 %v878_v15, %v874_v11  ;;  %v565_v24 = vsel %vm559_vm1, %v519_v19, %v451_v20  ;;  %v8093_v25 = vpack.c.bf16 %v879_v17, %v875_v12  ;;  %v725_v37 = vunpack.c.l.bf16 %v651_v28  ;;  %v7231_v11 = vld [vmem:[%s10719_s2 + $0x34c] sm:$0xf]  ;;  %v6763_v12 = vld [vmem:[%s10719_s2 + $0x35c] sm:$0xf0] }
  0x98   : > { %v8095_v26 = vpack.c.bf16 %v880_v18, %v876_v16  ;;  %v600_v14 = vsel %vm592_vm2, %v565_v24, %v483_v0  ;;  %468 = vrot.lane.b32.xlu1 %v8105_v29, %s7661_s30  ;;  %v726_v38 = vunpack.c.h.bf16 %v651_v28  ;;  %500 = vrot.lane.b32.xlu2 %v8105_v29, %s7660_s29  ;;  %v723_v41 = vunpack.c.l.bf16 %v650_v30  ;;  %v7271_v13 = vld [vmem:[%s10719_s2 + $0x48c] sm:$0xf]  ;;  %v6923_v17 = vld [vmem:[%s10719_s2 + $0x49c] sm:$0xf0] }
  0x99   : > { %v837_v39 = vunpack.c.l.bf16 %v600_v14  ;;  %v838_v40 = vunpack.c.h.bf16 %v600_v14  ;;  %v724_v42 = vunpack.c.h.bf16 %v650_v30  ;;  %v727_v43 = vunpack.c.l.bf16 %v652_v31  ;;  %v7151_v18 = vld [vmem:[%s10719_s2 + $0xcc] sm:$0xf]  ;;  %v6443_v19 = vld [vmem:[%s10719_s2 + $0xdc] sm:$0xf0] }
  0x9a   : > { %v728_v44 = vunpack.c.h.bf16 %v652_v31  ;;  %v729_v15 = vunpack.c.l.bf16 %v653_v7  ;;  %v6766_v16 = vor.u32 %v7231_v11, %v6763_v12  ;;  %v730_v20 = vunpack.c.h.bf16 %v653_v7  ;;  %v7191_v14 = vld [vmem:[%s10719_s2 + $0x20c] sm:$0xf]  ;;  %v6603_v28 = vld [vmem:[%s10719_s2 + $0x21c] sm:$0xf0]  ;;  %v660_v11 = vld [vmem:[%s8014_s10 + $0x98] sm:$0xff] }
  0x9b   : > { %v881_v45 = vmul.f32 %v837_v39, %v721_v1  ;;  %v882_v46 = vmul.f32 %v837_v39, %v722_v36  ;;  %v885_v47 = vmul.f32 %v838_v40, %v725_v37  ;;  %v886_v48 = vmul.f32 %v838_v40, %v726_v38  ;;  %v8160_v30 = vld [vmem:[%s7711_s27 + $0x60] sm:$0xff] }
  0x9c   : > { %v421_v49 = vpop.permute.xlu0 %420  ;;  %v883_v50 = vmul.f32 %v837_v39, %v723_v41  ;;  %v884_v51 = vmul.f32 %v837_v39, %v724_v42  ;;  %v887_v56 = vmul.f32 %v838_v40, %v727_v43  ;;  %v888_v57 = vmul.f32 %v838_v40, %v728_v44  ;;  %v453_v60 = vpop.permute.xlu1 %452  ;;  %2617 = vmatpush.bf16.msrb.mxu2 %v6766_v16 }
  0x9d   : > { %v522_v58 = vsel %vm510_vm0, %v7780_v21, %v421_v49  ;;  %v8117_v61 = vpack.c.bf16 %v885_v47, %v881_v45  ;;  %v8119_v63 = vpack.c.bf16 %v886_v48, %v882_v46  ;;  %v485_v6 = vpop.permute.xlu2 %484  ;;  %v656_v21 = vld [vmem:[%s8014_s10 + $0x78] sm:$0xff]  ;;  %v733_v24 = vunpack.c.l.bf16 %v655_v9  ;;  %438 = vrot.lane.b32.xlu0 %v8160_v30, %s7659_s28 }
  0x9e   : > { %v8121_v2 = vpack.c.bf16 %v887_v56, %v883_v50  ;;  %v8123_v3 = vpack.c.bf16 %v888_v57, %v884_v51  ;;  %v567_v5 = vsel %vm559_vm1, %v522_v58, %v453_v60  ;;  %v6926_v0 = vor.u32 %v7271_v13, %v6923_v17 }
  0x9f   : > { %v603_v10 = vsel %vm592_vm2, %v567_v5, %v485_v6  ;;  %v6446_v27 = vor.u32 %v7151_v18, %v6443_v19  ;;  %v734_v31 = vunpack.c.h.bf16 %v655_v9  ;;  %v6606_v37 = vor.u32 %v7191_v14, %v6603_v28  ;;  %v659_v9 = vld [vmem:[%s8014_s10 + $0x90] sm:$0xff] }
  0xa0   : > { %v839_v1 = vunpack.c.l.bf16 %v603_v10  ;;  %v840_v36 = vunpack.c.h.bf16 %v603_v10  ;;  %v731_v38 = vunpack.c.l.bf16 %v654_v8  ;;  %v732_v39 = vunpack.c.h.bf16 %v654_v8  ;;  %2706 = vmatpush.bf16.msrb.mxu3 %v6926_v0  ;;  %470 = vrot.lane.b32.xlu1 %v8160_v30, %s7661_s30  ;;  %v657_v8 = vld [vmem:[%s8014_s10 + $0x80] sm:$0xff]  ;;  %v658_v10 = vld [vmem:[%s8014_s10 + $0x88] sm:$0xff] }
  0xa1   : > { %v735_v40 = vunpack.c.l.bf16 %v656_v21  ;;  %v736_v41 = vunpack.c.h.bf16 %v656_v21  ;;  %2439 = vmatpush.bf16.msrb.mxu0 %v6446_v27  ;;  %2528 = vmatpush.bf16.msrb.mxu1 %v6606_v37  ;;  %v8187_v21 = vld [vmem:[%s7711_s27 + $0x68] sm:$0xff]  ;;  %v737_v12 = vunpack.c.l.bf16 %v657_v8  ;;  %v738_v13 = vunpack.c.h.bf16 %v657_v8 }
  0xa2   : > { %502 = vrot.lane.b32.xlu2 %v8160_v30, %s7660_s29  ;;  %v889_v42 = vmul.f32 %v839_v1, %v729_v15  ;;  %v890_v43 = vmul.f32 %v839_v1, %v730_v20  ;;  %v893_v44 = vmul.f32 %v840_v36, %v733_v24  ;;  %v894_v45 = vmul.f32 %v840_v36, %v734_v31 }
  0xa3   : > { %v891_v47 = vmul.f32 %v839_v1, %v731_v38  ;;  %v892_v48 = vmul.f32 %v839_v1, %v732_v39  ;;  %v895_v49 = vmul.f32 %v840_v36, %v735_v40  ;;  %v896_v50 = vmul.f32 %v840_v36, %v736_v41 }
  0xa4   : > { %v423_v46 = vpop.permute.xlu0 %422  ;;  %v455_v56 = vpop.permute.xlu1 %454  ;;  %v8170_v57 = vpack.c.bf16 %v893_v44, %v889_v42  ;;  %v8172_v58 = vpack.c.bf16 %v894_v45, %v890_v43  ;;  %v741_v15 = vunpack.c.l.bf16 %v659_v9  ;;  %v742_v16 = vunpack.c.h.bf16 %v659_v9  ;;  %v6903_v9 = vld [vmem:[%s10719_s2 + $0x474] sm:$0xf0] }
  0xa5   : > { %v525_v51 = vsel %vm510_vm0, %v7846_v52, %v423_v46  ;;  %v8174_v60 = vpack.c.bf16 %v895_v49, %v891_v47  ;;  %v8176_v5 = vpack.c.bf16 %v896_v50, %v892_v48  ;;  %v487_v7 = vpop.permute.xlu2 %486  ;;  %440 = vrot.lane.b32.xlu0 %v8187_v21, %s7659_s28  ;;  %v739_v19 = vunpack.c.l.bf16 %v658_v10  ;;  %v661_v48 = vld [vmem:[%s8014_s10 + $0xa0] sm:$0xff]  ;;  %v662_v49 = vld [vmem:[%s8014_s10 + $0xa8] sm:$0xff]  ;;  %v663_v50 = vld [vmem:[%s8014_s10 + $0xb0] sm:$0xff] }
  0xa6   : > { %2094 = vmatmul.bf16.gmra.mxu0 %v8088_v22  ;;  %2183 = vmatmul.bf16.gmra.mxu1 %v8090_v23  ;;  %v569_v6 = vsel %vm559_vm1, %v525_v51, %v455_v56  ;;  %v740_v20 = vunpack.c.h.bf16 %v658_v10  ;;  %v743_v24 = vunpack.c.l.bf16 %v660_v11  ;;  %v744_v0 = vunpack.c.h.bf16 %v660_v11  ;;  %v7226_v56 = vld [vmem:[%s10719_s2 + $0x324] sm:$0xf]  ;;  %v6423_v11 = vld [vmem:[%s10719_s2 + $0xb4] sm:$0xf0] }
  0xa7   : > { %2272 = vmatmul.bf16.gmra.mxu2 %v8093_v25  ;;  %2361 = vmatmul.bf16.gmra.mxu3 %v8095_v26  ;;  %v606_v52 = vsel %vm592_vm2, %v569_v6, %v487_v7  ;;  %v6743_v6 = vld [vmem:[%s10719_s2 + $0x334] sm:$0xf0]  ;;  %v7266_v7 = vld [vmem:[%s10719_s2 + $0x464] sm:$0xf]  ;;  %v745_v8 = vunpack.c.l.bf16 %v661_v48 }
  0xa8   : > { %472 = vrot.lane.b32.xlu1 %v8187_v21, %s7661_s30  ;;  %v841_v17 = vunpack.c.l.bf16 %v606_v52  ;;  %v842_v18 = vunpack.c.h.bf16 %v606_v52  ;;  %v6746_v52 = vor.u32 %v7226_v56, %v6743_v6  ;;  %v7146_v10 = vld [vmem:[%s10719_s2 + $0xa4] sm:$0xf] }
  0xaa   : > { %504 = vrot.lane.b32.xlu2 %v8187_v21, %s7660_s29  ;;  %v897_v27 = vmul.f32 %v841_v17, %v737_v12  ;;  %v898_v14 = vmul.f32 %v841_v17, %v738_v13  ;;  %v901_v28 = vmul.f32 %v842_v18, %v741_v15  ;;  %v902_v31 = vmul.f32 %v842_v18, %v742_v16 }
  0xab   : > { %v899_v36 = vmul.f32 %v841_v17, %v739_v19  ;;  %v900_v37 = vmul.f32 %v841_v17, %v740_v20  ;;  %v903_v38 = vmul.f32 %v842_v18, %v743_v24  ;;  %v904_v39 = vmul.f32 %v842_v18, %v744_v0  ;;  %v7186_v17 = vld [vmem:[%s10719_s2 + $0x1e4] sm:$0xf]  ;;  %v6583_v18 = vld [vmem:[%s10719_s2 + $0x1f4] sm:$0xf0]  ;;  %v8242_v19 = vld [vmem:[%s7711_s27 + $0x70] sm:$0xff]  ;;  %2618 = vmatpush.bf16.msrb.mxu2 %v6746_v52 }
  0xac   : > { %v425_v1 = vpop.permute.xlu0 %424  ;;  %v457_v41 = vpop.permute.xlu1 %456  ;;  %v8199_v42 = vpack.c.bf16 %v901_v28, %v897_v27  ;;  %v8201_v43 = vpack.c.bf16 %v902_v31, %v898_v14  ;;  %v746_v12 = vunpack.c.h.bf16 %v661_v48  ;;  %v749_v13 = vunpack.c.l.bf16 %v663_v50  ;;  %v665_v52 = vld [vmem:[%s8014_s10 + $0xc0] sm:$0xff] }
  0xad   : > { %v528_v40 = vsel %vm510_vm0, %v7855_v53, %v425_v1  ;;  %v8203_v44 = vpack.c.bf16 %v903_v38, %v899_v36  ;;  %v8205_v45 = vpack.c.bf16 %v904_v39, %v900_v37  ;;  %v489_v47 = vpop.permute.xlu2 %488  ;;  %v664_v53 = vld [vmem:[%s8014_s10 + $0xb8] sm:$0xff]  ;;  %v6906_v15 = vor.u32 %v7266_v7, %v6903_v9  ;;  %442 = vrot.lane.b32.xlu0 %v8242_v19, %s7659_s28  ;;  %v667_v9 = vld [vmem:[%s8014_s10 + $0xd0] sm:$0xff] }
  0xae   : > { %v571_v46 = vsel %vm559_vm1, %v528_v40, %v457_v41  ;;  %v6426_v16 = vor.u32 %v7146_v10, %v6423_v11  ;;  %v750_v20 = vunpack.c.h.bf16 %v663_v50  ;;  %v6586_v27 = vor.u32 %v7186_v17, %v6583_v18  ;;  %v8269_v10 = vld [vmem:[%s7711_s27 + $0x78] sm:$0xff]  ;;  %v666_v11 = vld [vmem:[%s8014_s10 + $0xc8] sm:$0xff] }
  0xaf   : > { %v609_v51 = vsel %vm592_vm2, %v571_v46, %v489_v47  ;;  %v747_v14 = vunpack.c.l.bf16 %v662_v49  ;;  %v748_v28 = vunpack.c.h.bf16 %v662_v49  ;;  %v751_v31 = vunpack.c.l.bf16 %v664_v53  ;;  %2707 = vmatpush.bf16.msrb.mxu3 %v6906_v15 }
  0xb0   : > { %v843_v24 = vunpack.c.l.bf16 %v609_v51  ;;  %v844_v0 = vunpack.c.h.bf16 %v609_v51  ;;  %v752_v1 = vunpack.c.h.bf16 %v664_v53  ;;  %2440 = vmatpush.bf16.msrb.mxu0 %v6426_v16  ;;  %2529 = vmatpush.bf16.msrb.mxu1 %v6586_v27  ;;  %v754_v15 = vunpack.c.h.bf16 %v665_v52 }
  0xb1   : > { %474 = vrot.lane.b32.xlu1 %v8242_v19, %s7661_s30  ;;  %v757_v16 = vunpack.c.l.bf16 %v667_v9  ;;  %v758_v17 = vunpack.c.h.bf16 %v667_v9 }
  0xb2   : > { %506 = vrot.lane.b32.xlu2 %v8242_v19, %s7660_s29  ;;  %v905_v36 = vmul.f32 %v843_v24, %v745_v8  ;;  %v906_v37 = vmul.f32 %v843_v24, %v746_v12  ;;  %v909_v38 = vmul.f32 %v844_v0, %v749_v13  ;;  %v910_v39 = vmul.f32 %v844_v0, %v750_v20  ;;  %v668_v12 = vld [vmem:[%s8014_s10 + $0xd8] sm:$0xff] }
  0xb3   : > { %v907_v41 = vmul.f32 %v843_v24, %v747_v14  ;;  %v908_v46 = vmul.f32 %v843_v24, %v748_v28  ;;  %v911_v47 = vmul.f32 %v844_v0, %v751_v31  ;;  %v912_v48 = vmul.f32 %v844_v0, %v752_v1 }
  0xb4   : > { %v427_v40 = vpop.permute.xlu0 %426  ;;  %v459_v50 = vpop.permute.xlu1 %458  ;;  %v8252_v53 = vpack.c.bf16 %v909_v38, %v905_v36  ;;  %v8254_v51 = vpack.c.bf16 %v910_v39, %v906_v37  ;;  %v753_v13 = vunpack.c.l.bf16 %v665_v52  ;;  %v755_v24 = vunpack.c.l.bf16 %v666_v11 }
  0xb5   : > { %v531_v49 = vsel %vm510_vm0, %v7864_v54, %v427_v40  ;;  %v8256_v56 = vpack.c.bf16 %v911_v47, %v907_v41  ;;  %v8258_v6 = vpack.c.bf16 %v912_v48, %v908_v46  ;;  %v491_v8 = vpop.permute.xlu2 %490  ;;  %444 = vrot.lane.b32.xlu0 %v8269_v10, %s7659_s28  ;;  %v756_v0 = vunpack.c.h.bf16 %v666_v11  ;;  %v7221_v11 = vld [vmem:[%s10719_s2 + $0x2fc] sm:$0xf] }
  0xb6   : > { %2099 = vmatmul.bf16.gmra.mxu0 %v8117_v61  ;;  %2188 = vmatmul.bf16.gmra.mxu1 %v8119_v63  ;;  %v573_v7 = vsel %vm559_vm1, %v531_v49, %v459_v50  ;;  %v759_v27 = vunpack.c.l.bf16 %v668_v12  ;;  %v760_v14 = vunpack.c.h.bf16 %v668_v12  ;;  %v6723_v12 = vld [vmem:[%s10719_s2 + $0x30c] sm:$0xf0] }
  0xb7   : > { %2277 = vmatmul.bf16.gmra.mxu2 %v8121_v2  ;;  %2366 = vmatmul.bf16.gmra.mxu3 %v8123_v3  ;;  %v612_v54 = vsel %vm592_vm2, %v573_v7, %v491_v8 }
  0xb8   : > { %v845_v18 = vunpack.c.l.bf16 %v612_v54  ;;  %v846_v20 = vunpack.c.h.bf16 %v612_v54  ;;  %v669_v54 = vld [vmem:[%s8014_s10 + $0xe0] sm:$0xff] }
  0xb9   : > { %476 = vrot.lane.b32.xlu1 %v8269_v10, %s7661_s30 }
  0xba   : > { %508 = vrot.lane.b32.xlu2 %v8269_v10, %s7660_s29  ;;  %v913_v28 = vmul.f32 %v845_v18, %v753_v13  ;;  %v914_v31 = vmul.f32 %v845_v18, %v754_v15  ;;  %v917_v1 = vmul.f32 %v846_v20, %v757_v16  ;;  %v918_v36 = vmul.f32 %v846_v20, %v758_v17  ;;  %v7261_v13 = vld [vmem:[%s10719_s2 + $0x43c] sm:$0xf]  ;;  %v670_v15 = vld [vmem:[%s8014_s10 + $0xe8] sm:$0xff] }
  0xbb   : > { %v915_v38 = vmul.f32 %v845_v18, %v755_v24  ;;  %v916_v39 = vmul.f32 %v845_v18, %v756_v0  ;;  %v919_v40 = vmul.f32 %v846_v20, %v759_v27  ;;  %v920_v41 = vmul.f32 %v846_v20, %v760_v14  ;;  %v672_v16 = vld [vmem:[%s8014_s10 + $0xf8] sm:$0xff]  ;;  %v6883_v18 = vld [vmem:[%s10719_s2 + $0x44c] sm:$0xf0] }
  0xbc   : > { %v429_v37 = vpop.permute.xlu0 %428  ;;  %v461_v47 = vpop.permute.xlu1 %460  ;;  %v8281_v48 = vpack.c.bf16 %v917_v1, %v913_v28  ;;  %v8283_v49 = vpack.c.bf16 %v918_v36, %v914_v31  ;;  %v6726_v17 = vor.u32 %v7221_v11, %v6723_v12  ;;  %v761_v20 = vunpack.c.l.bf16 %v669_v54 }
  0xbd   : > { %v534_v46 = vsel %vm510_vm0, %v7897_v4, %v429_v37  ;;  %v8285_v50 = vpack.c.bf16 %v919_v40, %v915_v38  ;;  %v8287_v7 = vpack.c.bf16 %v920_v41, %v916_v39  ;;  %v493_v52 = vpop.permute.xlu2 %492  ;;  %v671_v4 = vld [vmem:[%s8014_s10 + $0xf0] sm:$0xff]  ;;  %v762_v24 = vunpack.c.h.bf16 %v669_v54 }
  0xbe   : > { %10805 = vst [vmem:[#allocation2_spill] sm:$0xff] %v8281_v48  ;;  %v575_v8 = vsel %vm559_vm1, %v534_v46, %v461_v47  ;;  %v6886_v0 = vor.u32 %v7261_v13, %v6883_v18  ;;  %v765_v27 = vunpack.c.l.bf16 %v671_v4  ;;  %v766_v14 = vunpack.c.h.bf16 %v671_v4  ;;  %2619 = vmatpush.bf16.msrb.mxu2 %v6726_v17  ;;  %v6403_v13 = vld [vmem:[%s10719_s2 + $0x8c] sm:$0xf0] }
  0xbf   : > { %10806 = vst [vmem:[#allocation3_spill] sm:$0xff] %v8283_v49  ;;  %v615_v9 = vsel %vm592_vm2, %v575_v8, %v493_v52  ;;  %v763_v1 = vunpack.c.l.bf16 %v670_v15  ;;  %v764_v36 = vunpack.c.h.bf16 %v670_v15  ;;  %v767_v37 = vunpack.c.l.bf16 %v672_v16  ;;  %v7181_v15 = vld [vmem:[%s10719_s2 + $0x1bc] sm:$0xf]  ;;  %v6563_v18 = vld [vmem:[%s10719_s2 + $0x1cc] sm:$0xf0] }
  0xc0   : > { %10807 = vst [vmem:[#allocation4_spill] sm:$0xff] %v8285_v50  ;;  %v847_v28 = vunpack.c.l.bf16 %v615_v9  ;;  %v848_v31 = vunpack.c.h.bf16 %v615_v9  ;;  %v768_v38 = vunpack.c.h.bf16 %v672_v16  ;;  %2708 = vmatpush.bf16.msrb.mxu3 %v6886_v0  ;;  %v7141_v9 = vld [vmem:[%s10719_s2 + $0x7c] sm:$0xf]  ;;  %v6566_v0 = vor.u32 %v7181_v15, %v6563_v18 }
  0xc1   : > { %10808 = vst [vmem:[#allocation5_spill] sm:$0xff] %v8287_v7 }
  0xc2   : > { %v921_v39 = vmul.f32 %v847_v28, %v761_v20  ;;  %v922_v40 = vmul.f32 %v847_v28, %v762_v24  ;;  %v925_v41 = vmul.f32 %v848_v31, %v765_v27  ;;  %v926_v46 = vmul.f32 %v848_v31, %v766_v14  ;;  %2530 = vmatpush.bf16.msrb.mxu1 %v6566_v0 }
  0xc3   : > { %v923_v8 = vmul.f32 %v847_v28, %v763_v1  ;;  %v924_v52 = vmul.f32 %v847_v28, %v764_v36  ;;  %v927_v11 = vmul.f32 %v848_v31, %v767_v37  ;;  %v928_v54 = vmul.f32 %v848_v31, %v768_v38  ;;  %v673_v28 = vld [vmem:[%s8014_s10 + $0x100] sm:$0xff]  ;;  %v675_v1 = vld [vmem:[%s8014_s10 + $0x110] sm:$0xff]  ;;  %v674_v36 = vld [vmem:[%s8014_s10 + $0x108] sm:$0xff] }
  0xc4   : > { %v431_v47 = vpop.permute.xlu0 %430  ;;  %v463_v12 = vpop.permute.xlu1 %462  ;;  %v8322_v16 = vpack.c.bf16 %v925_v41, %v921_v39  ;;  %v8324_v17 = vpack.c.bf16 %v926_v46, %v922_v40  ;;  %v676_v37 = vld [vmem:[%s8014_s10 + $0x118] sm:$0xff]  ;;  %v769_v38 = vunpack.c.l.bf16 %v673_v28  ;;  %v770_v39 = vunpack.c.h.bf16 %v673_v28 }
  0xc5   : > { %v537_v4 = vsel %vm510_vm0, %v8002_v59, %v431_v47  ;;  %v6406_v59 = vor.u32 %v7141_v9, %v6403_v13  ;;  %v8329_v20 = vpack.c.bf16 %v927_v11, %v923_v8  ;;  %v8331_v24 = vpack.c.bf16 %v928_v54, %v924_v52  ;;  %v495_v14 = vpop.permute.xlu2 %494 }
  0xc6   : > { %2104 = vmatmul.bf16.gmra.mxu0 %v8170_v57  ;;  %2193 = vmatmul.bf16.gmra.mxu1 %v8172_v58  ;;  %10809 = vst [vmem:[#allocation6_spill] sm:$0xff] %v8322_v16  ;;  %v577_v27 = vsel %vm559_vm1, %v537_v4, %v463_v12  ;;  %v773_v40 = vunpack.c.l.bf16 %v675_v1  ;;  %v774_v41 = vunpack.c.h.bf16 %v675_v1  ;;  %v771_v8 = vunpack.c.l.bf16 %v674_v36 }
  0xc7   : > { %2282 = vmatmul.bf16.gmra.mxu2 %v8174_v60  ;;  %2371 = vmatmul.bf16.gmra.mxu3 %v8176_v5  ;;  %10810 = vst [vmem:[#allocation7_spill] sm:$0xff] %v8324_v17  ;;  %v618_v31 = vsel %vm592_vm2, %v577_v27, %v495_v14  ;;  %v772_v52 = vunpack.c.h.bf16 %v674_v36  ;;  %v775_v11 = vunpack.c.l.bf16 %v676_v37  ;;  %v776_v54 = vunpack.c.h.bf16 %v676_v37 }
  0xc8   : > { %10811 = vst [vmem:[#allocation8_spill] sm:$0xff] %v8329_v20  ;;  %2441 = vmatpush.bf16.msrb.mxu0 %v6406_v59  ;;  %v849_v46 = vunpack.c.l.bf16 %v618_v31  ;;  %v850_v47 = vunpack.c.h.bf16 %v618_v31 }
  0xc9   : > { %10812 = vst [vmem:[#allocation9_spill] sm:$0xff] %v8331_v24 }
  0xca   : > { %v929_v4 = vmul.f32 %v849_v46, %v769_v38  ;;  %v930_v12 = vmul.f32 %v849_v46, %v770_v39  ;;  %v933_v9 = vmul.f32 %v850_v47, %v773_v40  ;;  %v934_v13 = vmul.f32 %v850_v47, %v774_v41 }
  0xcb   : > { %v931_v59 = vmul.f32 %v849_v46, %v771_v8  ;;  %v932_v18 = vmul.f32 %v849_v46, %v772_v52  ;;  %v935_v0 = vmul.f32 %v850_v47, %v775_v11  ;;  %v936_v27 = vmul.f32 %v850_v47, %v776_v54  ;;  %v677_v47 = vld [vmem:[%s8014_s10 + $0x120] sm:$0xff]  ;;  %v679_v8 = vld [vmem:[%s8014_s10 + $0x130] sm:$0xff]  ;;  %v680_v11 = vld [vmem:[%s8014_s10 + $0x138] sm:$0xff] }
  0xcc   : > { %v433_v15 = vpop.permute.xlu0 %432  ;;  %v465_v28 = vpop.permute.xlu1 %464  ;;  %v8345_v31 = vpack.c.bf16 %v933_v9, %v929_v4  ;;  %v8347_v1 = vpack.c.bf16 %v934_v13, %v930_v12  ;;  %v777_v54 = vunpack.c.l.bf16 %v677_v47  ;;  %v778_v4 = vunpack.c.h.bf16 %v677_v47 }
  0xcd   : > { %v540_v14 = vsel %vm510_vm0, %v8017_v62, %v433_v15  ;;  %v8349_v38 = vpack.c.bf16 %v935_v0, %v931_v59  ;;  %v8351_v39 = vpack.c.bf16 %v936_v27, %v932_v18  ;;  %v497_v46 = vpop.permute.xlu2 %496  ;;  %v678_v62 = vld [vmem:[%s8014_s10 + $0x128] sm:$0xff]  ;;  %v781_v13 = vunpack.c.l.bf16 %v679_v8  ;;  %v7216_v15 = vld [vmem:[%s10719_s2 + $0x2d4] sm:$0xf] }
  0xce   : > { %10813 = vst [vmem:[#allocation10_spill] sm:$0xff] %v8345_v31  ;;  %v579_v41 = vsel %vm559_vm1, %v540_v14, %v465_v28  ;;  %v779_v12 = vunpack.c.l.bf16 %v678_v62  ;;  %v780_v9 = vunpack.c.h.bf16 %v678_v62  ;;  %v6703_v59 = vld [vmem:[%s10719_s2 + $0x2e4] sm:$0xf0]  ;;  %v7256_v18 = vld [vmem:[%s10719_s2 + $0x414] sm:$0xf]  ;;  %v782_v14 = vunpack.c.h.bf16 %v679_v8 }
  0xcf   : > { %10814 = vst [vmem:[#allocation11_spill] sm:$0xff] %v8347_v1  ;;  %v621_v52 = vsel %vm592_vm2, %v579_v41, %v497_v46  ;;  %v6863_v41 = vld [vmem:[%s10719_s2 + $0x424] sm:$0xf0]  ;;  %v3861_v8 = vld [vmem:[%s10720_s3] sm:$0xf] }
  0xd0   : > { %10815 = vst [vmem:[#allocation12_spill] sm:$0xff] %v8349_v38  ;;  %v851_v28 = vunpack.c.l.bf16 %v621_v52 }
  0xd1   : > { %10816 = vst [vmem:[#allocation13_spill] sm:$0xff] %v8351_v39 }
  0xd6   : > { %2109 = vmatmul.bf16.gmra.mxu0 %v8199_v42  ;;  %2198 = vmatmul.bf16.gmra.mxu1 %v8201_v43 }
  0xd7   : > { %2287 = vmatmul.bf16.gmra.mxu2 %v8203_v44  ;;  %2376 = vmatmul.bf16.gmra.mxu3 %v8205_v45 }
  0xe6   : > { %2114 = vmatmul.bf16.gmra.mxu0 %v8252_v53  ;;  %2203 = vmatmul.bf16.gmra.mxu1 %v8254_v51 }
  0xe7   : > { %2292 = vmatmul.bf16.gmra.mxu2 %v8256_v56  ;;  %2381 = vmatmul.bf16.gmra.mxu3 %v8258_v6 }
  0xf6   : > { %2119 = vmatmul.bf16.gmra.mxu0 %v8281_v48  ;;  %2208 = vmatmul.bf16.gmra.mxu1 %v8283_v49 }
  0xf7   : > { %2297 = vmatmul.bf16.gmra.mxu2 %v8285_v50  ;;  %2386 = vmatmul.bf16.gmra.mxu3 %v8287_v7  ;;  %v8378_v50 = vperm.slane %v3861_v8, 0  ;;  %v681_v8 = vld [vmem:[%s8014_s10 + $0x140] sm:$0xff] }
 0x106   : > { %2124 = vmatmul.bf16.gmra.mxu0 %v8322_v16  ;;  %2213 = vmatmul.bf16.gmra.mxu1 %v8324_v17  ;;  %v435_v17 = vpop.permute.xlu0 %434  ;;  %v939_v16 = vmul.f32 %v851_v28, %v779_v12 }
 0x107   : > { %2302 = vmatmul.bf16.gmra.mxu2 %v8329_v20  ;;  %2391 = vmatmul.bf16.gmra.mxu3 %v8331_v24 }
 0x113   : > { %v2090_v36 = vpop.f32.mrf.mxu0  ;;  %v2179_v37 = vpop.f32.mrf.mxu1 }
 0x114   : > { %v2180_v40 = vadd.f32 %v2179_v37, %v2090_v36  ;;  %v852_v36 = vunpack.c.h.bf16 %v621_v52  ;;  %v6706_v37 = vor.u32 %v7216_v15, %v6703_v59  ;;  %v937_v52 = vmul.f32 %v851_v28, %v777_v54  ;;  %v6383_v54 = vld [vmem:[%s10719_s2 + $0x64] sm:$0xf0] }
 0x115   : > { %v938_v15 = vmul.f32 %v851_v28, %v778_v4 }
 0x116   : > { %2129 = vmatmul.bf16.gmra.mxu0 %v8345_v31  ;;  %2218 = vmatmul.bf16.gmra.mxu1 %v8347_v1  ;;  %v6866_v1 = vor.u32 %v7256_v18, %v6863_v41  ;;  %v941_v59 = vmul.f32 %v852_v36, %v781_v13  ;;  %v942_v20 = vmul.f32 %v852_v36, %v782_v14  ;;  %v467_v18 = vpop.permute.xlu1 %466 }
 0x117   : > { %2307 = vmatmul.bf16.gmra.mxu2 %v8349_v38  ;;  %2396 = vmatmul.bf16.gmra.mxu3 %v8351_v39  ;;  %v783_v39 = vunpack.c.l.bf16 %v680_v11  ;;  %v784_v38 = vunpack.c.h.bf16 %v680_v11  ;;  %v543_v11 = vsel %vm510_vm0, %v8077_v55, %v435_v17  ;;  %v7176_v55 = vld [vmem:[%s10719_s2 + $0x194] sm:$0xf]  ;;  %v6543_v17 = vld [vmem:[%s10719_s2 + $0x1a4] sm:$0xf0] }
 0x118   : > { %2620 = vmatpush.bf16.msrb.mxu2 %v6706_v37  ;;  %2709 = vmatpush.bf16.msrb.mxu3 %v6866_v1  ;;  %v7136_v1 = vld [vmem:[%s10719_s2 + $0x54] sm:$0xf]  ;;  %v8388_v12 = vpack.c.bf16 %v941_v59, %v937_v52  ;;  %v581_v41 = vsel %vm559_vm1, %v543_v11, %v467_v18  ;;  %v785_v59 = vunpack.c.l.bf16 %v681_v8 }
 0x119   : > { %v944_v7 = vmul.f32 %v852_v36, %v784_v38  ;;  %v6386_v38 = vor.u32 %v7136_v1, %v6383_v54  ;;  %v683_v52 = vld [vmem:[%s8014_s10 + $0x150] sm:$0xff] }
 0x11a   : > { %v2268_v0 = vpop.f32.mrf.mxu2  ;;  %v2357_v27 = vpop.f32.mrf.mxu3  ;;  %10817 = vst [vmem:[#allocation14_spill] sm:$0xff] %v8388_v12 }
 0x11b   : > { %v2269_v46 = vadd.f32 %v2268_v0, %v2180_v40  ;;  %v2092_v47 = vpop.f32.mrf.mxu0  ;;  %v2181_v62 = vpop.f32.mrf.mxu1  ;;  %v940_v40 = vmul.f32 %v851_v28, %v780_v9  ;;  %v943_v0 = vmul.f32 %v852_v36, %v783_v39  ;;  %v8390_v39 = vpack.c.bf16 %v942_v20, %v938_v15  ;;  %2442 = vmatpush.bf16.msrb.mxu0 %v6386_v38  ;;  %v684_v15 = vld [vmem:[%s8014_s10 + $0x158] sm:$0xff] }
 0x11c   : > { %v2182_v31 = vadd.f32 %v2181_v62, %v2092_v47  ;;  %v6546_v20 = vor.u32 %v7176_v55, %v6543_v17 }
 0x11d   : > { %v2358_v24 = vadd.f32 %v2357_v27, %v2269_v46  ;;  %10818 = vst [vmem:[#allocation15_spill] sm:$0xff] %v8390_v39  ;;  %v8398_v28 = vpack.c.bf16 %v943_v0, %v939_v16  ;;  %v8400_v36 = vpack.c.bf16 %v944_v7, %v940_v40  ;;  %v499_v46 = vpop.permute.xlu2 %498  ;;  %v682_v16 = vld [vmem:[%s8014_s10 + $0x148] sm:$0xff] }
 0x11e   : > { %2531 = vmatpush.bf16.msrb.mxu1 %v6546_v20  ;;  %v787_v11 = vunpack.c.l.bf16 %v682_v16  ;;  %v788_v18 = vunpack.c.h.bf16 %v682_v16  ;;  %v791_v20 = vunpack.c.l.bf16 %v684_v15  ;;  %v437_v16 = vpop.permute.xlu0 %436 }
 0x11f   : > { %10819 = vst [vmem:[#allocation16_spill] sm:$0xff] %v8398_v28  ;;  %v3871_v47 = vadd.f32 %v8378_v50, %v2358_v24  ;;  %v786_v24 = vunpack.c.h.bf16 %v681_v8 }
 0x120   : > { %10820 = vst [vmem:[#allocation17_spill] sm:$0xff] %v8400_v36 }
 0x121   : > { %v3999_v40 = vmax.f32 %v3871_v47, 0.0 }
 0x122   : > { %v2270_v4 = vpop.f32.mrf.mxu2  ;;  %v2359_v13 = vpop.f32.mrf.mxu3 }
 0x123   : > { %v2271_v9 = vadd.f32 %v2270_v4, %v2182_v31  ;;  %v2095_v27 = vpop.f32.mrf.mxu0  ;;  %v2184_v14 = vpop.f32.mrf.mxu1  ;;  %v624_v31 = vsel %vm592_vm2, %v581_v41, %v499_v46  ;;  %v789_v4 = vunpack.c.l.bf16 %v683_v52  ;;  %v792_v41 = vunpack.c.h.bf16 %v684_v15 }
 0x124   : > { %v2185_v37 = vadd.f32 %v2184_v14, %v2095_v27  ;;  %v853_v38 = vunpack.c.l.bf16 %v624_v31  ;;  %v854_v55 = vunpack.c.h.bf16 %v624_v31  ;;  %v546_v31 = vsel %vm510_vm0, %v8105_v29, %v437_v16  ;;  %v7211_v16 = vld [vmem:[%s10719_s2 + $0x2ac] sm:$0xf] }
 0x125   : > { %v2360_v62 = vadd.f32 %v2359_v13, %v2271_v9  ;;  %v790_v13 = vunpack.c.h.bf16 %v683_v52 }
 0x126   : > { %2134 = vmatmul.bf16.gmra.mxu0 %v8388_v12  ;;  %2223 = vmatmul.bf16.gmra.mxu1 %v8390_v39  ;;  %v945_v8 = vmul.f32 %v853_v38, %v785_v59  ;;  %v946_v47 = vmul.f32 %v853_v38, %v786_v24  ;;  %v948_v39 = vmul.f32 %v853_v38, %v788_v18 }
 0x127   : > { %v3875_v7 = vadd.f32 %v8378_v50, %v2360_v62  ;;  %2312 = vmatmul.bf16.gmra.mxu2 %v8398_v28  ;;  %2401 = vmatmul.bf16.gmra.mxu3 %v8400_v36  ;;  %v950_v36 = vmul.f32 %v854_v55, %v790_v13  ;;  %v947_v28 = vmul.f32 %v853_v38, %v787_v11  ;;  %v501_v13 = vpop.permute.xlu2 %500 }
 0x128   : > { %v951_v12 = vmul.f32 %v854_v55, %v791_v20  ;;  %v952_v52 = vmul.f32 %v854_v55, %v792_v41 }
 0x129   : > { %v4003_v0 = vmax.f32 %v3875_v7, 0.0  ;;  %v949_v7 = vmul.f32 %v854_v55, %v789_v4  ;;  %v8420_v59 = vpack.c.bf16 %v950_v36, %v946_v47  ;;  %v687_v36 = vld [vmem:[%s8014_s10 + $0x170] sm:$0xff] }
 0x12a   : > { %v2273_v1 = vpop.f32.mrf.mxu2  ;;  %v2362_v54 = vpop.f32.mrf.mxu3  ;;  %v8422_v11 = vpack.c.bf16 %v951_v12, %v947_v28  ;;  %v8424_v18 = vpack.c.bf16 %v952_v52, %v948_v39  ;;  %v688_v28 = vld [vmem:[%s8014_s10 + $0x178] sm:$0xff]  ;;  %v797_v47 = vunpack.c.l.bf16 %v687_v36  ;;  %v6683_v52 = vld [vmem:[%s10719_s2 + $0x2bc] sm:$0xf0] }
 0x12b   : > { %v8414_v17 = vpack.c.bf16 %v4003_v0, %v3999_v40  ;;  %v2274_v9 = vadd.f32 %v2273_v1, %v2185_v37  ;;  %v2097_v27 = vpop.f32.mrf.mxu0  ;;  %v2186_v14 = vpop.f32.mrf.mxu1  ;;  %v8418_v15 = vpack.c.bf16 %v949_v7, %v945_v8  ;;  %10823 = vst [vmem:[#allocation20_spill] sm:$0xff] %v8420_v59  ;;  %v798_v7 = vunpack.c.h.bf16 %v687_v36 }
 0x12c   : > { %v2187_v46 = vadd.f32 %v2186_v14, %v2097_v27  ;;  %v469_v37 = vpop.permute.xlu1 %468  ;;  %10824 = vst [vmem:[#allocation21_spill] sm:$0xff] %v8422_v11  ;;  %v686_v27 = vld [vmem:[%s8014_s10 + $0x168] sm:$0xff] }
 0x12d   : > { %10821 = vst [vmem:[#allocation18_spill] sm:$0xff] %v8414_v17  ;;  %v2363_v62 = vadd.f32 %v2362_v54, %v2274_v9  ;;  %v583_v29 = vsel %vm559_vm1, %v546_v31, %v469_v37  ;;  %v685_v9 = vld [vmem:[%s8014_s10 + $0x160] sm:$0xff]  ;;  %v795_v41 = vunpack.c.l.bf16 %v686_v27 }
 0x12e   : > { %10822 = vst [vmem:[#allocation19_spill] sm:$0xff] %v8418_v15  ;;  %v627_v39 = vsel %vm592_vm2, %v583_v29, %v501_v13  ;;  %v793_v14 = vunpack.c.l.bf16 %v685_v9  ;;  %v794_v20 = vunpack.c.h.bf16 %v685_v9  ;;  %v6843_v29 = vld [vmem:[%s10719_s2 + $0x3fc] sm:$0xf0]  ;;  %v800_v9 = vunpack.c.h.bf16 %v688_v28 }
 0x12f   : > { %10825 = vst [vmem:[#allocation22_spill] sm:$0xff] %v8424_v18  ;;  %v3879_v38 = vadd.f32 %v8378_v50, %v2363_v62 }
 0x131   : > { %v4007_v62 = vmax.f32 %v3879_v38, 0.0 }
 0x132   : > { %v2275_v40 = vpop.f32.mrf.mxu2  ;;  %v2364_v0 = vpop.f32.mrf.mxu3 }
 0x133   : > { %v2276_v24 = vadd.f32 %v2275_v40, %v2187_v46  ;;  %v2100_v1 = vpop.f32.mrf.mxu0  ;;  %v2189_v54 = vpop.f32.mrf.mxu1  ;;  %v796_v46 = vunpack.c.h.bf16 %v686_v27  ;;  %v799_v40 = vunpack.c.l.bf16 %v688_v28 }
 0x134   : > { %v2190_v4 = vadd.f32 %v2189_v54, %v2100_v1  ;;  %v6686_v1 = vor.u32 %v7211_v16, %v6683_v52  ;;  %v7251_v54 = vld [vmem:[%s10719_s2 + $0x3ec] sm:$0xf]  ;;  %v471_v28 = vpop.permute.xlu1 %470 }
 0x135   : > { %v2365_v55 = vadd.f32 %v2364_v0, %v2276_v24  ;;  %v855_v0 = vunpack.c.l.bf16 %v627_v39  ;;  %v856_v24 = vunpack.c.h.bf16 %v627_v39  ;;  %v6846_v27 = vor.u32 %v7251_v54, %v6843_v29  ;;  %v503_v54 = vpop.permute.xlu2 %502 }
 0x136   : > { %2139 = vmatmul.bf16.gmra.mxu0 %v8418_v15  ;;  %2228 = vmatmul.bf16.gmra.mxu1 %v8420_v59 }
 0x137   : > { %v3883_v12 = vadd.f32 %v8378_v50, %v2365_v55  ;;  %2317 = vmatmul.bf16.gmra.mxu2 %v8422_v11  ;;  %2406 = vmatmul.bf16.gmra.mxu3 %v8424_v18  ;;  %v953_v39 = vmul.f32 %v855_v0, %v793_v14  ;;  %v954_v16 = vmul.f32 %v855_v0, %v794_v20  ;;  %v439_v11 = vpop.permute.xlu0 %438  ;;  %v6363_v14 = vld [vmem:[%s10719_s2 + $0x3c] sm:$0xf0] }
 0x138   : > { %2621 = vmatpush.bf16.msrb.mxu2 %v6686_v1  ;;  %2710 = vmatpush.bf16.msrb.mxu3 %v6846_v27  ;;  %v957_v52 = vmul.f32 %v856_v24, %v797_v47  ;;  %v958_v18 = vmul.f32 %v856_v24, %v798_v7  ;;  %v955_v59 = vmul.f32 %v855_v0, %v795_v41 }
 0x139   : > { %v4011_v8 = vmax.f32 %v3883_v12, 0.0  ;;  %v956_v15 = vmul.f32 %v855_v0, %v796_v46  ;;  %v959_v49 = vmul.f32 %v856_v24, %v799_v40  ;;  %v960_v48 = vmul.f32 %v856_v24, %v800_v9 }
 0x13a   : > { %v2278_v31 = vpop.f32.mrf.mxu2  ;;  %v2367_v37 = vpop.f32.mrf.mxu3  ;;  %v8460_v47 = vpack.c.bf16 %v957_v52, %v953_v39  ;;  %v8462_v41 = vpack.c.bf16 %v958_v18, %v954_v16 }
 0x13b   : > { %v2279_v13 = vadd.f32 %v2278_v31, %v2190_v4  ;;  %v2102_v38 = vpop.f32.mrf.mxu0  ;;  %v2191_v55 = vpop.f32.mrf.mxu1  ;;  %v8450_v36 = vpack.c.bf16 %v4011_v8, %v4007_v62  ;;  %v549_v4 = vsel %vm510_vm0, %v8160_v30, %v439_v11  ;;  %v7131_v62 = vld [vmem:[%s10719_s2 + $0x2c] sm:$0xf]  ;;  %v6523_v11 = vld [vmem:[%s10719_s2 + $0x17c] sm:$0xf0]  ;;  %v8470_v40 = vpack.c.bf16 %v959_v49, %v955_v59  ;;  %v691_v59 = vld [vmem:[%s8014_s10 + $0x190] sm:$0xff] }
 0x13c   : > { %v2192_v12 = vadd.f32 %v2191_v55, %v2102_v38  ;;  %10827 = vst [vmem:[#allocation24_spill] sm:$0xff] %v8460_v47  ;;  %v6366_v46 = vor.u32 %v7131_v62, %v6363_v14  ;;  %v7171_v30 = vld [vmem:[%s10719_s2 + $0x16c] sm:$0xf]  ;;  %v8472_v0 = vpack.c.bf16 %v960_v48, %v956_v15  ;;  %v585_v1 = vsel %vm559_vm1, %v549_v4, %v471_v28  ;;  %v689_v38 = vld [vmem:[%s8014_s10 + $0x180] sm:$0xff]  ;;  %v692_v55 = vld [vmem:[%s8014_s10 + $0x198] sm:$0xff] }
 0x13d   : > { %10826 = vst [vmem:[#allocation23_spill] sm:$0xff] %v8450_v36  ;;  %v2368_v17 = vadd.f32 %v2367_v37, %v2279_v13  ;;  %v6526_v18 = vor.u32 %v7171_v30, %v6523_v11  ;;  %v690_v49 = vld [vmem:[%s8014_s10 + $0x188] sm:$0xff]  ;;  %v630_v15 = vsel %vm592_vm2, %v585_v1, %v503_v54  ;;  %v801_v9 = vunpack.c.l.bf16 %v689_v38 }
 0x13e   : > { %10828 = vst [vmem:[#allocation25_spill] sm:$0xff] %v8462_v41  ;;  %2443 = vmatpush.bf16.msrb.mxu0 %v6366_v46  ;;  %v803_v39 = vunpack.c.l.bf16 %v690_v49  ;;  %v804_v16 = vunpack.c.h.bf16 %v690_v49  ;;  %v805_v28 = vunpack.c.l.bf16 %v691_v59  ;;  %v806_v62 = vunpack.c.h.bf16 %v691_v59 }
 0x13f   : > { %10829 = vst [vmem:[#allocation26_spill] sm:$0xff] %v8470_v40  ;;  %v3887_v29 = vadd.f32 %v8378_v50, %v2368_v17  ;;  %2532 = vmatpush.bf16.msrb.mxu1 %v6526_v18  ;;  %v802_v17 = vunpack.c.h.bf16 %v689_v38  ;;  %v857_v14 = vunpack.c.l.bf16 %v630_v15  ;;  %v807_v11 = vunpack.c.l.bf16 %v692_v55  ;;  %v441_v38 = vpop.permute.xlu0 %440 }
 0x140   : > { %10830 = vst [vmem:[#allocation27_spill] sm:$0xff] %v8472_v0 }
 0x141   : > { %v4015_v27 = vmax.f32 %v3887_v29, 0.0  ;;  %v961_v1 = vmul.f32 %v857_v14, %v801_v9  ;;  %v962_v54 = vmul.f32 %v857_v14, %v802_v17  ;;  %v963_v49 = vmul.f32 %v857_v14, %v803_v39 }
 0x142   : > { %v2280_v20 = vpop.f32.mrf.mxu2  ;;  %v2369_v8 = vpop.f32.mrf.mxu3 }
 0x143   : > { %v2281_v7 = vadd.f32 %v2280_v20, %v2192_v12  ;;  %v2105_v31 = vpop.f32.mrf.mxu0  ;;  %v2194_v37 = vpop.f32.mrf.mxu1  ;;  %v858_v20 = vunpack.c.h.bf16 %v630_v15 }
 0x144   : > { %v2195_v24 = vadd.f32 %v2194_v37, %v2105_v31  ;;  %v473_v15 = vpop.permute.xlu1 %472 }
 0x145   : > { %v2370_v13 = vadd.f32 %v2369_v8, %v2281_v7  ;;  %v808_v7 = vunpack.c.h.bf16 %v692_v55  ;;  %v965_v29 = vmul.f32 %v858_v20, %v805_v28  ;;  %v967_v36 = vmul.f32 %v858_v20, %v807_v11 }
 0x146   : > { %2144 = vmatmul.bf16.gmra.mxu0 %v8460_v47  ;;  %2233 = vmatmul.bf16.gmra.mxu1 %v8462_v41 }
 0x147   : > { %v3891_v48 = vadd.f32 %v8378_v50, %v2370_v13  ;;  %2322 = vmatmul.bf16.gmra.mxu2 %v8470_v40  ;;  %2411 = vmatmul.bf16.gmra.mxu3 %v8472_v0  ;;  %v966_v13 = vmul.f32 %v858_v20, %v806_v62  ;;  %v968_v59 = vmul.f32 %v858_v20, %v808_v7  ;;  %v505_v62 = vpop.permute.xlu2 %504  ;;  %v696_v7 = vld [vmem:[%s8014_s10 + $0x1b8] sm:$0xff] }
 0x148   : > { %v8494_v39 = vpack.c.bf16 %v967_v36, %v963_v49 }
 0x149   : > { %v4019_v12 = vmax.f32 %v3891_v48, 0.0  ;;  %v964_v48 = vmul.f32 %v857_v14, %v804_v16  ;;  %v8492_v9 = vpack.c.bf16 %v966_v13, %v962_v54 }
 0x14a   : > { %v2283_v52 = vpop.f32.mrf.mxu2  ;;  %v2372_v4 = vpop.f32.mrf.mxu3  ;;  %10834 = vst [vmem:[#allocation31_spill] sm:$0xff] %v8494_v39 }
 0x14b   : > { %v2284_v8 = vadd.f32 %v2283_v52, %v2195_v24  ;;  %v2107_v46 = vpop.f32.mrf.mxu0  ;;  %v2196_v30 = vpop.f32.mrf.mxu1  ;;  %v8486_v31 = vpack.c.bf16 %v4019_v12, %v4015_v27  ;;  %v552_v24 = vsel %vm510_vm0, %v8187_v21, %v441_v38  ;;  %v8490_v12 = vpack.c.bf16 %v965_v29, %v961_v1  ;;  %10833 = vst [vmem:[#allocation30_spill] sm:$0xff] %v8492_v9 }
 0x14c   : > { %v2197_v37 = vadd.f32 %v2196_v30, %v2107_v46  ;;  %v8496_v16 = vpack.c.bf16 %v968_v59, %v964_v48  ;;  %v587_v21 = vsel %vm559_vm1, %v552_v24, %v473_v15  ;;  %v694_v46 = vld [vmem:[%s8014_s10 + $0x1a8] sm:$0xff]  ;;  %v695_v30 = vld [vmem:[%s8014_s10 + $0x1b0] sm:$0xff]  ;;  %v7206_v48 = vld [vmem:[%s10719_s2 + $0x284] sm:$0xf] }
 0x14d   : > { %10831 = vst [vmem:[#allocation28_spill] sm:$0xff] %v8486_v31  ;;  %v2373_v18 = vadd.f32 %v2372_v4, %v2284_v8  ;;  %v693_v8 = vld [vmem:[%s8014_s10 + $0x1a0] sm:$0xff]  ;;  %v633_v11 = vsel %vm592_vm2, %v587_v21, %v505_v62  ;;  %v812_v54 = vunpack.c.h.bf16 %v694_v46  ;;  %v813_v38 = vunpack.c.l.bf16 %v695_v30  ;;  %v6663_v59 = vld [vmem:[%s10719_s2 + $0x294] sm:$0xf0] }
 0x14e   : > { %10832 = vst [vmem:[#allocation29_spill] sm:$0xff] %v8490_v12  ;;  %v810_v1 = vunpack.c.h.bf16 %v693_v8  ;;  %v814_v49 = vunpack.c.h.bf16 %v695_v30  ;;  %v6823_v21 = vld [vmem:[%s10719_s2 + $0x3d4] sm:$0xf0] }
 0x14f   : > { %10835 = vst [vmem:[#allocation32_spill] sm:$0xff] %v8496_v16  ;;  %v3895_v14 = vadd.f32 %v8378_v50, %v2373_v18  ;;  %v811_v18 = vunpack.c.l.bf16 %v694_v46 }
 0x151   : > { %v4023_v29 = vmax.f32 %v3895_v14, 0.0 }
 0x152   : > { %v2285_v55 = vpop.f32.mrf.mxu2  ;;  %v2374_v27 = vpop.f32.mrf.mxu3 }
 0x153   : > { %v2286_v17 = vadd.f32 %v2285_v55, %v2197_v37  ;;  %v2110_v52 = vpop.f32.mrf.mxu0  ;;  %v2199_v4 = vpop.f32.mrf.mxu1  ;;  %v809_v37 = vunpack.c.l.bf16 %v693_v8  ;;  %v815_v55 = vunpack.c.l.bf16 %v696_v7  ;;  %v816_v8 = vunpack.c.h.bf16 %v696_v7 }
 0x154   : > { %v2200_v28 = vadd.f32 %v2199_v4, %v2110_v52  ;;  %v6666_v52 = vor.u32 %v7206_v48, %v6663_v59  ;;  %v7246_v4 = vld [vmem:[%s10719_s2 + $0x3c4] sm:$0xf]  ;;  %v475_v7 = vpop.permute.xlu1 %474 }
 0x155   : > { %v2375_v20 = vadd.f32 %v2374_v27, %v2286_v17  ;;  %v859_v27 = vunpack.c.l.bf16 %v633_v11  ;;  %v860_v17 = vunpack.c.h.bf16 %v633_v11  ;;  %v6826_v46 = vor.u32 %v7246_v4, %v6823_v21  ;;  %v507_v4 = vpop.permute.xlu2 %506 }
 0x156   : > { %2149 = vmatmul.bf16.gmra.mxu0 %v8490_v12  ;;  %2238 = vmatmul.bf16.gmra.mxu1 %v8492_v9 }
 0x157   : > { %v3899_v36 = vadd.f32 %v8378_v50, %v2375_v20  ;;  %2327 = vmatmul.bf16.gmra.mxu2 %v8494_v39  ;;  %2416 = vmatmul.bf16.gmra.mxu3 %v8496_v16  ;;  %v969_v11 = vmul.f32 %v859_v27, %v809_v37  ;;  %v970_v48 = vmul.f32 %v859_v27, %v810_v1  ;;  %v443_v39 = vpop.permute.xlu0 %442  ;;  %v6343_v37 = vld [vmem:[%s10719_s2 + $0x14] sm:$0xf0] }
 0x158   : > { %2622 = vmatpush.bf16.msrb.mxu2 %v6666_v52  ;;  %2711 = vmatpush.bf16.msrb.mxu3 %v6826_v46  ;;  %v973_v59 = vmul.f32 %v860_v17, %v813_v38  ;;  %v974_v16 = vmul.f32 %v860_v17, %v814_v49  ;;  %v971_v9 = vmul.f32 %v859_v27, %v811_v18 }
 0x159   : > { %v4027_v13 = vmax.f32 %v3899_v36, 0.0  ;;  %v972_v12 = vmul.f32 %v859_v27, %v812_v54  ;;  %v975_v0 = vmul.f32 %v860_v17, %v815_v55  ;;  %v976_v40 = vmul.f32 %v860_v17, %v816_v8 }
 0x15a   : > { %v2288_v24 = vpop.f32.mrf.mxu2  ;;  %v2377_v15 = vpop.f32.mrf.mxu3  ;;  %v8532_v38 = vpack.c.bf16 %v973_v59, %v969_v11  ;;  %v8534_v18 = vpack.c.bf16 %v974_v16, %v970_v48 }
 0x15b   : > { %v2289_v62 = vadd.f32 %v2288_v24, %v2200_v28  ;;  %v2112_v14 = vpop.f32.mrf.mxu0  ;;  %v2201_v20 = vpop.f32.mrf.mxu1  ;;  %v8522_v30 = vpack.c.bf16 %v4027_v13, %v4023_v29  ;;  %v555_v28 = vsel %vm510_vm0, %v8242_v19, %v443_v39  ;;  %v7126_v29 = vld [vmem:[%s10719_s2 + $0x4] sm:$0xf]  ;;  %v6503_v39 = vld [vmem:[%s10719_s2 + $0x154] sm:$0xf0]  ;;  %v8542_v55 = vpack.c.bf16 %v975_v0, %v971_v9  ;;  %v698_v0 = vld [vmem:[%s8014_s10 + $0x1c8] sm:$0xff] }
 0x15c   : > { %v2202_v36 = vadd.f32 %v2201_v20, %v2112_v14  ;;  %10837 = vst [vmem:[#allocation34_spill] sm:$0xff] %v8532_v38  ;;  %v6346_v54 = vor.u32 %v7126_v29, %v6343_v37  ;;  %v7166_v19 = vld [vmem:[%s10719_s2 + $0x144] sm:$0xf]  ;;  %v8544_v27 = vpack.c.bf16 %v976_v40, %v972_v12  ;;  %v589_v52 = vsel %vm559_vm1, %v555_v28, %v475_v7  ;;  %v699_v9 = vld [vmem:[%s8014_s10 + $0x1d0] sm:$0xff]  ;;  %v700_v20 = vld [vmem:[%s8014_s10 + $0x1d8] sm:$0xff] }
 0x15d   : > { %10836 = vst [vmem:[#allocation33_spill] sm:$0xff] %v8522_v30  ;;  %v2378_v31 = vadd.f32 %v2377_v15, %v2289_v62  ;;  %v6506_v16 = vor.u32 %v7166_v19, %v6503_v39  ;;  %v697_v14 = vld [vmem:[%s8014_s10 + $0x1c0] sm:$0xff]  ;;  %v636_v12 = vsel %vm592_vm2, %v589_v52, %v507_v4  ;;  %v819_v11 = vunpack.c.l.bf16 %v698_v0 }
 0x15e   : > { %10838 = vst [vmem:[#allocation35_spill] sm:$0xff] %v8534_v18  ;;  %2444 = vmatpush.bf16.msrb.mxu0 %v6346_v54  ;;  %v817_v8 = vunpack.c.l.bf16 %v697_v14  ;;  %v820_v48 = vunpack.c.h.bf16 %v698_v0  ;;  %v821_v7 = vunpack.c.l.bf16 %v699_v9  ;;  %v822_v29 = vunpack.c.h.bf16 %v699_v9 }
 0x15f   : > { %10839 = vst [vmem:[#allocation36_spill] sm:$0xff] %v8542_v55  ;;  %v3903_v21 = vadd.f32 %v8378_v50, %v2378_v31  ;;  %2533 = vmatpush.bf16.msrb.mxu1 %v6506_v16  ;;  %v818_v31 = vunpack.c.h.bf16 %v697_v14  ;;  %v861_v37 = vunpack.c.l.bf16 %v636_v12  ;;  %v823_v39 = vunpack.c.l.bf16 %v700_v20  ;;  %v445_v14 = vpop.permute.xlu0 %444 }
 0x160   : > { %10840 = vst [vmem:[#allocation37_spill] sm:$0xff] %v8544_v27 }
 0x161   : > { %v4031_v46 = vmax.f32 %v3903_v21, 0.0  ;;  %v977_v52 = vmul.f32 %v861_v37, %v817_v8  ;;  %v978_v4 = vmul.f32 %v861_v37, %v818_v31  ;;  %v979_v0 = vmul.f32 %v861_v37, %v819_v11 }
 0x162   : > { %v2290_v1 = vpop.f32.mrf.mxu2  ;;  %v2379_v13 = vpop.f32.mrf.mxu3 }
 0x163   : > { %v2291_v49 = vadd.f32 %v2290_v1, %v2202_v36  ;;  %v2115_v24 = vpop.f32.mrf.mxu0  ;;  %v2204_v15 = vpop.f32.mrf.mxu1  ;;  %v862_v1 = vunpack.c.h.bf16 %v636_v12 }
 0x164   : > { %v2205_v17 = vadd.f32 %v2204_v15, %v2115_v24  ;;  %v477_v12 = vpop.permute.xlu1 %476 }
 0x165   : > { %v2380_v62 = vadd.f32 %v2379_v13, %v2291_v49  ;;  %v824_v49 = vunpack.c.h.bf16 %v700_v20  ;;  %v981_v21 = vmul.f32 %v862_v1, %v821_v7  ;;  %v983_v30 = vmul.f32 %v862_v1, %v823_v39 }
 0x166   : > { %2154 = vmatmul.bf16.gmra.mxu0 %v8532_v38  ;;  %2243 = vmatmul.bf16.gmra.mxu1 %v8534_v18 }
 0x167   : > { %v3907_v40 = vadd.f32 %v8378_v50, %v2380_v62  ;;  %2332 = vmatmul.bf16.gmra.mxu2 %v8542_v55  ;;  %2421 = vmatmul.bf16.gmra.mxu3 %v8544_v27  ;;  %v982_v62 = vmul.f32 %v862_v1, %v822_v29  ;;  %v984_v9 = vmul.f32 %v862_v1, %v824_v49  ;;  %v509_v29 = vpop.permute.xlu2 %508  ;;  %v704_v49 = vld [vmem:[%s8014_s10 + $0x1f8] sm:$0xff] }
 0x168   : > { %v8566_v11 = vpack.c.bf16 %v983_v30, %v979_v0 }
 0x169   : > { %v4035_v36 = vmax.f32 %v3907_v40, 0.0  ;;  %v980_v40 = vmul.f32 %v861_v37, %v820_v48  ;;  %v8564_v8 = vpack.c.bf16 %v982_v62, %v978_v4 }
 0x16a   : > { %v2293_v59 = vpop.f32.mrf.mxu2  ;;  %v2382_v28 = vpop.f32.mrf.mxu3  ;;  %10844 = vst [vmem:[#allocation41_spill] sm:$0xff] %v8566_v11 }
 0x16b   : > { %v2294_v13 = vadd.f32 %v2293_v59, %v2205_v17  ;;  %v2117_v54 = vpop.f32.mrf.mxu0  ;;  %v2206_v19 = vpop.f32.mrf.mxu1  ;;  %v8558_v24 = vpack.c.bf16 %v4035_v36, %v4031_v46  ;;  %v558_v17 = vsel %vm510_vm0, %v8269_v10, %v445_v14  ;;  %v8562_v36 = vpack.c.bf16 %v981_v21, %v977_v52  ;;  %10843 = vst [vmem:[#allocation40_spill] sm:$0xff] %v8564_v8 }
 0x16c   : > { %v2207_v15 = vadd.f32 %v2206_v19, %v2117_v54  ;;  %v8568_v48 = vpack.c.bf16 %v984_v9, %v980_v40  ;;  %v591_v10 = vsel %vm559_vm1, %v558_v17, %v477_v12  ;;  %v702_v54 = vld [vmem:[%s8014_s10 + $0x1e8] sm:$0xff]  ;;  %v703_v19 = vld [vmem:[%s8014_s10 + $0x1f0] sm:$0xff]  ;;  %v6809_v40 = vld [vmem:[%s10719_s2 + $0x3a0] sm:$0xf] }
 0x16d   : > { %10841 = vst [vmem:[#allocation38_spill] sm:$0xff] %v8558_v24  ;;  %v2383_v16 = vadd.f32 %v2382_v28, %v2294_v13  ;;  %v701_v13 = vld [vmem:[%s8014_s10 + $0x1e0] sm:$0xff]  ;;  %v639_v39 = vsel %vm592_vm2, %v591_v10, %v509_v29  ;;  %v828_v4 = vunpack.c.h.bf16 %v702_v54  ;;  %v829_v14 = vunpack.c.l.bf16 %v703_v19  ;;  %v7244_v9 = vld [vmem:[%s10719_s2 + $0x3b0] sm:$0xf0] }
 0x16e   : > { %10842 = vst [vmem:[#allocation39_spill] sm:$0xff] %v8562_v36  ;;  %v826_v52 = vunpack.c.h.bf16 %v701_v13  ;;  %v830_v0 = vunpack.c.h.bf16 %v703_v19  ;;  %v7284_v10 = vld [vmem:[%s10719_s2 + $0x4f0] sm:$0xf0] }
 0x16f   : > { %10845 = vst [vmem:[#allocation42_spill] sm:$0xff] %v8568_v48  ;;  %v3911_v37 = vadd.f32 %v8378_v50, %v2383_v16  ;;  %v827_v16 = vunpack.c.l.bf16 %v702_v54 }
 0x171   : > { %v4039_v21 = vmax.f32 %v3911_v37, 0.0 }
 0x172   : > { %v2295_v20 = vpop.f32.mrf.mxu2  ;;  %v2384_v46 = vpop.f32.mrf.mxu3 }
 0x173   : > { %v2296_v31 = vadd.f32 %v2295_v20, %v2207_v15  ;;  %v2120_v59 = vpop.f32.mrf.mxu0  ;;  %v2209_v28 = vpop.f32.mrf.mxu1  ;;  %v825_v15 = vunpack.c.l.bf16 %v701_v13  ;;  %v831_v20 = vunpack.c.l.bf16 %v704_v49  ;;  %v832_v13 = vunpack.c.h.bf16 %v704_v49  ;;  %v7164_v49 = vld [vmem:[%s10719_s2 + $0x130] sm:$0xf0] }
 0x174   : > { %v2210_v7 = vadd.f32 %v2209_v28, %v2120_v59  ;;  %v6810_v59 = vor.u32 %v7244_v9, %v6809_v40  ;;  %v6969_v28 = vld [vmem:[%s10719_s2 + $0x4e0] sm:$0xf] }
 0x175   : > { %v2385_v1 = vadd.f32 %v2384_v46, %v2296_v31  ;;  %v863_v46 = vunpack.c.l.bf16 %v639_v39  ;;  %v864_v31 = vunpack.c.h.bf16 %v639_v39  ;;  %v6970_v54 = vor.u32 %v7284_v10, %v6969_v28 }
 0x176   : > { %2159 = vmatmul.bf16.gmra.mxu0 %v8562_v36  ;;  %2248 = vmatmul.bf16.gmra.mxu1 %v8564_v8 }
 0x177   : > { %v3915_v30 = vadd.f32 %v8378_v50, %v2385_v1  ;;  %2337 = vmatmul.bf16.gmra.mxu2 %v8566_v11  ;;  %2426 = vmatmul.bf16.gmra.mxu3 %v8568_v48  ;;  %v985_v39 = vmul.f32 %v863_v46, %v825_v15  ;;  %v986_v40 = vmul.f32 %v863_v46, %v826_v52 }
 0x178   : > { %2971 = vmatpush.bf16.msra.mxu2 %v6810_v59  ;;  %3060 = vmatpush.bf16.msra.mxu3 %v6970_v54  ;;  %v989_v9 = vmul.f32 %v864_v31, %v829_v14  ;;  %v990_v48 = vmul.f32 %v864_v31, %v830_v0  ;;  %v987_v11 = vmul.f32 %v863_v46, %v827_v16  ;;  %v6649_v16 = vld [vmem:[%s10719_s2 + $0x260] sm:$0xf] }
 0x179   : > { %v4043_v62 = vmax.f32 %v3915_v30, 0.0  ;;  %v988_v8 = vmul.f32 %v863_v46, %v828_v4  ;;  %v991_v36 = vmul.f32 %v864_v31, %v831_v20  ;;  %v992_v27 = vmul.f32 %v864_v31, %v832_v13  ;;  %v7204_v4 = vld [vmem:[%s10719_s2 + $0x270] sm:$0xf0] }
 0x17a   : > { %v2298_v17 = vpop.f32.mrf.mxu2  ;;  %v2387_v12 = vpop.f32.mrf.mxu3  ;;  %v8604_v15 = vpack.c.bf16 %v990_v48, %v986_v40  ;;  %v6650_v31 = vor.u32 %v7204_v4, %v6649_v16 }
 0x17b   : > { %v2299_v29 = vadd.f32 %v2298_v17, %v2210_v7  ;;  %v2122_v37 = vpop.f32.mrf.mxu0  ;;  %v2211_v1 = vpop.f32.mrf.mxu1  ;;  %v8594_v19 = vpack.c.bf16 %v4043_v62, %v4039_v21  ;;  %v6489_v7 = vld [vmem:[%s10719_s2 + $0x120] sm:$0xf]  ;;  %v8602_v17 = vpack.c.bf16 %v989_v9, %v985_v39  ;;  %v8612_v20 = vpack.c.bf16 %v991_v36, %v987_v11 }
 0x17c   : > { %v2212_v30 = vadd.f32 %v2211_v1, %v2122_v37  ;;  %10848 = vst [vmem:[#allocation45_spill] sm:$0xff] %v8604_v15  ;;  %v6490_v52 = vor.u32 %v7164_v49, %v6489_v7  ;;  %v8614_v46 = vpack.c.bf16 %v992_v27, %v988_v8  ;;  %2882 = vmatpush.bf16.msra.mxu1 %v6650_v31 }
 0x17d   : > { %10846 = vst [vmem:[#allocation43_spill] sm:$0xff] %v8594_v19  ;;  %v2388_v24 = vadd.f32 %v2387_v12, %v2299_v29  ;;  %v10874_v19 = vld [vmem:[#allocation14_spill] sm:$0xff] }
 0x17e   : > { %10847 = vst [vmem:[#allocation44_spill] sm:$0xff] %v8602_v17  ;;  %2793 = vmatpush.bf16.msra.mxu0 %v6490_v52 }
 0x17f   : > { %10849 = vst [vmem:[#allocation46_spill] sm:$0xff] %v8612_v20  ;;  %v3919_v48 = vadd.f32 %v8378_v50, %v2388_v24 }
 0x180   : > { %10850 = vst [vmem:[#allocation47_spill] sm:$0xff] %v8614_v46 }
 0x181   : > { %v4047_v36 = vmax.f32 %v3919_v48, 0.0  ;;  %v6949_v48 = vld [vmem:[%s10719_s2 + $0x4b8] sm:$0xf] }
 0x182   : > { %v2300_v21 = vpop.f32.mrf.mxu2  ;;  %v2389_v62 = vpop.f32.mrf.mxu3 }
 0x183   : > { %v2301_v14 = vadd.f32 %v2300_v21, %v2212_v30  ;;  %v2125_v0 = vpop.f32.mrf.mxu0  ;;  %v2214_v12 = vpop.f32.mrf.mxu1 }
 0x184   : > { %v2215_v59 = vadd.f32 %v2214_v12, %v2125_v0  ;;  %v7239_v0 = vld [vmem:[%s10719_s2 + $0x388] sm:$0xf0] }
 0x185   : > { %v2390_v28 = vadd.f32 %v2389_v62, %v2301_v14  ;;  %v6789_v14 = vld [vmem:[%s10719_s2 + $0x378] sm:$0xf] }
 0x186   : > { %2164 = vmatmul.bf16.gmra.mxu0 %v8602_v17  ;;  %2253 = vmatmul.bf16.gmra.mxu1 %v8604_v15 }
 0x187   : > { %v3923_v10 = vadd.f32 %v8378_v50, %v2390_v28  ;;  %2342 = vmatmul.bf16.gmra.mxu2 %v8612_v20  ;;  %2431 = vmatmul.bf16.gmra.mxu3 %v8614_v46  ;;  %v7279_v28 = vld [vmem:[%s10719_s2 + $0x4c8] sm:$0xf0] }
 0x189   : > { %v4051_v27 = vmax.f32 %v3923_v10, 0.0 }
 0x18a   : > { %v2303_v8 = vpop.f32.mrf.mxu2  ;;  %v2392_v11 = vpop.f32.mrf.mxu3 }
 0x18b   : > { %v2304_v29 = vadd.f32 %v2303_v8, %v2215_v59  ;;  %v2127_v37 = vpop.f32.mrf.mxu0  ;;  %v2216_v1 = vpop.f32.mrf.mxu1  ;;  %v8622_v24 = vpack.c.bf16 %v4051_v27, %v4047_v36  ;;  %v6790_v59 = vor.u32 %v7239_v0, %v6789_v14  ;;  %v6950_v8 = vor.u32 %v7279_v28, %v6949_v48 }
 0x18c   : > { %v2217_v13 = vadd.f32 %v2216_v1, %v2127_v37  ;;  %v6469_v1 = vld [vmem:[%s10719_s2 + $0xf8] sm:$0xf] }
 0x18d   : > { %10851 = vst [vmem:[#allocation48_spill] sm:$0xff] %v8622_v24  ;;  %v2393_v54 = vadd.f32 %v2392_v11, %v2304_v29  ;;  %2972 = vmatpush.bf16.msra.mxu2 %v6790_v59  ;;  %3061 = vmatpush.bf16.msra.mxu3 %v6950_v8 }
 0x18f   : > { %v3927_v21 = vadd.f32 %v8378_v50, %v2393_v54 }
 0x191   : > { %v4055_v16 = vmax.f32 %v3927_v21, 0.0 }
 0x192   : > { %v2305_v30 = vpop.f32.mrf.mxu2  ;;  %v2394_v39 = vpop.f32.mrf.mxu3 }
 0x193   : > { %v2306_v40 = vadd.f32 %v2305_v30, %v2217_v13  ;;  %v2130_v9 = vpop.f32.mrf.mxu0  ;;  %v2219_v7 = vpop.f32.mrf.mxu1  ;;  %v7159_v13 = vld [vmem:[%s10719_s2 + $0x108] sm:$0xf0] }
 0x194   : > { %v2220_v49 = vadd.f32 %v2219_v7, %v2130_v9  ;;  %v7199_v9 = vld [vmem:[%s10719_s2 + $0x248] sm:$0xf0] }
 0x195   : > { %v2395_v62 = vadd.f32 %v2394_v39, %v2306_v40  ;;  %v6470_v39 = vor.u32 %v7159_v13, %v6469_v1  ;;  %v6629_v40 = vld [vmem:[%s10719_s2 + $0x238] sm:$0xf] }
 0x196   : > { %2445 = vmatmul.bf16.vlgmr.msrb.gmra.mxu0 %v8035_v32  ;;  %2534 = vmatmul.bf16.vlgmr.msrb.gmra.mxu1 %v8037_v33 }
 0x197   : > { %v3931_v52 = vadd.f32 %v8378_v50, %v2395_v62  ;;  %2623 = vmatmul.bf16.vlgmr.msrb.gmra.mxu2 %v8039_v34  ;;  %2712 = vmatmul.bf16.vlgmr.msrb.gmra.mxu3 %v8041_v35  ;;  %v6630_v62 = vor.u32 %v7199_v9, %v6629_v40 }
 0x198   : > { %2794 = vmatpush.bf16.msra.mxu0 %v6470_v39 }
 0x199   : > { %v4059_v4 = vmax.f32 %v3931_v52, 0.0  ;;  %2883 = vmatpush.bf16.msra.mxu1 %v6630_v62  ;;  %v7234_v62 = vld [vmem:[%s10719_s2 + $0x360] sm:$0xf0] }
 0x19a   : > { %v2308_v12 = vpop.f32.mrf.mxu2  ;;  %v2397_v31 = vpop.f32.mrf.mxu3 }
 0x19b   : > { %v2309_v10 = vadd.f32 %v2308_v12, %v2220_v49  ;;  %v2132_v36 = vpop.f32.mrf.mxu0  ;;  %v2221_v27 = vpop.f32.mrf.mxu1  ;;  %v8642_v11 = vpack.c.bf16 %v4059_v4, %v4055_v16 }
 0x19c   : > { %v2222_v29 = vadd.f32 %v2221_v27, %v2132_v36 }
 0x19d   : > { %10852 = vst [vmem:[#allocation49_spill] sm:$0xff] %v8642_v11  ;;  %v2398_v37 = vadd.f32 %v2397_v31, %v2309_v10 }
 0x19f   : > { %v3935_v16 = vadd.f32 %v8378_v50, %v2398_v37 }
 0x1a1   : > { %v4063_v0 = vmax.f32 %v3935_v16, 0.0 }
 0x1a2   : > { %v2310_v54 = vpop.f32.mrf.mxu2  ;;  %v2399_v30 = vpop.f32.mrf.mxu3 }
 0x1a3   : > { %v2311_v7 = vadd.f32 %v2310_v54, %v2222_v29  ;;  %v2135_v49 = vpop.f32.mrf.mxu0  ;;  %v2224_v21 = vpop.f32.mrf.mxu1 }
 0x1a4   : > { %v2225_v52 = vadd.f32 %v2224_v21, %v2135_v49  ;;  %v6769_v21 = vld [vmem:[%s10719_s2 + $0x350] sm:$0xf] }
 0x1a5   : > { %v2400_v4 = vadd.f32 %v2399_v30, %v2311_v7 }
 0x1a6   : > { %2450 = vmatmul.bf16.gmra.mxu0 %v8088_v22  ;;  %2539 = vmatmul.bf16.gmra.mxu1 %v8090_v23 }
 0x1a7   : > { %v3939_v14 = vadd.f32 %v8378_v50, %v2400_v4  ;;  %2628 = vmatmul.bf16.gmra.mxu2 %v8093_v25  ;;  %2717 = vmatmul.bf16.gmra.mxu3 %v8095_v26  ;;  %v6770_v4 = vor.u32 %v7234_v62, %v6769_v21 }
 0x1a9   : > { %v4067_v12 = vmax.f32 %v3939_v14, 0.0  ;;  %v6929_v14 = vld [vmem:[%s10719_s2 + $0x490] sm:$0xf]  ;;  %2973 = vmatpush.bf16.msra.mxu2 %v6770_v4 }
 0x1aa   : > { %v2313_v31 = vpop.f32.mrf.mxu2  ;;  %v2402_v59 = vpop.f32.mrf.mxu3 }
 0x1ab   : > { %v2314_v48 = vadd.f32 %v2313_v31, %v2225_v52  ;;  %v2137_v28 = vpop.f32.mrf.mxu0  ;;  %v2226_v10 = vpop.f32.mrf.mxu1  ;;  %v8662_v36 = vpack.c.bf16 %v4067_v12, %v4063_v0  ;;  %v7274_v0 = vld [vmem:[%s10719_s2 + $0x4a0] sm:$0xf0] }
 0x1ac   : > { %v2227_v27 = vadd.f32 %v2226_v10, %v2137_v28 }
 0x1ad   : > { %10853 = vst [vmem:[#allocation50_spill] sm:$0xff] %v8662_v36  ;;  %v2403_v8 = vadd.f32 %v2402_v59, %v2314_v48  ;;  %v6930_v48 = vor.u32 %v7274_v0, %v6929_v14 }
 0x1af   : > { %v3943_v39 = vadd.f32 %v8378_v50, %v2403_v8  ;;  %3062 = vmatpush.bf16.msra.mxu3 %v6930_v48  ;;  %v6449_v8 = vld [vmem:[%s10719_s2 + $0xd0] sm:$0xf] }
 0x1b1   : > { %v4071_v7 = vmax.f32 %v3943_v39, 0.0 }
 0x1b2   : > { %v2315_v29 = vpop.f32.mrf.mxu2  ;;  %v2404_v37 = vpop.f32.mrf.mxu3 }
 0x1b3   : > { %v2316_v1 = vadd.f32 %v2315_v29, %v2227_v27  ;;  %v2140_v13 = vpop.f32.mrf.mxu0  ;;  %v2229_v54 = vpop.f32.mrf.mxu1  ;;  %v7154_v29 = vld [vmem:[%s10719_s2 + $0xe0] sm:$0xf0] }
 0x1b4   : > { %v2230_v30 = vadd.f32 %v2229_v54, %v2140_v13  ;;  %v6450_v13 = vor.u32 %v7154_v29, %v6449_v8  ;;  %v6609_v54 = vld [vmem:[%s10719_s2 + $0x210] sm:$0xf] }
 0x1b5   : > { %v2405_v40 = vadd.f32 %v2404_v37, %v2316_v1 }
 0x1b6   : > { %2455 = vmatmul.bf16.gmra.mxu0 %v8117_v61  ;;  %2544 = vmatmul.bf16.gmra.mxu1 %v8119_v63 }
 0x1b7   : > { %v3947_v9 = vadd.f32 %v8378_v50, %v2405_v40  ;;  %2633 = vmatmul.bf16.gmra.mxu2 %v8121_v2  ;;  %2722 = vmatmul.bf16.gmra.mxu3 %v8123_v3 }
 0x1b8   : > { %2795 = vmatpush.bf16.msra.mxu0 %v6450_v13 }
 0x1b9   : > { %v4075_v49 = vmax.f32 %v3947_v9, 0.0 }
 0x1ba   : > { %v2318_v52 = vpop.f32.mrf.mxu2  ;;  %v2407_v16 = vpop.f32.mrf.mxu3 }
 0x1bb   : > { %v2319_v12 = vadd.f32 %v2318_v52, %v2230_v30  ;;  %v2142_v31 = vpop.f32.mrf.mxu0  ;;  %v2231_v59 = vpop.f32.mrf.mxu1  ;;  %v8682_v28 = vpack.c.bf16 %v4075_v49, %v4071_v7  ;;  %v7194_v30 = vld [vmem:[%s10719_s2 + $0x220] sm:$0xf0] }
 0x1bc   : > { %v2232_v10 = vadd.f32 %v2231_v59, %v2142_v31  ;;  %v6610_v7 = vor.u32 %v7194_v30, %v6609_v54 }
 0x1bd   : > { %10854 = vst [vmem:[#allocation51_spill] sm:$0xff] %v8682_v28  ;;  %v2408_v27 = vadd.f32 %v2407_v16, %v2319_v12 }
 0x1be   : > { %2884 = vmatpush.bf16.msra.mxu1 %v6610_v7 }
 0x1bf   : > { %v3951_v21 = vadd.f32 %v8378_v50, %v2408_v27 }
 0x1c1   : > { %v4079_v16 = vmax.f32 %v3951_v21, 0.0  ;;  %v7229_v21 = vld [vmem:[%s10719_s2 + $0x338] sm:$0xf0] }
 0x1c2   : > { %v2320_v37 = vpop.f32.mrf.mxu2  ;;  %v2409_v1 = vpop.f32.mrf.mxu3 }
 0x1c3   : > { %v2321_v39 = vadd.f32 %v2320_v37, %v2232_v10  ;;  %v2145_v40 = vpop.f32.mrf.mxu0  ;;  %v2234_v9 = vpop.f32.mrf.mxu1 }
 0x1c4   : > { %v2235_v49 = vadd.f32 %v2234_v9, %v2145_v40 }
 0x1c5   : > { %v2410_v62 = vadd.f32 %v2409_v1, %v2321_v39 }
 0x1c6   : > { %2460 = vmatmul.bf16.gmra.mxu0 %v8170_v57  ;;  %2549 = vmatmul.bf16.gmra.mxu1 %v8172_v58 }
 0x1c7   : > { %v3955_v52 = vadd.f32 %v8378_v50, %v2410_v62  ;;  %2638 = vmatmul.bf16.gmra.mxu2 %v8174_v60  ;;  %2727 = vmatmul.bf16.gmra.mxu3 %v8176_v5 }
 0x1c9   : > { %v4083_v4 = vmax.f32 %v3955_v52, 0.0 }
 0x1ca   : > { %v2323_v14 = vpop.f32.mrf.mxu2  ;;  %v2412_v0 = vpop.f32.mrf.mxu3 }
 0x1cb   : > { %v2324_v12 = vadd.f32 %v2323_v14, %v2235_v49  ;;  %v2147_v31 = vpop.f32.mrf.mxu0  ;;  %v2236_v59 = vpop.f32.mrf.mxu1  ;;  %v8702_v48 = vpack.c.bf16 %v4083_v4, %v4079_v16  ;;  %v6749_v49 = vld [vmem:[%s10719_s2 + $0x328] sm:$0xf]  ;;  %v7269_v14 = vld [vmem:[%s10719_s2 + $0x478] sm:$0xf0] }
 0x1cc   : > { %v2237_v10 = vadd.f32 %v2236_v59, %v2147_v31  ;;  %v6750_v16 = vor.u32 %v7229_v21, %v6749_v49  ;;  %v6909_v4 = vld [vmem:[%s10719_s2 + $0x468] sm:$0xf] }
 0x1cd   : > { %10855 = vst [vmem:[#allocation52_spill] sm:$0xff] %v8702_v48  ;;  %v2413_v27 = vadd.f32 %v2412_v0, %v2324_v12  ;;  %v6910_v59 = vor.u32 %v7269_v14, %v6909_v4 }
 0x1ce   : > { %2974 = vmatpush.bf16.msra.mxu2 %v6750_v16 }
 0x1cf   : > { %v3959_v30 = vadd.f32 %v8378_v50, %v2413_v27  ;;  %3063 = vmatpush.bf16.msra.mxu3 %v6910_v59 }
 0x1d1   : > { %v4087_v9 = vmax.f32 %v3959_v30, 0.0  ;;  %v6589_v30 = vld [vmem:[%s10719_s2 + $0x1e8] sm:$0xf] }
 0x1d2   : > { %v2325_v8 = vpop.f32.mrf.mxu2  ;;  %v2414_v29 = vpop.f32.mrf.mxu3 }
 0x1d3   : > { %v2326_v37 = vadd.f32 %v2325_v8, %v2237_v10  ;;  %v2150_v1 = vpop.f32.mrf.mxu0  ;;  %v2239_v13 = vpop.f32.mrf.mxu1 }
 0x1d4   : > { %v2240_v54 = vadd.f32 %v2239_v13, %v2150_v1 }
 0x1d5   : > { %v2415_v39 = vadd.f32 %v2414_v29, %v2326_v37  ;;  %v6429_v29 = vld [vmem:[%s10719_s2 + $0xa8] sm:$0xf]  ;;  %v7149_v37 = vld [vmem:[%s10719_s2 + $0xb8] sm:$0xf0] }
 0x1d6   : > { %2465 = vmatmul.bf16.gmra.mxu0 %v8199_v42  ;;  %2554 = vmatmul.bf16.gmra.mxu1 %v8201_v43 }
 0x1d7   : > { %v3963_v40 = vadd.f32 %v8378_v50, %v2415_v39  ;;  %2643 = vmatmul.bf16.gmra.mxu2 %v8203_v44  ;;  %2732 = vmatmul.bf16.gmra.mxu3 %v8205_v45  ;;  %v7189_v39 = vld [vmem:[%s10719_s2 + $0x1f8] sm:$0xf0] }
 0x1d8   : > { %v6590_v49 = vor.u32 %v7189_v39, %v6589_v30 }
 0x1d9   : > { %v4091_v7 = vmax.f32 %v3963_v40, 0.0 }
 0x1da   : > { %v2328_v62 = vpop.f32.mrf.mxu2  ;;  %v2417_v52 = vpop.f32.mrf.mxu3  ;;  %2885 = vmatpush.bf16.msra.mxu1 %v6590_v49  ;;  %v10858_v49 = vld [vmem:[#allocation2_spill] sm:$0xff] }
 0x1db   : > { %v2329_v0 = vadd.f32 %v2328_v62, %v2240_v54  ;;  %v2152_v12 = vpop.f32.mrf.mxu0  ;;  %v2241_v31 = vpop.f32.mrf.mxu1  ;;  %v8722_v10 = vpack.c.bf16 %v4091_v7, %v4087_v9  ;;  %v6430_v54 = vor.u32 %v7149_v37, %v6429_v29 }
 0x1dc   : > { %v2242_v27 = vadd.f32 %v2241_v31, %v2152_v12 }
 0x1dd   : > { %10856 = vst [vmem:[#allocation53_spill] sm:$0xff] %v8722_v10  ;;  %v2418_v8 = vadd.f32 %v2417_v52, %v2329_v0  ;;  %2796 = vmatpush.bf16.msra.mxu0 %v6430_v54 }
 0x1df   : > { %v3967_v62 = vadd.f32 %v8378_v50, %v2418_v8 }
 0x1e1   : > { %v4095_v4 = vmax.f32 %v3967_v62, 0.0  ;;  %v10859_v62 = vld [vmem:[#allocation3_spill] sm:$0xff] }
 0x1e2   : > { %v2330_v1 = vpop.f32.mrf.mxu2  ;;  %v2419_v13 = vpop.f32.mrf.mxu3 }
 0x1e3   : > { %v2331_v40 = vadd.f32 %v2330_v1, %v2242_v27  ;;  %v2155_v9 = vpop.f32.mrf.mxu0  ;;  %v2244_v7 = vpop.f32.mrf.mxu1 }
 0x1e4   : > { %v2245_v21 = vadd.f32 %v2244_v7, %v2155_v9 }
 0x1e5   : > { %v2420_v52 = vadd.f32 %v2419_v13, %v2331_v40 }
 0x1e6   : > { %2470 = vmatmul.bf16.gmra.mxu0 %v8252_v53  ;;  %2559 = vmatmul.bf16.gmra.mxu1 %v8254_v51 }
 0x1e7   : > { %v3971_v16 = vadd.f32 %v8378_v50, %v2420_v52  ;;  %2648 = vmatmul.bf16.gmra.mxu2 %v8256_v56  ;;  %2737 = vmatmul.bf16.gmra.mxu3 %v8258_v6  ;;  %v10860_v52 = vld [vmem:[#allocation4_spill] sm:$0xff] }
 0x1e9   : > { %v4099_v14 = vmax.f32 %v3971_v16, 0.0  ;;  %v10861_v16 = vld [vmem:[#allocation5_spill] sm:$0xff] }
 0x1ea   : > { %v2333_v0 = vpop.f32.mrf.mxu2  ;;  %v2422_v12 = vpop.f32.mrf.mxu3 }
 0x1eb   : > { %v2334_v31 = vadd.f32 %v2333_v0, %v2245_v21  ;;  %v2157_v59 = vpop.f32.mrf.mxu0  ;;  %v2246_v27 = vpop.f32.mrf.mxu1  ;;  %v8742_v8 = vpack.c.bf16 %v4099_v14, %v4095_v4  ;;  %v6729_v0 = vld [vmem:[%s10719_s2 + $0x300] sm:$0xf] }
 0x1ec   : > { %v2247_v29 = vadd.f32 %v2246_v27, %v2157_v59 }
 0x1ed   : > { %10857 = vst [vmem:[#allocation54_spill] sm:$0xff] %v8742_v8  ;;  %v2423_v37 = vadd.f32 %v2422_v12, %v2334_v31  ;;  %v7224_v12 = vld [vmem:[%s10719_s2 + $0x310] sm:$0xf0] }
 0x1ee   : > { %v6730_v27 = vor.u32 %v7224_v12, %v6729_v0  ;;  %v7144_v0 = vld [vmem:[%s10719_s2 + $0x90] sm:$0xf0] }
 0x1ef   : > { %v3975_v9 = vadd.f32 %v8378_v50, %v2423_v37  ;;  %v7264_v37 = vld [vmem:[%s10719_s2 + $0x450] sm:$0xf0] }
 0x1f0   : > { %2975 = vmatpush.bf16.msra.mxu2 %v6730_v27 }
 0x1f1   : > { %v4103_v4 = vmax.f32 %v3975_v9, 0.0 }
 0x1f2   : > { %v2335_v1 = vpop.f32.mrf.mxu2  ;;  %v2424_v13 = vpop.f32.mrf.mxu3 }
 0x1f3   : > { %v2336_v54 = vadd.f32 %v2335_v1, %v2247_v29  ;;  %v2160_v30 = vpop.f32.mrf.mxu0  ;;  %v2249_v39 = vpop.f32.mrf.mxu1  ;;  %v6889_v29 = vld [vmem:[%s10719_s2 + $0x440] sm:$0xf] }
 0x1f4   : > { %v2250_v40 = vadd.f32 %v2249_v39, %v2160_v30  ;;  %v6890_v30 = vor.u32 %v7264_v37, %v6889_v29 }
 0x1f5   : > { %v2425_v7 = vadd.f32 %v2424_v13, %v2336_v54 }
 0x1f6   : > { %2475 = vmatmul.bf16.gmra.mxu0 %v10858_v49  ;;  %2564 = vmatmul.bf16.gmra.mxu1 %v10859_v62 }
 0x1f7   : > { %v3979_v21 = vadd.f32 %v8378_v50, %v2425_v7  ;;  %2653 = vmatmul.bf16.gmra.mxu2 %v10860_v52  ;;  %2742 = vmatmul.bf16.gmra.mxu3 %v10861_v16 }
 0x1f8   : > { %3064 = vmatpush.bf16.msra.mxu3 %v6890_v30  ;;  %v10864_v30 = vld [vmem:[#allocation7_spill] sm:$0xff] }
 0x1f9   : > { %v4107_v14 = vmax.f32 %v3979_v21, 0.0  ;;  %v6409_v21 = vld [vmem:[%s10719_s2 + $0x80] sm:$0xf] }
 0x1fa   : > { %v2338_v31 = vpop.f32.mrf.mxu2  ;;  %v2427_v59 = vpop.f32.mrf.mxu3 }
 0x1fb   : > { %v2339_v1 = vadd.f32 %v2338_v31, %v2250_v40  ;;  %v2162_v13 = vpop.f32.mrf.mxu0  ;;  %v2251_v54 = vpop.f32.mrf.mxu1  ;;  %v8762_v39 = vpack.c.bf16 %v4107_v14, %v4103_v4  ;;  %v6410_v40 = vor.u32 %v7144_v0, %v6409_v21  ;;  %v6569_v4 = vld [vmem:[%s10719_s2 + $0x1c0] sm:$0xf]  ;;  %v7184_v14 = vld [vmem:[%s10719_s2 + $0x1d0] sm:$0xf0] }
 0x1fc   : > { %v2252_v9 = vadd.f32 %v2251_v54, %v2162_v13  ;;  %v6570_v29 = vor.u32 %v7184_v14, %v6569_v4  ;;  %v10863_v54 = vld [vmem:[#allocation6_spill] sm:$0xff]  ;;  %v10865_v0 = vld [vmem:[#allocation8_spill] sm:$0xff] }
 0x1fd   : > { %10862 = vst [vmem:[#allocation2_spill] sm:$0xff] %v8762_v39  ;;  %v2428_v7 = vadd.f32 %v2427_v59, %v2339_v1  ;;  %2797 = vmatpush.bf16.msra.mxu0 %v6410_v40  ;;  %v10866_v39 = vld [vmem:[#allocation9_spill] sm:$0xff] }
 0x1fe   : > { %2886 = vmatpush.bf16.msra.mxu1 %v6570_v29 }
 0x1ff   : > { %v3983_v1 = vadd.f32 %v8378_v50, %v2428_v7 }
 0x202   : > { %v2340_v12 = vpop.f32.mrf.mxu2  ;;  %v2429_v8 = vpop.f32.mrf.mxu3 }
 0x203   : > { %v2341_v31 = vadd.f32 %v2340_v12, %v2252_v9  ;;  %v2165_v59 = vpop.f32.mrf.mxu0  ;;  %v2254_v27 = vpop.f32.mrf.mxu1  ;;  %v4111_v9 = vmax.f32 %v3983_v1, 0.0  ;;  %v10868_v1 = vld [vmem:[#allocation10_spill] sm:$0xff] }
 0x204   : > { %v2255_v37 = vadd.f32 %v2254_v27, %v2165_v59 }
 0x205   : > { %v2430_v13 = vadd.f32 %v2429_v8, %v2341_v31 }
 0x206   : > { %2480 = vmatmul.bf16.gmra.mxu0 %v10863_v54  ;;  %2569 = vmatmul.bf16.gmra.mxu1 %v10864_v30 }
 0x207   : > { %v3987_v21 = vadd.f32 %v8378_v50, %v2430_v13  ;;  %2658 = vmatmul.bf16.gmra.mxu2 %v10865_v0  ;;  %2747 = vmatmul.bf16.gmra.mxu3 %v10866_v39 }
 0x209   : > { %v4115_v12 = vmax.f32 %v3987_v21, 0.0  ;;  %v10869_v21 = vld [vmem:[#allocation11_spill] sm:$0xff] }
 0x20a   : > { %v2343_v10 = vpop.f32.mrf.mxu2  ;;  %v2432_v4 = vpop.f32.mrf.mxu3 }
 0x20b   : > { %v2344_v14 = vadd.f32 %v2343_v10, %v2255_v37  ;;  %v2167_v40 = vpop.f32.mrf.mxu0  ;;  %v2256_v59 = vpop.f32.mrf.mxu1  ;;  %v8782_v7 = vpack.c.bf16 %v4115_v12, %v4111_v9  ;;  %v10870_v37 = vld [vmem:[#allocation12_spill] sm:$0xff]  ;;  %v10871_v9 = vld [vmem:[#allocation13_spill] sm:$0xff] }
 0x20c   : > { %v2257_v8 = vadd.f32 %v2256_v59, %v2167_v40 }
 0x20d   : > { %10867 = vst [vmem:[#allocation3_spill] sm:$0xff] %v8782_v7  ;;  %v2433_v31 = vadd.f32 %v2432_v4, %v2344_v14  ;;  %v6709_v14 = vld [vmem:[%s10719_s2 + $0x2d8] sm:$0xf] }
 0x20f   : > { %v3991_v11 = vadd.f32 %v8378_v50, %v2433_v31 }
 0x211   : > { %v4119_v12 = vmax.f32 %v3991_v11, 0.0 }
 0x212   : > { %v2345_v27 = vpop.f32.mrf.mxu2  ;;  %v2434_v29 = vpop.f32.mrf.mxu3 }
 0x213   : > { %v2346_v48 = vadd.f32 %v2345_v27, %v2257_v8  ;;  %v2446_v28 = vpop.f32.mrf.mxu0  ;;  %v2535_v13 = vpop.f32.mrf.mxu1 }
 0x214   : > { %v2536_v36 = vadd.f32 %v2535_v13, %v2446_v28  ;;  %v7219_v28 = vld [vmem:[%s10719_s2 + $0x2e8] sm:$0xf0] }
 0x215   : > { %v2435_v24 = vadd.f32 %v2434_v29, %v2346_v48  ;;  %v6710_v59 = vor.u32 %v7219_v28, %v6709_v14  ;;  %v8807_v14 = vld [vmem:[%s10720_s3] sm:$0xf] }
 0x216   : > { %2485 = vmatmul.bf16.gmra.mxu0 %v10868_v1  ;;  %2574 = vmatmul.bf16.gmra.mxu1 %v10869_v21  ;;  %10873 = vst [vmem:[#allocation5_spill] sm:$0xff] %v8807_v14  ;;  %v8810_v28 = vperm.slane %v8807_v14, 1  ;;  %v10876_v14 = vld [vmem:[#allocation16_spill] sm:$0xff] }
 0x217   : > { %v3995_v10 = vadd.f32 %v8378_v50, %v2435_v24  ;;  %2663 = vmatmul.bf16.gmra.mxu2 %v10870_v37  ;;  %2752 = vmatmul.bf16.gmra.mxu3 %v10871_v9  ;;  %v6869_v50 = vld [vmem:[%s10719_s2 + $0x418] sm:$0xf]  ;;  %v7259_v24 = vld [vmem:[%s10719_s2 + $0x428] sm:$0xf0] }
 0x218   : > { %v6870_v27 = vor.u32 %v7259_v24, %v6869_v50  ;;  %2976 = vmatpush.bf16.msra.mxu2 %v6710_v59  ;;  %v6549_v59 = vld [vmem:[%s10719_s2 + $0x198] sm:$0xf]  ;;  %v7179_v50 = vld [vmem:[%s10719_s2 + $0x1a8] sm:$0xf0] }
 0x219   : > { %v4123_v4 = vmax.f32 %v3995_v10, 0.0  ;;  %v10877_v9 = vld [vmem:[#allocation17_spill] sm:$0xff] }
 0x21a   : > { %v2624_v48 = vpop.f32.mrf.mxu2  ;;  %v2713_v40 = vpop.f32.mrf.mxu3  ;;  %3065 = vmatpush.bf16.msra.mxu3 %v6870_v27 }
 0x21b   : > { %v2625_v11 = vadd.f32 %v2624_v48, %v2536_v36  ;;  %v2448_v8 = vpop.f32.mrf.mxu0  ;;  %v2537_v31 = vpop.f32.mrf.mxu1  ;;  %v8802_v29 = vpack.c.bf16 %v4123_v4, %v4119_v12  ;;  %v6389_v36 = vld [vmem:[%s10719_s2 + $0x58] sm:$0xf]  ;;  %v7139_v12 = vld [vmem:[%s10719_s2 + $0x68] sm:$0xf0] }
 0x21c   : > { %v2538_v13 = vadd.f32 %v2537_v31, %v2448_v8  ;;  %v6550_v31 = vor.u32 %v7179_v50, %v6549_v59 }
 0x21d   : > { %10872 = vst [vmem:[#allocation4_spill] sm:$0xff] %v8802_v29  ;;  %v2714_v10 = vadd.f32 %v2713_v40, %v2625_v11  ;;  %v6390_v40 = vor.u32 %v7139_v12, %v6389_v36  ;;  %v10875_v36 = vld [vmem:[#allocation15_spill] sm:$0xff] }
 0x21e   : > { %2887 = vmatpush.bf16.msra.mxu1 %v6550_v31 }
 0x21f   : > { %2798 = vmatpush.bf16.msra.mxu0 %v6390_v40  ;;  %v3872_v29 = vadd.f32 %v8810_v28, %v2714_v10 }
 0x222   : > { %v2626_v4 = vpop.f32.mrf.mxu2  ;;  %v2715_v48 = vpop.f32.mrf.mxu3 }
 0x223   : > { %v2627_v24 = vadd.f32 %v2626_v4, %v2538_v13  ;;  %v2451_v11 = vpop.f32.mrf.mxu0  ;;  %v2540_v8 = vpop.f32.mrf.mxu1  ;;  %v4000_v13 = vmax.f32 %v3872_v29, 0.0  ;;  %v10879_v29 = vld [vmem:[#allocation19_spill] sm:$0xff] }
 0x224   : > { %v2541_v27 = vadd.f32 %v2540_v8, %v2451_v11 }
 0x225   : > { %v2716_v7 = vadd.f32 %v2715_v48, %v2627_v24 }
 0x226   : > { %2490 = vmatmul.bf16.gmra.mxu0 %v10874_v19  ;;  %2579 = vmatmul.bf16.gmra.mxu1 %v10875_v36 }
 0x227   : > { %v3876_v12 = vadd.f32 %v8810_v28, %v2716_v7  ;;  %2668 = vmatmul.bf16.gmra.mxu2 %v10876_v14  ;;  %2757 = vmatmul.bf16.gmra.mxu3 %v10877_v9 }
 0x229   : > { %v4004_v4 = vmax.f32 %v3876_v12, 0.0  ;;  %v10880_v12 = vld [vmem:[#allocation20_spill] sm:$0xff] }
 0x22a   : > { %v2629_v37 = vpop.f32.mrf.mxu2  ;;  %v2718_v59 = vpop.f32.mrf.mxu3 }
 0x22b   : > { %v8830_v50 = vpack.c.bf16 %v4004_v4, %v4000_v13  ;;  %v2630_v40 = vadd.f32 %v2629_v37, %v2541_v27  ;;  %v2453_v10 = vpop.f32.mrf.mxu0  ;;  %v2542_v48 = vpop.f32.mrf.mxu1  ;;  %v10881_v37 = vld [vmem:[#allocation21_spill] sm:$0xff]  ;;  %v10882_v27 = vld [vmem:[#allocation22_spill] sm:$0xff] }
 0x22c   : > { %v2543_v24 = vadd.f32 %v2542_v48, %v2453_v10 }
 0x22d   : > { %10878 = vst [vmem:[#allocation6_spill] sm:$0xff] %v8830_v50  ;;  %v2719_v11 = vadd.f32 %v2718_v59, %v2630_v40  ;;  %v6689_v40 = vld [vmem:[%s10719_s2 + $0x2b0] sm:$0xf] }
 0x22f   : > { %v3880_v14 = vadd.f32 %v8810_v28, %v2719_v11 }
 0x231   : > { %v4008_v4 = vmax.f32 %v3880_v14, 0.0  ;;  %v7254_v14 = vld [vmem:[%s10719_s2 + $0x400] sm:$0xf0] }
 0x232   : > { %v2631_v8 = vpop.f32.mrf.mxu2  ;;  %v2720_v31 = vpop.f32.mrf.mxu3 }
 0x233   : > { %v2632_v36 = vadd.f32 %v2631_v8, %v2543_v24  ;;  %v2456_v19 = vpop.f32.mrf.mxu0  ;;  %v2545_v7 = vpop.f32.mrf.mxu1 }
 0x234   : > { %v2546_v21 = vadd.f32 %v2545_v7, %v2456_v19  ;;  %v7214_v19 = vld [vmem:[%s10719_s2 + $0x2c0] sm:$0xf0] }
 0x235   : > { %v2721_v9 = vadd.f32 %v2720_v31, %v2632_v36  ;;  %v6690_v48 = vor.u32 %v7214_v19, %v6689_v40  ;;  %v6369_v40 = vld [vmem:[%s10719_s2 + $0x30] sm:$0xf]  ;;  %v7134_v19 = vld [vmem:[%s10719_s2 + $0x40] sm:$0xf0] }
 0x236   : > { %2495 = vmatmul.bf16.gmra.mxu0 %v10879_v29  ;;  %2584 = vmatmul.bf16.gmra.mxu1 %v10880_v12 }
 0x237   : > { %v3884_v13 = vadd.f32 %v8810_v28, %v2721_v9  ;;  %2673 = vmatmul.bf16.gmra.mxu2 %v10881_v37  ;;  %2762 = vmatmul.bf16.gmra.mxu3 %v10882_v27  ;;  %v6849_v9 = vld [vmem:[%s10719_s2 + $0x3f0] sm:$0xf] }
 0x238   : > { %v6850_v31 = vor.u32 %v7254_v14, %v6849_v9  ;;  %2977 = vmatpush.bf16.msra.mxu2 %v6690_v48 }
 0x239   : > { %v4012_v59 = vmax.f32 %v3884_v13, 0.0 }
 0x23a   : > { %v2634_v36 = vpop.f32.mrf.mxu2  ;;  %v2723_v10 = vpop.f32.mrf.mxu3  ;;  %3066 = vmatpush.bf16.msra.mxu3 %v6850_v31  ;;  %v10884_v31 = vld [vmem:[#allocation26_spill] sm:$0xff] }
 0x23b   : > { %v2635_v24 = vadd.f32 %v2634_v36, %v2546_v21  ;;  %v2458_v11 = vpop.f32.mrf.mxu0  ;;  %v2547_v8 = vpop.f32.mrf.mxu1  ;;  %v8850_v7 = vpack.c.bf16 %v4012_v59, %v4008_v4  ;;  %v6370_v21 = vor.u32 %v7134_v19, %v6369_v40  ;;  %v6529_v4 = vld [vmem:[%s10719_s2 + $0x170] sm:$0xf]  ;;  %v7174_v59 = vld [vmem:[%s10719_s2 + $0x180] sm:$0xf0]  ;;  %v10885_v40 = vld [vmem:[#allocation27_spill] sm:$0xff] }
 0x23c   : > { %v2548_v13 = vadd.f32 %v2547_v8, %v2458_v11  ;;  %v6530_v9 = vor.u32 %v7174_v59, %v6529_v4 }
 0x23d   : > { %10883 = vst [vmem:[#allocation7_spill] sm:$0xff] %v8850_v7  ;;  %v2724_v50 = vadd.f32 %v2723_v10, %v2635_v24  ;;  %2799 = vmatpush.bf16.msra.mxu0 %v6370_v21 }
 0x23e   : > { %2888 = vmatpush.bf16.msra.mxu1 %v6530_v9 }
 0x23f   : > { %v3888_v24 = vadd.f32 %v8810_v28, %v2724_v50 }
 0x242   : > { %v2636_v27 = vpop.f32.mrf.mxu2  ;;  %v2725_v37 = vpop.f32.mrf.mxu3 }
 0x243   : > { %v2637_v36 = vadd.f32 %v2636_v27, %v2548_v13  ;;  %v2461_v10 = vpop.f32.mrf.mxu0  ;;  %v2550_v48 = vpop.f32.mrf.mxu1  ;;  %v4016_v27 = vmax.f32 %v3888_v24, 0.0  ;;  %v10887_v24 = vld [vmem:[#allocation29_spill] sm:$0xff] }
 0x244   : > { %v2551_v14 = vadd.f32 %v2550_v48, %v2461_v10 }
 0x245   : > { %v2726_v11 = vadd.f32 %v2725_v37, %v2637_v36 }
 0x246   : > { %2500 = vmatmul.bf16.gmra.mxu0 %v8460_v47  ;;  %2589 = vmatmul.bf16.gmra.mxu1 %v8462_v41 }
 0x247   : > { %v3892_v8 = vadd.f32 %v8810_v28, %v2726_v11  ;;  %2678 = vmatmul.bf16.gmra.mxu2 %v10884_v31  ;;  %2767 = vmatmul.bf16.gmra.mxu3 %v10885_v40 }
 0x249   : > { %v4020_v13 = vmax.f32 %v3892_v8, 0.0  ;;  %v10888_v8 = vld [vmem:[#allocation30_spill] sm:$0xff] }
 0x24a   : > { %v2639_v19 = vpop.f32.mrf.mxu2  ;;  %v2728_v4 = vpop.f32.mrf.mxu3 }
 0x24b   : > { %v2640_v59 = vadd.f32 %v2639_v19, %v2551_v14  ;;  %v2463_v21 = vpop.f32.mrf.mxu0  ;;  %v2552_v10 = vpop.f32.mrf.mxu1  ;;  %v8870_v50 = vpack.c.bf16 %v4020_v13, %v4016_v27  ;;  %v10889_v19 = vld [vmem:[#allocation31_spill] sm:$0xff]  ;;  %v10890_v27 = vld [vmem:[#allocation32_spill] sm:$0xff] }
 0x24c   : > { %v2553_v37 = vadd.f32 %v2552_v10, %v2463_v21 }
 0x24d   : > { %10886 = vst [vmem:[#allocation8_spill] sm:$0xff] %v8870_v50  ;;  %v2729_v36 = vadd.f32 %v2728_v4, %v2640_v59  ;;  %v6669_v59 = vld [vmem:[%s10719_s2 + $0x288] sm:$0xf] }
 0x24f   : > { %v3896_v31 = vadd.f32 %v8810_v28, %v2729_v36 }
 0x251   : > { %v4024_v13 = vmax.f32 %v3896_v31, 0.0  ;;  %v7249_v31 = vld [vmem:[%s10719_s2 + $0x3d8] sm:$0xf0] }
 0x252   : > { %v2641_v48 = vpop.f32.mrf.mxu2  ;;  %v2730_v9 = vpop.f32.mrf.mxu3 }
 0x253   : > { %v2642_v7 = vadd.f32 %v2641_v48, %v2553_v37  ;;  %v2466_v41 = vpop.f32.mrf.mxu0  ;;  %v2555_v11 = vpop.f32.mrf.mxu1 }
 0x254   : > { %v2556_v47 = vadd.f32 %v2555_v11, %v2466_v41  ;;  %v7209_v41 = vld [vmem:[%s10719_s2 + $0x298] sm:$0xf0] }
 0x255   : > { %v2731_v40 = vadd.f32 %v2730_v9, %v2642_v7  ;;  %v6670_v10 = vor.u32 %v7209_v41, %v6669_v59  ;;  %v6349_v59 = vld [vmem:[%s10719_s2 + $0x8] sm:$0xf]  ;;  %v7129_v41 = vld [vmem:[%s10719_s2 + $0x18] sm:$0xf0] }
 0x256   : > { %2505 = vmatmul.bf16.gmra.mxu0 %v10887_v24  ;;  %2594 = vmatmul.bf16.gmra.mxu1 %v10888_v8 }
 0x257   : > { %v3900_v14 = vadd.f32 %v8810_v28, %v2731_v40  ;;  %2683 = vmatmul.bf16.gmra.mxu2 %v10889_v19  ;;  %2772 = vmatmul.bf16.gmra.mxu3 %v10890_v27  ;;  %v6829_v40 = vld [vmem:[%s10719_s2 + $0x3c8] sm:$0xf] }
 0x258   : > { %v6830_v9 = vor.u32 %v7249_v31, %v6829_v40  ;;  %2978 = vmatpush.bf16.msra.mxu2 %v6670_v10 }
 0x259   : > { %v4028_v4 = vmax.f32 %v3900_v14, 0.0 }
 0x25a   : > { %v2644_v7 = vpop.f32.mrf.mxu2  ;;  %v2733_v21 = vpop.f32.mrf.mxu3  ;;  %3067 = vmatpush.bf16.msra.mxu3 %v6830_v9  ;;  %v10892_v9 = vld [vmem:[#allocation37_spill] sm:$0xff] }
 0x25b   : > { %v2645_v37 = vadd.f32 %v2644_v7, %v2556_v47  ;;  %v2468_v36 = vpop.f32.mrf.mxu0  ;;  %v2557_v48 = vpop.f32.mrf.mxu1  ;;  %v8890_v11 = vpack.c.bf16 %v4028_v4, %v4024_v13  ;;  %v6350_v47 = vor.u32 %v7129_v41, %v6349_v59  ;;  %v6509_v13 = vld [vmem:[%s10719_s2 + $0x148] sm:$0xf]  ;;  %v7169_v4 = vld [vmem:[%s10719_s2 + $0x158] sm:$0xf0] }
 0x25c   : > { %v2558_v14 = vadd.f32 %v2557_v48, %v2468_v36  ;;  %v6510_v40 = vor.u32 %v7169_v4, %v6509_v13 }
 0x25d   : > { %10891 = vst [vmem:[#allocation9_spill] sm:$0xff] %v8890_v11  ;;  %v2734_v50 = vadd.f32 %v2733_v21, %v2645_v37  ;;  %2800 = vmatpush.bf16.msra.mxu0 %v6350_v47 }
 0x25e   : > { %2889 = vmatpush.bf16.msra.mxu1 %v6510_v40 }
 0x25f   : > { %v3904_v37 = vadd.f32 %v8810_v28, %v2734_v50 }
 0x262   : > { %v2646_v27 = vpop.f32.mrf.mxu2  ;;  %v2735_v19 = vpop.f32.mrf.mxu3 }
 0x263   : > { %v2647_v7 = vadd.f32 %v2646_v27, %v2558_v14  ;;  %v2471_v21 = vpop.f32.mrf.mxu0  ;;  %v2560_v10 = vpop.f32.mrf.mxu1  ;;  %v4032_v27 = vmax.f32 %v3904_v37, 0.0  ;;  %v10894_v37 = vld [vmem:[#allocation39_spill] sm:$0xff] }
 0x264   : > { %v2561_v31 = vadd.f32 %v2560_v10, %v2471_v21 }
 0x265   : > { %v2736_v36 = vadd.f32 %v2735_v19, %v2647_v7 }
 0x266   : > { %2510 = vmatmul.bf16.gmra.mxu0 %v8532_v38  ;;  %2599 = vmatmul.bf16.gmra.mxu1 %v8534_v18 }
 0x267   : > { %v3908_v48 = vadd.f32 %v8810_v28, %v2736_v36  ;;  %2688 = vmatmul.bf16.gmra.mxu2 %v8542_v55  ;;  %2777 = vmatmul.bf16.gmra.mxu3 %v10892_v9 }
 0x269   : > { %v4036_v14 = vmax.f32 %v3908_v48, 0.0  ;;  %v10895_v48 = vld [vmem:[#allocation40_spill] sm:$0xff] }
 0x26a   : > { %v2649_v59 = vpop.f32.mrf.mxu2  ;;  %v2738_v41 = vpop.f32.mrf.mxu3 }
 0x26b   : > { %v2650_v13 = vadd.f32 %v2649_v59, %v2561_v31  ;;  %v2473_v47 = vpop.f32.mrf.mxu0  ;;  %v2562_v4 = vpop.f32.mrf.mxu1  ;;  %v8910_v50 = vpack.c.bf16 %v4036_v14, %v4032_v27  ;;  %v10896_v59 = vld [vmem:[#allocation41_spill] sm:$0xff]  ;;  %v10897_v27 = vld [vmem:[#allocation42_spill] sm:$0xff] }
 0x26c   : > { %v2563_v19 = vadd.f32 %v2562_v4, %v2473_v47 }
 0x26d   : > { %10893 = vst [vmem:[#allocation10_spill] sm:$0xff] %v8910_v50  ;;  %v2739_v7 = vadd.f32 %v2738_v41, %v2650_v13  ;;  %v7242_v13 = vld [vmem:[%s10719_s2 + $0x3a4] sm:$0xf] }
 0x26f   : > { %v3912_v55 = vadd.f32 %v8810_v28, %v2739_v7 }
 0x271   : > { %v4040_v14 = vmax.f32 %v3912_v55, 0.0  ;;  %v6971_v55 = vld [vmem:[%s10719_s2 + $0x4f4] sm:$0xf0] }
 0x272   : > { %v2651_v21 = vpop.f32.mrf.mxu2  ;;  %v2740_v10 = vpop.f32.mrf.mxu3 }
 0x273   : > { %v2652_v40 = vadd.f32 %v2651_v21, %v2563_v19  ;;  %v2476_v11 = vpop.f32.mrf.mxu0  ;;  %v2565_v36 = vpop.f32.mrf.mxu1 }
 0x274   : > { %v2566_v18 = vadd.f32 %v2565_v36, %v2476_v11  ;;  %v6811_v11 = vld [vmem:[%s10719_s2 + $0x3b4] sm:$0xf0] }
 0x275   : > { %v2741_v9 = vadd.f32 %v2740_v10, %v2652_v40  ;;  %v6814_v19 = vor.u32 %v7242_v13, %v6811_v11  ;;  %v7162_v13 = vld [vmem:[%s10719_s2 + $0x124] sm:$0xf]  ;;  %v6491_v11 = vld [vmem:[%s10719_s2 + $0x134] sm:$0xf0] }
 0x276   : > { %2515 = vmatmul.bf16.gmra.mxu0 %v10894_v37  ;;  %2604 = vmatmul.bf16.gmra.mxu1 %v10895_v48 }
 0x277   : > { %v3916_v31 = vadd.f32 %v8810_v28, %v2741_v9  ;;  %2693 = vmatmul.bf16.gmra.mxu2 %v10896_v59  ;;  %2782 = vmatmul.bf16.gmra.mxu3 %v10897_v27  ;;  %v7282_v9 = vld [vmem:[%s10719_s2 + $0x4e4] sm:$0xf] }
 0x278   : > { %v6974_v40 = vor.u32 %v7282_v9, %v6971_v55  ;;  %3327 = vmatpush.bf16.msrb.mxu2 %v6814_v19 }
 0x279   : > { %v4044_v41 = vmax.f32 %v3916_v31, 0.0 }
 0x27a   : > { %v2654_v47 = vpop.f32.mrf.mxu2  ;;  %v2743_v4 = vpop.f32.mrf.mxu3  ;;  %3416 = vmatpush.bf16.msrb.mxu3 %v6974_v40 }
 0x27b   : > { %v2655_v7 = vadd.f32 %v2654_v47, %v2566_v18  ;;  %v2478_v21 = vpop.f32.mrf.mxu0  ;;  %v2567_v10 = vpop.f32.mrf.mxu1  ;;  %v8930_v36 = vpack.c.bf16 %v4044_v41, %v4040_v14  ;;  %v6494_v18 = vor.u32 %v7162_v13, %v6491_v11  ;;  %v7202_v14 = vld [vmem:[%s10719_s2 + $0x264] sm:$0xf]  ;;  %v6651_v41 = vld [vmem:[%s10719_s2 + $0x274] sm:$0xf0] }
 0x27c   : > { %v2568_v31 = vadd.f32 %v2567_v10, %v2478_v21  ;;  %v6654_v9 = vor.u32 %v7202_v14, %v6651_v41 }
 0x27d   : > { %10898 = vst [vmem:[#allocation19_spill] sm:$0xff] %v8930_v36  ;;  %v2744_v50 = vadd.f32 %v2743_v4, %v2655_v7  ;;  %3149 = vmatpush.bf16.msrb.mxu0 %v6494_v18 }
 0x27e   : > { %3238 = vmatpush.bf16.msrb.mxu1 %v6654_v9 }
 0x27f   : > { %v3920_v7 = vadd.f32 %v8810_v28, %v2744_v50 }
 0x282   : > { %v2656_v27 = vpop.f32.mrf.mxu2  ;;  %v2745_v59 = vpop.f32.mrf.mxu3 }
 0x283   : > { %v2657_v47 = vadd.f32 %v2656_v27, %v2568_v31  ;;  %v2481_v4 = vpop.f32.mrf.mxu0  ;;  %v2570_v19 = vpop.f32.mrf.mxu1  ;;  %v4048_v27 = vmax.f32 %v3920_v7, 0.0 }
 0x284   : > { %v2571_v55 = vadd.f32 %v2570_v19, %v2481_v4 }
 0x285   : > { %v2746_v21 = vadd.f32 %v2745_v59, %v2657_v47 }
 0x286   : > { %2520 = vmatmul.bf16.gmra.mxu0 %v8602_v17  ;;  %2609 = vmatmul.bf16.gmra.mxu1 %v8604_v15 }
 0x287   : > { %v3924_v10 = vadd.f32 %v8810_v28, %v2746_v21  ;;  %2698 = vmatmul.bf16.gmra.mxu2 %v8612_v20  ;;  %2787 = vmatmul.bf16.gmra.mxu3 %v8614_v46 }
 0x289   : > { %v4052_v40 = vmax.f32 %v3924_v10, 0.0 }
 0x28a   : > { %v2659_v31 = vpop.f32.mrf.mxu2  ;;  %v2748_v13 = vpop.f32.mrf.mxu3 }
 0x28b   : > { %v2660_v11 = vadd.f32 %v2659_v31, %v2571_v55  ;;  %v2483_v18 = vpop.f32.mrf.mxu0  ;;  %v2572_v14 = vpop.f32.mrf.mxu1  ;;  %v8950_v50 = vpack.c.bf16 %v4052_v40, %v4048_v27  ;;  %v7237_v27 = vld [vmem:[%s10719_s2 + $0x37c] sm:$0xf]  ;;  %v6791_v40 = vld [vmem:[%s10719_s2 + $0x38c] sm:$0xf0] }
 0x28c   : > { %v2573_v59 = vadd.f32 %v2572_v14, %v2483_v18 }
 0x28d   : > { %10899 = vst [vmem:[#allocation20_spill] sm:$0xff] %v8950_v50  ;;  %v2749_v41 = vadd.f32 %v2748_v13, %v2660_v11  ;;  %v6794_v11 = vor.u32 %v7237_v27, %v6791_v40 }
 0x28f   : > { %v3928_v20 = vadd.f32 %v8810_v28, %v2749_v41  ;;  %3328 = vmatpush.bf16.msrb.mxu2 %v6794_v11 }
 0x291   : > { %v4056_v7 = vmax.f32 %v3928_v20, 0.0  ;;  %v6951_v20 = vld [vmem:[%s10719_s2 + $0x4cc] sm:$0xf0] }
 0x292   : > { %v2661_v47 = vpop.f32.mrf.mxu2  ;;  %v2750_v4 = vpop.f32.mrf.mxu3 }
 0x293   : > { %v2662_v19 = vadd.f32 %v2661_v47, %v2573_v59  ;;  %v2486_v9 = vpop.f32.mrf.mxu0  ;;  %v2575_v21 = vpop.f32.mrf.mxu1 }
 0x294   : > { %v2576_v36 = vadd.f32 %v2575_v21, %v2486_v9  ;;  %v7157_v9 = vld [vmem:[%s10719_s2 + $0xfc] sm:$0xf]  ;;  %v6471_v21 = vld [vmem:[%s10719_s2 + $0x10c] sm:$0xf0] }
 0x295   : > { %v2751_v46 = vadd.f32 %v2750_v4, %v2662_v19 }
 0x296   : > { %2801 = vmatmul.bf16.vlgmr.msra.gmra.mxu0 %v8035_v32  ;;  %2890 = vmatmul.bf16.vlgmr.msra.gmra.mxu1 %v8037_v33 }
 0x297   : > { %v3932_v55 = vadd.f32 %v8810_v28, %v2751_v46  ;;  %2979 = vmatmul.bf16.vlgmr.msra.gmra.mxu2 %v8039_v34  ;;  %3068 = vmatmul.bf16.vlgmr.msra.gmra.mxu3 %v8041_v35  ;;  %v7277_v46 = vld [vmem:[%s10719_s2 + $0x4bc] sm:$0xf] }
 0x298   : > { %v6954_v41 = vor.u32 %v7277_v46, %v6951_v20 }
 0x299   : > { %v4060_v10 = vmax.f32 %v3932_v55, 0.0 }
 0x29a   : > { %v2664_v31 = vpop.f32.mrf.mxu2  ;;  %v2753_v13 = vpop.f32.mrf.mxu3  ;;  %3417 = vmatpush.bf16.msrb.mxu3 %v6954_v41 }
 0x29b   : > { %v2665_v18 = vadd.f32 %v2664_v31, %v2576_v36  ;;  %v2488_v14 = vpop.f32.mrf.mxu0  ;;  %v2577_v59 = vpop.f32.mrf.mxu1  ;;  %v8970_v47 = vpack.c.bf16 %v4060_v10, %v4056_v7  ;;  %v6474_v36 = vor.u32 %v7157_v9, %v6471_v21  ;;  %v7197_v7 = vld [vmem:[%s10719_s2 + $0x23c] sm:$0xf]  ;;  %v6631_v10 = vld [vmem:[%s10719_s2 + $0x24c] sm:$0xf0] }
 0x29c   : > { %v2578_v4 = vadd.f32 %v2577_v59, %v2488_v14  ;;  %v6634_v11 = vor.u32 %v7197_v7, %v6631_v10 }
 0x29d   : > { %10900 = vst [vmem:[#allocation29_spill] sm:$0xff] %v8970_v47  ;;  %v2754_v19 = vadd.f32 %v2753_v13, %v2665_v18  ;;  %3150 = vmatpush.bf16.msrb.mxu0 %v6474_v36 }
 0x29e   : > { %3239 = vmatpush.bf16.msrb.mxu1 %v6634_v11 }
 0x29f   : > { %v3936_v20 = vadd.f32 %v8810_v28, %v2754_v19 }
 0x2a1   : > { %v4064_v59 = vmax.f32 %v3936_v20, 0.0 }
 0x2a2   : > { %v2666_v55 = vpop.f32.mrf.mxu2  ;;  %v2755_v27 = vpop.f32.mrf.mxu3 }
 0x2a3   : > { %v2667_v40 = vadd.f32 %v2666_v55, %v2578_v4  ;;  %v2491_v31 = vpop.f32.mrf.mxu0  ;;  %v2580_v13 = vpop.f32.mrf.mxu1 }
 0x2a4   : > { %v2581_v46 = vadd.f32 %v2580_v13, %v2491_v31 }
 0x2a5   : > { %v2756_v18 = vadd.f32 %v2755_v27, %v2667_v40 }
 0x2a6   : > { %2806 = vmatmul.bf16.gmra.mxu0 %v8088_v22  ;;  %2895 = vmatmul.bf16.gmra.mxu1 %v8090_v23 }
 0x2a7   : > { %v3940_v14 = vadd.f32 %v8810_v28, %v2756_v18  ;;  %2984 = vmatmul.bf16.gmra.mxu2 %v8093_v25  ;;  %3073 = vmatmul.bf16.gmra.mxu3 %v8095_v26 }
 0x2a9   : > { %v4068_v41 = vmax.f32 %v3940_v14, 0.0 }
 0x2aa   : > { %v2669_v4 = vpop.f32.mrf.mxu2  ;;  %v2758_v9 = vpop.f32.mrf.mxu3 }
 0x2ab   : > { %v2670_v21 = vadd.f32 %v2669_v4, %v2581_v46  ;;  %v2493_v55 = vpop.f32.mrf.mxu0  ;;  %v2582_v36 = vpop.f32.mrf.mxu1  ;;  %v8990_v19 = vpack.c.bf16 %v4068_v41, %v4064_v59  ;;  %v7232_v59 = vld [vmem:[%s10719_s2 + $0x354] sm:$0xf]  ;;  %v6771_v41 = vld [vmem:[%s10719_s2 + $0x364] sm:$0xf0] }
 0x2ac   : > { %v2583_v27 = vadd.f32 %v2582_v36, %v2493_v55 }
 0x2ad   : > { %10901 = vst [vmem:[#allocation30_spill] sm:$0xff] %v8990_v19  ;;  %v2759_v7 = vadd.f32 %v2758_v9, %v2670_v21  ;;  %v6774_v21 = vor.u32 %v7232_v59, %v6771_v41 }
 0x2af   : > { %v3944_v47 = vadd.f32 %v8810_v28, %v2759_v7  ;;  %3329 = vmatpush.bf16.msrb.mxu2 %v6774_v21 }
 0x2b1   : > { %v4072_v20 = vmax.f32 %v3944_v47, 0.0  ;;  %v6931_v47 = vld [vmem:[%s10719_s2 + $0x4a4] sm:$0xf0] }
 0x2b2   : > { %v2671_v10 = vpop.f32.mrf.mxu2  ;;  %v2760_v40 = vpop.f32.mrf.mxu3 }
 0x2b3   : > { %v2672_v31 = vadd.f32 %v2671_v10, %v2583_v27  ;;  %v2496_v13 = vpop.f32.mrf.mxu0  ;;  %v2585_v11 = vpop.f32.mrf.mxu1 }
 0x2b4   : > { %v2586_v18 = vadd.f32 %v2585_v11, %v2496_v13  ;;  %v7152_v13 = vld [vmem:[%s10719_s2 + $0xd4] sm:$0xf]  ;;  %v6451_v11 = vld [vmem:[%s10719_s2 + $0xe4] sm:$0xf0] }
 0x2b5   : > { %v2761_v50 = vadd.f32 %v2760_v40, %v2672_v31 }
 0x2b6   : > { %2811 = vmatmul.bf16.gmra.mxu0 %v8117_v61  ;;  %2900 = vmatmul.bf16.gmra.mxu1 %v8119_v63 }
 0x2b7   : > { %v3948_v46 = vadd.f32 %v8810_v28, %v2761_v50  ;;  %2989 = vmatmul.bf16.gmra.mxu2 %v8121_v2  ;;  %3078 = vmatmul.bf16.gmra.mxu3 %v8123_v3  ;;  %v7272_v50 = vld [vmem:[%s10719_s2 + $0x494] sm:$0xf] }
 0x2b8   : > { %v6934_v7 = vor.u32 %v7272_v50, %v6931_v47 }
 0x2b9   : > { %v4076_v14 = vmax.f32 %v3948_v46, 0.0 }
 0x2ba   : > { %v2674_v4 = vpop.f32.mrf.mxu2  ;;  %v2763_v9 = vpop.f32.mrf.mxu3  ;;  %3418 = vmatpush.bf16.msrb.mxu3 %v6934_v7 }
 0x2bb   : > { %v2675_v55 = vadd.f32 %v2674_v4, %v2586_v18  ;;  %v2498_v36 = vpop.f32.mrf.mxu0  ;;  %v2587_v27 = vpop.f32.mrf.mxu1  ;;  %v9010_v10 = vpack.c.bf16 %v4076_v14, %v4072_v20  ;;  %v6454_v18 = vor.u32 %v7152_v13, %v6451_v11  ;;  %v7192_v20 = vld [vmem:[%s10719_s2 + $0x214] sm:$0xf]  ;;  %v6611_v14 = vld [vmem:[%s10719_s2 + $0x224] sm:$0xf0] }
 0x2bc   : > { %v2588_v40 = vadd.f32 %v2587_v27, %v2498_v36  ;;  %v6614_v21 = vor.u32 %v7192_v20, %v6611_v14 }
 0x2bd   : > { %10902 = vst [vmem:[#allocation39_spill] sm:$0xff] %v9010_v10  ;;  %v2764_v31 = vadd.f32 %v2763_v9, %v2675_v55  ;;  %3151 = vmatpush.bf16.msrb.mxu0 %v6454_v18 }
 0x2be   : > { %3240 = vmatpush.bf16.msrb.mxu1 %v6614_v21 }
 0x2bf   : > { %v3952_v47 = vadd.f32 %v8810_v28, %v2764_v31 }
 0x2c1   : > { %v4080_v27 = vmax.f32 %v3952_v47, 0.0 }
 0x2c2   : > { %v2676_v46 = vpop.f32.mrf.mxu2  ;;  %v2765_v59 = vpop.f32.mrf.mxu3 }
 0x2c3   : > { %v2677_v41 = vadd.f32 %v2676_v46, %v2588_v40  ;;  %v2501_v4 = vpop.f32.mrf.mxu0  ;;  %v2590_v9 = vpop.f32.mrf.mxu1 }
 0x2c4   : > { %v2591_v50 = vadd.f32 %v2590_v9, %v2501_v4 }
 0x2c5   : > { %v2766_v55 = vadd.f32 %v2765_v59, %v2677_v41 }
 0x2c6   : > { %2816 = vmatmul.bf16.gmra.mxu0 %v8170_v57  ;;  %2905 = vmatmul.bf16.gmra.mxu1 %v8172_v58 }
 0x2c7   : > { %v3956_v36 = vadd.f32 %v8810_v28, %v2766_v55  ;;  %2994 = vmatmul.bf16.gmra.mxu2 %v8174_v60  ;;  %3083 = vmatmul.bf16.gmra.mxu3 %v8176_v5 }
 0x2c9   : > { %v4084_v7 = vmax.f32 %v3956_v36, 0.0 }
 0x2ca   : > { %v2679_v40 = vpop.f32.mrf.mxu2  ;;  %v2768_v13 = vpop.f32.mrf.mxu3 }
 0x2cb   : > { %v2680_v11 = vadd.f32 %v2679_v40, %v2591_v50  ;;  %v2503_v46 = vpop.f32.mrf.mxu0  ;;  %v2592_v18 = vpop.f32.mrf.mxu1  ;;  %v9030_v31 = vpack.c.bf16 %v4084_v7, %v4080_v27  ;;  %v7227_v27 = vld [vmem:[%s10719_s2 + $0x32c] sm:$0xf]  ;;  %v6751_v7 = vld [vmem:[%s10719_s2 + $0x33c] sm:$0xf0] }
 0x2cc   : > { %v2593_v59 = vadd.f32 %v2592_v18, %v2503_v46 }
 0x2cd   : > { %10903 = vst [vmem:[#allocation40_spill] sm:$0xff] %v9030_v31  ;;  %v2769_v20 = vadd.f32 %v2768_v13, %v2680_v11  ;;  %v6754_v11 = vor.u32 %v7227_v27, %v6751_v7 }
 0x2cf   : > { %v3960_v10 = vadd.f32 %v8810_v28, %v2769_v20  ;;  %3330 = vmatpush.bf16.msrb.mxu2 %v6754_v11 }
 0x2d1   : > { %v4088_v47 = vmax.f32 %v3960_v10, 0.0  ;;  %v6911_v10 = vld [vmem:[%s10719_s2 + $0x47c] sm:$0xf0] }
 0x2d2   : > { %v2681_v14 = vpop.f32.mrf.mxu2  ;;  %v2770_v41 = vpop.f32.mrf.mxu3 }
 0x2d3   : > { %v2682_v4 = vadd.f32 %v2681_v14, %v2593_v59  ;;  %v2506_v9 = vpop.f32.mrf.mxu0  ;;  %v2595_v21 = vpop.f32.mrf.mxu1 }
 0x2d4   : > { %v2596_v55 = vadd.f32 %v2595_v21, %v2506_v9  ;;  %v7147_v9 = vld [vmem:[%s10719_s2 + $0xac] sm:$0xf]  ;;  %v6431_v21 = vld [vmem:[%s10719_s2 + $0xbc] sm:$0xf0] }
 0x2d5   : > { %v2771_v19 = vadd.f32 %v2770_v41, %v2682_v4 }
 0x2d6   : > { %2821 = vmatmul.bf16.gmra.mxu0 %v8199_v42  ;;  %2910 = vmatmul.bf16.gmra.mxu1 %v8201_v43 }
 0x2d7   : > { %v3964_v50 = vadd.f32 %v8810_v28, %v2771_v19  ;;  %2999 = vmatmul.bf16.gmra.mxu2 %v8203_v44  ;;  %3088 = vmatmul.bf16.gmra.mxu3 %v8205_v45  ;;  %v7267_v19 = vld [vmem:[%s10719_s2 + $0x46c] sm:$0xf] }
 0x2d8   : > { %v6914_v20 = vor.u32 %v7267_v19, %v6911_v10 }
 0x2d9   : > { %v4092_v36 = vmax.f32 %v3964_v50, 0.0 }
 0x2da   : > { %v2684_v40 = vpop.f32.mrf.mxu2  ;;  %v2773_v13 = vpop.f32.mrf.mxu3  ;;  %3419 = vmatpush.bf16.msrb.mxu3 %v6914_v20 }
 0x2db   : > { %v2685_v46 = vadd.f32 %v2684_v40, %v2596_v55  ;;  %v2508_v18 = vpop.f32.mrf.mxu0  ;;  %v2597_v59 = vpop.f32.mrf.mxu1  ;;  %v9050_v14 = vpack.c.bf16 %v4092_v36, %v4088_v47  ;;  %v6434_v55 = vor.u32 %v7147_v9, %v6431_v21  ;;  %v7187_v47 = vld [vmem:[%s10719_s2 + $0x1ec] sm:$0xf]  ;;  %v6591_v36 = vld [vmem:[%s10719_s2 + $0x1fc] sm:$0xf0] }
 0x2dc   : > { %v2598_v41 = vadd.f32 %v2597_v59, %v2508_v18  ;;  %v6594_v11 = vor.u32 %v7187_v47, %v6591_v36 }
 0x2dd   : > { %10904 = vst [vmem:[#allocation55_spill] sm:$0xff] %v9050_v14  ;;  %v2774_v4 = vadd.f32 %v2773_v13, %v2685_v46  ;;  %3152 = vmatpush.bf16.msrb.mxu0 %v6434_v55 }
 0x2de   : > { %3241 = vmatpush.bf16.msrb.mxu1 %v6594_v11 }
 0x2df   : > { %v3968_v10 = vadd.f32 %v8810_v28, %v2774_v4 }
 0x2e1   : > { %v4096_v59 = vmax.f32 %v3968_v10, 0.0 }
 0x2e2   : > { %v2686_v50 = vpop.f32.mrf.mxu2  ;;  %v2775_v27 = vpop.f32.mrf.mxu3 }
 0x2e3   : > { %v2687_v7 = vadd.f32 %v2686_v50, %v2598_v41  ;;  %v2511_v40 = vpop.f32.mrf.mxu0  ;;  %v2600_v13 = vpop.f32.mrf.mxu1 }
 0x2e4   : > { %v2601_v19 = vadd.f32 %v2600_v13, %v2511_v40 }
 0x2e5   : > { %v2776_v46 = vadd.f32 %v2775_v27, %v2687_v7 }
 0x2e6   : > { %2826 = vmatmul.bf16.gmra.mxu0 %v8252_v53  ;;  %2915 = vmatmul.bf16.gmra.mxu1 %v8254_v51 }
 0x2e7   : > { %v3972_v18 = vadd.f32 %v8810_v28, %v2776_v46  ;;  %3004 = vmatmul.bf16.gmra.mxu2 %v8256_v56  ;;  %3093 = vmatmul.bf16.gmra.mxu3 %v8258_v6 }
 0x2e9   : > { %v4100_v20 = vmax.f32 %v3972_v18, 0.0 }
 0x2ea   : > { %v2689_v41 = vpop.f32.mrf.mxu2  ;;  %v2778_v9 = vpop.f32.mrf.mxu3 }
 0x2eb   : > { %v2690_v21 = vadd.f32 %v2689_v41, %v2601_v19  ;;  %v2513_v50 = vpop.f32.mrf.mxu0  ;;  %v2602_v55 = vpop.f32.mrf.mxu1  ;;  %v9070_v4 = vpack.c.bf16 %v4100_v20, %v4096_v59  ;;  %v7222_v59 = vld [vmem:[%s10719_s2 + $0x304] sm:$0xf]  ;;  %v6731_v20 = vld [vmem:[%s10719_s2 + $0x314] sm:$0xf0] }
 0x2ec   : > { %v2603_v27 = vadd.f32 %v2602_v55, %v2513_v50 }
 0x2ed   : > { %10905 = vst [vmem:[#allocation56_spill] sm:$0xff] %v9070_v4  ;;  %v2779_v47 = vadd.f32 %v2778_v9, %v2690_v21  ;;  %v6734_v21 = vor.u32 %v7222_v59, %v6731_v20 }
 0x2ef   : > { %v3976_v14 = vadd.f32 %v8810_v28, %v2779_v47  ;;  %3331 = vmatpush.bf16.msrb.mxu2 %v6734_v21 }
 0x2f1   : > { %v4104_v10 = vmax.f32 %v3976_v14, 0.0  ;;  %v6891_v14 = vld [vmem:[%s10719_s2 + $0x454] sm:$0xf0] }
 0x2f2   : > { %v2691_v36 = vpop.f32.mrf.mxu2  ;;  %v2780_v7 = vpop.f32.mrf.mxu3 }
 0x2f3   : > { %v2692_v40 = vadd.f32 %v2691_v36, %v2603_v27  ;;  %v2516_v13 = vpop.f32.mrf.mxu0  ;;  %v2605_v11 = vpop.f32.mrf.mxu1 }
 0x2f4   : > { %v2606_v46 = vadd.f32 %v2605_v11, %v2516_v13  ;;  %v7142_v13 = vld [vmem:[%s10719_s2 + $0x84] sm:$0xf]  ;;  %v6411_v11 = vld [vmem:[%s10719_s2 + $0x94] sm:$0xf0] }
 0x2f5   : > { %v2781_v31 = vadd.f32 %v2780_v7, %v2692_v40 }
 0x2f6   : > { %2831 = vmatmul.bf16.gmra.mxu0 %v10858_v49  ;;  %2920 = vmatmul.bf16.gmra.mxu1 %v10859_v62 }
 0x2f7   : > { %v3980_v19 = vadd.f32 %v8810_v28, %v2781_v31  ;;  %3009 = vmatmul.bf16.gmra.mxu2 %v10860_v52  ;;  %3098 = vmatmul.bf16.gmra.mxu3 %v10861_v16  ;;  %v7262_v31 = vld [vmem:[%s10719_s2 + $0x444] sm:$0xf] }
 0x2f8   : > { %v6894_v47 = vor.u32 %v7262_v31, %v6891_v14 }
 0x2f9   : > { %v4108_v18 = vmax.f32 %v3980_v19, 0.0 }
 0x2fa   : > { %v2694_v41 = vpop.f32.mrf.mxu2  ;;  %v2783_v9 = vpop.f32.mrf.mxu3  ;;  %3420 = vmatpush.bf16.msrb.mxu3 %v6894_v47 }
 0x2fb   : > { %v2695_v50 = vadd.f32 %v2694_v41, %v2606_v46  ;;  %v2518_v55 = vpop.f32.mrf.mxu0  ;;  %v2607_v27 = vpop.f32.mrf.mxu1  ;;  %v9090_v36 = vpack.c.bf16 %v4108_v18, %v4104_v10  ;;  %v6414_v46 = vor.u32 %v7142_v13, %v6411_v11  ;;  %v7182_v10 = vld [vmem:[%s10719_s2 + $0x1c4] sm:$0xf]  ;;  %v6571_v18 = vld [vmem:[%s10719_s2 + $0x1d4] sm:$0xf0] }
 0x2fc   : > { %v2608_v7 = vadd.f32 %v2607_v27, %v2518_v55  ;;  %v6574_v21 = vor.u32 %v7182_v10, %v6571_v18 }
 0x2fd   : > { %10906 = vst [vmem:[#allocation57_spill] sm:$0xff] %v9090_v36  ;;  %v2784_v40 = vadd.f32 %v2783_v9, %v2695_v50  ;;  %3153 = vmatpush.bf16.msrb.mxu0 %v6414_v46 }
 0x2fe   : > { %3242 = vmatpush.bf16.msrb.mxu1 %v6574_v21 }
 0x2ff   : > { %v3984_v14 = vadd.f32 %v8810_v28, %v2784_v40 }
 0x301   : > { %v4112_v27 = vmax.f32 %v3984_v14, 0.0  ;;  %v10908_v14 = vld [vmem:[#allocation11_spill] sm:$0xff] }
 0x302   : > { %v2696_v19 = vpop.f32.mrf.mxu2  ;;  %v2785_v59 = vpop.f32.mrf.mxu3 }
 0x303   : > { %v2697_v20 = vadd.f32 %v2696_v19, %v2608_v7  ;;  %v2521_v41 = vpop.f32.mrf.mxu0  ;;  %v2610_v9 = vpop.f32.mrf.mxu1 }
 0x304   : > { %v2611_v31 = vadd.f32 %v2610_v9, %v2521_v41 }
 0x305   : > { %v2786_v50 = vadd.f32 %v2785_v59, %v2697_v20 }
 0x306   : > { %2836 = vmatmul.bf16.gmra.mxu0 %v10863_v54  ;;  %2925 = vmatmul.bf16.gmra.mxu1 %v10864_v30 }
 0x307   : > { %v3988_v55 = vadd.f32 %v8810_v28, %v2786_v50  ;;  %3014 = vmatmul.bf16.gmra.mxu2 %v10865_v0  ;;  %3103 = vmatmul.bf16.gmra.mxu3 %v10866_v39 }
 0x309   : > { %v4116_v47 = vmax.f32 %v3988_v55, 0.0  ;;  %v10909_v55 = vld [vmem:[#allocation12_spill] sm:$0xff] }
 0x30a   : > { %v2699_v7 = vpop.f32.mrf.mxu2  ;;  %v2788_v13 = vpop.f32.mrf.mxu3 }
 0x30b   : > { %v2700_v11 = vadd.f32 %v2699_v7, %v2611_v31  ;;  %v2523_v19 = vpop.f32.mrf.mxu0  ;;  %v2612_v46 = vpop.f32.mrf.mxu1  ;;  %v9110_v40 = vpack.c.bf16 %v4116_v47, %v4112_v27  ;;  %v10910_v27 = vld [vmem:[#allocation13_spill] sm:$0xff] }
 0x30c   : > { %v2613_v59 = vadd.f32 %v2612_v46, %v2523_v19 }
 0x30d   : > { %10907 = vst [vmem:[#allocation58_spill] sm:$0xff] %v9110_v40  ;;  %v2789_v10 = vadd.f32 %v2788_v13, %v2700_v11  ;;  %v7217_v13 = vld [vmem:[%s10719_s2 + $0x2dc] sm:$0xf]  ;;  %v6711_v11 = vld [vmem:[%s10719_s2 + $0x2ec] sm:$0xf0] }
 0x30f   : > { %v3992_v36 = vadd.f32 %v8810_v28, %v2789_v10 }
 0x311   : > { %v4120_v47 = vmax.f32 %v3992_v36, 0.0 }
 0x312   : > { %v2701_v18 = vpop.f32.mrf.mxu2  ;;  %v2790_v20 = vpop.f32.mrf.mxu3 }
 0x313   : > { %v2702_v41 = vadd.f32 %v2701_v18, %v2613_v59  ;;  %v2802_v9 = vpop.f32.mrf.mxu0  ;;  %v2891_v21 = vpop.f32.mrf.mxu1  ;;  %v6714_v59 = vor.u32 %v7217_v13, %v6711_v11  ;;  %v7137_v11 = vld [vmem:[%s10719_s2 + $0x5c] sm:$0xf] }
 0x314   : > { %v2892_v50 = vadd.f32 %v2891_v21, %v2802_v9 }
 0x315   : > { %v2791_v4 = vadd.f32 %v2790_v20, %v2702_v41  ;;  %3332 = vmatpush.bf16.msrb.mxu2 %v6714_v59 }
 0x316   : > { %2841 = vmatmul.bf16.gmra.mxu0 %v10868_v1  ;;  %2930 = vmatmul.bf16.gmra.mxu1 %v10908_v14 }
 0x317   : > { %v3996_v31 = vadd.f32 %v8810_v28, %v2791_v4  ;;  %3019 = vmatmul.bf16.gmra.mxu2 %v10909_v55  ;;  %3108 = vmatmul.bf16.gmra.mxu3 %v10910_v27  ;;  %v7257_v28 = vld [vmem:[%s10719_s2 + $0x41c] sm:$0xf]  ;;  %v6871_v4 = vld [vmem:[%s10719_s2 + $0x42c] sm:$0xf0] }
 0x318   : > { %v6874_v20 = vor.u32 %v7257_v28, %v6871_v4  ;;  %v10916_v27 = vld [vmem:[#allocation17_spill] sm:$0xff] }
 0x319   : > { %v4124_v7 = vmax.f32 %v3996_v31, 0.0  ;;  %v10912_v31 = vld [vmem:[#allocation5_spill] sm:$0xff] }
 0x31a   : > { %v2980_v19 = vpop.f32.mrf.mxu2  ;;  %v3069_v46 = vpop.f32.mrf.mxu3  ;;  %3421 = vmatpush.bf16.msrb.mxu3 %v6874_v20  ;;  %v9133_v13 = vperm.slane %v10912_v31, 2  ;;  %v10913_v31 = vld [vmem:[#allocation14_spill] sm:$0xff] }
 0x31b   : > { %v2981_v36 = vadd.f32 %v2980_v19, %v2892_v50  ;;  %v2804_v10 = vpop.f32.mrf.mxu0  ;;  %v2893_v18 = vpop.f32.mrf.mxu1  ;;  %v9130_v41 = vpack.c.bf16 %v4124_v7, %v4120_v47  ;;  %v6391_v50 = vld [vmem:[%s10719_s2 + $0x6c] sm:$0xf0]  ;;  %v7177_v47 = vld [vmem:[%s10719_s2 + $0x19c] sm:$0xf] }
 0x31c   : > { %v2894_v9 = vadd.f32 %v2893_v18, %v2804_v10  ;;  %v6394_v28 = vor.u32 %v7137_v11, %v6391_v50  ;;  %v6551_v7 = vld [vmem:[%s10719_s2 + $0x1ac] sm:$0xf0]  ;;  %v10914_v11 = vld [vmem:[#allocation15_spill] sm:$0xff] }
 0x31d   : > { %10911 = vst [vmem:[#allocation59_spill] sm:$0xff] %v9130_v41  ;;  %v3070_v21 = vadd.f32 %v3069_v46, %v2981_v36  ;;  %v6554_v36 = vor.u32 %v7177_v47, %v6551_v7  ;;  %v10915_v41 = vld [vmem:[#allocation16_spill] sm:$0xff] }
 0x31e   : > { %3154 = vmatpush.bf16.msrb.mxu0 %v6394_v28 }
 0x31f   : > { %v3873_v18 = vadd.f32 %v9133_v13, %v3070_v21  ;;  %3243 = vmatpush.bf16.msrb.mxu1 %v6554_v36 }
 0x322   : > { %v2982_v19 = vpop.f32.mrf.mxu2  ;;  %v3071_v40 = vpop.f32.mrf.mxu3 }
 0x323   : > { %v2983_v46 = vadd.f32 %v2982_v19, %v2894_v9  ;;  %v2807_v59 = vpop.f32.mrf.mxu0  ;;  %v2896_v4 = vpop.f32.mrf.mxu1  ;;  %v4001_v9 = vmax.f32 %v3873_v18, 0.0 }
 0x324   : > { %v2897_v10 = vadd.f32 %v2896_v4, %v2807_v59 }
 0x325   : > { %v3072_v20 = vadd.f32 %v3071_v40, %v2983_v46 }
 0x326   : > { %2846 = vmatmul.bf16.gmra.mxu0 %v10913_v31  ;;  %2935 = vmatmul.bf16.gmra.mxu1 %v10914_v11 }
 0x327   : > { %v3877_v50 = vadd.f32 %v9133_v13, %v3072_v20  ;;  %3024 = vmatmul.bf16.gmra.mxu2 %v10915_v41  ;;  %3113 = vmatmul.bf16.gmra.mxu3 %v10916_v27 }
 0x329   : > { %v4005_v19 = vmax.f32 %v3877_v50, 0.0 }
 0x32a   : > { %v2985_v55 = vpop.f32.mrf.mxu2  ;;  %v3074_v47 = vpop.f32.mrf.mxu3 }
 0x32b   : > { %v9153_v7 = vpack.c.bf16 %v4005_v19, %v4001_v9  ;;  %v2986_v28 = vadd.f32 %v2985_v55, %v2897_v10  ;;  %v2809_v21 = vpop.f32.mrf.mxu0  ;;  %v2898_v40 = vpop.f32.mrf.mxu1  ;;  %v10918_v55 = vld [vmem:[#allocation21_spill] sm:$0xff]  ;;  %v10919_v10 = vld [vmem:[#allocation22_spill] sm:$0xff]  ;;  %v7212_v19 = vld [vmem:[%s10719_s2 + $0x2b4] sm:$0xf] }
 0x32c   : > { %v2899_v46 = vadd.f32 %v2898_v40, %v2809_v21 }
 0x32d   : > { %10917 = vst [vmem:[#allocation5_spill] sm:$0xff] %v9153_v7  ;;  %v3075_v59 = vadd.f32 %v3074_v47, %v2986_v28 }
 0x32f   : > { %v3881_v41 = vadd.f32 %v9133_v13, %v3075_v59 }
 0x331   : > { %v4009_v50 = vmax.f32 %v3881_v41, 0.0  ;;  %v6851_v41 = vld [vmem:[%s10719_s2 + $0x404] sm:$0xf0] }
 0x332   : > { %v2987_v4 = vpop.f32.mrf.mxu2  ;;  %v3076_v36 = vpop.f32.mrf.mxu3 }
 0x333   : > { %v2988_v11 = vadd.f32 %v2987_v4, %v2899_v46  ;;  %v2812_v31 = vpop.f32.mrf.mxu0  ;;  %v2901_v20 = vpop.f32.mrf.mxu1 }
 0x334   : > { %v2902_v14 = vadd.f32 %v2901_v20, %v2812_v31  ;;  %v6691_v31 = vld [vmem:[%s10719_s2 + $0x2c4] sm:$0xf0] }
 0x335   : > { %v3077_v27 = vadd.f32 %v3076_v36, %v2988_v11  ;;  %v6694_v28 = vor.u32 %v7212_v19, %v6691_v31  ;;  %v6371_v19 = vld [vmem:[%s10719_s2 + $0x44] sm:$0xf0] }
 0x336   : > { %2851 = vmatmul.bf16.gmra.mxu0 %v10879_v29  ;;  %2940 = vmatmul.bf16.gmra.mxu1 %v10880_v12 }
 0x337   : > { %v3885_v18 = vadd.f32 %v9133_v13, %v3077_v27  ;;  %3029 = vmatmul.bf16.gmra.mxu2 %v10918_v55  ;;  %3118 = vmatmul.bf16.gmra.mxu3 %v10919_v10  ;;  %v7252_v27 = vld [vmem:[%s10719_s2 + $0x3f4] sm:$0xf] }
 0x338   : > { %v6854_v59 = vor.u32 %v7252_v27, %v6851_v41  ;;  %3333 = vmatpush.bf16.msrb.mxu2 %v6694_v28 }
 0x339   : > { %v4013_v9 = vmax.f32 %v3885_v18, 0.0  ;;  %v7132_v18 = vld [vmem:[%s10719_s2 + $0x34] sm:$0xf] }
 0x33a   : > { %v2990_v11 = vpop.f32.mrf.mxu2  ;;  %v3079_v47 = vpop.f32.mrf.mxu3  ;;  %3422 = vmatpush.bf16.msrb.mxu3 %v6854_v59  ;;  %v10922_v59 = vld [vmem:[#allocation25_spill] sm:$0xff] }
 0x33b   : > { %v2991_v21 = vadd.f32 %v2990_v11, %v2902_v14  ;;  %v2814_v40 = vpop.f32.mrf.mxu0  ;;  %v2903_v46 = vpop.f32.mrf.mxu1  ;;  %v9173_v4 = vpack.c.bf16 %v4013_v9, %v4009_v50  ;;  %v6374_v14 = vor.u32 %v7132_v18, %v6371_v19  ;;  %v7172_v50 = vld [vmem:[%s10719_s2 + $0x174] sm:$0xf]  ;;  %v6531_v9 = vld [vmem:[%s10719_s2 + $0x184] sm:$0xf0]  ;;  %v10923_v19 = vld [vmem:[#allocation26_spill] sm:$0xff] }
 0x33c   : > { %v2904_v36 = vadd.f32 %v2903_v46, %v2814_v40  ;;  %v6534_v27 = vor.u32 %v7172_v50, %v6531_v9  ;;  %v10921_v46 = vld [vmem:[#allocation24_spill] sm:$0xff] }
 0x33d   : > { %10920 = vst [vmem:[#allocation60_spill] sm:$0xff] %v9173_v4  ;;  %v3080_v20 = vadd.f32 %v3079_v47, %v2991_v21  ;;  %3155 = vmatpush.bf16.msrb.mxu0 %v6374_v14  ;;  %v10924_v4 = vld [vmem:[#allocation27_spill] sm:$0xff] }
 0x33e   : > { %3244 = vmatpush.bf16.msrb.mxu1 %v6534_v27 }
 0x33f   : > { %v3889_v21 = vadd.f32 %v9133_v13, %v3080_v20 }
 0x342   : > { %v2992_v31 = vpop.f32.mrf.mxu2  ;;  %v3081_v7 = vpop.f32.mrf.mxu3 }
 0x343   : > { %v2993_v11 = vadd.f32 %v2992_v31, %v2904_v36  ;;  %v2817_v47 = vpop.f32.mrf.mxu0  ;;  %v2906_v28 = vpop.f32.mrf.mxu1  ;;  %v4017_v36 = vmax.f32 %v3889_v21, 0.0  ;;  %v10927_v21 = vld [vmem:[#allocation32_spill] sm:$0xff] }
 0x344   : > { %v2907_v41 = vadd.f32 %v2906_v28, %v2817_v47 }
 0x345   : > { %v3082_v40 = vadd.f32 %v3081_v7, %v2993_v11 }
 0x346   : > { %2856 = vmatmul.bf16.gmra.mxu0 %v10921_v46  ;;  %2945 = vmatmul.bf16.gmra.mxu1 %v10922_v59 }
 0x347   : > { %v3893_v18 = vadd.f32 %v9133_v13, %v3082_v40  ;;  %3034 = vmatmul.bf16.gmra.mxu2 %v10923_v19  ;;  %3123 = vmatmul.bf16.gmra.mxu3 %v10924_v4 }
 0x349   : > { %v4021_v31 = vmax.f32 %v3893_v18, 0.0 }
 0x34a   : > { %v2995_v10 = vpop.f32.mrf.mxu2  ;;  %v3084_v50 = vpop.f32.mrf.mxu3 }
 0x34b   : > { %v2996_v9 = vadd.f32 %v2995_v10, %v2907_v41  ;;  %v2819_v14 = vpop.f32.mrf.mxu0  ;;  %v2908_v47 = vpop.f32.mrf.mxu1  ;;  %v9193_v20 = vpack.c.bf16 %v4021_v31, %v4017_v36  ;;  %v10926_v41 = vld [vmem:[#allocation31_spill] sm:$0xff] }
 0x34c   : > { %v2909_v7 = vadd.f32 %v2908_v47, %v2819_v14  ;;  %v7207_v31 = vld [vmem:[%s10719_s2 + $0x28c] sm:$0xf] }
 0x34d   : > { %10925 = vst [vmem:[#allocation61_spill] sm:$0xff] %v9193_v20  ;;  %v3085_v11 = vadd.f32 %v3084_v50, %v2996_v9 }
 0x34f   : > { %v3897_v19 = vadd.f32 %v9133_v13, %v3085_v11 }
 0x351   : > { %v4025_v18 = vmax.f32 %v3897_v19, 0.0  ;;  %v6831_v19 = vld [vmem:[%s10719_s2 + $0x3dc] sm:$0xf0] }
 0x352   : > { %v2997_v28 = vpop.f32.mrf.mxu2  ;;  %v3086_v27 = vpop.f32.mrf.mxu3 }
 0x353   : > { %v2998_v59 = vadd.f32 %v2997_v28, %v2909_v7  ;;  %v2822_v46 = vpop.f32.mrf.mxu0  ;;  %v2911_v40 = vpop.f32.mrf.mxu1 }
 0x354   : > { %v2912_v55 = vadd.f32 %v2911_v40, %v2822_v46  ;;  %v6671_v46 = vld [vmem:[%s10719_s2 + $0x29c] sm:$0xf0] }
 0x355   : > { %v3087_v4 = vadd.f32 %v3086_v27, %v2998_v59  ;;  %v6674_v9 = vor.u32 %v7207_v31, %v6671_v46  ;;  %v6351_v31 = vld [vmem:[%s10719_s2 + $0x1c] sm:$0xf0] }
 0x356   : > { %2861 = vmatmul.bf16.gmra.mxu0 %v10887_v24  ;;  %2950 = vmatmul.bf16.gmra.mxu1 %v10888_v8 }
 0x357   : > { %v3901_v10 = vadd.f32 %v9133_v13, %v3087_v4  ;;  %3039 = vmatmul.bf16.gmra.mxu2 %v10926_v41  ;;  %3128 = vmatmul.bf16.gmra.mxu3 %v10927_v21  ;;  %v7247_v4 = vld [vmem:[%s10719_s2 + $0x3cc] sm:$0xf] }
 0x358   : > { %v6834_v11 = vor.u32 %v7247_v4, %v6831_v19  ;;  %3334 = vmatpush.bf16.msrb.mxu2 %v6674_v9 }
 0x359   : > { %v4029_v36 = vmax.f32 %v3901_v10, 0.0  ;;  %v7127_v10 = vld [vmem:[%s10719_s2 + $0xc] sm:$0xf] }
 0x35a   : > { %v3000_v59 = vpop.f32.mrf.mxu2  ;;  %v3089_v50 = vpop.f32.mrf.mxu3  ;;  %3423 = vmatpush.bf16.msrb.mxu3 %v6834_v11 }
 0x35b   : > { %v3001_v14 = vadd.f32 %v3000_v59, %v2912_v55  ;;  %v2824_v47 = vpop.f32.mrf.mxu0  ;;  %v2913_v7 = vpop.f32.mrf.mxu1  ;;  %v9213_v28 = vpack.c.bf16 %v4029_v36, %v4025_v18  ;;  %v6354_v55 = vor.u32 %v7127_v10, %v6351_v31  ;;  %v7167_v18 = vld [vmem:[%s10719_s2 + $0x14c] sm:$0xf]  ;;  %v6511_v36 = vld [vmem:[%s10719_s2 + $0x15c] sm:$0xf0]  ;;  %v10930_v10 = vld [vmem:[#allocation36_spill] sm:$0xff] }
 0x35c   : > { %v2914_v27 = vadd.f32 %v2913_v7, %v2824_v47  ;;  %v6514_v4 = vor.u32 %v7167_v18, %v6511_v36  ;;  %v10929_v7 = vld [vmem:[#allocation35_spill] sm:$0xff]  ;;  %v10931_v31 = vld [vmem:[#allocation37_spill] sm:$0xff] }
 0x35d   : > { %10928 = vst [vmem:[#allocation31_spill] sm:$0xff] %v9213_v28  ;;  %v3090_v40 = vadd.f32 %v3089_v50, %v3001_v14  ;;  %3156 = vmatpush.bf16.msrb.mxu0 %v6354_v55 }
 0x35e   : > { %3245 = vmatpush.bf16.msrb.mxu1 %v6514_v4 }
 0x35f   : > { %v3905_v14 = vadd.f32 %v9133_v13, %v3090_v40 }
 0x362   : > { %v3002_v46 = vpop.f32.mrf.mxu2  ;;  %v3091_v20 = vpop.f32.mrf.mxu3 }
 0x363   : > { %v3003_v59 = vadd.f32 %v3002_v46, %v2914_v27  ;;  %v2827_v50 = vpop.f32.mrf.mxu0  ;;  %v2916_v9 = vpop.f32.mrf.mxu1  ;;  %v4033_v27 = vmax.f32 %v3905_v14, 0.0  ;;  %v10934_v14 = vld [vmem:[#allocation42_spill] sm:$0xff] }
 0x364   : > { %v2917_v19 = vadd.f32 %v2916_v9, %v2827_v50 }
 0x365   : > { %v3092_v47 = vadd.f32 %v3091_v20, %v3003_v59 }
 0x366   : > { %2866 = vmatmul.bf16.gmra.mxu0 %v8532_v38  ;;  %2955 = vmatmul.bf16.gmra.mxu1 %v10929_v7 }
 0x367   : > { %v3909_v11 = vadd.f32 %v9133_v13, %v3092_v47  ;;  %3044 = vmatmul.bf16.gmra.mxu2 %v10930_v10  ;;  %3133 = vmatmul.bf16.gmra.mxu3 %v10931_v31 }
 0x369   : > { %v4037_v46 = vmax.f32 %v3909_v11, 0.0 }
 0x36a   : > { %v3005_v28 = vpop.f32.mrf.mxu2  ;;  %v3094_v18 = vpop.f32.mrf.mxu3 }
 0x36b   : > { %v3006_v36 = vadd.f32 %v3005_v28, %v2917_v19  ;;  %v2829_v55 = vpop.f32.mrf.mxu0  ;;  %v2918_v50 = vpop.f32.mrf.mxu1  ;;  %v9233_v40 = vpack.c.bf16 %v4037_v46, %v4033_v27  ;;  %v10933_v19 = vld [vmem:[#allocation41_spill] sm:$0xff]  ;;  %v6817_v46 = vld [vmem:[%s10719_s2 + $0x3a8] sm:$0xf] }
 0x36c   : > { %v2919_v20 = vadd.f32 %v2918_v50, %v2829_v55 }
 0x36d   : > { %10932 = vst [vmem:[#allocation62_spill] sm:$0xff] %v9233_v40  ;;  %v3095_v59 = vadd.f32 %v3094_v18, %v3006_v36 }
 0x36f   : > { %v3913_v10 = vadd.f32 %v9133_v13, %v3095_v59 }
 0x371   : > { %v4041_v11 = vmax.f32 %v3913_v10, 0.0  ;;  %v7285_v10 = vld [vmem:[%s10719_s2 + $0x4f8] sm:$0xf0] }
 0x372   : > { %v3007_v9 = vpop.f32.mrf.mxu2  ;;  %v3096_v4 = vpop.f32.mrf.mxu3 }
 0x373   : > { %v3008_v7 = vadd.f32 %v3007_v9, %v2919_v20  ;;  %v2832_v38 = vpop.f32.mrf.mxu0  ;;  %v2921_v47 = vpop.f32.mrf.mxu1 }
 0x374   : > { %v2922_v21 = vadd.f32 %v2921_v47, %v2832_v38  ;;  %v7245_v38 = vld [vmem:[%s10719_s2 + $0x3b8] sm:$0xf0] }
 0x375   : > { %v3097_v31 = vadd.f32 %v3096_v4, %v3008_v7  ;;  %v6818_v36 = vor.u32 %v7245_v38, %v6817_v46  ;;  %v7165_v46 = vld [vmem:[%s10719_s2 + $0x138] sm:$0xf0] }
 0x376   : > { %2871 = vmatmul.bf16.gmra.mxu0 %v10894_v37  ;;  %2960 = vmatmul.bf16.gmra.mxu1 %v10895_v48 }
 0x377   : > { %v3917_v28 = vadd.f32 %v9133_v13, %v3097_v31  ;;  %3049 = vmatmul.bf16.gmra.mxu2 %v10933_v19  ;;  %3138 = vmatmul.bf16.gmra.mxu3 %v10934_v14  ;;  %v6977_v31 = vld [vmem:[%s10719_s2 + $0x4e8] sm:$0xf] }
 0x378   : > { %v6978_v59 = vor.u32 %v7285_v10, %v6977_v31  ;;  %3683 = vmatpush.bf16.msra.mxu2 %v6818_v36 }
 0x379   : > { %v4045_v27 = vmax.f32 %v3917_v28, 0.0  ;;  %v6497_v28 = vld [vmem:[%s10719_s2 + $0x128] sm:$0xf] }
 0x37a   : > { %v3010_v7 = vpop.f32.mrf.mxu2  ;;  %v3099_v18 = vpop.f32.mrf.mxu3  ;;  %3772 = vmatpush.bf16.msra.mxu3 %v6978_v59  ;;  %v10936_v59 = vld [vmem:[#allocation46_spill] sm:$0xff] }
 0x37b   : > { %v3011_v55 = vadd.f32 %v3010_v7, %v2922_v21  ;;  %v2834_v50 = vpop.f32.mrf.mxu0  ;;  %v2923_v20 = vpop.f32.mrf.mxu1  ;;  %v9253_v9 = vpack.c.bf16 %v4045_v27, %v4041_v11  ;;  %v6498_v21 = vor.u32 %v7165_v46, %v6497_v28  ;;  %v6657_v11 = vld [vmem:[%s10719_s2 + $0x268] sm:$0xf]  ;;  %v7205_v27 = vld [vmem:[%s10719_s2 + $0x278] sm:$0xf0] }
 0x37c   : > { %v2924_v4 = vadd.f32 %v2923_v20, %v2834_v50  ;;  %v6658_v31 = vor.u32 %v7205_v27, %v6657_v11  ;;  %v10937_v28 = vld [vmem:[#allocation47_spill] sm:$0xff] }
 0x37d   : > { %10935 = vst [vmem:[#allocation41_spill] sm:$0xff] %v9253_v9  ;;  %v3100_v47 = vadd.f32 %v3099_v18, %v3011_v55  ;;  %3505 = vmatpush.bf16.msra.mxu0 %v6498_v21 }
 0x37e   : > { %3594 = vmatpush.bf16.msra.mxu1 %v6658_v31 }
 0x37f   : > { %v3921_v55 = vadd.f32 %v9133_v13, %v3100_v47 }
 0x382   : > { %v3012_v38 = vpop.f32.mrf.mxu2  ;;  %v3101_v40 = vpop.f32.mrf.mxu3 }
 0x383   : > { %v3013_v7 = vadd.f32 %v3012_v38, %v2924_v4  ;;  %v2837_v18 = vpop.f32.mrf.mxu0  ;;  %v2926_v36 = vpop.f32.mrf.mxu1  ;;  %v4049_v4 = vmax.f32 %v3921_v55, 0.0 }
 0x384   : > { %v2927_v10 = vadd.f32 %v2926_v36, %v2837_v18 }
 0x385   : > { %v3102_v50 = vadd.f32 %v3101_v40, %v3013_v7 }
 0x386   : > { %2876 = vmatmul.bf16.gmra.mxu0 %v8602_v17  ;;  %2965 = vmatmul.bf16.gmra.mxu1 %v8604_v15 }
 0x387   : > { %v3925_v20 = vadd.f32 %v9133_v13, %v3102_v50  ;;  %3054 = vmatmul.bf16.gmra.mxu2 %v10936_v59  ;;  %3143 = vmatmul.bf16.gmra.mxu3 %v10937_v28 }
 0x389   : > { %v4053_v46 = vmax.f32 %v3925_v20, 0.0 }
 0x38a   : > { %v3015_v38 = vpop.f32.mrf.mxu2  ;;  %v3104_v11 = vpop.f32.mrf.mxu3 }
 0x38b   : > { %v3016_v27 = vadd.f32 %v3015_v38, %v2927_v10  ;;  %v2839_v21 = vpop.f32.mrf.mxu0  ;;  %v2928_v18 = vpop.f32.mrf.mxu1  ;;  %v9273_v47 = vpack.c.bf16 %v4053_v46, %v4049_v4  ;;  %v6797_v4 = vld [vmem:[%s10719_s2 + $0x380] sm:$0xf] }
 0x38c   : > { %v2929_v40 = vadd.f32 %v2928_v18, %v2839_v21 }
 0x38d   : > { %10938 = vst [vmem:[#allocation42_spill] sm:$0xff] %v9273_v47  ;;  %v3105_v7 = vadd.f32 %v3104_v11, %v3016_v27 }
 0x38f   : > { %v3929_v59 = vadd.f32 %v9133_v13, %v3105_v7 }
 0x391   : > { %v4057_v55 = vmax.f32 %v3929_v59, 0.0  ;;  %v7280_v59 = vld [vmem:[%s10719_s2 + $0x4d0] sm:$0xf0] }
 0x392   : > { %v3017_v36 = vpop.f32.mrf.mxu2  ;;  %v3106_v31 = vpop.f32.mrf.mxu3 }
 0x393   : > { %v3018_v9 = vadd.f32 %v3017_v36, %v2929_v40  ;;  %v2842_v15 = vpop.f32.mrf.mxu0  ;;  %v2931_v50 = vpop.f32.mrf.mxu1 }
 0x394   : > { %v2932_v17 = vadd.f32 %v2931_v50, %v2842_v15  ;;  %v7240_v15 = vld [vmem:[%s10719_s2 + $0x390] sm:$0xf0] }
 0x395   : > { %v3107_v28 = vadd.f32 %v3106_v31, %v3018_v9  ;;  %v6798_v38 = vor.u32 %v7240_v15, %v6797_v4  ;;  %v6477_v31 = vld [vmem:[%s10719_s2 + $0x100] sm:$0xf]  ;;  %v7160_v50 = vld [vmem:[%s10719_s2 + $0x110] sm:$0xf0] }
 0x396   : > { %3157 = vmatmul.bf16.vlgmr.msrb.gmra.mxu0 %v8035_v32  ;;  %3246 = vmatmul.bf16.vlgmr.msrb.gmra.mxu1 %v8037_v33 }
 0x397   : > { %v3933_v10 = vadd.f32 %v9133_v13, %v3107_v28  ;;  %3335 = vmatmul.bf16.vlgmr.msrb.gmra.mxu2 %v8039_v34  ;;  %3424 = vmatmul.bf16.vlgmr.msrb.gmra.mxu3 %v8041_v35  ;;  %v6957_v28 = vld [vmem:[%s10719_s2 + $0x4c0] sm:$0xf] }
 0x398   : > { %v6958_v18 = vor.u32 %v7280_v59, %v6957_v28  ;;  %3684 = vmatpush.bf16.msra.mxu2 %v6798_v38 }
 0x399   : > { %v4061_v20 = vmax.f32 %v3933_v10, 0.0 }
 0x39a   : > { %v3020_v9 = vpop.f32.mrf.mxu2  ;;  %v3109_v46 = vpop.f32.mrf.mxu3  ;;  %3773 = vmatpush.bf16.msra.mxu3 %v6958_v18 }
 0x39b   : > { %v3021_v11 = vadd.f32 %v3020_v9, %v2932_v17  ;;  %v2844_v27 = vpop.f32.mrf.mxu0  ;;  %v2933_v21 = vpop.f32.mrf.mxu1  ;;  %v9293_v40 = vpack.c.bf16 %v4061_v20, %v4057_v55  ;;  %v6478_v17 = vor.u32 %v7160_v50, %v6477_v31  ;;  %v6637_v55 = vld [vmem:[%s10719_s2 + $0x240] sm:$0xf]  ;;  %v7200_v20 = vld [vmem:[%s10719_s2 + $0x250] sm:$0xf0] }
 0x39c   : > { %v2934_v7 = vadd.f32 %v2933_v21, %v2844_v27  ;;  %v6638_v38 = vor.u32 %v7200_v20, %v6637_v55 }
 0x39d   : > { %10939 = vst [vmem:[#allocation63_spill] sm:$0xff] %v9293_v40  ;;  %v3110_v36 = vadd.f32 %v3109_v46, %v3021_v11  ;;  %3506 = vmatpush.bf16.msra.mxu0 %v6478_v17 }
 0x39e   : > { %3595 = vmatpush.bf16.msra.mxu1 %v6638_v38 }
 0x39f   : > { %v3937_v59 = vadd.f32 %v9133_v13, %v3110_v36 }
 0x3a1   : > { %v4065_v21 = vmax.f32 %v3937_v59, 0.0 }
 0x3a2   : > { %v3022_v10 = vpop.f32.mrf.mxu2  ;;  %v3111_v4 = vpop.f32.mrf.mxu3 }
 0x3a3   : > { %v3023_v15 = vadd.f32 %v3022_v10, %v2934_v7  ;;  %v2847_v9 = vpop.f32.mrf.mxu0  ;;  %v2936_v46 = vpop.f32.mrf.mxu1 }
 0x3a4   : > { %v2937_v28 = vadd.f32 %v2936_v46, %v2847_v9 }
 0x3a5   : > { %v3112_v11 = vadd.f32 %v3111_v4, %v3023_v15 }
 0x3a6   : > { %3162 = vmatmul.bf16.gmra.mxu0 %v8088_v22  ;;  %3251 = vmatmul.bf16.gmra.mxu1 %v8090_v23 }
 0x3a7   : > { %v3941_v27 = vadd.f32 %v9133_v13, %v3112_v11  ;;  %3340 = vmatmul.bf16.gmra.mxu2 %v8093_v25  ;;  %3429 = vmatmul.bf16.gmra.mxu3 %v8095_v26 }
 0x3a9   : > { %v4069_v18 = vmax.f32 %v3941_v27, 0.0 }
 0x3aa   : > { %v3025_v7 = vpop.f32.mrf.mxu2  ;;  %v3114_v31 = vpop.f32.mrf.mxu3 }
 0x3ab   : > { %v3026_v50 = vadd.f32 %v3025_v7, %v2937_v28  ;;  %v2849_v10 = vpop.f32.mrf.mxu0  ;;  %v2938_v17 = vpop.f32.mrf.mxu1  ;;  %v9313_v36 = vpack.c.bf16 %v4069_v18, %v4065_v21  ;;  %v6777_v21 = vld [vmem:[%s10719_s2 + $0x358] sm:$0xf]  ;;  %v7235_v18 = vld [vmem:[%s10719_s2 + $0x368] sm:$0xf0] }
 0x3ac   : > { %v2939_v4 = vadd.f32 %v2938_v17, %v2849_v10 }
 0x3ad   : > { %10940 = vst [vmem:[#allocation64_spill] sm:$0xff] %v9313_v36  ;;  %v3115_v55 = vadd.f32 %v3114_v31, %v3026_v50  ;;  %v6778_v50 = vor.u32 %v7235_v18, %v6777_v21 }
 0x3af   : > { %v3945_v40 = vadd.f32 %v9133_v13, %v3115_v55  ;;  %3685 = vmatpush.bf16.msra.mxu2 %v6778_v50 }
 0x3b1   : > { %v4073_v59 = vmax.f32 %v3945_v40, 0.0  ;;  %v7275_v40 = vld [vmem:[%s10719_s2 + $0x4a8] sm:$0xf0] }
 0x3b2   : > { %v3027_v20 = vpop.f32.mrf.mxu2  ;;  %v3116_v15 = vpop.f32.mrf.mxu3 }
 0x3b3   : > { %v3028_v9 = vadd.f32 %v3027_v20, %v2939_v4  ;;  %v2852_v46 = vpop.f32.mrf.mxu0  ;;  %v2941_v38 = vpop.f32.mrf.mxu1 }
 0x3b4   : > { %v2942_v11 = vadd.f32 %v2941_v38, %v2852_v46  ;;  %v6457_v46 = vld [vmem:[%s10719_s2 + $0xd8] sm:$0xf]  ;;  %v7155_v38 = vld [vmem:[%s10719_s2 + $0xe8] sm:$0xf0] }
 0x3b5   : > { %v3117_v47 = vadd.f32 %v3116_v15, %v3028_v9 }
 0x3b6   : > { %3167 = vmatmul.bf16.gmra.mxu0 %v8117_v61  ;;  %3256 = vmatmul.bf16.gmra.mxu1 %v8119_v63 }
 0x3b7   : > { %v3949_v28 = vadd.f32 %v9133_v13, %v3117_v47  ;;  %3345 = vmatmul.bf16.gmra.mxu2 %v8121_v2  ;;  %3434 = vmatmul.bf16.gmra.mxu3 %v8123_v3  ;;  %v6937_v47 = vld [vmem:[%s10719_s2 + $0x498] sm:$0xf] }
 0x3b8   : > { %v6938_v55 = vor.u32 %v7275_v40, %v6937_v47 }
 0x3b9   : > { %v4077_v27 = vmax.f32 %v3949_v28, 0.0 }
 0x3ba   : > { %v3030_v7 = vpop.f32.mrf.mxu2  ;;  %v3119_v31 = vpop.f32.mrf.mxu3  ;;  %3774 = vmatpush.bf16.msra.mxu3 %v6938_v55 }
 0x3bb   : > { %v3031_v10 = vadd.f32 %v3030_v7, %v2942_v11  ;;  %v2854_v17 = vpop.f32.mrf.mxu0  ;;  %v2943_v4 = vpop.f32.mrf.mxu1  ;;  %v9333_v20 = vpack.c.bf16 %v4077_v27, %v4073_v59  ;;  %v6458_v11 = vor.u32 %v7155_v38, %v6457_v46  ;;  %v6617_v59 = vld [vmem:[%s10719_s2 + $0x218] sm:$0xf]  ;;  %v7195_v27 = vld [vmem:[%s10719_s2 + $0x228] sm:$0xf0] }
 0x3bc   : > { %v2944_v15 = vadd.f32 %v2943_v4, %v2854_v17  ;;  %v6618_v50 = vor.u32 %v7195_v27, %v6617_v59 }
 0x3bd   : > { %10941 = vst [vmem:[#allocation65_spill] sm:$0xff] %v9333_v20  ;;  %v3120_v9 = vadd.f32 %v3119_v31, %v3031_v10  ;;  %3507 = vmatpush.bf16.msra.mxu0 %v6458_v11 }
 0x3be   : > { %3596 = vmatpush.bf16.msra.mxu1 %v6618_v50 }
 0x3bf   : > { %v3953_v40 = vadd.f32 %v9133_v13, %v3120_v9 }
 0x3c1   : > { %v4081_v4 = vmax.f32 %v3953_v40, 0.0 }
 0x3c2   : > { %v3032_v28 = vpop.f32.mrf.mxu2  ;;  %v3121_v21 = vpop.f32.mrf.mxu3 }
 0x3c3   : > { %v3033_v18 = vadd.f32 %v3032_v28, %v2944_v15  ;;  %v2857_v7 = vpop.f32.mrf.mxu0  ;;  %v2946_v31 = vpop.f32.mrf.mxu1 }
 0x3c4   : > { %v2947_v47 = vadd.f32 %v2946_v31, %v2857_v7 }
 0x3c5   : > { %v3122_v10 = vadd.f32 %v3121_v21, %v3033_v18 }
 0x3c6   : > { %3172 = vmatmul.bf16.gmra.mxu0 %v8170_v57  ;;  %3261 = vmatmul.bf16.gmra.mxu1 %v8172_v58 }
 0x3c7   : > { %v3957_v17 = vadd.f32 %v9133_v13, %v3122_v10  ;;  %3350 = vmatmul.bf16.gmra.mxu2 %v8174_v60  ;;  %3439 = vmatmul.bf16.gmra.mxu3 %v8176_v5 }
 0x3c9   : > { %v4085_v55 = vmax.f32 %v3957_v17, 0.0 }
 0x3ca   : > { %v3035_v15 = vpop.f32.mrf.mxu2  ;;  %v3124_v46 = vpop.f32.mrf.mxu3 }
 0x3cb   : > { %v3036_v38 = vadd.f32 %v3035_v15, %v2947_v47  ;;  %v2859_v28 = vpop.f32.mrf.mxu0  ;;  %v2948_v11 = vpop.f32.mrf.mxu1  ;;  %v9353_v9 = vpack.c.bf16 %v4085_v55, %v4081_v4  ;;  %v6757_v4 = vld [vmem:[%s10719_s2 + $0x330] sm:$0xf]  ;;  %v7230_v55 = vld [vmem:[%s10719_s2 + $0x340] sm:$0xf0] }
 0x3cc   : > { %v2949_v21 = vadd.f32 %v2948_v11, %v2859_v28 }
 0x3cd   : > { %10942 = vst [vmem:[#allocation66_spill] sm:$0xff] %v9353_v9  ;;  %v3125_v59 = vadd.f32 %v3124_v46, %v3036_v38  ;;  %v6758_v38 = vor.u32 %v7230_v55, %v6757_v4 }
 0x3cf   : > { %v3961_v20 = vadd.f32 %v9133_v13, %v3125_v59  ;;  %3686 = vmatpush.bf16.msra.mxu2 %v6758_v38 }
 0x3d1   : > { %v4089_v40 = vmax.f32 %v3961_v20, 0.0  ;;  %v7270_v20 = vld [vmem:[%s10719_s2 + $0x480] sm:$0xf0] }
 0x3d2   : > { %v3037_v27 = vpop.f32.mrf.mxu2  ;;  %v3126_v18 = vpop.f32.mrf.mxu3 }
 0x3d3   : > { %v3038_v7 = vadd.f32 %v3037_v27, %v2949_v21  ;;  %v2862_v31 = vpop.f32.mrf.mxu0  ;;  %v2951_v50 = vpop.f32.mrf.mxu1 }
 0x3d4   : > { %v2952_v10 = vadd.f32 %v2951_v50, %v2862_v31  ;;  %v6437_v31 = vld [vmem:[%s10719_s2 + $0xb0] sm:$0xf]  ;;  %v7150_v50 = vld [vmem:[%s10719_s2 + $0xc0] sm:$0xf0] }
 0x3d5   : > { %v3127_v36 = vadd.f32 %v3126_v18, %v3038_v7 }
 0x3d6   : > { %3177 = vmatmul.bf16.gmra.mxu0 %v8199_v42  ;;  %3266 = vmatmul.bf16.gmra.mxu1 %v8201_v43 }
 0x3d7   : > { %v3965_v47 = vadd.f32 %v9133_v13, %v3127_v36  ;;  %3355 = vmatmul.bf16.gmra.mxu2 %v8203_v44  ;;  %3444 = vmatmul.bf16.gmra.mxu3 %v8205_v45  ;;  %v6917_v36 = vld [vmem:[%s10719_s2 + $0x470] sm:$0xf] }
 0x3d8   : > { %v6918_v59 = vor.u32 %v7270_v20, %v6917_v36 }
 0x3d9   : > { %v4093_v17 = vmax.f32 %v3965_v47, 0.0 }
 0x3da   : > { %v3040_v15 = vpop.f32.mrf.mxu2  ;;  %v3129_v46 = vpop.f32.mrf.mxu3  ;;  %3775 = vmatpush.bf16.msra.mxu3 %v6918_v59 }
 0x3db   : > { %v3041_v28 = vadd.f32 %v3040_v15, %v2952_v10  ;;  %v2864_v11 = vpop.f32.mrf.mxu0  ;;  %v2953_v21 = vpop.f32.mrf.mxu1  ;;  %v9373_v27 = vpack.c.bf16 %v4093_v17, %v4089_v40  ;;  %v6438_v10 = vor.u32 %v7150_v50, %v6437_v31  ;;  %v6597_v40 = vld [vmem:[%s10719_s2 + $0x1f0] sm:$0xf]  ;;  %v7190_v17 = vld [vmem:[%s10719_s2 + $0x200] sm:$0xf0] }
 0x3dc   : > { %v2954_v18 = vadd.f32 %v2953_v21, %v2864_v11  ;;  %v6598_v38 = vor.u32 %v7190_v17, %v6597_v40 }
 0x3dd   : > { %10943 = vst [vmem:[#allocation67_spill] sm:$0xff] %v9373_v27  ;;  %v3130_v7 = vadd.f32 %v3129_v46, %v3041_v28  ;;  %3508 = vmatpush.bf16.msra.mxu0 %v6438_v10 }
 0x3de   : > { %3597 = vmatpush.bf16.msra.mxu1 %v6598_v38 }
 0x3df   : > { %v3969_v20 = vadd.f32 %v9133_v13, %v3130_v7 }
 0x3e1   : > { %v4097_v21 = vmax.f32 %v3969_v20, 0.0 }
 0x3e2   : > { %v3042_v47 = vpop.f32.mrf.mxu2  ;;  %v3131_v4 = vpop.f32.mrf.mxu3 }
 0x3e3   : > { %v3043_v55 = vadd.f32 %v3042_v47, %v2954_v18  ;;  %v2867_v15 = vpop.f32.mrf.mxu0  ;;  %v2956_v46 = vpop.f32.mrf.mxu1 }
 0x3e4   : > { %v2957_v36 = vadd.f32 %v2956_v46, %v2867_v15 }
 0x3e5   : > { %v3132_v28 = vadd.f32 %v3131_v4, %v3043_v55 }
 0x3e6   : > { %3182 = vmatmul.bf16.gmra.mxu0 %v8252_v53  ;;  %3271 = vmatmul.bf16.gmra.mxu1 %v8254_v51 }
 0x3e7   : > { %v3973_v11 = vadd.f32 %v9133_v13, %v3132_v28  ;;  %3360 = vmatmul.bf16.gmra.mxu2 %v8256_v56  ;;  %3449 = vmatmul.bf16.gmra.mxu3 %v8258_v6 }
 0x3e9   : > { %v4101_v59 = vmax.f32 %v3973_v11, 0.0 }
 0x3ea   : > { %v3045_v18 = vpop.f32.mrf.mxu2  ;;  %v3134_v31 = vpop.f32.mrf.mxu3 }
 0x3eb   : > { %v3046_v50 = vadd.f32 %v3045_v18, %v2957_v36  ;;  %v2869_v47 = vpop.f32.mrf.mxu0  ;;  %v2958_v10 = vpop.f32.mrf.mxu1  ;;  %v9393_v7 = vpack.c.bf16 %v4101_v59, %v4097_v21  ;;  %v6737_v21 = vld [vmem:[%s10719_s2 + $0x308] sm:$0xf]  ;;  %v7225_v59 = vld [vmem:[%s10719_s2 + $0x318] sm:$0xf0] }
 0x3ec   : > { %v2959_v4 = vadd.f32 %v2958_v10, %v2869_v47 }
 0x3ed   : > { %10944 = vst [vmem:[#allocation68_spill] sm:$0xff] %v9393_v7  ;;  %v3135_v40 = vadd.f32 %v3134_v31, %v3046_v50  ;;  %v6738_v50 = vor.u32 %v7225_v59, %v6737_v21 }
 0x3ef   : > { %v3977_v27 = vadd.f32 %v9133_v13, %v3135_v40  ;;  %3687 = vmatpush.bf16.msra.mxu2 %v6738_v50 }
 0x3f1   : > { %v4105_v20 = vmax.f32 %v3977_v27, 0.0  ;;  %v7265_v27 = vld [vmem:[%s10719_s2 + $0x458] sm:$0xf0] }
 0x3f2   : > { %v3047_v17 = vpop.f32.mrf.mxu2  ;;  %v3136_v55 = vpop.f32.mrf.mxu3 }
 0x3f3   : > { %v3048_v15 = vadd.f32 %v3047_v17, %v2959_v4  ;;  %v2872_v46 = vpop.f32.mrf.mxu0  ;;  %v2961_v38 = vpop.f32.mrf.mxu1 }
 0x3f4   : > { %v2962_v28 = vadd.f32 %v2961_v38, %v2872_v46  ;;  %v6417_v46 = vld [vmem:[%s10719_s2 + $0x88] sm:$0xf]  ;;  %v7145_v38 = vld [vmem:[%s10719_s2 + $0x98] sm:$0xf0] }
 0x3f5   : > { %v3137_v9 = vadd.f32 %v3136_v55, %v3048_v15 }
 0x3f6   : > { %3187 = vmatmul.bf16.gmra.mxu0 %v10858_v49  ;;  %3276 = vmatmul.bf16.gmra.mxu1 %v10859_v62 }
 0x3f7   : > { %v3981_v36 = vadd.f32 %v9133_v13, %v3137_v9  ;;  %3365 = vmatmul.bf16.gmra.mxu2 %v10860_v52  ;;  %3454 = vmatmul.bf16.gmra.mxu3 %v10861_v16  ;;  %v6897_v9 = vld [vmem:[%s10719_s2 + $0x448] sm:$0xf] }
 0x3f8   : > { %v6898_v40 = vor.u32 %v7265_v27, %v6897_v9 }
 0x3f9   : > { %v4109_v11 = vmax.f32 %v3981_v36, 0.0 }
 0x3fa   : > { %v3050_v18 = vpop.f32.mrf.mxu2  ;;  %v3139_v31 = vpop.f32.mrf.mxu3  ;;  %3776 = vmatpush.bf16.msra.mxu3 %v6898_v40 }
 0x3fb   : > { %v3051_v47 = vadd.f32 %v3050_v18, %v2962_v28  ;;  %v2874_v10 = vpop.f32.mrf.mxu0  ;;  %v2963_v4 = vpop.f32.mrf.mxu1  ;;  %v9413_v17 = vpack.c.bf16 %v4109_v11, %v4105_v20  ;;  %v6418_v28 = vor.u32 %v7145_v38, %v6417_v46  ;;  %v6577_v20 = vld [vmem:[%s10719_s2 + $0x1c8] sm:$0xf]  ;;  %v7185_v11 = vld [vmem:[%s10719_s2 + $0x1d8] sm:$0xf0] }
 0x3fc   : > { %v2964_v55 = vadd.f32 %v2963_v4, %v2874_v10  ;;  %v6578_v50 = vor.u32 %v7185_v11, %v6577_v20 }
 0x3fd   : > { %10945 = vst [vmem:[#allocation69_spill] sm:$0xff] %v9413_v17  ;;  %v3140_v15 = vadd.f32 %v3139_v31, %v3051_v47  ;;  %3509 = vmatpush.bf16.msra.mxu0 %v6418_v28 }
 0x3fe   : > { %3598 = vmatpush.bf16.msra.mxu1 %v6578_v50 }
 0x3ff   : > { %v3985_v27 = vadd.f32 %v9133_v13, %v3140_v15 }
 0x401   : > { %v4113_v4 = vmax.f32 %v3985_v27, 0.0  ;;  %v10947_v27 = vld [vmem:[#allocation11_spill] sm:$0xff] }
 0x402   : > { %v3052_v36 = vpop.f32.mrf.mxu2  ;;  %v3141_v21 = vpop.f32.mrf.mxu3 }
 0x403   : > { %v3053_v59 = vadd.f32 %v3052_v36, %v2964_v55  ;;  %v2877_v18 = vpop.f32.mrf.mxu0  ;;  %v2966_v31 = vpop.f32.mrf.mxu1 }
 0x404   : > { %v2967_v9 = vadd.f32 %v2966_v31, %v2877_v18 }
 0x405   : > { %v3142_v47 = vadd.f32 %v3141_v21, %v3053_v59 }
 0x406   : > { %3192 = vmatmul.bf16.gmra.mxu0 %v10863_v54  ;;  %3281 = vmatmul.bf16.gmra.mxu1 %v10864_v30 }
 0x407   : > { %v3989_v10 = vadd.f32 %v9133_v13, %v3142_v47  ;;  %3370 = vmatmul.bf16.gmra.mxu2 %v10865_v0  ;;  %3459 = vmatmul.bf16.gmra.mxu3 %v10866_v39 }
 0x409   : > { %v4117_v40 = vmax.f32 %v3989_v10, 0.0  ;;  %v10948_v10 = vld [vmem:[#allocation12_spill] sm:$0xff] }
 0x40a   : > { %v3055_v55 = vpop.f32.mrf.mxu2  ;;  %v3144_v46 = vpop.f32.mrf.mxu3 }
 0x40b   : > { %v3056_v38 = vadd.f32 %v3055_v55, %v2967_v9  ;;  %v2879_v36 = vpop.f32.mrf.mxu0  ;;  %v2968_v28 = vpop.f32.mrf.mxu1  ;;  %v9433_v15 = vpack.c.bf16 %v4117_v40, %v4113_v4  ;;  %v10949_v4 = vld [vmem:[#allocation13_spill] sm:$0xff] }
 0x40c   : > { %v2969_v21 = vadd.f32 %v2968_v28, %v2879_v36 }
 0x40d   : > { %10946 = vst [vmem:[#allocation70_spill] sm:$0xff] %v9433_v15  ;;  %v3145_v20 = vadd.f32 %v3144_v46, %v3056_v38  ;;  %v6717_v46 = vld [vmem:[%s10719_s2 + $0x2e0] sm:$0xf]  ;;  %v7220_v38 = vld [vmem:[%s10719_s2 + $0x2f0] sm:$0xf0] }
 0x40e   : > { %v10953_v15 = vld [vmem:[#allocation16_spill] sm:$0xff] }
 0x40f   : > { %v3993_v17 = vadd.f32 %v9133_v13, %v3145_v20 }
 0x411   : > { %v4121_v40 = vmax.f32 %v3993_v17, 0.0 }
 0x412   : > { %v3057_v11 = vpop.f32.mrf.mxu2  ;;  %v3146_v59 = vpop.f32.mrf.mxu3 }
 0x413   : > { %v3058_v18 = vadd.f32 %v3057_v11, %v2969_v21  ;;  %v3158_v31 = vpop.f32.mrf.mxu0  ;;  %v3247_v50 = vpop.f32.mrf.mxu1  ;;  %v6718_v21 = vor.u32 %v7220_v38, %v6717_v46  ;;  %v6397_v38 = vld [vmem:[%s10719_s2 + $0x60] sm:$0xf] }
 0x414   : > { %v3248_v47 = vadd.f32 %v3247_v50, %v3158_v31 }
 0x415   : > { %v3147_v7 = vadd.f32 %v3146_v59, %v3058_v18  ;;  %3688 = vmatpush.bf16.msra.mxu2 %v6718_v21  ;;  %v7180_v21 = vld [vmem:[%s10719_s2 + $0x1b0] sm:$0xf0] }
 0x416   : > { %3197 = vmatmul.bf16.gmra.mxu0 %v10868_v1  ;;  %3286 = vmatmul.bf16.gmra.mxu1 %v10947_v27 }
 0x417   : > { %v3997_v9 = vadd.f32 %v9133_v13, %v3147_v7  ;;  %3375 = vmatmul.bf16.gmra.mxu2 %v10948_v10  ;;  %3464 = vmatmul.bf16.gmra.mxu3 %v10949_v4  ;;  %v6877_v13 = vld [vmem:[%s10719_s2 + $0x420] sm:$0xf]  ;;  %v7260_v7 = vld [vmem:[%s10719_s2 + $0x430] sm:$0xf0]  ;;  %v10954_v4 = vld [vmem:[#allocation17_spill] sm:$0xff] }
 0x418   : > { %v6878_v59 = vor.u32 %v7260_v7, %v6877_v13 }
 0x419   : > { %v4125_v55 = vmax.f32 %v3997_v9, 0.0  ;;  %v7650_v9 = vld [vmem:[%s10720_s3] sm:$0xf] }
 0x41a   : > { %v3336_v36 = vpop.f32.mrf.mxu2  ;;  %v3425_v28 = vpop.f32.mrf.mxu3  ;;  %3777 = vmatpush.bf16.msra.mxu3 %v6878_v59  ;;  %v9458_v46 = vperm.slane %v7650_v9, 3 }
 0x41b   : > { %v3337_v17 = vadd.f32 %v3336_v36, %v3248_v47  ;;  %v3160_v20 = vpop.f32.mrf.mxu0  ;;  %v3249_v11 = vpop.f32.mrf.mxu1  ;;  %v9453_v18 = vpack.c.bf16 %v4125_v55, %v4121_v40  ;;  %v7140_v47 = vld [vmem:[%s10719_s2 + $0x70] sm:$0xf0] }
 0x41c   : > { %v3250_v31 = vadd.f32 %v3249_v11, %v3160_v20  ;;  %v6398_v36 = vor.u32 %v7140_v47, %v6397_v38  ;;  %v10952_v38 = vld [vmem:[#allocation15_spill] sm:$0xff] }
 0x41d   : > { %10950 = vst [vmem:[#allocation71_spill] sm:$0xff] %v9453_v18  ;;  %v3426_v50 = vadd.f32 %v3425_v28, %v3337_v17  ;;  %v6557_v28 = vld [vmem:[%s10719_s2 + $0x1a0] sm:$0xf] }
 0x41e   : > { %v6558_v20 = vor.u32 %v7180_v21, %v6557_v28  ;;  %3510 = vmatpush.bf16.msra.mxu0 %v6398_v36  ;;  %v10951_v18 = vld [vmem:[#allocation14_spill] sm:$0xff] }
 0x41f   : > { %v3874_v59 = vadd.f32 %v9458_v46, %v3426_v50 }
 0x420   : > { %3599 = vmatpush.bf16.msra.mxu1 %v6558_v20 }
 0x422   : > { %v3338_v40 = vpop.f32.mrf.mxu2  ;;  %v3427_v55 = vpop.f32.mrf.mxu3 }
 0x423   : > { %v3339_v13 = vadd.f32 %v3338_v40, %v3250_v31  ;;  %v3163_v7 = vpop.f32.mrf.mxu0  ;;  %v3252_v17 = vpop.f32.mrf.mxu1  ;;  %v4002_v31 = vmax.f32 %v3874_v59, 0.0 }
 0x424   : > { %v3253_v11 = vadd.f32 %v3252_v17, %v3163_v7 }
 0x425   : > { %v3428_v9 = vadd.f32 %v3427_v55, %v3339_v13 }
 0x426   : > { %3202 = vmatmul.bf16.gmra.mxu0 %v10951_v18  ;;  %3291 = vmatmul.bf16.gmra.mxu1 %v10952_v38 }
 0x427   : > { %v3878_v47 = vadd.f32 %v9458_v46, %v3428_v9  ;;  %3380 = vmatmul.bf16.gmra.mxu2 %v10953_v15  ;;  %3469 = vmatmul.bf16.gmra.mxu3 %v10954_v4 }
 0x429   : > { %v4006_v40 = vmax.f32 %v3878_v47, 0.0 }
 0x42a   : > { %v3341_v10 = vpop.f32.mrf.mxu2  ;;  %v3430_v28 = vpop.f32.mrf.mxu3 }
 0x42b   : > { %v9478_v21 = vpack.c.bf16 %v4006_v40, %v4002_v31  ;;  %v3342_v36 = vadd.f32 %v3341_v10, %v3253_v11  ;;  %v3165_v50 = vpop.f32.mrf.mxu0  ;;  %v3254_v55 = vpop.f32.mrf.mxu1  ;;  %v10956_v10 = vld [vmem:[#allocation21_spill] sm:$0xff]  ;;  %v10957_v11 = vld [vmem:[#allocation22_spill] sm:$0xff] }
 0x42c   : > { %v3255_v13 = vadd.f32 %v3254_v55, %v3165_v50  ;;  %v6697_v40 = vld [vmem:[%s10719_s2 + $0x2b8] sm:$0xf] }
 0x42d   : > { %10955 = vst [vmem:[#allocation72_spill] sm:$0xff] %v9478_v21  ;;  %v3431_v7 = vadd.f32 %v3430_v28, %v3342_v36 }
 0x42f   : > { %v3882_v15 = vadd.f32 %v9458_v46, %v3431_v7 }
 0x431   : > { %v4010_v47 = vmax.f32 %v3882_v15, 0.0  ;;  %v7255_v15 = vld [vmem:[%s10719_s2 + $0x408] sm:$0xf0] }
 0x432   : > { %v3343_v17 = vpop.f32.mrf.mxu2  ;;  %v3432_v20 = vpop.f32.mrf.mxu3 }
 0x433   : > { %v3344_v38 = vadd.f32 %v3343_v17, %v3255_v13  ;;  %v3168_v18 = vpop.f32.mrf.mxu0  ;;  %v3257_v9 = vpop.f32.mrf.mxu1 }
 0x434   : > { %v3258_v27 = vadd.f32 %v3257_v9, %v3168_v18  ;;  %v7215_v18 = vld [vmem:[%s10719_s2 + $0x2c8] sm:$0xf0] }
 0x435   : > { %v3433_v4 = vadd.f32 %v3432_v20, %v3344_v38  ;;  %v6698_v36 = vor.u32 %v7215_v18, %v6697_v40  ;;  %v7135_v40 = vld [vmem:[%s10719_s2 + $0x48] sm:$0xf0] }
 0x436   : > { %3207 = vmatmul.bf16.gmra.mxu0 %v10879_v29  ;;  %3296 = vmatmul.bf16.gmra.mxu1 %v10880_v12 }
 0x437   : > { %v3886_v59 = vadd.f32 %v9458_v46, %v3433_v4  ;;  %3385 = vmatmul.bf16.gmra.mxu2 %v10956_v10  ;;  %3474 = vmatmul.bf16.gmra.mxu3 %v10957_v11  ;;  %v6857_v4 = vld [vmem:[%s10719_s2 + $0x3f8] sm:$0xf] }
 0x438   : > { %v6858_v7 = vor.u32 %v7255_v15, %v6857_v4  ;;  %3689 = vmatpush.bf16.msra.mxu2 %v6698_v36 }
 0x439   : > { %v4014_v31 = vmax.f32 %v3886_v59, 0.0  ;;  %v6377_v59 = vld [vmem:[%s10719_s2 + $0x38] sm:$0xf] }
 0x43a   : > { %v3346_v38 = vpop.f32.mrf.mxu2  ;;  %v3435_v28 = vpop.f32.mrf.mxu3  ;;  %3778 = vmatpush.bf16.msra.mxu3 %v6858_v7  ;;  %v10960_v7 = vld [vmem:[#allocation25_spill] sm:$0xff] }
 0x43b   : > { %v3347_v50 = vadd.f32 %v3346_v38, %v3258_v27  ;;  %v3170_v55 = vpop.f32.mrf.mxu0  ;;  %v3259_v13 = vpop.f32.mrf.mxu1  ;;  %v9498_v17 = vpack.c.bf16 %v4014_v31, %v4010_v47  ;;  %v6378_v27 = vor.u32 %v7135_v40, %v6377_v59  ;;  %v6537_v47 = vld [vmem:[%s10719_s2 + $0x178] sm:$0xf]  ;;  %v7175_v31 = vld [vmem:[%s10719_s2 + $0x188] sm:$0xf0]  ;;  %v10961_v40 = vld [vmem:[#allocation26_spill] sm:$0xff] }
 0x43c   : > { %v3260_v20 = vadd.f32 %v3259_v13, %v3170_v55  ;;  %v6538_v4 = vor.u32 %v7175_v31, %v6537_v47  ;;  %v10959_v13 = vld [vmem:[#allocation24_spill] sm:$0xff] }
 0x43d   : > { %10958 = vst [vmem:[#allocation73_spill] sm:$0xff] %v9498_v17  ;;  %v3436_v9 = vadd.f32 %v3435_v28, %v3347_v50  ;;  %3511 = vmatpush.bf16.msra.mxu0 %v6378_v27  ;;  %v10962_v17 = vld [vmem:[#allocation27_spill] sm:$0xff] }
 0x43e   : > { %3600 = vmatpush.bf16.msra.mxu1 %v6538_v4 }
 0x43f   : > { %v3890_v50 = vadd.f32 %v9458_v46, %v3436_v9 }
 0x442   : > { %v3348_v18 = vpop.f32.mrf.mxu2  ;;  %v3437_v21 = vpop.f32.mrf.mxu3 }
 0x443   : > { %v3349_v38 = vadd.f32 %v3348_v18, %v3260_v20  ;;  %v3173_v28 = vpop.f32.mrf.mxu0  ;;  %v3262_v36 = vpop.f32.mrf.mxu1  ;;  %v4018_v20 = vmax.f32 %v3890_v50, 0.0 }
 0x444   : > { %v3263_v15 = vadd.f32 %v3262_v36, %v3173_v28 }
 0x445   : > { %v3438_v55 = vadd.f32 %v3437_v21, %v3349_v38 }
 0x446   : > { %3212 = vmatmul.bf16.gmra.mxu0 %v10959_v13  ;;  %3301 = vmatmul.bf16.gmra.mxu1 %v10960_v7 }
 0x447   : > { %v3894_v59 = vadd.f32 %v9458_v46, %v3438_v55  ;;  %3390 = vmatmul.bf16.gmra.mxu2 %v10961_v40  ;;  %3479 = vmatmul.bf16.gmra.mxu3 %v10962_v17 }
 0x449   : > { %v4022_v18 = vmax.f32 %v3894_v59, 0.0 }
 0x44a   : > { %v3351_v11 = vpop.f32.mrf.mxu2  ;;  %v3440_v47 = vpop.f32.mrf.mxu3 }
 0x44b   : > { %v3352_v31 = vadd.f32 %v3351_v11, %v3263_v15  ;;  %v3175_v27 = vpop.f32.mrf.mxu0  ;;  %v3264_v28 = vpop.f32.mrf.mxu1  ;;  %v9518_v9 = vpack.c.bf16 %v4022_v18, %v4018_v20  ;;  %v10964_v15 = vld [vmem:[#allocation32_spill] sm:$0xff] }
 0x44c   : > { %v3265_v21 = vadd.f32 %v3264_v28, %v3175_v27  ;;  %v6677_v20 = vld [vmem:[%s10719_s2 + $0x290] sm:$0xf] }
 0x44d   : > { %10963 = vst [vmem:[#allocation74_spill] sm:$0xff] %v9518_v9  ;;  %v3441_v38 = vadd.f32 %v3440_v47, %v3352_v31 }
 0x44f   : > { %v3898_v40 = vadd.f32 %v9458_v46, %v3441_v38 }
 0x451   : > { %v4026_v50 = vmax.f32 %v3898_v40, 0.0  ;;  %v7250_v40 = vld [vmem:[%s10719_s2 + $0x3e0] sm:$0xf0] }
 0x452   : > { %v3353_v36 = vpop.f32.mrf.mxu2  ;;  %v3442_v4 = vpop.f32.mrf.mxu3 }
 0x453   : > { %v3354_v7 = vadd.f32 %v3353_v36, %v3265_v21  ;;  %v3178_v13 = vpop.f32.mrf.mxu0  ;;  %v3267_v55 = vpop.f32.mrf.mxu1 }
 0x454   : > { %v3268_v10 = vadd.f32 %v3267_v55, %v3178_v13  ;;  %v7210_v13 = vld [vmem:[%s10719_s2 + $0x2a0] sm:$0xf0]  ;;  %v6357_v55 = vld [vmem:[%s10719_s2 + $0x10] sm:$0xf] }
 0x455   : > { %v3443_v17 = vadd.f32 %v3442_v4, %v3354_v7  ;;  %v6678_v47 = vor.u32 %v7210_v13, %v6677_v20 }
 0x456   : > { %3217 = vmatmul.bf16.gmra.mxu0 %v10887_v24  ;;  %3306 = vmatmul.bf16.gmra.mxu1 %v10888_v8 }
 0x457   : > { %v3902_v11 = vadd.f32 %v9458_v46, %v3443_v17  ;;  %3395 = vmatmul.bf16.gmra.mxu2 %v10926_v41  ;;  %3484 = vmatmul.bf16.gmra.mxu3 %v10964_v15  ;;  %v6837_v17 = vld [vmem:[%s10719_s2 + $0x3d0] sm:$0xf] }
 0x458   : > { %v6838_v21 = vor.u32 %v7250_v40, %v6837_v17  ;;  %3690 = vmatpush.bf16.msra.mxu2 %v6678_v47 }
 0x459   : > { %v4030_v59 = vmax.f32 %v3902_v11, 0.0  ;;  %v7130_v11 = vld [vmem:[%s10719_s2 + $0x20] sm:$0xf0] }
 0x45a   : > { %v3356_v7 = vpop.f32.mrf.mxu2  ;;  %v3445_v18 = vpop.f32.mrf.mxu3  ;;  %3779 = vmatpush.bf16.msra.mxu3 %v6838_v21  ;;  %v10967_v21 = vld [vmem:[#allocation35_spill] sm:$0xff] }
 0x45b   : > { %v3357_v31 = vadd.f32 %v3356_v7, %v3268_v10  ;;  %v3180_v27 = vpop.f32.mrf.mxu0  ;;  %v3269_v28 = vpop.f32.mrf.mxu1  ;;  %v9538_v38 = vpack.c.bf16 %v4030_v59, %v4026_v50  ;;  %v6358_v10 = vor.u32 %v7130_v11, %v6357_v55  ;;  %v6517_v50 = vld [vmem:[%s10719_s2 + $0x150] sm:$0xf]  ;;  %v7170_v59 = vld [vmem:[%s10719_s2 + $0x160] sm:$0xf0] }
 0x45c   : > { %v3270_v36 = vadd.f32 %v3269_v28, %v3180_v27  ;;  %v6518_v17 = vor.u32 %v7170_v59, %v6517_v50  ;;  %v10966_v28 = vld [vmem:[#allocation34_spill] sm:$0xff]  ;;  %v10968_v11 = vld [vmem:[#allocation36_spill] sm:$0xff] }
 0x45d   : > { %10965 = vst [vmem:[#allocation75_spill] sm:$0xff] %v9538_v38  ;;  %v3446_v4 = vadd.f32 %v3445_v18, %v3357_v31  ;;  %3512 = vmatpush.bf16.msra.mxu0 %v6358_v10  ;;  %v10969_v38 = vld [vmem:[#allocation37_spill] sm:$0xff] }
 0x45e   : > { %3601 = vmatpush.bf16.msra.mxu1 %v6518_v17 }
 0x45f   : > { %v3906_v31 = vadd.f32 %v9458_v46, %v3446_v4 }
 0x462   : > { %v3358_v20 = vpop.f32.mrf.mxu2  ;;  %v3447_v13 = vpop.f32.mrf.mxu3 }
 0x463   : > { %v3359_v7 = vadd.f32 %v3358_v20, %v3270_v36  ;;  %v3183_v18 = vpop.f32.mrf.mxu0  ;;  %v3272_v47 = vpop.f32.mrf.mxu1  ;;  %v4034_v36 = vmax.f32 %v3906_v31, 0.0 }
 0x464   : > { %v3273_v40 = vadd.f32 %v3272_v47, %v3183_v18 }
 0x465   : > { %v3448_v27 = vadd.f32 %v3447_v13, %v3359_v7 }
 0x466   : > { %3222 = vmatmul.bf16.gmra.mxu0 %v10966_v28  ;;  %3311 = vmatmul.bf16.gmra.mxu1 %v10967_v21 }
 0x467   : > { %v3910_v55 = vadd.f32 %v9458_v46, %v3448_v27  ;;  %3400 = vmatmul.bf16.gmra.mxu2 %v10968_v11  ;;  %3489 = vmatmul.bf16.gmra.mxu3 %v10969_v38 }
 0x469   : > { %v4038_v20 = vmax.f32 %v3910_v55, 0.0  ;;  %v7309_v55 = vld [vmem:[%s10721_s4 + $0xb8] sm:$0xff] }
 0x46a   : > { %v3361_v9 = vpop.f32.mrf.mxu2  ;;  %v3450_v50 = vpop.f32.mrf.mxu3  ;;  %4625 = vmatpush.bf16.msrb.mxu2 %v7309_v55  ;;  %v10972_v55 = vld [vmem:[#allocation44_spill] sm:$0xff] }
 0x46b   : > { %v3362_v59 = vadd.f32 %v3361_v9, %v3273_v40  ;;  %v3185_v10 = vpop.f32.mrf.mxu0  ;;  %v3274_v18 = vpop.f32.mrf.mxu1  ;;  %v9558_v4 = vpack.c.bf16 %v4038_v20, %v4034_v36 }
 0x46c   : > { %v3275_v13 = vadd.f32 %v3274_v18, %v3185_v10  ;;  %v7293_v18 = vld [vmem:[%s10721_s4 + $0x38] sm:$0xff] }
 0x46d   : > { %10970 = vst [vmem:[#allocation76_spill] sm:$0xff] %v9558_v4  ;;  %v3451_v7 = vadd.f32 %v3450_v50, %v3362_v59  ;;  %4447 = vmatpush.bf16.msrb.mxu0 %v7293_v18 }
 0x46f   : > { %v3914_v11 = vadd.f32 %v9458_v46, %v3451_v7 }
 0x471   : > { %v4042_v40 = vmax.f32 %v3914_v11, 0.0 }
 0x472   : > { %v3363_v47 = vpop.f32.mrf.mxu2  ;;  %v3452_v17 = vpop.f32.mrf.mxu3 }
 0x473   : > { %v3364_v21 = vadd.f32 %v3363_v47, %v3275_v13  ;;  %v3188_v28 = vpop.f32.mrf.mxu0  ;;  %v3277_v27 = vpop.f32.mrf.mxu1  ;;  %v7301_v13 = vld [vmem:[%s10721_s4 + $0x78] sm:$0xff] }
 0x474   : > { %v3278_v15 = vadd.f32 %v3277_v27, %v3188_v28  ;;  %v7317_v28 = vld [vmem:[%s10721_s4 + $0xf8] sm:$0xff]  ;;  %4536 = vmatpush.bf16.msrb.mxu1 %v7301_v13 }
 0x475   : > { %v3453_v38 = vadd.f32 %v3452_v17, %v3364_v21  ;;  %4714 = vmatpush.bf16.msrb.mxu3 %v7317_v28  ;;  %v10973_v28 = vld [vmem:[#allocation45_spill] sm:$0xff] }
 0x476   : > { %3227 = vmatmul.bf16.gmra.mxu0 %v10894_v37  ;;  %3316 = vmatmul.bf16.gmra.mxu1 %v10895_v48 }
 0x477   : > { %v3918_v9 = vadd.f32 %v9458_v46, %v3453_v38  ;;  %3405 = vmatmul.bf16.gmra.mxu2 %v10933_v19  ;;  %3494 = vmatmul.bf16.gmra.mxu3 %v10934_v14 }
 0x479   : > { %v4046_v31 = vmax.f32 %v3918_v9, 0.0 }
 0x47a   : > { %v3366_v21 = vpop.f32.mrf.mxu2  ;;  %v3455_v36 = vpop.f32.mrf.mxu3 }
 0x47b   : > { %v3367_v20 = vadd.f32 %v3366_v21, %v3278_v15  ;;  %v3190_v50 = vpop.f32.mrf.mxu0  ;;  %v3279_v59 = vpop.f32.mrf.mxu1  ;;  %v9572_v38 = vpack.c.bf16 %v4046_v31, %v4042_v40 }
 0x47c   : > { %v3280_v10 = vadd.f32 %v3279_v59, %v3190_v50 }
 0x47d   : > { %10971 = vst [vmem:[#allocation77_spill] sm:$0xff] %v9572_v38  ;;  %v3456_v11 = vadd.f32 %v3455_v36, %v3367_v20  ;;  %v10974_v36 = vld [vmem:[#allocation46_spill] sm:$0xff]  ;;  %v10975_v20 = vld [vmem:[#allocation47_spill] sm:$0xff] }
 0x47f   : > { %v3922_v40 = vadd.f32 %v9458_v46, %v3456_v11 }
 0x481   : > { %v4050_v50 = vmax.f32 %v3922_v40, 0.0 }
 0x482   : > { %v3368_v7 = vpop.f32.mrf.mxu2  ;;  %v3457_v47 = vpop.f32.mrf.mxu3 }
 0x483   : > { %v3369_v17 = vadd.f32 %v3368_v7, %v3280_v10  ;;  %v3193_v15 = vpop.f32.mrf.mxu0  ;;  %v3282_v27 = vpop.f32.mrf.mxu1 }
 0x484   : > { %v3283_v9 = vadd.f32 %v3282_v27, %v3193_v15 }
 0x485   : > { %v3458_v31 = vadd.f32 %v3457_v47, %v3369_v17 }
 0x486   : > { %3232 = vmatmul.bf16.gmra.mxu0 %v10972_v55  ;;  %3321 = vmatmul.bf16.gmra.mxu1 %v10973_v28 }
 0x487   : > { %v3926_v21 = vadd.f32 %v9458_v46, %v3458_v31  ;;  %3410 = vmatmul.bf16.gmra.mxu2 %v10974_v36  ;;  %3499 = vmatmul.bf16.gmra.mxu3 %v10975_v20 }
 0x489   : > { %v4054_v59 = vmax.f32 %v3926_v21, 0.0 }
 0x48a   : > { %v3371_v10 = vpop.f32.mrf.mxu2  ;;  %v3460_v7 = vpop.f32.mrf.mxu3 }
 0x48b   : > { %v3372_v18 = vadd.f32 %v3371_v10, %v3283_v9  ;;  %v3195_v13 = vpop.f32.mrf.mxu0  ;;  %v3284_v15 = vpop.f32.mrf.mxu1  ;;  %v9586_v27 = vpack.c.bf16 %v4054_v59, %v4050_v50  ;;  %v7308_v50 = vld [vmem:[%s10721_s4 + $0xb0] sm:$0xff] }
 0x48c   : > { %v3285_v11 = vadd.f32 %v3284_v15, %v3195_v13  ;;  %4626 = vmatpush.bf16.msrb.mxu2 %v7308_v50  ;;  %v7300_v10 = vld [vmem:[%s10721_s4 + $0x70] sm:$0xff] }
 0x48d   : > { %v3461_v47 = vadd.f32 %v3460_v7, %v3372_v18  ;;  %4537 = vmatpush.bf16.msrb.mxu1 %v7300_v10 }
 0x48f   : > { %v3930_v36 = vadd.f32 %v9458_v46, %v3461_v47 }
 0x491   : > { %v4058_v40 = vmax.f32 %v3930_v36, 0.0 }
 0x492   : > { %v3373_v17 = vpop.f32.mrf.mxu2  ;;  %v3462_v38 = vpop.f32.mrf.mxu3 }
 0x493   : > { %v3374_v4 = vadd.f32 %v3373_v17, %v3285_v11  ;;  %v3198_v28 = vpop.f32.mrf.mxu0  ;;  %v3287_v31 = vpop.f32.mrf.mxu1 }
 0x494   : > { %v3288_v55 = vadd.f32 %v3287_v31, %v3198_v28 }
 0x495   : > { %v3463_v20 = vadd.f32 %v3462_v38, %v3374_v4  ;;  %v7316_v4 = vld [vmem:[%s10721_s4 + $0xf0] sm:$0xff] }
 0x496   : > { %3513 = vmatmul.bf16.vlgmr.msra.gmra.mxu0 %v8035_v32  ;;  %3602 = vmatmul.bf16.vlgmr.msra.gmra.mxu1 %v8037_v33 }
 0x497   : > { %v3934_v9 = vadd.f32 %v9458_v46, %v3463_v20  ;;  %3691 = vmatmul.bf16.vlgmr.msra.gmra.mxu2 %v8039_v34  ;;  %3780 = vmatmul.bf16.vlgmr.msra.gmra.mxu3 %v8041_v35  ;;  %v7292_v20 = vld [vmem:[%s10721_s4 + $0x30] sm:$0xff] }
 0x498   : > { %4715 = vmatpush.bf16.msrb.mxu3 %v7316_v4  ;;  %4448 = vmatpush.bf16.msrb.mxu0 %v7292_v20 }
 0x499   : > { %v4062_v21 = vmax.f32 %v3934_v9, 0.0 }
 0x49a   : > { %v3376_v38 = vpop.f32.mrf.mxu2  ;;  %v3465_v32 = vpop.f32.mrf.mxu3 }
 0x49b   : > { %v3377_v28 = vadd.f32 %v3376_v38, %v3288_v55  ;;  %v3200_v33 = vpop.f32.mrf.mxu0  ;;  %v3289_v59 = vpop.f32.mrf.mxu1  ;;  %v9600_v34 = vpack.c.bf16 %v4062_v21, %v4058_v40 }
 0x49c   : > { %v3290_v35 = vadd.f32 %v3289_v59, %v3200_v33 }
 0x49d   : > { %v3466_v36 = vadd.f32 %v3465_v32, %v3377_v28 }
 0x49f   : > { %v3938_v47 = vadd.f32 %v9458_v46, %v3466_v36 }
 0x4a1   : > { %v4066_v9 = vmax.f32 %v3938_v47, 0.0 }
 0x4a2   : > { %v3378_v7 = vpop.f32.mrf.mxu2  ;;  %v3467_v18 = vpop.f32.mrf.mxu3 }
 0x4a3   : > { %v3379_v13 = vadd.f32 %v3378_v7, %v3290_v35  ;;  %v3203_v55 = vpop.f32.mrf.mxu0  ;;  %v3292_v15 = vpop.f32.mrf.mxu1 }
 0x4a4   : > { %v3293_v11 = vadd.f32 %v3292_v15, %v3203_v55  ;;  %v7307_v55 = vld [vmem:[%s10721_s4 + $0xa8] sm:$0xff] }
 0x4a5   : > { %v3468_v17 = vadd.f32 %v3467_v18, %v3379_v13  ;;  %v7315_v15 = vld [vmem:[%s10721_s4 + $0xe8] sm:$0xff]  ;;  %4627 = vmatpush.bf16.msrb.mxu2 %v7307_v55 }
 0x4a6   : > { %3518 = vmatmul.bf16.gmra.mxu0 %v8088_v22  ;;  %3607 = vmatmul.bf16.gmra.mxu1 %v8090_v23 }
 0x4a7   : > { %v3942_v31 = vadd.f32 %v9458_v46, %v3468_v17  ;;  %3696 = vmatmul.bf16.gmra.mxu2 %v8093_v25  ;;  %3785 = vmatmul.bf16.gmra.mxu3 %v8095_v26 }
 0x4a8   : > { %4716 = vmatpush.bf16.msrb.mxu3 %v7315_v15 }
 0x4a9   : > { %v4070_v40 = vmax.f32 %v3942_v31, 0.0 }
 0x4aa   : > { %v3381_v21 = vpop.f32.mrf.mxu2  ;;  %v3470_v50 = vpop.f32.mrf.mxu3 }
 0x4ab   : > { %v3382_v4 = vadd.f32 %v3381_v21, %v3293_v11  ;;  %v3205_v38 = vpop.f32.mrf.mxu0  ;;  %v3294_v32 = vpop.f32.mrf.mxu1  ;;  %v9614_v28 = vpack.c.bf16 %v4070_v40, %v4066_v9  ;;  %v7291_v9 = vld [vmem:[%s10721_s4 + $0x28] sm:$0xff] }
 0x4ac   : > { %v3295_v33 = vadd.f32 %v3294_v32, %v3205_v38  ;;  %v7299_v40 = vld [vmem:[%s10721_s4 + $0x68] sm:$0xff]  ;;  %4449 = vmatpush.bf16.msrb.mxu0 %v7291_v9  ;;  %v7314_v9 = vld [vmem:[%s10721_s4 + $0xe0] sm:$0xff] }
 0x4ad   : > { %v3471_v59 = vadd.f32 %v3470_v50, %v3382_v4  ;;  %4538 = vmatpush.bf16.msrb.mxu1 %v7299_v40  ;;  %4717 = vmatpush.bf16.msrb.mxu3 %v7314_v9 }
 0x4af   : > { %v3946_v25 = vadd.f32 %v9458_v46, %v3471_v59 }
 0x4b1   : > { %v4074_v18 = vmax.f32 %v3946_v25, 0.0 }
 0x4b2   : > { %v3383_v22 = vpop.f32.mrf.mxu2  ;;  %v3472_v35 = vpop.f32.mrf.mxu3 }
 0x4b3   : > { %v3384_v23 = vadd.f32 %v3383_v22, %v3295_v33  ;;  %v3208_v36 = vpop.f32.mrf.mxu0  ;;  %v3297_v20 = vpop.f32.mrf.mxu1 }
 0x4b4   : > { %v3298_v10 = vadd.f32 %v3297_v20, %v3208_v36 }
 0x4b5   : > { %v3473_v26 = vadd.f32 %v3472_v35, %v3384_v23 }
 0x4b6   : > { %3523 = vmatmul.bf16.gmra.mxu0 %v8117_v61  ;;  %3612 = vmatmul.bf16.gmra.mxu1 %v8119_v63 }
 0x4b7   : > { %v3950_v7 = vadd.f32 %v9458_v46, %v3473_v26  ;;  %3701 = vmatmul.bf16.gmra.mxu2 %v8121_v2  ;;  %3790 = vmatmul.bf16.gmra.mxu3 %v8123_v3 }
 0x4b9   : > { %v4078_v13 = vmax.f32 %v3950_v7, 0.0 }
 0x4ba   : > { %v3386_v11 = vpop.f32.mrf.mxu2  ;;  %v3475_v61 = vpop.f32.mrf.mxu3 }
 0x4bb   : > { %v3387_v47 = vadd.f32 %v3386_v11, %v3298_v10  ;;  %v3210_v63 = vpop.f32.mrf.mxu0  ;;  %v3299_v17 = vpop.f32.mrf.mxu1  ;;  %v9628_v2 = vpack.c.bf16 %v4078_v13, %v4074_v18 }
 0x4bc   : > { %v3300_v3 = vadd.f32 %v3299_v17, %v3210_v63 }
 0x4bd   : > { %v3476_v31 = vadd.f32 %v3475_v61, %v3387_v47 }
 0x4bf   : > { %v3954_v59 = vadd.f32 %v9458_v46, %v3476_v31  ;;  %v7306_v31 = vld [vmem:[%s10721_s4 + $0xa0] sm:$0xff] }
 0x4c0   : > { %4628 = vmatpush.bf16.msrb.mxu2 %v7306_v31 }
 0x4c1   : > { %v4082_v23 = vmax.f32 %v3954_v59, 0.0 }
 0x4c2   : > { %v3388_v21 = vpop.f32.mrf.mxu2  ;;  %v3477_v50 = vpop.f32.mrf.mxu3 }
 0x4c3   : > { %v3389_v4 = vadd.f32 %v3388_v21, %v3300_v3  ;;  %v3213_v38 = vpop.f32.mrf.mxu0  ;;  %v3302_v32 = vpop.f32.mrf.mxu1 }
 0x4c4   : > { %v3303_v33 = vadd.f32 %v3302_v32, %v3213_v38  ;;  %v7290_v38 = vld [vmem:[%s10721_s4 + $0x20] sm:$0xff] }
 0x4c5   : > { %v3478_v22 = vadd.f32 %v3477_v50, %v3389_v4  ;;  %v7298_v32 = vld [vmem:[%s10721_s4 + $0x60] sm:$0xff]  ;;  %4450 = vmatpush.bf16.msrb.mxu0 %v7290_v38  ;;  %v7297_v38 = vld [vmem:[%s10721_s4 + $0x58] sm:$0xff] }
 0x4c6   : > { %3528 = vmatmul.bf16.gmra.mxu0 %v8170_v57  ;;  %3617 = vmatmul.bf16.gmra.mxu1 %v8172_v58 }
 0x4c7   : > { %v3958_v35 = vadd.f32 %v9458_v46, %v3478_v22  ;;  %3706 = vmatmul.bf16.gmra.mxu2 %v8174_v60  ;;  %3795 = vmatmul.bf16.gmra.mxu3 %v8176_v5 }
 0x4c8   : > { %4539 = vmatpush.bf16.msrb.mxu1 %v7298_v32 }
 0x4c9   : > { %v4086_v36 = vmax.f32 %v3958_v35, 0.0 }
 0x4ca   : > { %v3391_v20 = vpop.f32.mrf.mxu2  ;;  %v3480_v10 = vpop.f32.mrf.mxu3 }
 0x4cb   : > { %v3392_v25 = vadd.f32 %v3391_v20, %v3303_v33  ;;  %v3215_v26 = vpop.f32.mrf.mxu0  ;;  %v3304_v7 = vpop.f32.mrf.mxu1  ;;  %v9642_v18 = vpack.c.bf16 %v4086_v36, %v4082_v23 }
 0x4cc   : > { %v3305_v13 = vadd.f32 %v3304_v7, %v3215_v26  ;;  %4540 = vmatpush.bf16.msrb.mxu1 %v7297_v38 }
 0x4cd   : > { %v3481_v55 = vadd.f32 %v3480_v10, %v3392_v25 }
 0x4cf   : > { %v3962_v60 = vadd.f32 %v9458_v46, %v3481_v55 }
 0x4d1   : > { %v4090_v17 = vmax.f32 %v3962_v60, 0.0 }
 0x4d2   : > { %v3393_v57 = vpop.f32.mrf.mxu2  ;;  %v3482_v15 = vpop.f32.mrf.mxu3 }
 0x4d3   : > { %v3394_v58 = vadd.f32 %v3393_v57, %v3305_v13  ;;  %v3218_v11 = vpop.f32.mrf.mxu0  ;;  %v3307_v61 = vpop.f32.mrf.mxu1 }
 0x4d4   : > { %v3308_v47 = vadd.f32 %v3307_v61, %v3218_v11 }
 0x4d5   : > { %v3483_v5 = vadd.f32 %v3482_v15, %v3394_v58 }
 0x4d6   : > { %3533 = vmatmul.bf16.gmra.mxu0 %v8199_v42  ;;  %3622 = vmatmul.bf16.gmra.mxu1 %v8201_v43 }
 0x4d7   : > { %v3966_v63 = vadd.f32 %v9458_v46, %v3483_v5  ;;  %3711 = vmatmul.bf16.gmra.mxu2 %v8203_v44  ;;  %3800 = vmatmul.bf16.gmra.mxu3 %v8205_v45 }
 0x4d9   : > { %v4094_v3 = vmax.f32 %v3966_v63, 0.0 }
 0x4da   : > { %v3396_v40 = vpop.f32.mrf.mxu2  ;;  %v3485_v42 = vpop.f32.mrf.mxu3 }
 0x4db   : > { %v3397_v21 = vadd.f32 %v3396_v40, %v3308_v47  ;;  %v3220_v43 = vpop.f32.mrf.mxu0  ;;  %v3309_v50 = vpop.f32.mrf.mxu1  ;;  %v9656_v44 = vpack.c.bf16 %v4094_v3, %v4090_v17  ;;  %v7305_v40 = vld [vmem:[%s10721_s4 + $0x98] sm:$0xff] }
 0x4dc   : > { %v3310_v45 = vadd.f32 %v3309_v50, %v3220_v43  ;;  %4629 = vmatpush.bf16.msrb.mxu2 %v7305_v40 }
 0x4dd   : > { %v3486_v4 = vadd.f32 %v3485_v42, %v3397_v21  ;;  %v7313_v42 = vld [vmem:[%s10721_s4 + $0xd8] sm:$0xff] }
 0x4de   : > { %4718 = vmatpush.bf16.msrb.mxu3 %v7313_v42 }
 0x4df   : > { %v3970_v20 = vadd.f32 %v9458_v46, %v3486_v4  ;;  %v7289_v4 = vld [vmem:[%s10721_s4 + $0x18] sm:$0xff] }
 0x4e0   : > { %4451 = vmatpush.bf16.msrb.mxu0 %v7289_v4 }
 0x4e1   : > { %v4098_v26 = vmax.f32 %v3970_v20, 0.0 }
 0x4e2   : > { %v3398_v33 = vpop.f32.mrf.mxu2  ;;  %v3487_v59 = vpop.f32.mrf.mxu3 }
 0x4e3   : > { %v3399_v22 = vadd.f32 %v3398_v33, %v3310_v45  ;;  %v3223_v35 = vpop.f32.mrf.mxu0  ;;  %v3312_v23 = vpop.f32.mrf.mxu1 }
 0x4e4   : > { %v3313_v36 = vadd.f32 %v3312_v23, %v3223_v35 }
 0x4e5   : > { %v3488_v10 = vadd.f32 %v3487_v59, %v3399_v22 }
 0x4e6   : > { %3538 = vmatmul.bf16.gmra.mxu0 %v8252_v53  ;;  %3627 = vmatmul.bf16.gmra.mxu1 %v8254_v51 }
 0x4e7   : > { %v3974_v25 = vadd.f32 %v9458_v46, %v3488_v10  ;;  %3716 = vmatmul.bf16.gmra.mxu2 %v8256_v56  ;;  %3805 = vmatmul.bf16.gmra.mxu3 %v8258_v6 }
 0x4e9   : > { %v4102_v7 = vmax.f32 %v3974_v25, 0.0 }
 0x4ea   : > { %v3401_v13 = vpop.f32.mrf.mxu2  ;;  %v3490_v55 = vpop.f32.mrf.mxu3 }
 0x4eb   : > { %v3402_v57 = vadd.f32 %v3401_v13, %v3313_v36  ;;  %v3225_v15 = vpop.f32.mrf.mxu0  ;;  %v3314_v58 = vpop.f32.mrf.mxu1  ;;  %v9670_v11 = vpack.c.bf16 %v4102_v7, %v4098_v26 }
 0x4ec   : > { %v3315_v61 = vadd.f32 %v3314_v58, %v3225_v15 }
 0x4ed   : > { %v3491_v47 = vadd.f32 %v3490_v55, %v3402_v57 }
 0x4ef   : > { %v3978_v56 = vadd.f32 %v9458_v46, %v3491_v47 }
 0x4f1   : > { %v4106_v31 = vmax.f32 %v3978_v56, 0.0  ;;  %v10977_v56 = vld [vmem:[#allocation12_spill] sm:$0xff] }
 0x4f2   : > { %v3403_v53 = vpop.f32.mrf.mxu2  ;;  %v3492_v60 = vpop.f32.mrf.mxu3 }
 0x4f3   : > { %v3404_v51 = vadd.f32 %v3403_v53, %v3315_v61  ;;  %v3228_v5 = vpop.f32.mrf.mxu0  ;;  %v3317_v63 = vpop.f32.mrf.mxu1 }
 0x4f4   : > { %v3318_v17 = vadd.f32 %v3317_v63, %v3228_v5  ;;  %v10976_v63 = vld [vmem:[#allocation11_spill] sm:$0xff] }
 0x4f5   : > { %v3493_v6 = vadd.f32 %v3492_v60, %v3404_v51 }
 0x4f6   : > { %3543 = vmatmul.bf16.gmra.mxu0 %v10858_v49  ;;  %3632 = vmatmul.bf16.gmra.mxu1 %v10859_v62 }
 0x4f7   : > { %v3982_v3 = vadd.f32 %v9458_v46, %v3493_v6  ;;  %3721 = vmatmul.bf16.gmra.mxu2 %v10860_v52  ;;  %3810 = vmatmul.bf16.gmra.mxu3 %v10861_v16  ;;  %v10978_v6 = vld [vmem:[#allocation13_spill] sm:$0xff] }
 0x4f9   : > { %v4110_v9 = vmax.f32 %v3982_v3, 0.0  ;;  %v7304_v3 = vld [vmem:[%s10721_s4 + $0x90] sm:$0xff] }
 0x4fa   : > { %v3406_v21 = vpop.f32.mrf.mxu2  ;;  %v3495_v49 = vpop.f32.mrf.mxu3  ;;  %4630 = vmatpush.bf16.msrb.mxu2 %v7304_v3 }
 0x4fb   : > { %v3407_v43 = vadd.f32 %v3406_v21, %v3318_v17  ;;  %v3230_v62 = vpop.f32.mrf.mxu0  ;;  %v3319_v50 = vpop.f32.mrf.mxu1  ;;  %v9684_v52 = vpack.c.bf16 %v4110_v9, %v4106_v31  ;;  %v7312_v31 = vld [vmem:[%s10721_s4 + $0xd0] sm:$0xff] }
 0x4fc   : > { %v3320_v16 = vadd.f32 %v3319_v50, %v3230_v62  ;;  %4719 = vmatpush.bf16.msrb.mxu3 %v7312_v31 }
 0x4fd   : > { %v3496_v45 = vadd.f32 %v3495_v49, %v3407_v43 }
 0x4ff   : > { %v3986_v36 = vadd.f32 %v9458_v46, %v3496_v45  ;;  %v7296_v45 = vld [vmem:[%s10721_s4 + $0x50] sm:$0xff] }
 0x500   : > { %4541 = vmatpush.bf16.msrb.mxu1 %v7296_v45  ;;  %v10985_v45 = vld [vmem:[#allocation24_spill] sm:$0xff] }
 0x501   : > { %v4114_v25 = vmax.f32 %v3986_v36, 0.0  ;;  %v10980_v36 = vld [vmem:[#allocation15_spill] sm:$0xff] }
 0x502   : > { %v3408_v32 = vpop.f32.mrf.mxu2  ;;  %v3497_v33 = vpop.f32.mrf.mxu3 }
 0x503   : > { %v3409_v59 = vadd.f32 %v3408_v32, %v3320_v16  ;;  %v3233_v22 = vpop.f32.mrf.mxu0  ;;  %v3322_v35 = vpop.f32.mrf.mxu1  ;;  %v7288_v16 = vld [vmem:[%s10721_s4 + $0x10] sm:$0xff] }
 0x504   : > { %v3323_v23 = vadd.f32 %v3322_v35, %v3233_v22  ;;  %4452 = vmatpush.bf16.msrb.mxu0 %v7288_v16 }
 0x505   : > { %v3498_v20 = vadd.f32 %v3497_v33, %v3409_v59 }
 0x506   : > { %3548 = vmatmul.bf16.gmra.mxu0 %v10863_v54  ;;  %3637 = vmatmul.bf16.gmra.mxu1 %v10864_v30 }
 0x507   : > { %v3990_v10 = vadd.f32 %v9458_v46, %v3498_v20  ;;  %3726 = vmatmul.bf16.gmra.mxu2 %v10865_v0  ;;  %3815 = vmatmul.bf16.gmra.mxu3 %v10866_v39  ;;  %v10981_v20 = vld [vmem:[#allocation16_spill] sm:$0xff] }
 0x509   : > { %v4118_v26 = vmax.f32 %v3990_v10, 0.0  ;;  %v10982_v10 = vld [vmem:[#allocation17_spill] sm:$0xff] }
 0x50a   : > { %v3411_v7 = vpop.f32.mrf.mxu2  ;;  %v3500_v13 = vpop.f32.mrf.mxu3 }
 0x50b   : > { %v3412_v55 = vadd.f32 %v3411_v7, %v3323_v23  ;;  %v3235_v57 = vpop.f32.mrf.mxu0  ;;  %v3324_v15 = vpop.f32.mrf.mxu1  ;;  %v9698_v58 = vpack.c.bf16 %v4118_v26, %v4114_v25  ;;  %v10979_v23 = vld [vmem:[#allocation14_spill] sm:$0xff] }
 0x50c   : > { %v3325_v61 = vadd.f32 %v3324_v15, %v3235_v57 }
 0x50d   : > { %v3501_v47 = vadd.f32 %v3500_v13, %v3412_v55 }
 0x50f   : > { %v3994_v0 = vadd.f32 %v9458_v46, %v3501_v47 }
 0x511   : > { %v4122_v9 = vmax.f32 %v3994_v0, 0.0  ;;  %v10984_v0 = vld [vmem:[#allocation22_spill] sm:$0xff] }
 0x512   : > { %v3413_v54 = vpop.f32.mrf.mxu2  ;;  %v3502_v53 = vpop.f32.mrf.mxu3 }
 0x513   : > { %v3414_v30 = vadd.f32 %v3413_v54, %v3325_v61  ;;  %v3514_v60 = vpop.f32.mrf.mxu0  ;;  %v3603_v51 = vpop.f32.mrf.mxu1 }
 0x514   : > { %v3604_v5 = vadd.f32 %v3603_v51, %v3514_v60 }
 0x515   : > { %v3503_v39 = vadd.f32 %v3502_v53, %v3414_v30 }
 0x516   : > { %3553 = vmatmul.bf16.gmra.mxu0 %v10868_v1  ;;  %3642 = vmatmul.bf16.gmra.mxu1 %v10976_v63  ;;  %v7311_v63 = vld [vmem:[%s10721_s4 + $0xc8] sm:$0xff] }
 0x517   : > { %v3998_v17 = vadd.f32 %v9458_v46, %v3503_v39  ;;  %3731 = vmatmul.bf16.gmra.mxu2 %v10977_v56  ;;  %3820 = vmatmul.bf16.gmra.mxu3 %v10978_v6  ;;  %v7303_v39 = vld [vmem:[%s10721_s4 + $0x88] sm:$0xff] }
 0x518   : > { %4631 = vmatpush.bf16.msrb.mxu2 %v7303_v39  ;;  %4720 = vmatpush.bf16.msrb.mxu3 %v7311_v63  ;;  %v7294_v63 = vld [vmem:[%s10721_s4 + $0x40] sm:$0xff] }
 0x519   : > { %v4126_v40 = vmax.f32 %v3998_v17, 0.0 }
 0x51a   : > { %v3692_v1 = vpop.f32.mrf.mxu2  ;;  %v3781_v42 = vpop.f32.mrf.mxu3 }
 0x51b   : > { %v3693_v21 = vadd.f32 %v3692_v1, %v3604_v5  ;;  %v3516_v46 = vpop.f32.mrf.mxu0  ;;  %v3605_v49 = vpop.f32.mrf.mxu1  ;;  %v9712_v43 = vpack.c.bf16 %v4126_v40, %v4122_v9  ;;  %v10983_v5 = vld [vmem:[#allocation21_spill] sm:$0xff]  ;;  %v7287_v9 = vld [vmem:[%s10721_s4 + $0x8] sm:$0xff] }
 0x51c   : > { %v3606_v62 = vadd.f32 %v3605_v49, %v3516_v46  ;;  %v7295_v40 = vld [vmem:[%s10721_s4 + $0x48] sm:$0xff]  ;;  %4453 = vmatpush.bf16.msrb.mxu0 %v7287_v9 }
 0x51d   : > { %v9714_v50 = vadd.f32 %v3781_v42, %v3693_v21  ;;  %4542 = vmatpush.bf16.msrb.mxu1 %v7295_v40  ;;  %v10990_v40 = vld [vmem:[#allocation34_spill] sm:$0xff] }
 0x521   : > { %4543 = vmatpush.bf16.msrb.mxu1 %v7294_v63 }
 0x522   : > { %v3694_v4 = vpop.f32.mrf.mxu2  ;;  %v3783_v38 = vpop.f32.mrf.mxu3 }
 0x523   : > { %v3695_v32 = vadd.f32 %v3694_v4, %v3606_v62  ;;  %v3519_v33 = vpop.f32.mrf.mxu0  ;;  %v3608_v59 = vpop.f32.mrf.mxu1  ;;  %v10986_v4 = vld [vmem:[#allocation25_spill] sm:$0xff] }
 0x524   : > { %v3609_v22 = vadd.f32 %v3608_v59, %v3519_v33 }
 0x525   : > { %v9722_v35 = vadd.f32 %v3783_v38, %v3695_v32  ;;  %v10987_v38 = vld [vmem:[#allocation26_spill] sm:$0xff]  ;;  %v10988_v32 = vld [vmem:[#allocation27_spill] sm:$0xff] }
 0x526   : > { %3558 = vmatmul.bf16.gmra.mxu0 %v10979_v23  ;;  %3647 = vmatmul.bf16.gmra.mxu1 %v10980_v36 }
 0x527   : > { %3736 = vmatmul.bf16.gmra.mxu2 %v10981_v20  ;;  %3825 = vmatmul.bf16.gmra.mxu3 %v10982_v10 }
 0x52a   : > { %v3697_v25 = vpop.f32.mrf.mxu2  ;;  %v3786_v26 = vpop.f32.mrf.mxu3 }
 0x52b   : > { %v3698_v7 = vadd.f32 %v3697_v25, %v3609_v22  ;;  %v3521_v13 = vpop.f32.mrf.mxu0  ;;  %v3610_v55 = vpop.f32.mrf.mxu1 }
 0x52c   : > { %v3611_v57 = vadd.f32 %v3610_v55, %v3521_v13 }
 0x52d   : > { %v9728_v15 = vadd.f32 %v3786_v26, %v3698_v7 }
 0x532   : > { %v3699_v61 = vpop.f32.mrf.mxu2  ;;  %v3788_v47 = vpop.f32.mrf.mxu3 }
 0x533   : > { %v3700_v54 = vadd.f32 %v3699_v61, %v3611_v57  ;;  %v3524_v53 = vpop.f32.mrf.mxu0  ;;  %v3613_v30 = vpop.f32.mrf.mxu1 }
 0x534   : > { %v3614_v60 = vadd.f32 %v3613_v30, %v3524_v53  ;;  %v7310_v53 = vld [vmem:[%s10721_s4 + $0xc0] sm:$0xff] }
 0x535   : > { %v9730_v51 = vadd.f32 %v3788_v47, %v3700_v54  ;;  %v10989_v47 = vld [vmem:[#allocation32_spill] sm:$0xff]  ;;  %v7302_v54 = vld [vmem:[%s10721_s4 + $0x80] sm:$0xff]  ;;  %4721 = vmatpush.bf16.msrb.mxu3 %v7310_v53 }
 0x536   : > { %3563 = vmatmul.bf16.gmra.mxu0 %v10879_v29  ;;  %3652 = vmatmul.bf16.gmra.mxu1 %v10880_v12 }
 0x537   : > { %3741 = vmatmul.bf16.gmra.mxu2 %v10983_v5  ;;  %3830 = vmatmul.bf16.gmra.mxu3 %v10984_v0 }
 0x538   : > { %4632 = vmatpush.bf16.msrb.mxu2 %v7302_v54 }
 0x53a   : > { %v3702_v17 = vpop.f32.mrf.mxu2  ;;  %v3791_v56 = vpop.f32.mrf.mxu3 }
 0x53b   : > { %v3703_v6 = vadd.f32 %v3702_v17, %v3614_v60  ;;  %v3526_v29 = vpop.f32.mrf.mxu0  ;;  %v3615_v3 = vpop.f32.mrf.mxu1 }
 0x53c   : > { %v3616_v12 = vadd.f32 %v3615_v3, %v3526_v29 }
 0x53d   : > { %v9742_v31 = vadd.f32 %v3791_v56, %v3703_v6 }
 0x542   : > { %v3704_v1 = vpop.f32.mrf.mxu2  ;;  %v3793_v42 = vpop.f32.mrf.mxu3 }
 0x543   : > { %v3705_v21 = vadd.f32 %v3704_v1, %v3616_v12  ;;  %v3529_v46 = vpop.f32.mrf.mxu0  ;;  %v3618_v49 = vpop.f32.mrf.mxu1  ;;  %v10991_v1 = vld [vmem:[#allocation35_spill] sm:$0xff] }
 0x544   : > { %v3619_v62 = vadd.f32 %v3618_v49, %v3529_v46 }
 0x545   : > { %v9750_v16 = vadd.f32 %v3793_v42, %v3705_v21  ;;  %v10992_v42 = vld [vmem:[#allocation36_spill] sm:$0xff]  ;;  %v10993_v21 = vld [vmem:[#allocation37_spill] sm:$0xff] }
 0x546   : > { %3568 = vmatmul.bf16.gmra.mxu0 %v10985_v45  ;;  %3657 = vmatmul.bf16.gmra.mxu1 %v10986_v4 }
 0x547   : > { %3746 = vmatmul.bf16.gmra.mxu2 %v10987_v38  ;;  %3835 = vmatmul.bf16.gmra.mxu3 %v10988_v32 }
 0x54a   : > { %v3707_v33 = vpop.f32.mrf.mxu2  ;;  %v3796_v59 = vpop.f32.mrf.mxu3 }
 0x54b   : > { %v3708_v22 = vadd.f32 %v3707_v33, %v3619_v62  ;;  %v3531_v23 = vpop.f32.mrf.mxu0  ;;  %v3620_v36 = vpop.f32.mrf.mxu1 }
 0x54c   : > { %v3621_v20 = vadd.f32 %v3620_v36, %v3531_v23 }
 0x54d   : > { %v9756_v10 = vadd.f32 %v3796_v59, %v3708_v22 }
 0x552   : > { %v3709_v25 = vpop.f32.mrf.mxu2  ;;  %v3798_v26 = vpop.f32.mrf.mxu3 }
 0x553   : > { %v3710_v7 = vadd.f32 %v3709_v25, %v3621_v20  ;;  %v3534_v13 = vpop.f32.mrf.mxu0  ;;  %v3623_v55 = vpop.f32.mrf.mxu1 }
 0x554   : > { %v3624_v57 = vadd.f32 %v3623_v55, %v3534_v13 }
 0x555   : > { %v9758_v61 = vadd.f32 %v3798_v26, %v3710_v7 }
 0x556   : > { %3573 = vmatmul.bf16.gmra.mxu0 %v10887_v24  ;;  %3662 = vmatmul.bf16.gmra.mxu1 %v10888_v8 }
 0x557   : > { %3751 = vmatmul.bf16.gmra.mxu2 %v10926_v41  ;;  %3840 = vmatmul.bf16.gmra.mxu3 %v10989_v47  ;;  %v7286_v41 = vld [vmem:[%s10721_s4] sm:$0xff] }
 0x558   : > { %4454 = vmatpush.bf16.msrb.mxu0 %v7286_v41 }
 0x55a   : > { %v3712_v30 = vpop.f32.mrf.mxu2  ;;  %v3801_v60 = vpop.f32.mrf.mxu3 }
 0x55b   : > { %v3713_v5 = vadd.f32 %v3712_v30, %v3624_v57  ;;  %v3536_v24 = vpop.f32.mrf.mxu0  ;;  %v3625_v0 = vpop.f32.mrf.mxu1 }
 0x55c   : > { %v3626_v8 = vadd.f32 %v3625_v0, %v3536_v24 }
 0x55d   : > { %v9770_v39 = vadd.f32 %v3801_v60, %v3713_v5 }
 0x562   : > { %v3714_v17 = vpop.f32.mrf.mxu2  ;;  %v3803_v56 = vpop.f32.mrf.mxu3 }
 0x563   : > { %v3715_v6 = vadd.f32 %v3714_v17, %v3626_v8  ;;  %v3539_v29 = vpop.f32.mrf.mxu0  ;;  %v3628_v3 = vpop.f32.mrf.mxu1  ;;  %v10997_v8 = vld [vmem:[#allocation47_spill] sm:$0xff] }
 0x564   : > { %v3629_v12 = vadd.f32 %v3628_v3, %v3539_v29 }
 0x565   : > { %v9778_v9 = vadd.f32 %v3803_v56, %v3715_v6 }
 0x566   : > { %3578 = vmatmul.bf16.gmra.mxu0 %v10990_v40  ;;  %3667 = vmatmul.bf16.gmra.mxu1 %v10991_v1 }
 0x567   : > { %3756 = vmatmul.bf16.gmra.mxu2 %v10992_v42  ;;  %3845 = vmatmul.bf16.gmra.mxu3 %v10993_v21 }
 0x56a   : > { %v3717_v46 = vpop.f32.mrf.mxu2  ;;  %v3806_v49 = vpop.f32.mrf.mxu3 }
 0x56b   : > { %v3718_v62 = vadd.f32 %v3717_v46, %v3629_v12  ;;  %v3541_v45 = vpop.f32.mrf.mxu0  ;;  %v3630_v4 = vpop.f32.mrf.mxu1 }
 0x56c   : > { %v3631_v38 = vadd.f32 %v3630_v4, %v3541_v45  ;;  %v10999_v45 = vld [vmem:[#allocation6_spill] sm:$0xff]  ;;  %v11000_v4 = vld [vmem:[#allocation5_spill] sm:$0xff] }
 0x56d   : > { %v9784_v32 = vadd.f32 %v3806_v49, %v3718_v62  ;;  %v10998_v62 = vld [vmem:[#allocation18_spill] sm:$0xff] }
 0x572   : > { %v3719_v33 = vpop.f32.mrf.mxu2  ;;  %v3808_v59 = vpop.f32.mrf.mxu3 }
 0x573   : > { %v3720_v22 = vadd.f32 %v3719_v33, %v3631_v38  ;;  %v3544_v23 = vpop.f32.mrf.mxu0  ;;  %v3633_v36 = vpop.f32.mrf.mxu1  ;;  %v11001_v38 = vld [vmem:[#allocation72_spill] sm:$0xff] }
 0x574   : > { %v3634_v20 = vadd.f32 %v3633_v36, %v3544_v23 }
 0x575   : > { %v9786_v25 = vadd.f32 %v3808_v59, %v3720_v22 }
 0x576   : > { %3583 = vmatmul.bf16.gmra.mxu0 %v10894_v37  ;;  %3672 = vmatmul.bf16.gmra.mxu1 %v10895_v48  ;;  %v10994_v48 = vld [vmem:[#allocation44_spill] sm:$0xff] }
 0x577   : > { %3761 = vmatmul.bf16.gmra.mxu2 %v10933_v19  ;;  %3850 = vmatmul.bf16.gmra.mxu3 %v10934_v14  ;;  %v10995_v19 = vld [vmem:[#allocation45_spill] sm:$0xff]  ;;  %v10996_v14 = vld [vmem:[#allocation46_spill] sm:$0xff] }
 0x57a   : > { %v3722_v26 = vpop.f32.mrf.mxu2  ;;  %v3811_v7 = vpop.f32.mrf.mxu3 }
 0x57b   : > { %v3723_v13 = vadd.f32 %v3722_v26, %v3634_v20  ;;  %v3546_v55 = vpop.f32.mrf.mxu0  ;;  %v3635_v57 = vpop.f32.mrf.mxu1 }
 0x57c   : > { %v3636_v47 = vadd.f32 %v3635_v57, %v3546_v55 }
 0x57d   : > { %v9792_v54 = vadd.f32 %v3811_v7, %v3723_v13 }
 0x582   : > { %v3724_v53 = vpop.f32.mrf.mxu2  ;;  %v3813_v30 = vpop.f32.mrf.mxu3 }
 0x583   : > { %v3725_v60 = vadd.f32 %v3724_v53, %v3636_v47  ;;  %v3549_v5 = vpop.f32.mrf.mxu0  ;;  %v3638_v24 = vpop.f32.mrf.mxu1 }
 0x584   : > { %v3639_v37 = vadd.f32 %v3638_v24, %v3549_v5  ;;  %v11003_v5 = vld [vmem:[#allocation7_spill] sm:$0xff]  ;;  %v11004_v24 = vld [vmem:[#allocation60_spill] sm:$0xff] }
 0x585   : > { %v9794_v0 = vadd.f32 %v3813_v30, %v3725_v60  ;;  %v11002_v60 = vld [vmem:[#allocation23_spill] sm:$0xff] }
 0x586   : > { %3588 = vmatmul.bf16.gmra.mxu0 %v10994_v48  ;;  %3677 = vmatmul.bf16.gmra.mxu1 %v10995_v19 }
 0x587   : > { %3766 = vmatmul.bf16.gmra.mxu2 %v10996_v14  ;;  %3855 = vmatmul.bf16.gmra.mxu3 %v10997_v8 }
 0x58a   : > { %v3727_v41 = vpop.f32.mrf.mxu2  ;;  %v3816_v63 = vpop.f32.mrf.mxu3 }
 0x58b   : > { %v3728_v17 = vadd.f32 %v3727_v41, %v3639_v37  ;;  %v3551_v56 = vpop.f32.mrf.mxu0  ;;  %v3640_v6 = vpop.f32.mrf.mxu1  ;;  %v11005_v37 = vld [vmem:[#allocation73_spill] sm:$0xff] }
 0x58c   : > { %v3641_v29 = vadd.f32 %v3640_v6, %v3551_v56 }
 0x58d   : > { %v9800_v3 = vadd.f32 %v3816_v63, %v3728_v17 }
 0x592   : > { %v3729_v12 = vpop.f32.mrf.mxu2  ;;  %v3818_v40 = vpop.f32.mrf.mxu3 }
 0x593   : > { %v3730_v1 = vadd.f32 %v3729_v12, %v3641_v29  ;;  %v3554_v42 = vpop.f32.mrf.mxu0  ;;  %v3643_v21 = vpop.f32.mrf.mxu1 }
 0x594   : > { %v3644_v46 = vadd.f32 %v3643_v21, %v3554_v42  ;;  %v11006_v21 = vld [vmem:[#allocation28_spill] sm:$0xff] }
 0x595   : > { %v9802_v49 = vadd.f32 %v3818_v40, %v3730_v1 }
 0x596   : > { %4455 = vmatmul.bf16.vlgmr.msrb.gmra.mxu0 %v10998_v62  ;;  %4544 = vmatmul.bf16.vlgmr.msrb.gmra.mxu1 %v10999_v45  ;;  %v11008_v62 = vld [vmem:[#allocation61_spill] sm:$0xff]  ;;  %v11009_v45 = vld [vmem:[#allocation74_spill] sm:$0xff] }
 0x597   : > { %4633 = vmatmul.bf16.vlgmr.msrb.gmra.mxu2 %v11000_v4  ;;  %4722 = vmatmul.bf16.vlgmr.msrb.gmra.mxu3 %v11001_v38 }
 0x59a   : > { %v3732_v33 = vpop.f32.mrf.mxu2  ;;  %v3821_v59 = vpop.f32.mrf.mxu3 }
 0x59b   : > { %v3733_v22 = vadd.f32 %v3732_v33, %v3644_v46  ;;  %v3556_v23 = vpop.f32.mrf.mxu0  ;;  %v3645_v36 = vpop.f32.mrf.mxu1  ;;  %v11007_v46 = vld [vmem:[#allocation8_spill] sm:$0xff] }
 0x59c   : > { %v3646_v20 = vadd.f32 %v3645_v36, %v3556_v23 }
 0x59d   : > { %v9808_v26 = vadd.f32 %v3821_v59, %v3733_v22 }
 0x5a2   : > { %v3734_v7 = vpop.f32.mrf.mxu2  ;;  %v3823_v13 = vpop.f32.mrf.mxu3 }
 0x5a3   : > { %v3735_v55 = vadd.f32 %v3734_v7, %v3646_v20  ;;  %v3559_v57 = vpop.f32.mrf.mxu0  ;;  %v3648_v47 = vpop.f32.mrf.mxu1 }
 0x5a4   : > { %v3649_v53 = vadd.f32 %v3648_v47, %v3559_v57 }
 0x5a5   : > { %v9810_v30 = vadd.f32 %v3823_v13, %v3735_v55 }
 0x5a6   : > { %4460 = vmatmul.bf16.gmra.mxu0 %v11002_v60  ;;  %4549 = vmatmul.bf16.gmra.mxu1 %v11003_v5  ;;  %v11010_v60 = vld [vmem:[#allocation33_spill] sm:$0xff] }
 0x5a7   : > { %4638 = vmatmul.bf16.gmra.mxu2 %v11004_v24  ;;  %4727 = vmatmul.bf16.gmra.mxu3 %v11005_v37  ;;  %v11011_v5 = vld [vmem:[#allocation9_spill] sm:$0xff]  ;;  %v11012_v24 = vld [vmem:[#allocation31_spill] sm:$0xff] }
 0x5a8   : > { %v11013_v37 = vld [vmem:[#allocation75_spill] sm:$0xff] }
 0x5aa   : > { %v3737_v48 = vpop.f32.mrf.mxu2  ;;  %v3826_v19 = vpop.f32.mrf.mxu3 }
 0x5ab   : > { %v3738_v14 = vadd.f32 %v3737_v48, %v3649_v53  ;;  %v3561_v8 = vpop.f32.mrf.mxu0  ;;  %v3650_v41 = vpop.f32.mrf.mxu1 }
 0x5ac   : > { %v3651_v63 = vadd.f32 %v3650_v41, %v3561_v8 }
 0x5ad   : > { %v9816_v17 = vadd.f32 %v3826_v19, %v3738_v14 }
 0x5b2   : > { %v3739_v56 = vpop.f32.mrf.mxu2  ;;  %v3828_v6 = vpop.f32.mrf.mxu3 }
 0x5b3   : > { %v3740_v29 = vadd.f32 %v3739_v56, %v3651_v63  ;;  %v3564_v12 = vpop.f32.mrf.mxu0  ;;  %v3653_v40 = vpop.f32.mrf.mxu1 }
 0x5b4   : > { %v3654_v1 = vadd.f32 %v3653_v40, %v3564_v12 }
 0x5b5   : > { %v9818_v42 = vadd.f32 %v3828_v6, %v3740_v29 }
 0x5b6   : > { %4465 = vmatmul.bf16.gmra.mxu0 %v11006_v21  ;;  %4554 = vmatmul.bf16.gmra.mxu1 %v11007_v46 }
 0x5b7   : > { %4643 = vmatmul.bf16.gmra.mxu2 %v11008_v62  ;;  %4732 = vmatmul.bf16.gmra.mxu3 %v11009_v45  ;;  %v11014_v62 = vld [vmem:[#allocation38_spill] sm:$0xff] }
 0x5b8   : > { %v11015_v45 = vld [vmem:[#allocation10_spill] sm:$0xff] }
 0x5ba   : > { %v3742_v4 = vpop.f32.mrf.mxu2  ;;  %v3831_v38 = vpop.f32.mrf.mxu3 }
 0x5bb   : > { %v3743_v33 = vadd.f32 %v3742_v4, %v3654_v1  ;;  %v3566_v59 = vpop.f32.mrf.mxu0  ;;  %v3655_v22 = vpop.f32.mrf.mxu1  ;;  %v11016_v4 = vld [vmem:[#allocation62_spill] sm:$0xff] }
 0x5bc   : > { %v3656_v23 = vadd.f32 %v3655_v22, %v3566_v59 }
 0x5bd   : > { %v9824_v36 = vadd.f32 %v3831_v38, %v3743_v33  ;;  %v11017_v38 = vld [vmem:[#allocation76_spill] sm:$0xff] }
 0x5c2   : > { %v3744_v20 = vpop.f32.mrf.mxu2  ;;  %v3833_v7 = vpop.f32.mrf.mxu3 }
 0x5c3   : > { %v3745_v13 = vadd.f32 %v3744_v20, %v3656_v23  ;;  %v3569_v55 = vpop.f32.mrf.mxu0  ;;  %v3658_v57 = vpop.f32.mrf.mxu1 }
 0x5c4   : > { %v3659_v47 = vadd.f32 %v3658_v57, %v3569_v55 }
 0x5c5   : > { %v9826_v53 = vadd.f32 %v3833_v7, %v3745_v13 }
 0x5c6   : > { %4470 = vmatmul.bf16.gmra.mxu0 %v11010_v60  ;;  %4559 = vmatmul.bf16.gmra.mxu1 %v11011_v5 }
 0x5c7   : > { %4648 = vmatmul.bf16.gmra.mxu2 %v11012_v24  ;;  %4737 = vmatmul.bf16.gmra.mxu3 %v11013_v37 }
 0x5ca   : > { %v3747_v48 = vpop.f32.mrf.mxu2  ;;  %v3836_v19 = vpop.f32.mrf.mxu3 }
 0x5cb   : > { %v3748_v14 = vadd.f32 %v3747_v48, %v3659_v47  ;;  %v3571_v8 = vpop.f32.mrf.mxu0  ;;  %v3660_v41 = vpop.f32.mrf.mxu1  ;;  %v11018_v48 = vld [vmem:[#allocation43_spill] sm:$0xff] }
 0x5cc   : > { %v3661_v63 = vadd.f32 %v3660_v41, %v3571_v8  ;;  %v11021_v8 = vld [vmem:[#allocation77_spill] sm:$0xff] }
 0x5cd   : > { %v9832_v56 = vadd.f32 %v3836_v19, %v3748_v14  ;;  %v11019_v19 = vld [vmem:[#allocation19_spill] sm:$0xff]  ;;  %v11020_v14 = vld [vmem:[#allocation41_spill] sm:$0xff] }
 0x5d2   : > { %v3749_v6 = vpop.f32.mrf.mxu2  ;;  %v3838_v29 = vpop.f32.mrf.mxu3 }
 0x5d3   : > { %v3750_v12 = vadd.f32 %v3749_v6, %v3661_v63  ;;  %v3574_v40 = vpop.f32.mrf.mxu0  ;;  %v3663_v1 = vpop.f32.mrf.mxu1 }
 0x5d4   : > { %v3664_v21 = vadd.f32 %v3663_v1, %v3574_v40 }
 0x5d5   : > { %v9834_v46 = vadd.f32 %v3838_v29, %v3750_v12 }
 0x5d6   : > { %4475 = vmatmul.bf16.gmra.mxu0 %v11014_v62  ;;  %4564 = vmatmul.bf16.gmra.mxu1 %v11015_v45 }
 0x5d7   : > { %4653 = vmatmul.bf16.gmra.mxu2 %v11016_v4  ;;  %4742 = vmatmul.bf16.gmra.mxu3 %v11017_v38 }
 0x5da   : > { %v3752_v33 = vpop.f32.mrf.mxu2  ;;  %v3841_v59 = vpop.f32.mrf.mxu3 }
 0x5db   : > { %v3753_v22 = vadd.f32 %v3752_v33, %v3664_v21  ;;  %v3576_v23 = vpop.f32.mrf.mxu0  ;;  %v3665_v20 = vpop.f32.mrf.mxu1 }
 0x5dc   : > { %v3666_v7 = vadd.f32 %v3665_v20, %v3576_v23  ;;  %v11024_v23 = vld [vmem:[#allocation20_spill] sm:$0xff]  ;;  %v11025_v20 = vld [vmem:[#allocation42_spill] sm:$0xff] }
 0x5dd   : > { %v9840_v13 = vadd.f32 %v3841_v59, %v3753_v22  ;;  %v11023_v22 = vld [vmem:[#allocation48_spill] sm:$0xff] }
 0x5e2   : > { %v3754_v55 = vpop.f32.mrf.mxu2  ;;  %v3843_v57 = vpop.f32.mrf.mxu3 }
 0x5e3   : > { %v3755_v47 = vadd.f32 %v3754_v55, %v3666_v7  ;;  %v3579_v60 = vpop.f32.mrf.mxu0  ;;  %v3668_v5 = vpop.f32.mrf.mxu1 }
 0x5e4   : > { %v3669_v24 = vadd.f32 %v3668_v5, %v3579_v60 }
 0x5e5   : > { %v9842_v37 = vadd.f32 %v3843_v57, %v3755_v47 }
 0x5e6   : > { %4480 = vmatmul.bf16.gmra.mxu0 %v11018_v48  ;;  %4569 = vmatmul.bf16.gmra.mxu1 %v11019_v19 }
 0x5e7   : > { %4658 = vmatmul.bf16.gmra.mxu2 %v11020_v14  ;;  %4747 = vmatmul.bf16.gmra.mxu3 %v11021_v8 }
 0x5ea   : > { %v3757_v41 = vpop.f32.mrf.mxu2  ;;  %v3846_v63 = vpop.f32.mrf.mxu3 }
 0x5eb   : > { %v3758_v6 = vadd.f32 %v3757_v41, %v3669_v24  ;;  %v3581_v29 = vpop.f32.mrf.mxu0  ;;  %v3670_v12 = vpop.f32.mrf.mxu1 }
 0x5ec   : > { %v3671_v40 = vadd.f32 %v3670_v12, %v3581_v29  ;;  %v11027_v29 = vld [vmem:[#allocation49_spill] sm:$0xff] }
 0x5ed   : > { %v9848_v1 = vadd.f32 %v3846_v63, %v3758_v6  ;;  %v11028_v12 = vld [vmem:[#allocation29_spill] sm:$0xff] }
 0x5ef   : > { %11022 = vst [vmem:[#allocation11_spill] sm:$0xff] %v9848_v1 }
 0x5f2   : > { %v3759_v21 = vpop.f32.mrf.mxu2  ;;  %v3848_v62 = vpop.f32.mrf.mxu3 }
 0x5f3   : > { %v3760_v45 = vadd.f32 %v3759_v21, %v3671_v40  ;;  %v3584_v4 = vpop.f32.mrf.mxu0  ;;  %v3673_v38 = vpop.f32.mrf.mxu1 }
 0x5f4   : > { %v3674_v33 = vadd.f32 %v3673_v38, %v3584_v4 }
 0x5f5   : > { %v9850_v59 = vadd.f32 %v3848_v62, %v3760_v45 }
 0x5f6   : > { %4485 = vmatmul.bf16.gmra.mxu0 %v11023_v22  ;;  %4574 = vmatmul.bf16.gmra.mxu1 %v11024_v23 }
 0x5f7   : > { %4663 = vmatmul.bf16.gmra.mxu2 %v11025_v20  ;;  %4752 = vmatmul.bf16.gmra.mxu3 %v9586_v27  ;;  %v11029_v27 = vld [vmem:[#allocation63_spill] sm:$0xff] }
 0x5fa   : > { %v3762_v7 = vpop.f32.mrf.mxu2  ;;  %v3851_v55 = vpop.f32.mrf.mxu3 }
 0x5fb   : > { %v3763_v57 = vadd.f32 %v3762_v7, %v3674_v33  ;;  %v3586_v47 = vpop.f32.mrf.mxu0  ;;  %v3675_v60 = vpop.f32.mrf.mxu1 }
 0x5fc   : > { %v3676_v5 = vadd.f32 %v3675_v60, %v3586_v47  ;;  %v11031_v47 = vld [vmem:[#allocation50_spill] sm:$0xff] }
 0x5fd   : > { %v9856_v24 = vadd.f32 %v3851_v55, %v3763_v57  ;;  %v11032_v60 = vld [vmem:[#allocation30_spill] sm:$0xff] }
 0x602   : > { %v3764_v48 = vpop.f32.mrf.mxu2  ;;  %v3853_v19 = vpop.f32.mrf.mxu3 }
 0x603   : > { %v3765_v14 = vadd.f32 %v3764_v48, %v3676_v5  ;;  %v3589_v8 = vpop.f32.mrf.mxu0  ;;  %v3678_v41 = vpop.f32.mrf.mxu1 }
 0x604   : > { %v3679_v63 = vadd.f32 %v3678_v41, %v3589_v8 }
 0x605   : > { %v9858_v6 = vadd.f32 %v3853_v19, %v3765_v14 }
 0x606   : > { %4490 = vmatmul.bf16.gmra.mxu0 %v11027_v29  ;;  %4579 = vmatmul.bf16.gmra.mxu1 %v11028_v12 }
 0x607   : > { %11026 = vst [vmem:[#allocation12_spill] sm:$0xff] %v9858_v6  ;;  %4668 = vmatmul.bf16.gmra.mxu2 %v11029_v27  ;;  %4757 = vmatmul.bf16.gmra.mxu3 %v9600_v34  ;;  %v11033_v34 = vld [vmem:[#allocation64_spill] sm:$0xff] }
 0x60a   : > { %v3767_v40 = vpop.f32.mrf.mxu2  ;;  %v3856_v21 = vpop.f32.mrf.mxu3 }
 0x60b   : > { %v3768_v62 = vadd.f32 %v3767_v40, %v3679_v63  ;;  %v3591_v45 = vpop.f32.mrf.mxu0  ;;  %v3680_v4 = vpop.f32.mrf.mxu1 }
 0x60c   : > { %v3681_v38 = vadd.f32 %v3680_v4, %v3591_v45  ;;  %v11034_v4 = vld [vmem:[#allocation51_spill] sm:$0xff] }
 0x60d   : > { %v9864_v33 = vadd.f32 %v3856_v21, %v3768_v62 }
 0x612   : > { %v3769_v22 = vpop.f32.mrf.mxu2  ;;  %v3858_v23 = vpop.f32.mrf.mxu3 }
 0x613   : > { %v3770_v20 = vadd.f32 %v3769_v22, %v3681_v38  ;;  %v4456_v7 = vpop.f32.mrf.mxu0  ;;  %v4545_v55 = vpop.f32.mrf.mxu1  ;;  %v11035_v38 = vld [vmem:[#allocation39_spill] sm:$0xff]  ;;  %v11036_v22 = vld [vmem:[#allocation65_spill] sm:$0xff] }
 0x614   : > { %v4546_v5 = vadd.f32 %v4545_v55, %v4456_v7 }
 0x615   : > { %v9866_v57 = vadd.f32 %v3858_v23, %v3770_v20 }
 0x616   : > { %4495 = vmatmul.bf16.gmra.mxu0 %v11031_v47  ;;  %4584 = vmatmul.bf16.gmra.mxu1 %v11032_v60 }
 0x617   : > { %11030 = vst [vmem:[#allocation13_spill] sm:$0xff] %v9866_v57  ;;  %4673 = vmatmul.bf16.gmra.mxu2 %v11033_v34  ;;  %4762 = vmatmul.bf16.gmra.mxu3 %v9614_v28 }
 0x61a   : > { %v4634_v48 = vpop.f32.mrf.mxu2  ;;  %v4723_v19 = vpop.f32.mrf.mxu3 }
 0x61b   : > { %v4635_v14 = vadd.f32 %v4634_v48, %v4546_v5  ;;  %v4458_v8 = vpop.f32.mrf.mxu0  ;;  %v4547_v41 = vpop.f32.mrf.mxu1 }
 0x61c   : > { %v4548_v12 = vadd.f32 %v4547_v41, %v4458_v8 }
 0x61d   : > { %v9872_v63 = vadd.f32 %v4723_v19, %v4635_v14 }
 0x61f   : > { %v4804_v29 = vsel %vm4803_vm3, %v9872_v63, -inf }
 0x620   : > { %4805 = vmax.xlane.f32.xlu0 %v4804_v29 }
 0x622   : > { %v4636_v27 = vpop.f32.mrf.mxu2  ;;  %v4725_v40 = vpop.f32.mrf.mxu3 }
 0x623   : > { %v4637_v21 = vadd.f32 %v4636_v27, %v4548_v12  ;;  %v4461_v62 = vpop.f32.mrf.mxu0  ;;  %v4550_v45 = vpop.f32.mrf.mxu1  ;;  %v11037_v27 = vld [vmem:[#allocation52_spill] sm:$0xff] }
 0x624   : > { %v4551_v20 = vadd.f32 %v4550_v45, %v4461_v62 }
 0x625   : > { %v9876_v28 = vadd.f32 %v4725_v40, %v4637_v21  ;;  %v11038_v40 = vld [vmem:[#allocation40_spill] sm:$0xff]  ;;  %v11039_v21 = vld [vmem:[#allocation66_spill] sm:$0xff] }
 0x626   : > { %4500 = vmatmul.bf16.gmra.mxu0 %v11034_v4  ;;  %4589 = vmatmul.bf16.gmra.mxu1 %v11035_v38 }
 0x627   : > { %4678 = vmatmul.bf16.gmra.mxu2 %v11036_v22  ;;  %4767 = vmatmul.bf16.gmra.mxu3 %v9628_v2  ;;  %v4807_v23 = vsel %vm4803_vm3, %v9876_v28, -inf }
 0x628   : > { %4808 = vmax.xlane.f32.xlu1 %v4807_v23 }
 0x62a   : > { %v4639_v7 = vpop.f32.mrf.mxu2  ;;  %v4728_v55 = vpop.f32.mrf.mxu3 }
 0x62b   : > { %v4640_v47 = vadd.f32 %v4639_v7, %v4551_v20  ;;  %v4463_v60 = vpop.f32.mrf.mxu0  ;;  %v4552_v34 = vpop.f32.mrf.mxu1 }
 0x62c   : > { %v4553_v19 = vadd.f32 %v4552_v34, %v4463_v60 }
 0x62d   : > { %v9884_v5 = vadd.f32 %v4728_v55, %v4640_v47 }
 0x62f   : > { %v4810_v48 = vsel %vm4803_vm3, %v9884_v5, -inf }
 0x630   : > { %4811 = vmax.xlane.f32.xlu2 %v4810_v48 }
 0x632   : > { %v4641_v14 = vpop.f32.mrf.mxu2  ;;  %v4730_v8 = vpop.f32.mrf.mxu3 }
 0x633   : > { %v4642_v2 = vadd.f32 %v4641_v14, %v4553_v19  ;;  %v4466_v41 = vpop.f32.mrf.mxu0  ;;  %v4555_v29 = vpop.f32.mrf.mxu1 }
 0x634   : > { %v4556_v45 = vadd.f32 %v4555_v29, %v4466_v41  ;;  %v11042_v41 = vld [vmem:[#allocation67_spill] sm:$0xff] }
 0x635   : > { %v9888_v12 = vadd.f32 %v4730_v8, %v4642_v2  ;;  %v11040_v8 = vld [vmem:[#allocation53_spill] sm:$0xff]  ;;  %v11041_v2 = vld [vmem:[#allocation55_spill] sm:$0xff] }
 0x636   : > { %4505 = vmatmul.bf16.gmra.mxu0 %v11037_v27  ;;  %4594 = vmatmul.bf16.gmra.mxu1 %v11038_v40 }
 0x637   : > { %4683 = vmatmul.bf16.gmra.mxu2 %v11039_v21  ;;  %4772 = vmatmul.bf16.gmra.mxu3 %v9642_v18  ;;  %v4813_v62 = vsel %vm4803_vm3, %v9888_v12, -inf }
 0x638   : > { %4814 = vmax.xlane.f32.xlu2 %v4813_v62 }
 0x63a   : > { %v4644_v4 = vpop.f32.mrf.mxu2  ;;  %v4733_v38 = vpop.f32.mrf.mxu3 }
 0x63b   : > { %v4645_v22 = vadd.f32 %v4644_v4, %v4556_v45  ;;  %v4468_v23 = vpop.f32.mrf.mxu0  ;;  %v4557_v20 = vpop.f32.mrf.mxu1 }
 0x63c   : > { %v4558_v47 = vadd.f32 %v4557_v20, %v4468_v23 }
 0x63d   : > { %v9896_v7 = vadd.f32 %v4733_v38, %v4645_v22 }
 0x63f   : > { %v4816_v55 = vsel %vm4803_vm3, %v9896_v7, -inf }
 0x640   : > { %4817 = vmax.xlane.f32.xlu0 %v4816_v55 }
 0x642   : > { %v4646_v60 = vpop.f32.mrf.mxu2  ;;  %v4735_v34 = vpop.f32.mrf.mxu3 }
 0x643   : > { %v4647_v18 = vadd.f32 %v4646_v60, %v4558_v47  ;;  %v4471_v48 = vpop.f32.mrf.mxu0  ;;  %v4560_v19 = vpop.f32.mrf.mxu1 }
 0x644   : > { %v4561_v27 = vadd.f32 %v4560_v19, %v4471_v48  ;;  %v11044_v48 = vld [vmem:[#allocation56_spill] sm:$0xff] }
 0x645   : > { %v9900_v14 = vadd.f32 %v4735_v34, %v4647_v18  ;;  %v11043_v18 = vld [vmem:[#allocation54_spill] sm:$0xff]  ;;  %v11045_v19 = vld [vmem:[#allocation68_spill] sm:$0xff] }
 0x646   : > { %4510 = vmatmul.bf16.gmra.mxu0 %v11040_v8  ;;  %4599 = vmatmul.bf16.gmra.mxu1 %v11041_v2 }
 0x647   : > { %4688 = vmatmul.bf16.gmra.mxu2 %v11042_v41  ;;  %4777 = vmatmul.bf16.gmra.mxu3 %v9656_v44  ;;  %v4819_v29 = vsel %vm4803_vm3, %v9900_v14, -inf }
 0x648   : > { %4820 = vmax.xlane.f32.xlu1 %v4819_v29 }
 0x64a   : > { %v4649_v40 = vpop.f32.mrf.mxu2  ;;  %v4738_v21 = vpop.f32.mrf.mxu3 }
 0x64b   : > { %v4650_v62 = vadd.f32 %v4649_v40, %v4561_v27  ;;  %v4473_v45 = vpop.f32.mrf.mxu0  ;;  %v4562_v4 = vpop.f32.mrf.mxu1 }
 0x64c   : > { %v4563_v23 = vadd.f32 %v4562_v4, %v4473_v45 }
 0x64d   : > { %v9908_v38 = vadd.f32 %v4738_v21, %v4650_v62 }
 0x64f   : > { %v4822_v22 = vsel %vm4803_vm3, %v9908_v38, -inf }
 0x650   : > { %4823 = vmax.xlane.f32.xlu2 %v4822_v22 }
 0x652   : > { %v4651_v20 = vpop.f32.mrf.mxu2  ;;  %v4740_v55 = vpop.f32.mrf.mxu3 }
 0x653   : > { %v4652_v44 = vadd.f32 %v4651_v20, %v4563_v23  ;;  %v4476_v47 = vpop.f32.mrf.mxu0  ;;  %v4565_v60 = vpop.f32.mrf.mxu1 }
 0x654   : > { %v4566_v2 = vadd.f32 %v4565_v60, %v4476_v47  ;;  %v11046_v47 = vld [vmem:[#allocation2_spill] sm:$0xff]  ;;  %v11047_v60 = vld [vmem:[#allocation57_spill] sm:$0xff] }
 0x655   : > { %v9912_v34 = vadd.f32 %v4740_v55, %v4652_v44 }
 0x656   : > { %4515 = vmatmul.bf16.gmra.mxu0 %v11043_v18  ;;  %4604 = vmatmul.bf16.gmra.mxu1 %v11044_v48  ;;  %v11048_v18 = vld [vmem:[#allocation69_spill] sm:$0xff] }
 0x657   : > { %4693 = vmatmul.bf16.gmra.mxu2 %v11045_v19  ;;  %4782 = vmatmul.bf16.gmra.mxu3 %v9670_v11  ;;  %v4825_v8 = vsel %vm4803_vm3, %v9912_v34, -inf }
 0x658   : > { %4826 = vmax.xlane.f32.xlu0 %v4825_v8 }
 0x65a   : > { %v4654_v41 = vpop.f32.mrf.mxu2  ;;  %v4743_v29 = vpop.f32.mrf.mxu3 }
 0x65b   : > { %v4655_v27 = vadd.f32 %v4654_v41, %v4566_v2  ;;  %v4478_v40 = vpop.f32.mrf.mxu0  ;;  %v4567_v21 = vpop.f32.mrf.mxu1 }
 0x65c   : > { %v4568_v4 = vadd.f32 %v4567_v21, %v4478_v40 }
 0x65d   : > { %v9920_v62 = vadd.f32 %v4743_v29, %v4655_v27 }
 0x65f   : > { %v4828_v45 = vsel %vm4803_vm3, %v9920_v62, -inf }
 0x660   : > { %4829 = vmax.xlane.f32.xlu1 %v4828_v45 }
 0x662   : > { %v4656_v22 = vpop.f32.mrf.mxu2  ;;  %v4745_v23 = vpop.f32.mrf.mxu3 }
 0x663   : > { %v4657_v11 = vadd.f32 %v4656_v22, %v4568_v4  ;;  %v4481_v20 = vpop.f32.mrf.mxu0  ;;  %v4570_v55 = vpop.f32.mrf.mxu1 }
 0x664   : > { %v4571_v19 = vadd.f32 %v4570_v55, %v4481_v20  ;;  %v11049_v20 = vld [vmem:[#allocation3_spill] sm:$0xff]  ;;  %v11050_v55 = vld [vmem:[#allocation58_spill] sm:$0xff] }
 0x665   : > { %v9924_v44 = vadd.f32 %v4745_v23, %v4657_v11 }
 0x666   : > { %4520 = vmatmul.bf16.gmra.mxu0 %v11046_v47  ;;  %4609 = vmatmul.bf16.gmra.mxu1 %v11047_v60  ;;  %v11051_v60 = vld [vmem:[#allocation70_spill] sm:$0xff] }
 0x667   : > { %4698 = vmatmul.bf16.gmra.mxu2 %v11048_v18  ;;  %4787 = vmatmul.bf16.gmra.mxu3 %v9684_v52  ;;  %v4831_v48 = vsel %vm4803_vm3, %v9924_v44, -inf }
 0x668   : > { %4832 = vmax.xlane.f32.xlu2 %v4831_v48 }
 0x66a   : > { %v4659_v8 = vpop.f32.mrf.mxu2  ;;  %v4748_v2 = vpop.f32.mrf.mxu3 }
 0x66b   : > { %v4660_v41 = vadd.f32 %v4659_v8, %v4571_v19  ;;  %v4483_v29 = vpop.f32.mrf.mxu0  ;;  %v4572_v27 = vpop.f32.mrf.mxu1 }
 0x66c   : > { %v4573_v45 = vadd.f32 %v4572_v27, %v4483_v29 }
 0x66d   : > { %v9932_v40 = vadd.f32 %v4748_v2, %v4660_v41 }
 0x66f   : > { %v4834_v21 = vsel %vm4803_vm3, %v9932_v40, -inf }
 0x670   : > { %4835 = vmax.xlane.f32.xlu0 %v4834_v21 }
 0x672   : > { %v4661_v4 = vpop.f32.mrf.mxu2  ;;  %v4750_v22 = vpop.f32.mrf.mxu3 }
 0x673   : > { %v4662_v52 = vadd.f32 %v4661_v4, %v4573_v45  ;;  %v4486_v23 = vpop.f32.mrf.mxu0  ;;  %v4575_v11 = vpop.f32.mrf.mxu1 }
 0x674   : > { %v4576_v48 = vadd.f32 %v4575_v11, %v4486_v23  ;;  %v11052_v23 = vld [vmem:[#allocation4_spill] sm:$0xff]  ;;  %v11053_v11 = vld [vmem:[#allocation59_spill] sm:$0xff] }
 0x675   : > { %v9936_v47 = vadd.f32 %v4750_v22, %v4662_v52 }
 0x676   : > { %4525 = vmatmul.bf16.gmra.mxu0 %v11049_v20  ;;  %4614 = vmatmul.bf16.gmra.mxu1 %v11050_v55 }
 0x677   : > { %4703 = vmatmul.bf16.gmra.mxu2 %v11051_v60  ;;  %4792 = vmatmul.bf16.gmra.mxu3 %v9698_v58  ;;  %v4837_v18 = vsel %vm4803_vm3, %v9936_v47, -inf  ;;  %v11054_v60 = vld [vmem:[#allocation71_spill] sm:$0xff] }
 0x678   : > { %4838 = vmax.xlane.f32.xlu1 %v4837_v18 }
 0x67a   : > { %v4664_v19 = vpop.f32.mrf.mxu2  ;;  %v4753_v8 = vpop.f32.mrf.mxu3 }
 0x67b   : > { %v4665_v2 = vadd.f32 %v4664_v19, %v4576_v48  ;;  %v4488_v41 = vpop.f32.mrf.mxu0  ;;  %v4577_v29 = vpop.f32.mrf.mxu1 }
 0x67c   : > { %v4578_v45 = vadd.f32 %v4577_v29, %v4488_v41 }
 0x67d   : > { %v9944_v27 = vadd.f32 %v4753_v8, %v4665_v2 }
 0x67f   : > { %v4840_v21 = vsel %vm4803_vm3, %v9944_v27, -inf }
 0x680   : > { %4841 = vmax.xlane.f32.xlu2 %v4840_v21 }
 0x682   : > { %v4666_v4 = vpop.f32.mrf.mxu2  ;;  %v4755_v22 = vpop.f32.mrf.mxu3 }
 0x683   : > { %v4667_v58 = vadd.f32 %v4666_v4, %v4578_v45  ;;  %v4491_v52 = vpop.f32.mrf.mxu0  ;;  %v4580_v20 = vpop.f32.mrf.mxu1 }
 0x684   : > { %v4581_v48 = vadd.f32 %v4580_v20, %v4491_v52 }
 0x685   : > { %v9948_v55 = vadd.f32 %v4755_v22, %v4667_v58 }
 0x686   : > { %4530 = vmatmul.bf16.gmra.mxu0 %v11052_v23  ;;  %4619 = vmatmul.bf16.gmra.mxu1 %v11053_v11 }
 0x687   : > { %4708 = vmatmul.bf16.gmra.mxu2 %v11054_v60  ;;  %4797 = vmatmul.bf16.gmra.mxu3 %v9712_v43  ;;  %v4843_v18 = vsel %vm4803_vm3, %v9948_v55, -inf }
 0x688   : > { %4844 = vmax.xlane.f32.xlu0 %v4843_v18 }
 0x68a   : > { %v4669_v19 = vpop.f32.mrf.mxu2  ;;  %v4758_v8 = vpop.f32.mrf.mxu3 }
 0x68b   : > { %v4670_v2 = vadd.f32 %v4669_v19, %v4581_v48  ;;  %v4493_v41 = vpop.f32.mrf.mxu0  ;;  %v4582_v29 = vpop.f32.mrf.mxu1 }
 0x68c   : > { %v4583_v4 = vadd.f32 %v4582_v29, %v4493_v41 }
 0x68d   : > { %v9956_v21 = vadd.f32 %v4758_v8, %v4670_v2 }
 0x68f   : > { %v4846_v45 = vsel %vm4803_vm3, %v9956_v21, -inf }
 0x690   : > { %4847 = vmax.xlane.f32.xlu1 %v4846_v45 }
 0x692   : > { %v4671_v22 = vpop.f32.mrf.mxu2  ;;  %v4760_v58 = vpop.f32.mrf.mxu3 }
 0x693   : > { %v4672_v43 = vadd.f32 %v4671_v22, %v4583_v4  ;;  %v9960_v23 = vpop.xlane.xlu0 %4805  ;;  %v4496_v11 = vpop.f32.mrf.mxu0 }
 0x694   : > { %v4900_v52 = vsub.f32 %v9872_v63, %v9960_v23  ;;  %v4585_v20 = vpop.f32.mrf.mxu1 }
 0x695   : > { %v9964_v60 = vadd.f32 %v4760_v58, %v4672_v43  ;;  %v4586_v19 = vadd.f32 %v4585_v20, %v4496_v11 }
 0x696   : > { %v4932_v18 = vmul.f32 1.442695, %v4900_v52 }
 0x697   : > { %v4849_v48 = vsel %vm4803_vm3, %v9964_v60, -inf }
 0x698   : > { %7329 = vpow2.f32 %v4932_v18  ;;  %4850 = vmax.xlane.f32.xlu2 %v4849_v48 }
 0x69a   : > { %v4674_v8 = vpop.f32.mrf.mxu2  ;;  %v4763_v2 = vpop.f32.mrf.mxu3 }
 0x69b   : > { %v4675_v41 = vadd.f32 %v4674_v8, %v4586_v19  ;;  %v9968_v29 = vpop.xlane.xlu1 %4808  ;;  %v4498_v45 = vpop.f32.mrf.mxu0 }
 0x69c   : > { %v4901_v4 = vsub.f32 %v9876_v28, %v9968_v29  ;;  %v4587_v63 = vpop.f32.mrf.mxu1 }
 0x69d   : > { %v9972_v22 = vadd.f32 %v4763_v2, %v4675_v41  ;;  %v4588_v11 = vadd.f32 %v4587_v63, %v4498_v45 }
 0x69e   : > { %v7330_v58 = vpop.eup %7329  ;;  %v4934_v43 = vmul.f32 1.442695, %v4901_v4 }
 0x69f   : > { %v4996_v52 = vsel %vm4803_vm3, %v7330_v58, 0.0  ;;  %v4852_v18 = vsel %vm4803_vm3, %v9972_v22, -inf  ;;  %v5316_v2 = vmul.f32 %v7330_v58, %v9714_v50 }
 0x6a0   : > { %7331 = vpow2.f32 %v4934_v43  ;;  %4997 = vadd.xlane.f32.xlu1 %v4996_v52  ;;  %4853 = vmax.xlane.f32.xlu0 %v4852_v18 }
 0x6a1   : > { %v5348_v45 = vsel %vm4803_vm3, %v5316_v2, 0.0 }
 0x6a2   : > { %v4676_v20 = vpop.f32.mrf.mxu2  ;;  %v4765_v48 = vpop.f32.mrf.mxu3 }
 0x6a3   : > { %v4677_v19 = vadd.f32 %v4676_v20, %v4588_v11  ;;  %v9977_v8 = vpop.xlane.xlu2 %4811  ;;  %v4501_v28 = vpop.f32.mrf.mxu0 }
 0x6a4   : > { %v4902_v41 = vsub.f32 %v9884_v5, %v9977_v8  ;;  %v4590_v4 = vpop.f32.mrf.mxu1 }
 0x6a5   : > { %v9982_v57 = vadd.f32 %v4765_v48, %v4677_v19  ;;  %v4591_v52 = vadd.f32 %v4590_v4, %v4501_v28 }
 0x6a6   : > { %v7332_v6 = vpop.eup %7331  ;;  %v4936_v1 = vmul.f32 1.442695, %v4902_v41 }
 0x6a7   : > { %v4999_v43 = vsel %vm4803_vm3, %v7332_v6, 0.0  ;;  %v4855_v63 = vsel %vm4803_vm3, %v9982_v57, -inf  ;;  %v5317_v19 = vmul.f32 %v7332_v6, %v9722_v35 }
 0x6a8   : > { %7333 = vpow2.f32 %v4936_v1  ;;  %5000 = vadd.xlane.f32.xlu2 %v4999_v43  ;;  %5349 = vadd.xlane.f32.xlu0 %v5348_v45 }
 0x6a9   : > { %4856 = vmax.xlane.f32.xlu1 %v4855_v63  ;;  %v5351_v4 = vsel %vm4803_vm3, %v5317_v19, 0.0 }
 0x6aa   : > { %v4679_v50 = vpop.f32.mrf.mxu2  ;;  %v4768_v58 = vpop.f32.mrf.mxu3 }
 0x6ab   : > { %v4680_v5 = vadd.f32 %v4679_v50, %v4591_v52  ;;  %v9988_v18 = vpop.xlane.xlu2 %4814  ;;  %v4503_v11 = vpop.f32.mrf.mxu0 }
 0x6ac   : > { %v4903_v20 = vsub.f32 %v9888_v12, %v9988_v18  ;;  %v4592_v48 = vpop.f32.mrf.mxu1 }
 0x6ad   : > { %v9993_v2 = vadd.f32 %v4768_v58, %v4680_v5  ;;  %v4593_v45 = vadd.f32 %v4592_v48, %v4503_v11 }
 0x6ae   : > { %v7334_v41 = vpop.eup %7333  ;;  %v4938_v1 = vmul.f32 1.442695, %v4903_v20 }
 0x6af   : > { %v5002_v43 = vsel %vm4803_vm3, %v7334_v41, 0.0  ;;  %v4858_v28 = vsel %vm4803_vm3, %v9993_v2, -inf  ;;  %v5318_v50 = vmul.f32 %v7334_v41, %v9728_v15 }
 0x6b0   : > { %7335 = vpow2.f32 %v4938_v1  ;;  %5003 = vadd.xlane.f32.xlu0 %v5002_v43  ;;  %4859 = vmax.xlane.f32.xlu2 %v4858_v28 }
 0x6b1   : > { %5352 = vadd.xlane.f32.xlu1 %v5351_v4  ;;  %v5354_v11 = vsel %vm4803_vm3, %v5318_v50, 0.0 }
 0x6b2   : > { %v4681_v12 = vpop.f32.mrf.mxu2  ;;  %v4770_v63 = vpop.f32.mrf.mxu3 }
 0x6b3   : > { %v4682_v52 = vadd.f32 %v4681_v12, %v4593_v45  ;;  %v9999_v35 = vpop.xlane.xlu0 %4817  ;;  %v4506_v6 = vpop.f32.mrf.mxu0 }
 0x6b4   : > { %v4904_v58 = vsub.f32 %v9896_v7, %v9999_v35  ;;  %v4595_v5 = vpop.f32.mrf.mxu1 }
 0x6b5   : > { %v10004_v20 = vadd.f32 %v4770_v63, %v4682_v52  ;;  %v4596_v28 = vadd.f32 %v4595_v5, %v4506_v6 }
 0x6b6   : > { %v7336_v1 = vpop.eup %7335  ;;  %v4940_v43 = vmul.f32 1.442695, %v4904_v58 }
 0x6b7   : > { %v5005_v19 = vsel %vm4803_vm3, %v7336_v1, 0.0  ;;  %v4861_v48 = vsel %vm4803_vm3, %v10004_v20, -inf  ;;  %v5319_v12 = vmul.f32 %v7336_v1, %v9730_v51 }
 0x6b8   : > { %7337 = vpow2.f32 %v4940_v43  ;;  %5355 = vadd.xlane.f32.xlu2 %v5354_v11  ;;  %4862 = vmax.xlane.f32.xlu0 %v4861_v48 }
 0x6b9   : > { %5006 = vadd.xlane.f32.xlu1 %v5005_v19  ;;  %v5357_v6 = vsel %vm4803_vm3, %v5319_v12, 0.0 }
 0x6ba   : > { %v4684_v15 = vpop.f32.mrf.mxu2  ;;  %v4773_v41 = vpop.f32.mrf.mxu3 }
 0x6bb   : > { %v4685_v7 = vadd.f32 %v4684_v15, %v4596_v28  ;;  %v10010_v4 = vpop.xlane.xlu1 %4820  ;;  %v4508_v45 = vpop.f32.mrf.mxu0 }
 0x6bc   : > { %v4905_v63 = vsub.f32 %v9900_v14, %v10010_v4  ;;  %v4597_v52 = vpop.f32.mrf.mxu1 }
 0x6bd   : > { %v10015_v50 = vadd.f32 %v4773_v41, %v4685_v7  ;;  %v4598_v19 = vadd.f32 %v4597_v52, %v4508_v45 }
 0x6be   : > { %v7338_v58 = vpop.eup %7337  ;;  %v4942_v43 = vmul.f32 1.442695, %v4905_v63 }
 0x6bf   : > { %v5008_v11 = vsel %vm4803_vm3, %v7338_v58, 0.0  ;;  %v4864_v5 = vsel %vm4803_vm3, %v10015_v50, -inf  ;;  %v5320_v7 = vmul.f32 %v7338_v58, %v9742_v31 }
 0x6c0   : > { %7339 = vpow2.f32 %v4942_v43  ;;  %5009 = vadd.xlane.f32.xlu2 %v5008_v11  ;;  %5358 = vadd.xlane.f32.xlu0 %v5357_v6 }
 0x6c1   : > { %4865 = vmax.xlane.f32.xlu1 %v4864_v5  ;;  %v5360_v52 = vsel %vm4803_vm3, %v5320_v7, 0.0 }
 0x6c2   : > { %v4686_v51 = vpop.f32.mrf.mxu2  ;;  %v4775_v1 = vpop.f32.mrf.mxu3 }
 0x6c3   : > { %v4687_v14 = vadd.f32 %v4686_v51, %v4598_v19  ;;  %v10021_v48 = vpop.xlane.xlu2 %4823  ;;  %v4511_v28 = vpop.f32.mrf.mxu0 }
 0x6c4   : > { %v4906_v15 = vsub.f32 %v9908_v38, %v10021_v48  ;;  %v4600_v41 = vpop.f32.mrf.mxu1 }
 0x6c5   : > { %v10026_v12 = vadd.f32 %v4775_v1, %v4687_v14  ;;  %v4601_v6 = vadd.f32 %v4600_v41, %v4511_v28 }
 0x6c6   : > { %v7340_v63 = vpop.eup %7339  ;;  %v4944_v43 = vmul.f32 1.442695, %v4906_v15 }
 0x6c7   : > { %v5011_v11 = vsel %vm4803_vm3, %v7340_v63, 0.0  ;;  %v4867_v45 = vsel %vm4803_vm3, %v10026_v12, -inf  ;;  %v5321_v51 = vmul.f32 %v7340_v63, %v9750_v16 }
 0x6c8   : > { %7341 = vpow2.f32 %v4944_v43  ;;  %5012 = vadd.xlane.f32.xlu0 %v5011_v11  ;;  %4868 = vmax.xlane.f32.xlu2 %v4867_v45 }
 0x6c9   : > { %5361 = vadd.xlane.f32.xlu1 %v5360_v52  ;;  %v5363_v28 = vsel %vm4803_vm3, %v5321_v51, 0.0 }
 0x6ca   : > { %v4689_v38 = vpop.f32.mrf.mxu2  ;;  %v4778_v5 = vpop.f32.mrf.mxu3 }
 0x6cb   : > { %v4690_v19 = vadd.f32 %v4689_v38, %v4601_v6  ;;  %v10032_v31 = vpop.xlane.xlu0 %4826  ;;  %v4513_v58 = vpop.f32.mrf.mxu0 }
 0x6cc   : > { %v4907_v1 = vsub.f32 %v9912_v34, %v10032_v31  ;;  %v4602_v14 = vpop.f32.mrf.mxu1 }
 0x6cd   : > { %v10037_v15 = vadd.f32 %v4778_v5, %v4690_v19  ;;  %v4603_v45 = vadd.f32 %v4602_v14, %v4513_v58 }
 0x6ce   : > { %v7342_v43 = vpop.eup %7341  ;;  %v4946_v11 = vmul.f32 1.442695, %v4907_v1 }
 0x6cf   : > { %v5014_v7 = vsel %vm4803_vm3, %v7342_v43, 0.0  ;;  %v4870_v41 = vsel %vm4803_vm3, %v10037_v15, -inf  ;;  %v5322_v38 = vmul.f32 %v7342_v43, %v9756_v10 }
 0x6d0   : > { %7343 = vpow2.f32 %v4946_v11  ;;  %5364 = vadd.xlane.f32.xlu2 %v5363_v28  ;;  %4871 = vmax.xlane.f32.xlu0 %v4870_v41 }
 0x6d1   : > { %5015 = vadd.xlane.f32.xlu1 %v5014_v7  ;;  %v5366_v58 = vsel %vm4803_vm3, %v5322_v38, 0.0 }
 0x6d2   : > { %v4691_v16 = vpop.f32.mrf.mxu2  ;;  %v4780_v63 = vpop.f32.mrf.mxu3 }
 0x6d3   : > { %v4692_v34 = vadd.f32 %v4691_v16, %v4603_v45  ;;  %v10043_v52 = vpop.xlane.xlu1 %4829  ;;  %v4516_v6 = vpop.f32.mrf.mxu0 }
 0x6d4   : > { %v4908_v5 = vsub.f32 %v9920_v62, %v10043_v52  ;;  %v4605_v19 = vpop.f32.mrf.mxu1 }
 0x6d5   : > { %v10048_v51 = vadd.f32 %v4780_v63, %v4692_v34  ;;  %v4606_v7 = vadd.f32 %v4605_v19, %v4516_v6 }
 0x6d6   : > { %v7344_v1 = vpop.eup %7343  ;;  %v4948_v11 = vmul.f32 1.442695, %v4908_v5 }
 0x6d7   : > { %v5017_v28 = vsel %vm4803_vm3, %v7344_v1, 0.0  ;;  %v4873_v14 = vsel %vm4803_vm3, %v10048_v51, -inf  ;;  %v5323_v34 = vmul.f32 %v7344_v1, %v9758_v61 }
 0x6d8   : > { %7345 = vpow2.f32 %v4948_v11  ;;  %5018 = vadd.xlane.f32.xlu2 %v5017_v28  ;;  %5367 = vadd.xlane.f32.xlu0 %v5366_v58 }
 0x6d9   : > { %4874 = vmax.xlane.f32.xlu1 %v4873_v14  ;;  %v5369_v19 = vsel %vm4803_vm3, %v5323_v34, 0.0 }
 0x6da   : > { %v4694_v10 = vpop.f32.mrf.mxu2  ;;  %v4783_v43 = vpop.f32.mrf.mxu3 }
 0x6db   : > { %v4695_v62 = vadd.f32 %v4694_v10, %v4606_v7  ;;  %v10054_v41 = vpop.xlane.xlu2 %4832  ;;  %v4518_v45 = vpop.f32.mrf.mxu0 }
 0x6dc   : > { %v4909_v16 = vsub.f32 %v9924_v44, %v10054_v41  ;;  %v4607_v63 = vpop.f32.mrf.mxu1 }
 0x6dd   : > { %v10059_v38 = vadd.f32 %v4783_v43, %v4695_v62  ;;  %v4608_v58 = vadd.f32 %v4607_v63, %v4518_v45 }
 0x6de   : > { %v7346_v5 = vpop.eup %7345  ;;  %v4950_v11 = vmul.f32 1.442695, %v4909_v16 }
 0x6df   : > { %v5020_v28 = vsel %vm4803_vm3, %v7346_v5, 0.0  ;;  %v4876_v6 = vsel %vm4803_vm3, %v10059_v38, -inf  ;;  %v5324_v10 = vmul.f32 %v7346_v5, %v9770_v39 }
 0x6e0   : > { %7347 = vpow2.f32 %v4950_v11  ;;  %5021 = vadd.xlane.f32.xlu0 %v5020_v28  ;;  %4877 = vmax.xlane.f32.xlu2 %v4876_v6 }
 0x6e1   : > { %5370 = vadd.xlane.f32.xlu1 %v5369_v19  ;;  %v5372_v45 = vsel %vm4803_vm3, %v5324_v10, 0.0 }
 0x6e2   : > { %v4696_v44 = vpop.f32.mrf.mxu2  ;;  %v4785_v14 = vpop.f32.mrf.mxu3 }
 0x6e3   : > { %v4697_v7 = vadd.f32 %v4696_v44, %v4608_v58  ;;  %v10065_v61 = vpop.xlane.xlu0 %4835  ;;  %v4521_v1 = vpop.f32.mrf.mxu0 }
 0x6e4   : > { %v4910_v43 = vsub.f32 %v9932_v40, %v10065_v61  ;;  %v4610_v62 = vpop.f32.mrf.mxu1 }
 0x6e5   : > { %v10070_v16 = vadd.f32 %v4785_v14, %v4697_v7  ;;  %v4611_v6 = vadd.f32 %v4610_v62, %v4521_v1 }
 0x6e6   : > { %v7348_v11 = vpop.eup %7347  ;;  %v4952_v28 = vmul.f32 1.442695, %v4910_v43 }
 0x6e7   : > { %v5023_v34 = vsel %vm4803_vm3, %v7348_v11, 0.0  ;;  %v4879_v63 = vsel %vm4803_vm3, %v10070_v16, -inf  ;;  %v5325_v44 = vmul.f32 %v7348_v11, %v9778_v9 }
 0x6e8   : > { %7349 = vpow2.f32 %v4952_v28  ;;  %5373 = vadd.xlane.f32.xlu2 %v5372_v45  ;;  %4880 = vmax.xlane.f32.xlu0 %v4879_v63 }
 0x6e9   : > { %5024 = vadd.xlane.f32.xlu1 %v5023_v34  ;;  %v5375_v1 = vsel %vm4803_vm3, %v5325_v44, 0.0 }
 0x6ea   : > { %v4699_v39 = vpop.f32.mrf.mxu2  ;;  %v4788_v5 = vpop.f32.mrf.mxu3 }
 0x6eb   : > { %v4700_v40 = vadd.f32 %v4699_v39, %v4611_v6  ;;  %v10076_v19 = vpop.xlane.xlu1 %4838  ;;  %v4523_v58 = vpop.f32.mrf.mxu0 }
 0x6ec   : > { %v4911_v14 = vsub.f32 %v9936_v47, %v10076_v19  ;;  %v4612_v7 = vpop.f32.mrf.mxu1 }
 0x6ed   : > { %v10081_v10 = vadd.f32 %v4788_v5, %v4700_v40  ;;  %v4613_v34 = vadd.f32 %v4612_v7, %v4523_v58 }
 0x6ee   : > { %v7350_v43 = vpop.eup %7349  ;;  %v4954_v28 = vmul.f32 1.442695, %v4911_v14 }
 0x6ef   : > { %v5026_v45 = vsel %vm4803_vm3, %v7350_v43, 0.0  ;;  %v4882_v62 = vsel %vm4803_vm3, %v10081_v10, -inf  ;;  %v5326_v40 = vmul.f32 %v7350_v43, %v9784_v32 }
 0x6f0   : > { %7351 = vpow2.f32 %v4954_v28  ;;  %5027 = vadd.xlane.f32.xlu2 %v5026_v45  ;;  %5376 = vadd.xlane.f32.xlu0 %v5375_v1 }
 0x6f1   : > { %4883 = vmax.xlane.f32.xlu1 %v4882_v62  ;;  %v5378_v7 = vsel %vm4803_vm3, %v5326_v40, 0.0 }
 0x6f2   : > { %v4701_v9 = vpop.f32.mrf.mxu2  ;;  %v4790_v11 = vpop.f32.mrf.mxu3 }
 0x6f3   : > { %v4702_v47 = vadd.f32 %v4701_v9, %v4613_v34  ;;  %v10087_v63 = vpop.xlane.xlu2 %4841  ;;  %v4526_v6 = vpop.f32.mrf.mxu0 }
 0x6f4   : > { %v4912_v39 = vsub.f32 %v9944_v27, %v10087_v63  ;;  %v4615_v5 = vpop.f32.mrf.mxu1 }
 0x6f5   : > { %v10092_v44 = vadd.f32 %v4790_v11, %v4702_v47  ;;  %v4616_v1 = vadd.f32 %v4615_v5, %v4526_v6 }
 0x6f6   : > { %v7352_v14 = vpop.eup %7351  ;;  %v4956_v28 = vmul.f32 1.442695, %v4912_v39 }
 0x6f7   : > { %v5029_v45 = vsel %vm4803_vm3, %v7352_v14, 0.0  ;;  %v4885_v58 = vsel %vm4803_vm3, %v10092_v44, -inf  ;;  %v5327_v9 = vmul.f32 %v7352_v14, %v9786_v25 }
 0x6f8   : > { %7353 = vpow2.f32 %v4956_v28  ;;  %5030 = vadd.xlane.f32.xlu0 %v5029_v45  ;;  %4886 = vmax.xlane.f32.xlu2 %v4885_v58 }
 0x6f9   : > { %5379 = vadd.xlane.f32.xlu1 %v5378_v7  ;;  %v5381_v6 = vsel %vm4803_vm3, %v5327_v9, 0.0 }
 0x6fa   : > { %v4704_v27 = vpop.f32.mrf.mxu2  ;;  %v4793_v62 = vpop.f32.mrf.mxu3 }
 0x6fb   : > { %v4705_v34 = vadd.f32 %v4704_v27, %v4616_v1  ;;  %v10098_v32 = vpop.xlane.xlu0 %4844  ;;  %v4528_v43 = vpop.f32.mrf.mxu0 }
 0x6fc   : > { %v4913_v11 = vsub.f32 %v9948_v55, %v10098_v32  ;;  %v4617_v47 = vpop.f32.mrf.mxu1 }
 0x6fd   : > { %v10103_v39 = vadd.f32 %v4793_v62, %v4705_v34  ;;  %v4618_v58 = vadd.f32 %v4617_v47, %v4528_v43 }
 0x6fe   : > { %v7354_v28 = vpop.eup %7353  ;;  %v4958_v45 = vmul.f32 1.442695, %v4913_v11 }
 0x6ff   : > { %v5032_v40 = vsel %vm4803_vm3, %v7354_v28, 0.0  ;;  %v4888_v5 = vsel %vm4803_vm3, %v10103_v39, -inf  ;;  %v5328_v1 = vmul.f32 %v7354_v28, %v9792_v54 }
 0x700   : > { %7355 = vpow2.f32 %v4958_v45  ;;  %5382 = vadd.xlane.f32.xlu2 %v5381_v6  ;;  %4889 = vmax.xlane.f32.xlu0 %v4888_v5 }
 0x701   : > { %5033 = vadd.xlane.f32.xlu1 %v5032_v40  ;;  %v5384_v43 = vsel %vm4803_vm3, %v5328_v1, 0.0 }
 0x702   : > { %v4706_v25 = vpop.f32.mrf.mxu2  ;;  %v4795_v14 = vpop.f32.mrf.mxu3 }
 0x703   : > { %v4707_v55 = vadd.f32 %v4706_v25, %v4618_v58  ;;  %v10109_v7 = vpop.xlane.xlu1 %4847  ;;  %v4531_v62 = vpop.f32.mrf.mxu0 }
 0x704   : > { %v4914_v27 = vsub.f32 %v9956_v21, %v10109_v7  ;;  %v4620_v34 = vpop.f32.mrf.mxu1 }
 0x705   : > { %v10114_v9 = vadd.f32 %v4795_v14, %v4707_v55  ;;  %v4621_v54 = vadd.f32 %v4620_v34, %v4531_v62 }
 0x706   : > { %v7356_v11 = vpop.eup %7355  ;;  %v4960_v45 = vmul.f32 1.442695, %v4914_v27 }
 0x707   : > { %v5035_v6 = vsel %vm4803_vm3, %v7356_v11, 0.0  ;;  %v4891_v47 = vsel %vm4803_vm3, %v10114_v9, -inf  ;;  %v5329_v25 = vmul.f32 %v7356_v11, %v9794_v0 }
 0x708   : > { %7357 = vpow2.f32 %v4960_v45  ;;  %5036 = vadd.xlane.f32.xlu2 %v5035_v6  ;;  %5385 = vadd.xlane.f32.xlu0 %v5384_v43 }
 0x709   : > { %4892 = vmax.xlane.f32.xlu1 %v4891_v47  ;;  %v5387_v34 = vsel %vm4803_vm3, %v5329_v25, 0.0 }
 0x70a   : > { %v4709_v28 = vpop.f32.mrf.mxu2  ;;  %v4798_v21 = vpop.f32.mrf.mxu3 }
 0x70b   : > { %v4710_v40 = vadd.f32 %v4709_v28, %v4621_v54  ;;  %v10120_v5 = vpop.xlane.xlu2 %4850  ;;  %v4533_v27 = vpop.f32.mrf.mxu0 }
 0x70c   : > { %v4915_v58 = vsub.f32 %v9964_v60, %v10120_v5  ;;  %v4622_v45 = vpop.f32.mrf.mxu1 }
 0x70d   : > { %v10125_v14 = vadd.f32 %v4798_v21, %v4710_v40  ;;  %v4623_v43 = vadd.f32 %v4622_v45, %v4533_v27 }
 0x70e   : > { %v7358_v55 = vpop.eup %7357  ;;  %v4962_v1 = vmul.f32 1.442695, %v4915_v58 }
 0x70f   : > { %v5038_v6 = vsel %vm4803_vm3, %v7358_v55, 0.0  ;;  %v4894_v62 = vsel %vm4803_vm3, %v10125_v14, -inf  ;;  %v5330_v54 = vmul.f32 %v7358_v55, %v9800_v3 }
 0x710   : > { %7359 = vpow2.f32 %v4962_v1  ;;  %5039 = vadd.xlane.f32.xlu0 %v5038_v6  ;;  %4895 = vmax.xlane.f32.xlu2 %v4894_v62 }
 0x711   : > { %5388 = vadd.xlane.f32.xlu1 %v5387_v34  ;;  %v5390_v27 = vsel %vm4803_vm3, %v5330_v54, 0.0 }
 0x712   : > { %v4711_v60 = vpop.f32.mrf.mxu2  ;;  %v4800_v28 = vpop.f32.mrf.mxu3 }
 0x713   : > { %v4712_v0 = vadd.f32 %v4711_v60, %v4623_v43  ;;  %v4998_v11 = vpop.xlane.xlu1 %4997  ;;  %v10131_v47 = vpop.xlane.xlu0 %4853  ;;  %v5092_v43 = vmul.f32 0.5, %v9960_v23 }
 0x714   : > { %7361 = vlog2.f32 %v4998_v11  ;;  %v4916_v21 = vsub.f32 %v9972_v22, %v10131_v47 }
 0x715   : > { %v10136_v40 = vadd.f32 %v4800_v28, %v4712_v0 }
 0x716   : > { %v7360_v58 = vpop.eup %7359  ;;  %v4964_v1 = vmul.f32 1.442695, %v4916_v21 }
 0x717   : > { %v5041_v25 = vsel %vm4803_vm3, %v7360_v58, 0.0  ;;  %v4897_v45 = vsel %vm4803_vm3, %v10136_v40, -inf  ;;  %v5331_v55 = vmul.f32 %v7360_v58, %v9802_v49 }
 0x718   : > { %7363 = vpow2.f32 %v4964_v1  ;;  %5391 = vadd.xlane.f32.xlu2 %v5390_v27  ;;  %4898 = vmax.xlane.f32.xlu0 %v4897_v45 }
 0x719   : > { %5042 = vadd.xlane.f32.xlu1 %v5041_v25  ;;  %v5393_v54 = vsel %vm4803_vm3, %v5331_v55, 0.0  ;;  %v5093_v55 = vmul.f32 0.5, %v9968_v29 }
 0x71a   : > { %v7362_v3 = vpop.eup %7361 }
 0x71b   : > { %v5125_v6 = vmul.f32 0.6931472, %v7362_v3  ;;  %v5001_v22 = vpop.xlane.xlu2 %5000  ;;  %v5350_v62 = vpop.xlane.xlu0 %5349 }
 0x71c   : > { %7365 = vlog2.f32 %v5001_v22  ;;  %v10143_v34 = vpop.xlane.xlu1 %4856 }
 0x71d   : > { %v5188_v60 = vmul.f32 0.5, %v5125_v6  ;;  %v4917_v0 = vsub.f32 %v9982_v57, %v10143_v34 }
 0x71e   : > { %v7364_v11 = vpop.eup %7363 }
 0x71f   : > { %v5220_v28 = vsub.f32 %v5092_v43, %v5188_v60  ;;  %v4966_v21 = vmul.f32 1.442695, %v4917_v0  ;;  %v5044_v49 = vsel %vm4803_vm3, %v7364_v11, 0.0  ;;  %v5332_v58 = vmul.f32 %v7364_v11, %v9808_v26 }
 0x720   : > { %5045 = vadd.xlane.f32.xlu2 %v5044_v49  ;;  %5394 = vadd.xlane.f32.xlu0 %v5393_v54 }
 0x721   : > { %v5252_v1 = vmul.f32 1.442695, %v5220_v28  ;;  %7367 = vpow2.f32 %v4966_v21  ;;  %v5396_v23 = vsel %vm4803_vm3, %v5332_v58, 0.0  ;;  %v5476_v28 = vld [vmem:[%s10163_s22] sm:$0xff] }
 0x722   : > { %v7366_v25 = vpop.eup %7365  ;;  %5397 = vadd.xlane.f32.xlu1 %v5396_v23 }
 0x723   : > { %7369 = vpow2.f32 %v5252_v1  ;;  %v5127_v57 = vmul.f32 0.6931472, %v7366_v25  ;;  %v5004_v27 = vpop.xlane.xlu0 %5003  ;;  %v10153_v45 = vpop.xlane.xlu2 %4859 }
 0x724   : > { %7371 = vlog2.f32 %v5004_v27  ;;  %v5353_v3 = vpop.xlane.xlu1 %5352  ;;  %v4918_v26 = vsub.f32 %v9993_v2, %v10153_v45  ;;  %v5094_v27 = vmul.f32 0.5, %v9977_v8 }
 0x725   : > { %v5189_v6 = vmul.f32 0.5, %v5127_v57 }
 0x726   : > { %v4968_v22 = vmul.f32 1.442695, %v4918_v26 }
 0x727   : > { %v7368_v43 = vpop.eup %7367  ;;  %v5221_v60 = vsub.f32 %v5093_v55, %v5189_v6 }
 0x728   : > { %7373 = vpow2.f32 %v4968_v22  ;;  %v5047_v0 = vsel %vm4803_vm3, %v7368_v43, 0.0  ;;  %v5333_v11 = vmul.f32 %v7368_v43, %v9810_v30 }
 0x729   : > { %v7370_v54 = vpop.eup %7369  ;;  %v5254_v2 = vmul.f32 1.442695, %v5221_v60  ;;  %5048 = vadd.xlane.f32.xlu0 %v5047_v0 }
 0x72a   : > { %v7372_v29 = vpop.eup %7371  ;;  %v5444_v21 = vmul.f32 %v7370_v54, %v5350_v62  ;;  %v5399_v49 = vsel %vm4803_vm3, %v5333_v11, 0.0 }
 0x72b   : > { %7375 = vpow2.f32 %v5254_v2  ;;  %v5129_v58 = vmul.f32 0.6931472, %v7372_v29  ;;  %5400 = vadd.xlane.f32.xlu2 %v5399_v49  ;;  %v5356_v1 = vpop.xlane.xlu2 %5355  ;;  %v10169_v23 = vpop.xlane.xlu0 %4862  ;;  %v5477_v2 = vld [vmem:[%s10163_s22 + $0x8] sm:$0xff] }
 0x72c   : > { %v5508_v25 = vadd.f32 %v5476_v28, %v5444_v21  ;;  %v5007_v57 = vpop.xlane.xlu1 %5006  ;;  %v4919_v30 = vsub.f32 %v10004_v20, %v10169_v23 }
 0x72d   : > { %v5190_v26 = vmul.f32 0.5, %v5129_v58  ;;  %7377 = vlog2.f32 %v5007_v57 }
 0x72e   : > { %v7374_v55 = vpop.eup %7373  ;;  %v5540_v62 = vsub.f32 0.0, %v5508_v25  ;;  %v4970_v6 = vmul.f32 1.442695, %v4919_v30  ;;  %v5095_v30 = vmul.f32 0.5, %v9988_v18 }
 0x72f   : > { %v5222_v22 = vsub.f32 %v5094_v27, %v5190_v26  ;;  %v5050_v43 = vsel %vm4803_vm3, %v7374_v55, 0.0  ;;  %v5334_v60 = vmul.f32 %v7374_v55, %v9816_v17 }
 0x730   : > { %v5572_v0 = vmul.f32 1.442695, %v5540_v62  ;;  %7379 = vpow2.f32 %v4970_v6  ;;  %5051 = vadd.xlane.f32.xlu1 %v5050_v43 }
 0x731   : > { %v7376_v11 = vpop.eup %7375  ;;  %v5256_v54 = vmul.f32 1.442695, %v5222_v22  ;;  %v5402_v20 = vsel %vm4803_vm3, %v5334_v60, 0.0 }
 0x732   : > { %7381 = vpow2.f32 %v5572_v0  ;;  %v5445_v8 = vmul.f32 %v7376_v11, %v5353_v3  ;;  %5403 = vadd.xlane.f32.xlu0 %v5402_v20  ;;  %v5478_v11 = vld [vmem:[%s10163_s22 + $0x10] sm:$0xff] }
 0x733   : > { %v7378_v28 = vpop.eup %7377  ;;  %7383 = vpow2.f32 %v5256_v54  ;;  %v5010_v29 = vpop.xlane.xlu2 %5009 }
 0x734   : > { %v10178_v21 = vpop.xlane.xlu0 %5358  ;;  %v5509_v49 = vadd.f32 %v5477_v2, %v5445_v8  ;;  %v5131_v58 = vmul.f32 0.6931472, %v7378_v28  ;;  %7385 = vlog2.f32 %v5010_v29  ;;  %v10180_v17 = vpop.xlane.xlu1 %4865 }
 0x735   : > { %v4920_v25 = vsub.f32 %v10015_v50, %v10180_v17 }
 0x736   : > { %v7380_v57 = vpop.eup %7379  ;;  %v5541_v27 = vsub.f32 0.0, %v5509_v49  ;;  %v5191_v3 = vmul.f32 0.5, %v5131_v58  ;;  %v5096_v58 = vmul.f32 0.5, %v9999_v35 }
 0x737   : > { %v4972_v26 = vmul.f32 1.442695, %v4920_v25  ;;  %v5053_v55 = vsel %vm4803_vm3, %v7380_v57, 0.0  ;;  %v5335_v62 = vmul.f32 %v7380_v57, %v9818_v42 }
 0x738   : > { %v7382_v6 = vpop.eup %7381  ;;  %v5574_v22 = vmul.f32 1.442695, %v5541_v27  ;;  %v5223_v43 = vsub.f32 %v5095_v30, %v5191_v3  ;;  %5054 = vadd.xlane.f32.xlu2 %v5053_v55 }
 0x739   : > { %v7384_v60 = vpop.eup %7383  ;;  %v10187_v0 = vadd.f32 1.0, %v7382_v6  ;;  %7387 = vpow2.f32 %v4972_v26  ;;  %v5405_v50 = vsel %vm4803_vm3, %v5335_v62, 0.0 }
 0x73a   : > { %v7386_v54 = vpop.eup %7385  ;;  %7389 = vpow2.f32 %v5574_v22  ;;  %v5258_v18 = vmul.f32 1.442695, %v5223_v43  ;;  %v5446_v2 = vmul.f32 %v7384_v60, %v5356_v1  ;;  %5406 = vadd.xlane.f32.xlu1 %v5405_v50 }
 0x73b   : > { %7391 = vrcp.f32 %v10187_v0  ;;  %v10192_v42 = vpop.xlane.xlu2 %4868  ;;  %v5133_v28 = vmul.f32 0.6931472, %v7386_v54  ;;  %v5677_v50 = vand.u32 2147483647, %v10187_v0  ;;  %v5479_v54 = vld [vmem:[%s10163_s22 + $0x18] sm:$0xff]  ;;  %vm5673_vm6 = vweird.f32 %v10187_v0 }
 0x73c   : > { %v5013_v20 = vpop.xlane.xlu0 %5012  ;;  %7393 = vpow2.f32 %v5258_v18  ;;  %v5510_v8 = vadd.f32 %v5478_v11, %v5446_v2  ;;  %v10194_v29 = vpop.xlane.xlu1 %5361  ;;  %v4921_v49 = vsub.f32 %v10026_v12, %v10192_v42  ;;  %v5097_v11 = vmul.f32 0.5, %v10010_v4 }
 0x73d   : > { %7395 = vlog2.f32 %v5013_v20  ;;  %v5192_v57 = vmul.f32 0.5, %v5133_v28  ;;  %vm5678_vm8 = vcmp.eq.f32.partialorder %v5677_v50, 8.507059e+37 }
 0x73e   : > { %v5542_v25 = vsub.f32 0.0, %v5510_v8  ;;  %v4974_v1 = vmul.f32 1.442695, %v4921_v49  ;;  %v5679_v49 = vand.u32 2147483648, %v10187_v0 }
 0x73f   : > { %v7388_v30 = vpop.eup %7387  ;;  %v5224_v26 = vsub.f32 %v5096_v58, %v5192_v57 }
 0x740   : > { %v7390_v27 = vpop.eup %7389  ;;  %v5576_v3 = vmul.f32 1.442695, %v5542_v25  ;;  %7397 = vpow2.f32 %v4974_v1  ;;  %v5056_v55 = vsel %vm4803_vm3, %v7388_v30, 0.0  ;;  %v5336_v12 = vmul.f32 %v7388_v30, %v9824_v36 }
 0x741   : > { %v7392_v62 = vpop.eup %7391  ;;  %v10200_v6 = vadd.f32 1.0, %v7390_v27  ;;  %5057 = vadd.xlane.f32.xlu0 %v5056_v55  ;;  %v5260_v43 = vmul.f32 1.442695, %v5224_v26 }
 0x742   : > { %v7394_v22 = vpop.eup %7393  ;;  %v5669_v35 = vmul.f32 %v7392_v62, %v10187_v0  ;;  %7399 = vpow2.f32 %v5576_v3  ;;  %vm5674_vm4 = vweird.f32 %v7392_v62  ;;  %v5408_v4 = vsel %vm4803_vm3, %v5336_v12, 0.0 }
 0x743   : > { %v7396_v60 = vpop.eup %7395  ;;  %7401 = vrcp.f32 %v10200_v6  ;;  %v10208_v18 = vpop.xlane.xlu2 %5364  ;;  %v5447_v36 = vmul.f32 %v7394_v22, %v10178_v21  ;;  %5409 = vadd.xlane.f32.xlu2 %v5408_v4  ;;  %vm5675_vm7 = vmor %vm5673_vm6, %vm5674_vm4  ;;  %vm5688_vm10 = vweird.f32 %v10200_v6 }
 0x744   : > { %v10210_v2 = vpop.xlane.xlu0 %4871  ;;  %v5670_v20 = vsub.f32 1.0, %v5669_v35  ;;  %7403 = vpow2.f32 %v5260_v43  ;;  %v5135_v8 = vmul.f32 0.6931472, %v7396_v60  ;;  %v5016_v28 = vpop.xlane.xlu1 %5015 }
 0x745   : > { %7405 = vlog2.f32 %v5016_v28  ;;  %v5511_v57 = vadd.f32 %v5479_v54, %v5447_v36  ;;  %v4922_v30 = vsub.f32 %v10037_v15, %v10210_v2  ;;  %v5680_v15 = vor.u32 1.1754944e-38, %v5679_v49 }
 0x746   : > { %v7398_v58 = vpop.eup %7397  ;;  %v5671_v25 = vmul.f32 %v7392_v62, %v5670_v20  ;;  %v5193_v1 = vmul.f32 0.5, %v5135_v8  ;;  %v5480_v8 = vld [vmem:[%s10163_s22 + $0x20] sm:$0xff] }
 0x747   : > { %v5059_v21 = vsel %vm4803_vm3, %v7398_v58, 0.0  ;;  %v5337_v27 = vmul.f32 %v7398_v58, %v9826_v53  ;;  %v5543_v55 = vsub.f32 0.0, %v5511_v57  ;;  %v4976_v35 = vmul.f32 1.442695, %v4922_v30 }
 0x748   : > { %v7400_v3 = vpop.eup %7399  ;;  %v5672_v26 = vadd.f32 %v7392_v62, %v5671_v25  ;;  %v5225_v12 = vsub.f32 %v5097_v11, %v5193_v1  ;;  %5060 = vadd.xlane.f32.xlu1 %v5059_v21  ;;  %v5692_v58 = vand.u32 2147483647, %v10200_v6  ;;  %v5694_v25 = vand.u32 2147483648, %v10200_v6 }
 0x749   : > { %v7402_v22 = vpop.eup %7401  ;;  %v10228_v53 = vadd.f32 1.0, %v7400_v3  ;;  %v5411_v0 = vsel %vm4803_vm3, %v5337_v27, 0.0  ;;  %v5578_v54 = vmul.f32 1.442695, %v5543_v55  ;;  %v5098_v27 = vmul.f32 0.5, %v10021_v48 }
 0x74a   : > { %v7404_v43 = vpop.eup %7403  ;;  %v5676_v60 = vsel %vm5675_vm7, %v7392_v62, %v5672_v26  ;;  %v5684_v11 = vmul.f32 %v7402_v22, %v10200_v6  ;;  %5412 = vadd.xlane.f32.xlu0 %v5411_v0  ;;  %v5262_v62 = vmul.f32 1.442695, %v5225_v12  ;;  %vm5689_vm9 = vweird.f32 %v7402_v22 }
 0x74b   : > { %v7406_v20 = vpop.eup %7405  ;;  %v5681_v36 = vsel %vm5678_vm8, %v5680_v15, %v5676_v60  ;;  %7407 = vrcp.f32 %v10228_v53  ;;  %v5019_v28 = vpop.xlane.xlu2 %5018  ;;  %v5448_v57 = vmul.f32 %v7404_v43, %v10194_v29  ;;  %vm5690_vm11 = vmor %vm5688_vm10, %vm5689_vm9  ;;  %v5695_v29 = vor.u32 1.1754944e-38, %v5694_v25 }
 0x74c   : > { %v10234_v49 = vpop.xlane.xlu0 %5367  ;;  %6149 = vst.msk [vmem:[%s10225_s26] sm:$0xff] %vm6148_vm5, %v5681_v36  ;;  %v5685_v4 = vsub.f32 1.0, %v5684_v11  ;;  %7409 = vpow2.f32 %v5578_v54  ;;  %v10239_v50 = vpop.xlane.xlu1 %4874  ;;  %v5137_v1 = vmul.f32 0.6931472, %v7406_v20  ;;  %vm5693_vm12 = vcmp.eq.f32.partialorder %v5692_v58, 8.507059e+37 }
 0x74d   : > { %7411 = vpow2.f32 %v4976_v35  ;;  %v4923_v21 = vsub.f32 %v10048_v51, %v10239_v50  ;;  %v5512_v3 = vadd.f32 %v5480_v8, %v5448_v57  ;;  %v5707_v57 = vand.u32 2147483647, %v10228_v53 }
 0x74e   : > { %v5686_v30 = vmul.f32 %v7402_v22, %v5685_v4  ;;  %7413 = vpow2.f32 %v5262_v62  ;;  %v5194_v26 = vmul.f32 0.5, %v5137_v1  ;;  %v5709_v1 = vand.u32 2147483648, %v10228_v53 }
 0x74f   : > { %7415 = vlog2.f32 %v5019_v28  ;;  %v4978_v12 = vmul.f32 1.442695, %v4923_v21  ;;  %v5544_v35 = vsub.f32 0.0, %v5512_v3  ;;  %vm5703_vm14 = vweird.f32 %v10228_v53 }
 0x750   : > { %v5687_v55 = vadd.f32 %v7402_v22, %v5686_v30  ;;  %v5226_v0 = vsub.f32 %v5098_v27, %v5194_v26  ;;  %v5481_v30 = vld [vmem:[%s10163_s22 + $0x28] sm:$0xff]  ;;  %vm5708_vm0 = vcmp.eq.f32.partialorder %v5707_v57, 8.507059e+37 }
 0x751   : > { %v7408_v15 = vpop.eup %7407  ;;  %7417 = vpow2.f32 %v4978_v12  ;;  %v5580_v20 = vmul.f32 1.442695, %v5544_v35 }
 0x752   : > { %v7410_v43 = vpop.eup %7409  ;;  %v5691_v60 = vsel %vm5690_vm11, %v7402_v22, %v5687_v55  ;;  %v5699_v51 = vmul.f32 %v7408_v15, %v10228_v53  ;;  %v5264_v6 = vmul.f32 1.442695, %v5226_v0  ;;  %vm5704_vm13 = vweird.f32 %v7408_v15 }
 0x753   : > { %v7412_v48 = vpop.eup %7411  ;;  %v5696_v11 = vsel %vm5693_vm12, %v5695_v29, %v5691_v60  ;;  %v10248_v54 = vadd.f32 1.0, %v7410_v43  ;;  %v10250_v8 = vpop.xlane.xlu2 %4877  ;;  %vm5705_vm15 = vmor %vm5703_vm14, %vm5704_vm13 }
 0x754   : > { %v5022_v36 = vpop.xlane.xlu0 %5021  ;;  %v7414_v28 = vpop.eup %7413  ;;  %6150 = vst.msk [vmem:[%s10225_s26 + $0x8] sm:$0xff] %vm6148_vm5, %v5696_v11  ;;  %v5700_v4 = vsub.f32 1.0, %v5699_v51  ;;  %v5062_v22 = vsel %vm4803_vm3, %v7412_v48, 0.0  ;;  %v5338_v58 = vmul.f32 %v7412_v48, %v9832_v56  ;;  %v5099_v56 = vmul.f32 0.5, %v10032_v31 }
 0x755   : > { %7419 = vlog2.f32 %v5022_v36  ;;  %v10256_v62 = vpop.xlane.xlu1 %5370  ;;  %v7416_v25 = vpop.eup %7415  ;;  %5063 = vadd.xlane.f32.xlu2 %v5062_v22  ;;  %v5449_v27 = vmul.f32 %v7414_v28, %v10208_v18  ;;  %v4924_v0 = vsub.f32 %v10059_v38, %v10250_v8  ;;  %v5710_v18 = vor.u32 1.1754944e-38, %v5709_v1  ;;  %v5482_v1 = vld [vmem:[%s10163_s22 + $0x30] sm:$0xff] }
 0x756   : > { %7421 = vrcp.f32 %v10248_v54  ;;  %v5701_v21 = vmul.f32 %v7408_v15, %v5700_v4  ;;  %v5139_v3 = vmul.f32 0.6931472, %v7416_v25  ;;  %v5414_v26 = vsel %vm4803_vm3, %v5338_v58, 0.0 }
 0x757   : > { %7423 = vpow2.f32 %v5580_v20  ;;  %v7418_v55 = vpop.eup %7417  ;;  %v5513_v29 = vadd.f32 %v5481_v30, %v5449_v27  ;;  %5415 = vadd.xlane.f32.xlu1 %v5414_v26  ;;  %v4980_v11 = vmul.f32 1.442695, %v4924_v0  ;;  %v5100_v27 = vmul.f32 0.5, %v10043_v52 }
 0x758   : > { %7425 = vpow2.f32 %v5264_v6  ;;  %v5702_v12 = vadd.f32 %v7408_v15, %v5701_v21  ;;  %v5195_v35 = vmul.f32 0.5, %v5139_v3  ;;  %v5065_v31 = vsel %vm4803_vm3, %v7418_v55, 0.0 }
 0x759   : > { %v10271_v53 = vmul.f32 %v7418_v55, %v9834_v46  ;;  %v5545_v51 = vsub.f32 0.0, %v5513_v29  ;;  %5066 = vadd.xlane.f32.xlu0 %v5065_v31  ;;  %7427 = vpow2.f32 %v4980_v11  ;;  %v5722_v26 = vand.u32 2147483647, %v10248_v54 }
 0x75a   : > { %v5706_v60 = vsel %vm5705_vm15, %v7408_v15, %v5702_v12  ;;  %v5227_v48 = vsub.f32 %v5099_v56, %v5195_v35  ;;  %v5724_v55 = vand.u32 2147483648, %v10248_v54  ;;  %vm5718_vm2 = vweird.f32 %v10248_v54 }
 0x75b   : > { %v7420_v43 = vpop.eup %7419  ;;  %v5711_v6 = vsel %vm5708_vm0, %v5710_v18, %v5706_v60  ;;  %v10273_v36 = vpop.xlane.xlu2 %5373  ;;  %v5582_v22 = vmul.f32 1.442695, %v5545_v51  ;;  %vm5723_vm6 = vcmp.eq.f32.partialorder %v5722_v26, 8.507059e+37 }
 0x75c   : > { %v7422_v20 = vpop.eup %7421  ;;  %v5141_v38 = vmul.f32 0.6931472, %v7420_v43  ;;  %v10275_v28 = vpop.xlane.xlu0 %4880  ;;  %6151 = vst.msk [vmem:[%s10225_s26 + $0x10] sm:$0xff] %vm6148_vm5, %v5711_v6  ;;  %v5266_v58 = vmul.f32 1.442695, %v5227_v48 }
 0x75d   : > { %v7424_v4 = vpop.eup %7423  ;;  %v5714_v46 = vmul.f32 %v7422_v20, %v10248_v54  ;;  %v5025_v15 = vpop.xlane.xlu1 %5024  ;;  %v4925_v21 = vsub.f32 %v10070_v16, %v10275_v28  ;;  %7429 = vpow2.f32 %v5582_v22  ;;  %vm5719_vm1 = vweird.f32 %v7422_v20 }
 0x75e   : > { %v7426_v25 = vpop.eup %7425  ;;  %v10280_v57 = vadd.f32 1.0, %v7424_v4  ;;  %v5196_v30 = vmul.f32 0.5, %v5141_v38  ;;  %vm5720_vm4 = vmor %vm5718_vm2, %vm5719_vm1 }
 0x75f   : > { %v5715_v3 = vsub.f32 1.0, %v5714_v46  ;;  %v5450_v56 = vmul.f32 %v7426_v25, %v10234_v49  ;;  %v4982_v0 = vmul.f32 1.442695, %v4925_v21  ;;  %v10291_v31 = vpop.eup %7427  ;;  %v5725_v49 = vor.u32 1.1754944e-38, %v5724_v55 }
 0x760   : > { %7431 = vrcp.f32 %v10280_v57  ;;  %v5228_v35 = vsub.f32 %v5100_v27, %v5196_v30  ;;  %v5068_v54 = vsel %vm4803_vm3, %v10291_v31, 0.0  ;;  %v5739_v25 = vand.u32 2147483648, %v10280_v57 }
 0x761   : > { %v5716_v12 = vmul.f32 %v7422_v20, %v5715_v3  ;;  %7433 = vpow2.f32 %v5266_v58  ;;  %v5514_v29 = vadd.f32 %v5482_v1, %v5450_v56  ;;  %5069 = vadd.xlane.f32.xlu1 %v5068_v54  ;;  %v5483_v1 = vld [vmem:[%s10163_s22 + $0x38] sm:$0xff]  ;;  %v5737_v26 = vand.u32 2147483647, %v10280_v57 }
 0x762   : > { %7435 = vlog2.f32 %v5025_v15  ;;  %v5268_v18 = vmul.f32 1.442695, %v5228_v35  ;;  %vm5733_vm8 = vweird.f32 %v10280_v57 }
 0x763   : > { %v5717_v16 = vadd.f32 %v7422_v20, %v5716_v12  ;;  %v5546_v52 = vsub.f32 0.0, %v5514_v29  ;;  %7437 = vpow2.f32 %v4982_v0  ;;  %v5028_v43 = vpop.xlane.xlu2 %5027  ;;  %v7430_v51 = vpop.eup %7429  ;;  %v5484_v0 = vld [vmem:[%s10163_s22 + $0x40] sm:$0xff]  ;;  %vm5738_vm10 = vcmp.eq.f32.partialorder %v5737_v26, 8.507059e+37 }
 0x764   : > { %v10294_v60 = vpop.xlane.xlu0 %5376  ;;  %7439 = vpow2.f32 %v5268_v18  ;;  %v10300_v46 = vadd.f32 1.0, %v7430_v51 }
 0x765   : > { %v5721_v48 = vsel %vm5720_vm4, %v7422_v20, %v5717_v16  ;;  %v5584_v11 = vmul.f32 1.442695, %v5546_v52  ;;  %v10298_v6 = vpop.xlane.xlu1 %4883  ;;  %7441 = vlog2.f32 %v5028_v43  ;;  %v5740_v52 = vor.u32 1.1754944e-38, %v5739_v25 }
 0x766   : > { %v7432_v38 = vpop.eup %7431  ;;  %v5726_v4 = vsel %vm5723_vm6, %v5725_v49, %v5721_v48  ;;  %v4926_v22 = vsub.f32 %v10081_v10, %v10298_v6  ;;  %v5101_v10 = vmul.f32 0.5, %v10054_v41  ;;  %vm5748_vm12 = vweird.f32 %v10300_v46 }
 0x767   : > { %v7434_v58 = vpop.eup %7433  ;;  %6152 = vst.msk [vmem:[%s10225_s26 + $0x18] sm:$0xff] %vm6148_vm5, %v5726_v4  ;;  %v5729_v20 = vmul.f32 %v7432_v38, %v10280_v57  ;;  %7443 = vpow2.f32 %v5584_v11  ;;  %vm5734_vm7 = vweird.f32 %v7432_v38 }
 0x768   : > { %v7436_v15 = vpop.eup %7435  ;;  %7445 = vrcp.f32 %v10300_v46  ;;  %v5451_v21 = vmul.f32 %v7434_v58, %v10256_v62  ;;  %v4984_v3 = vmul.f32 1.442695, %v4926_v22  ;;  %vm5735_vm9 = vmor %vm5733_vm8, %vm5734_vm7 }
 0x769   : > { %v5730_v30 = vsub.f32 1.0, %v5729_v20  ;;  %v5143_v27 = vmul.f32 0.6931472, %v7436_v15  ;;  %v10311_v56 = vpop.eup %7437 }
 0x76a   : > { %v7440_v55 = vpop.eup %7439  ;;  %v5515_v29 = vadd.f32 %v5483_v1, %v5451_v21  ;;  %7447 = vpow2.f32 %v4984_v3  ;;  %v5071_v18 = vsel %vm4803_vm3, %v10311_v56, 0.0  ;;  %v5102_v21 = vmul.f32 0.5, %v10065_v61 }
 0x76b   : > { %v5731_v12 = vmul.f32 %v7432_v38, %v5730_v30  ;;  %v5197_v35 = vmul.f32 0.5, %v5143_v27  ;;  %v7442_v16 = vpop.eup %7441  ;;  %v5452_v62 = vmul.f32 %v7440_v55, %v10273_v36  ;;  %v10320_v41 = vpop.xlane.xlu2 %4886  ;;  %5072 = vadd.xlane.f32.xlu2 %v5071_v18 }
 0x76c   : > { %v5031_v49 = vpop.xlane.xlu0 %5030  ;;  %v5547_v48 = vsub.f32 0.0, %v5515_v29  ;;  %v5145_v54 = vmul.f32 0.6931472, %v7442_v16  ;;  %v4927_v58 = vsub.f32 %v10092_v44, %v10320_v41 }
 0x76d   : > { %v7444_v43 = vpop.eup %7443  ;;  %v5732_v51 = vadd.f32 %v7432_v38, %v5731_v12  ;;  %v5229_v11 = vsub.f32 %v5101_v10, %v5197_v35  ;;  %v10322_v4 = vpop.xlane.xlu1 %5379  ;;  %v5516_v36 = vadd.f32 %v5484_v0, %v5452_v62  ;;  %7449 = vlog2.f32 %v5031_v49 }
 0x76e   : > { %v7446_v22 = vpop.eup %7445  ;;  %v10325_v57 = vadd.f32 1.0, %v7444_v43  ;;  %v5586_v25 = vmul.f32 1.442695, %v5547_v48  ;;  %v5754_v10 = vand.u32 2147483648, %v10300_v46  ;;  %v4986_v26 = vmul.f32 1.442695, %v4927_v58 }
 0x76f   : > { %v5736_v20 = vsel %vm5735_vm9, %v7432_v38, %v5732_v51  ;;  %v5744_v15 = vmul.f32 %v7446_v22, %v10300_v46  ;;  %v5270_v3 = vmul.f32 1.442695, %v5229_v11  ;;  %v5548_v44 = vsub.f32 0.0, %v5516_v36 }
 0x770   : > { %v5741_v1 = vsel %vm5738_vm10, %v5740_v52, %v5736_v20  ;;  %7451 = vrcp.f32 %v10325_v57  ;;  %v10331_v30 = vpop.eup %7447  ;;  %v5198_v38 = vmul.f32 0.5, %v5145_v54  ;;  %vm5749_vm11 = vweird.f32 %v7446_v22 }
 0x771   : > { %6153 = vst.msk [vmem:[%s10225_s26 + $0x20] sm:$0xff] %vm6148_vm5, %v5741_v1  ;;  %v5745_v27 = vsub.f32 1.0, %v5744_v15  ;;  %7453 = vpow2.f32 %v5586_v25  ;;  %v5752_v12 = vand.u32 2147483647, %v10300_v46  ;;  %v5588_v35 = vmul.f32 1.442695, %v5548_v44  ;;  %vm5750_vm13 = vmor %vm5748_vm12, %vm5749_vm11 }
 0x772   : > { %7455 = vpow2.f32 %v5270_v3  ;;  %v5230_v0 = vsub.f32 %v5102_v21, %v5198_v38  ;;  %v5074_v61 = vsel %vm4803_vm3, %v10331_v30, 0.0  ;;  %v5103_v48 = vmul.f32 0.5, %v10076_v19 }
 0x773   : > { %v5746_v55 = vmul.f32 %v7446_v22, %v5745_v27  ;;  %v7450_v29 = vpop.eup %7449  ;;  %7457 = vpow2.f32 %v4986_v26  ;;  %v10340_v16 = vpop.xlane.xlu2 %5382  ;;  %5075 = vadd.xlane.f32.xlu0 %v5074_v61  ;;  %v5755_v11 = vor.u32 1.1754944e-38, %v5754_v10  ;;  %vm5753_vm14 = vcmp.eq.f32.partialorder %v5752_v12, 8.507059e+37  ;;  %v5485_v10 = vld [vmem:[%s10163_s22 + $0x48] sm:$0xff] }
 0x774   : > { %v10342_v52 = vpop.xlane.xlu0 %4889  ;;  %v5147_v18 = vmul.f32 0.6931472, %v7450_v29  ;;  %7459 = vpow2.f32 %v5588_v35  ;;  %v5272_v54 = vmul.f32 1.442695, %v5230_v0  ;;  %v5769_v3 = vand.u32 2147483648, %v10325_v57 }
 0x775   : > { %v5747_v62 = vadd.f32 %v7446_v22, %v5746_v55  ;;  %v5034_v49 = vpop.xlane.xlu1 %5033  ;;  %v4928_v43 = vsub.f32 %v10103_v39, %v10342_v52  ;;  %vm5763_vm0 = vweird.f32 %v10325_v57 }
 0x776   : > { %v7452_v51 = vpop.eup %7451  ;;  %v5199_v20 = vmul.f32 0.5, %v5147_v18  ;;  %7461 = vpow2.f32 %v5272_v54 }
 0x777   : > { %v7454_v36 = vpop.eup %7453  ;;  %v5751_v58 = vsel %vm5750_vm13, %v7446_v22, %v5747_v62  ;;  %v5759_v46 = vmul.f32 %v7452_v51, %v10325_v57  ;;  %v4988_v39 = vmul.f32 1.442695, %v4928_v43  ;;  %7463 = vlog2.f32 %v5034_v49 }
 0x778   : > { %v5756_v15 = vsel %vm5753_vm14, %v5755_v11, %v5751_v58  ;;  %v10350_v25 = vadd.f32 1.0, %v7454_v36  ;;  %v7456_v1 = vpop.eup %7455  ;;  %v5231_v21 = vsub.f32 %v5103_v48, %v5199_v20  ;;  %vm5764_vm15 = vweird.f32 %v7452_v51  ;;  %v5486_v36 = vld [vmem:[%s10163_s22 + $0x50] sm:$0xff] }
 0x779   : > { %6154 = vst.msk [vmem:[%s10225_s26 + $0x28] sm:$0xff] %vm6148_vm5, %v5756_v15  ;;  %v5760_v19 = vsub.f32 1.0, %v5759_v46  ;;  %v10354_v27 = vpop.eup %7457  ;;  %v5767_v22 = vand.u32 2147483647, %v10325_v57  ;;  %v5453_v38 = vmul.f32 %v7456_v1, %v10294_v60  ;;  %vm5765_vm1 = vmor %vm5763_vm0, %vm5764_vm15  ;;  %v5770_v49 = vor.u32 1.1754944e-38, %v5769_v3 }
 0x77a   : > { %7465 = vrcp.f32 %v10350_v25  ;;  %v5274_v26 = vmul.f32 1.442695, %v5231_v21  ;;  %v7460_v55 = vpop.eup %7459  ;;  %v5077_v12 = vsel %vm4803_vm3, %v10354_v27, 0.0  ;;  %v5782_v57 = vand.u32 2147483647, %v10350_v25 }
 0x77b   : > { %v5761_v44 = vmul.f32 %v7452_v51, %v5760_v19  ;;  %7467 = vpow2.f32 %v4988_v39  ;;  %v5037_v29 = vpop.xlane.xlu2 %5036  ;;  %v10366_v61 = vadd.f32 1.0, %v7460_v55  ;;  %v5517_v62 = vadd.f32 %v5485_v10, %v5453_v38  ;;  %5078 = vadd.xlane.f32.xlu1 %v5077_v12 }
 0x77c   : > { %v10364_v35 = vpop.xlane.xlu0 %5385  ;;  %7469 = vpow2.f32 %v5274_v26  ;;  %v7462_v60 = vpop.eup %7461  ;;  %vm5768_vm2 = vcmp.eq.f32.partialorder %v5767_v22, 8.507059e+37  ;;  %v5784_v54 = vand.u32 2147483648, %v10350_v25  ;;  %v5104_v46 = vmul.f32 0.5, %v10087_v63  ;;  %v5487_v26 = vld [vmem:[%s10163_s22 + $0x58] sm:$0xff] }
 0x77d   : > { %v5762_v0 = vadd.f32 %v7452_v51, %v5761_v44  ;;  %v10368_v18 = vpop.xlane.xlu1 %4892  ;;  %7471 = vlog2.f32 %v5037_v29  ;;  %v7464_v48 = vpop.eup %7463  ;;  %v5549_v15 = vsub.f32 0.0, %v5517_v62  ;;  %v5454_v39 = vmul.f32 %v7462_v60, %v10322_v4 }
 0x77e   : > { %v4929_v43 = vsub.f32 %v10114_v9, %v10368_v18  ;;  %7473 = vrcp.f32 %v10366_v61  ;;  %v5105_v9 = vmul.f32 0.5, %v10098_v32  ;;  %vm5778_vm4 = vweird.f32 %v10350_v25 }
 0x77f   : > { %v5766_v11 = vsel %vm5765_vm1, %v7452_v51, %v5762_v0  ;;  %v5149_v19 = vmul.f32 0.6931472, %v7464_v48  ;;  %vm10386_vm6 = vcmp.eq.f32.partialorder %v5782_v57, 8.507059e+37  ;;  %v5590_v63 = vmul.f32 1.442695, %v5549_v15 }
 0x780   : > { %v7466_v58 = vpop.eup %7465  ;;  %v5771_v20 = vsel %vm5768_vm2, %v5770_v49, %v5766_v11  ;;  %v5518_v22 = vadd.f32 %v5486_v36, %v5454_v39  ;;  %v4990_v3 = vmul.f32 1.442695, %v4929_v43  ;;  %v5785_v44 = vor.u32 1.1754944e-38, %v5784_v54 }
 0x781   : > { %v10379_v1 = vpop.eup %7467  ;;  %6155 = vst.msk [vmem:[%s10225_s26 + $0x30] sm:$0xff] %vm6148_vm5, %v5771_v20  ;;  %v5774_v51 = vmul.f32 %v7466_v58, %v10350_v25  ;;  %v5200_v38 = vmul.f32 0.5, %v5149_v19  ;;  %vm5779_vm7 = vweird.f32 %v7466_v58  ;;  %7475 = vpow2.f32 %v5590_v63 }
 0x782   : > { %v7470_v10 = vpop.eup %7469  ;;  %v5080_v32 = vsel %vm4803_vm3, %v10379_v1, 0.0  ;;  %v5550_v12 = vsub.f32 0.0, %v5518_v22  ;;  %7477 = vpow2.f32 %v4990_v3  ;;  %v5797_v54 = vand.u32 2147483647, %v10366_v61  ;;  %vm5780_vm8 = vmor %vm5778_vm4, %vm5779_vm7 }
 0x783   : > { %v5775_v4 = vsub.f32 1.0, %v5774_v51  ;;  %v7472_v55 = vpop.eup %7471  ;;  %v5455_v29 = vmul.f32 %v7470_v10, %v10340_v16  ;;  %5081 = vadd.xlane.f32.xlu2 %v5080_v32  ;;  %v10394_v62 = vpop.xlane.xlu2 %4895  ;;  %v5232_v57 = vsub.f32 %v5104_v46, %v5200_v38  ;;  %v5799_v22 = vand.u32 2147483648, %v10366_v61 }
 0x784   : > { %v5040_v0 = vpop.xlane.xlu0 %5039  ;;  %v7474_v60 = vpop.eup %7473  ;;  %v5151_v43 = vmul.f32 0.6931472, %v7472_v55  ;;  %v5592_v36 = vmul.f32 1.442695, %v5550_v12  ;;  %v4930_v19 = vsub.f32 %v10125_v14, %v10394_v62  ;;  %vm5793_vm10 = vweird.f32 %v10366_v61 }
 0x785   : > { %v5776_v49 = vmul.f32 %v7466_v58, %v5775_v4  ;;  %v10396_v48 = vpop.xlane.xlu1 %5388  ;;  %v5789_v11 = vmul.f32 %v7474_v60, %v10366_v61  ;;  %v5519_v20 = vadd.f32 %v5487_v26, %v5455_v29  ;;  %v5276_v39 = vmul.f32 1.442695, %v5232_v57 }
 0x786   : > { %v5201_v16 = vmul.f32 0.5, %v5151_v43  ;;  %7479 = vlog2.f32 %v5040_v0  ;;  %vm5794_vm9 = vweird.f32 %v7474_v60  ;;  %v4992_v55 = vmul.f32 1.442695, %v4930_v19 }
 0x787   : > { %v5777_v15 = vadd.f32 %v7466_v58, %v5776_v49  ;;  %v5790_v46 = vsub.f32 1.0, %v5789_v11  ;;  %7481 = vpow2.f32 %v5592_v36  ;;  %v5551_v51 = vsub.f32 0.0, %v5519_v20  ;;  %v7476_v10 = vpop.eup %7475  ;;  %vm5795_vm11 = vmor %vm5793_vm10, %vm5794_vm9  ;;  %v5488_v20 = vld [vmem:[%s10163_s22 + $0x60] sm:$0xff] }
 0x788   : > { %7483 = vpow2.f32 %v5276_v39  ;;  %v5233_v3 = vsub.f32 %v5105_v9, %v5201_v16  ;;  %v10408_v26 = vpop.eup %7477  ;;  %v10413_v32 = vadd.f32 1.0, %v7476_v10  ;;  %vm5798_vm12 = vcmp.eq.f32.partialorder %v5797_v54, 8.507059e+37 }
 0x789   : > { %v5781_v63 = vsel %vm5780_vm8, %v7466_v58, %v5777_v15  ;;  %v5791_v38 = vmul.f32 %v7474_v60, %v5790_v46  ;;  %v5594_v25 = vmul.f32 1.442695, %v5551_v51  ;;  %v5340_v58 = vmul.f32 %v10291_v31, %v9840_v13 }
 0x78a   : > { %v5786_v4 = vsel %vm10386_vm6, %v5785_v44, %v5781_v63  ;;  %v5278_v14 = vmul.f32 1.442695, %v5233_v3  ;;  %v5083_v21 = vsel %vm4803_vm3, %v10408_v26, 0.0  ;;  %v5800_v61 = vor.u32 1.1754944e-38, %v5799_v22 }
 0x78b   : > { %6156 = vst.msk [vmem:[%s10225_s26 + $0x38] sm:$0xff] %vm6148_vm5, %v5786_v4  ;;  %v5792_v9 = vadd.f32 %v7474_v60, %v5791_v38  ;;  %7485 = vpow2.f32 %v5594_v25  ;;  %v10419_v44 = vpop.xlane.xlu2 %5391  ;;  %5084 = vadd.xlane.f32.xlu0 %v5083_v21  ;;  %v5341_v13 = vmul.f32 %v10311_v56, %v9842_v37  ;;  %v5106_v11 = vmul.f32 0.5, %v10109_v7 }
 0x78c   : > { %v10421_v12 = vpop.xlane.xlu0 %4898  ;;  %v7480_v29 = vpop.eup %7479  ;;  %7487 = vrcp.f32 %v10413_v32  ;;  %v5343_v39 = vmul.f32 %v10354_v27, %v9850_v59  ;;  %v5812_v7 = vand.u32 2147483647, %v10413_v32  ;;  %v5420_v16 = vsel %vm4803_vm3, %v5340_v58, 0.0 }
 0x78d   : > { %v7482_v31 = vpop.eup %7481  ;;  %v5796_v0 = vsel %vm5795_vm11, %v7474_v60, %v5792_v9  ;;  %7489 = vpow2.f32 %v5278_v14  ;;  %v5153_v49 = vmul.f32 0.6931472, %v7480_v29  ;;  %v4931_v57 = vsub.f32 %v10136_v40, %v10421_v12  ;;  %v5043_v15 = vpop.xlane.xlu1 %5042 }
 0x78e   : > { %v7484_v43 = vpop.eup %7483  ;;  %v5801_v36 = vsel %vm5798_vm12, %v5800_v61, %v5796_v0  ;;  %v10430_v54 = vadd.f32 1.0, %v7482_v31  ;;  %7491 = vpow2.f32 %v4992_v55  ;;  %v10439_v40 = vmul.f32 0.5, %v10120_v5  ;;  %v5489_v61 = vld [vmem:[%s10163_s22 + $0x68] sm:$0xff] }
 0x78f   : > { %6157 = vst.msk [vmem:[%s10225_s26 + $0x40] sm:$0xff] %vm6148_vm5, %v5801_v36  ;;  %v5456_v37 = vmul.f32 %v7484_v43, %v10364_v35  ;;  %v5202_v56 = vmul.f32 0.5, %v5153_v49  ;;  %v4994_v60 = vmul.f32 1.442695, %v4931_v57  ;;  %v10445_v59 = vsel %vm4803_vm3, %v5341_v13, 0.0 }
 0x790   : > { %7493 = vrcp.f32 %v10430_v54  ;;  %v5814_v35 = vand.u32 2147483648, %v10413_v32  ;;  %v5429_v5 = vsel %vm4803_vm3, %v5343_v39, 0.0  ;;  %vm5808_vm13 = vweird.f32 %v10413_v32 }
 0x791   : > { %v7486_v46 = vpop.eup %7485  ;;  %v5520_v51 = vadd.f32 %v5488_v20, %v5456_v37  ;;  %v5234_v19 = vsub.f32 %v5106_v11, %v5202_v56  ;;  %7495 = vlog2.f32 %v5043_v15  ;;  %vm10455_vm14 = vcmp.eq.f32.partialorder %v5812_v7, 8.507059e+37 }
 0x792   : > { %v7488_v27 = vpop.eup %7487  ;;  %v10448_v63 = vadd.f32 1.0, %v7486_v46  ;;  %7497 = vpow2.f32 %v4994_v60  ;;  %v5827_v58 = vand.u32 2147483647, %v10430_v54  ;;  %v5829_v9 = vand.u32 2147483648, %v10430_v54 }
 0x793   : > { %v7490_v22 = vpop.eup %7489  ;;  %v5804_v3 = vmul.f32 %v7488_v27, %v10413_v32  ;;  %v5552_v10 = vsub.f32 0.0, %v5520_v51  ;;  %v5280_v4 = vmul.f32 1.442695, %v5234_v19  ;;  %v5046_v38 = vpop.xlane.xlu2 %5045  ;;  %5421 = vadd.xlane.f32.xlu0 %v5420_v16  ;;  %v5815_v0 = vor.u32 1.1754944e-38, %v5814_v35 }
 0x794   : > { %v10453_v25 = vpop.xlane.xlu0 %5394  ;;  %7499 = vrcp.f32 %v10448_v63  ;;  %v7492_v55 = vpop.eup %7491  ;;  %v5457_v13 = vmul.f32 %v7490_v22, %v10396_v48  ;;  %vm5823_vm15 = vweird.f32 %v10430_v54  ;;  %vm5809_vm0 = vweird.f32 %v7488_v27 }
 0x795   : > { %v5805_v21 = vsub.f32 1.0, %v5804_v3  ;;  %v5596_v29 = vmul.f32 1.442695, %v5552_v10  ;;  %7501 = vpow2.f32 %v5280_v4  ;;  %v5086_v49 = vsel %vm4803_vm3, %v7492_v55, 0.0  ;;  %vm5810_vm2 = vmor %vm5808_vm13, %vm5809_vm0  ;;  %v5490_v4 = vld [vmem:[%s10163_s22 + $0x70] sm:$0xff] }
 0x796   : > { %v7494_v31 = vpop.eup %7493  ;;  %7503 = vlog2.f32 %v5046_v38  ;;  %5087 = vadd.xlane.f32.xlu1 %v5086_v49  ;;  %vm10469_vm1 = vcmp.eq.f32.partialorder %v5827_v58, 8.507059e+37  ;;  %v5830_v48 = vor.u32 1.1754944e-38, %v5829_v9  ;;  %v5521_v15 = vadd.f32 %v5489_v61, %v5457_v13  ;;  %v10481_v38 = vpop.xlane.xlu1 %5397 }
 0x797   : > { %v7496_v57 = vpop.eup %7495  ;;  %v5806_v43 = vmul.f32 %v7488_v27, %v5805_v21  ;;  %v5819_v11 = vmul.f32 %v7494_v31, %v10430_v54  ;;  %7505 = vpow2.f32 %v5596_v29  ;;  %v5842_v60 = vand.u32 2147483647, %v10448_v63 }
 0x798   : > { %v10467_v36 = vpop.eup %7497  ;;  %v5155_v39 = vmul.f32 0.6931472, %v7496_v57  ;;  %vm5824_vm4 = vweird.f32 %v7494_v31  ;;  %v5844_v46 = vand.u32 2147483648, %v10448_v63  ;;  %v5553_v51 = vsub.f32 0.0, %v5521_v15 }
 0x799   : > { %v5807_v37 = vadd.f32 %v7488_v27, %v5806_v43  ;;  %v5820_v56 = vsub.f32 1.0, %v5819_v11  ;;  %v5089_v7 = vsel %vm4803_vm3, %v10467_v36, 0.0  ;;  %v5346_v58 = vmul.f32 %v7492_v55, %v9864_v33  ;;  %vm5825_vm6 = vmor %vm5823_vm15, %vm5824_vm4 }
 0x79a   : > { %v7500_v16 = vpop.eup %7499  ;;  %v5203_v19 = vmul.f32 0.5, %v5155_v39  ;;  %5090 = vadd.xlane.f32.xlu2 %v5089_v7  ;;  %v5598_v21 = vmul.f32 1.442695, %v5553_v51  ;;  %v5417_v54 = vsel %vm4803_vm3, %v10271_v53, 0.0  ;;  %vm5838_vm8 = vweird.f32 %v10448_v63 }
 0x79b   : > { %v7502_v35 = vpop.eup %7501  ;;  %v5811_v22 = vsel %vm5810_vm2, %v7488_v27, %v5807_v37  ;;  %v5821_v3 = vmul.f32 %v7494_v31, %v5820_v56  ;;  %v5834_v10 = vmul.f32 %v7500_v16, %v10448_v63  ;;  %5430 = vadd.xlane.f32.xlu0 %v5429_v5  ;;  %vm5839_vm7 = vweird.f32 %v7500_v16 }
 0x79c   : > { %v7504_v9 = vpop.eup %7503  ;;  %v5816_v32 = vsel %vm10455_vm14, %v5815_v0, %v5811_v22  ;;  %v5235_v29 = vsub.f32 %v10439_v40, %v5203_v19  ;;  %v5458_v61 = vmul.f32 %v7502_v35, %v10419_v44  ;;  %v5049_v13 = vpop.xlane.xlu0 %5048  ;;  %v5108_v0 = vmul.f32 0.5, %v10131_v47  ;;  %vm5840_vm9 = vmor %vm5838_vm8, %vm5839_vm7 }
 0x79d   : > { %v7506_v27 = vpop.eup %7505  ;;  %6158 = vst.msk [vmem:[%s10225_s26 + $0x48] sm:$0xff] %vm6148_vm5, %v5816_v32  ;;  %v5822_v49 = vadd.f32 %v7494_v31, %v5821_v3  ;;  %v5835_v57 = vsub.f32 1.0, %v5834_v10  ;;  %v5157_v43 = vmul.f32 0.6931472, %v7504_v9  ;;  %7507 = vlog2.f32 %v5049_v13 }
 0x79e   : > { %v10493_v33 = vadd.f32 1.0, %v7506_v27  ;;  %7509 = vpow2.f32 %v5598_v21  ;;  %v5282_v40 = vmul.f32 1.442695, %v5235_v29  ;;  %v5522_v14 = vadd.f32 %v5490_v4, %v5458_v61  ;;  %5424 = vadd.xlane.f32.xlu1 %v10445_v59  ;;  %v10507_v53 = vpop.xlane.xlu2 %5400 }
 0x79f   : > { %v5826_v44 = vsel %vm5825_vm6, %v7494_v31, %v5822_v49  ;;  %v5836_v5 = vmul.f32 %v7500_v16, %v5835_v57  ;;  %v5204_v55 = vmul.f32 0.5, %v5157_v43  ;;  %v5845_v39 = vor.u32 1.1754944e-38, %v5844_v46  ;;  %v11063_v43 = vld [vmem:[#allocation13_spill] sm:$0xff] }
 0x7a0   : > { %v5831_v11 = vsel %vm10469_vm1, %v5830_v48, %v5826_v44  ;;  %7511 = vrcp.f32 %v10493_v33  ;;  %v5554_v31 = vsub.f32 0.0, %v5522_v14  ;;  %v5344_v47 = vmul.f32 %v10379_v1, %v9856_v24  ;;  %v11061_v1 = vld [vmem:[#allocation11_spill] sm:$0xff] }
 0x7a1   : > { %6159 = vst.msk [vmem:[%s10225_s26 + $0x50] sm:$0xff] %vm6148_vm5, %v5831_v11  ;;  %v5837_v15 = vadd.f32 %v7500_v16, %v5836_v5  ;;  %7513 = vpow2.f32 %v5282_v40  ;;  %v5236_v59 = vsub.f32 %v5108_v0, %v5204_v55  ;;  %vm5843_vm10 = vcmp.eq.f32.partialorder %v5842_v60, 8.507059e+37 }
 0x7a2   : > { %5418 = vadd.xlane.f32.xlu2 %v5417_v54  ;;  %v5600_v37 = vmul.f32 1.442695, %v5554_v31  ;;  %v5438_v56 = vsel %vm4803_vm3, %v5346_v58, 0.0  ;;  %v5342_v60 = vmul.f32 %v10331_v30, %v11061_v1  ;;  %v5109_v35 = vmul.f32 0.5, %v10143_v34  ;;  %v5491_v58 = vld [vmem:[%s10163_s22 + $0x78] sm:$0xff]  ;;  %v11062_v34 = vld [vmem:[#allocation12_spill] sm:$0xff] }
 0x7a3   : > { %v7508_v20 = vpop.eup %7507  ;;  %v5841_v48 = vsel %vm5840_vm9, %v7500_v16, %v5837_v15  ;;  %v5052_v7 = vpop.xlane.xlu1 %5051  ;;  %v5284_v19 = vmul.f32 1.442695, %v5236_v59  ;;  %5439 = vadd.xlane.f32.xlu0 %v5438_v56  ;;  %v5432_v3 = vsel %vm4803_vm3, %v5344_v47, 0.0  ;;  %v5110_v21 = vmul.f32 0.5, %v10153_v45  ;;  %v5492_v15 = vld [vmem:[%s10163_s22 + $0x80] sm:$0xff] }
 0x7a4   : > { %v7510_v63 = vpop.eup %7509  ;;  %v5846_v51 = vsel %vm5843_vm10, %v5845_v39, %v5841_v48  ;;  %v5159_v46 = vmul.f32 0.6931472, %v7508_v20  ;;  %7515 = vlog2.f32 %v5052_v7  ;;  %v5426_v29 = vsel %vm4803_vm3, %v5342_v60, 0.0 }
 0x7a5   : > { %6160 = vst.msk [vmem:[%s10225_s26 + $0x58] sm:$0xff] %vm6148_vm5, %v5846_v51  ;;  %v10512_v24 = vadd.f32 1.0, %v7510_v63  ;;  %7517 = vpow2.f32 %v5600_v37  ;;  %v5345_v61 = vmul.f32 %v10408_v26, %v11062_v34  ;;  %v5859_v27 = vand.u32 2147483648, %v10493_v33  ;;  %v10533_v11 = vpop.xlane.xlu0 %5403 }
 0x7a6   : > { %v7512_v16 = vpop.eup %7511  ;;  %7519 = vpow2.f32 %v5284_v19  ;;  %v5205_v22 = vmul.f32 0.5, %v5159_v46  ;;  %5433 = vadd.xlane.f32.xlu1 %v5432_v3  ;;  %v5347_v40 = vmul.f32 %v10467_v36, %v11063_v43  ;;  %v5857_v45 = vand.u32 2147483647, %v10493_v33 }
 0x7a7   : > { %v7514_v10 = vpop.eup %7513  ;;  %v5849_v4 = vmul.f32 %v7512_v16, %v10493_v33  ;;  %7521 = vrcp.f32 %v10512_v24  ;;  %vm5854_vm11 = vweird.f32 %v7512_v16  ;;  %vm5853_vm12 = vweird.f32 %v10493_v33 }
 0x7a8   : > { %v5459_v9 = vmul.f32 %v7514_v10, %v10453_v25  ;;  %v5237_v32 = vsub.f32 %v5109_v35, %v5205_v22  ;;  %vm5855_vm13 = vmor %vm5853_vm12, %vm5854_vm11  ;;  %v5860_v59 = vor.u32 1.1754944e-38, %v5859_v27  ;;  %v5441_v33 = vsel %vm4803_vm3, %v5347_v40, 0.0 }
 0x7a9   : > { %v5850_v30 = vsub.f32 1.0, %v5849_v4  ;;  %vm5858_vm14 = vcmp.eq.f32.partialorder %v5857_v45, 8.507059e+37  ;;  %v5872_v63 = vand.u32 2147483647, %v10512_v24  ;;  %v5874_v51 = vand.u32 2147483648, %v10512_v24 }
 0x7aa   : > { %v7516_v13 = vpop.eup %7515  ;;  %v5523_v49 = vadd.f32 %v5491_v58, %v5459_v9  ;;  %v5286_v57 = vmul.f32 1.442695, %v5237_v32  ;;  %5427 = vadd.xlane.f32.xlu2 %v5426_v29  ;;  %v5435_v19 = vsel %vm4803_vm3, %v5345_v61, 0.0  ;;  %v5111_v3 = vmul.f32 0.5, %v10169_v23 }
 0x7ab   : > { %v7518_v25 = vpop.eup %7517  ;;  %v5851_v14 = vmul.f32 %v7512_v16, %v5850_v30  ;;  %v5161_v44 = vmul.f32 0.6931472, %v7516_v13  ;;  %v5055_v5 = vpop.xlane.xlu2 %5054  ;;  %vm5868_vm0 = vweird.f32 %v10512_v24  ;;  %v5875_v29 = vor.u32 1.1754944e-38, %v5874_v51 }
 0x7ac   : > { %v7520_v55 = vpop.eup %7519  ;;  %v10531_v26 = vadd.f32 1.0, %v7518_v25  ;;  %v5555_v0 = vsub.f32 0.0, %v5523_v49  ;;  %7523 = vpow2.f32 %v5286_v57  ;;  %vm5873_vm1 = vcmp.eq.f32.partialorder %v5872_v63, 8.507059e+37 }
 0x7ad   : > { %v7522_v54 = vpop.eup %7521  ;;  %v5852_v36 = vadd.f32 %v7512_v16, %v5851_v14  ;;  %v5460_v31 = vmul.f32 %v7520_v55, %v10481_v38  ;;  %v5206_v39 = vmul.f32 0.5, %v5161_v44  ;;  %7525 = vlog2.f32 %v5055_v5  ;;  %v10550_v4 = vpop.xlane.xlu1 %5406  ;;  %v5494_v5 = vld [vmem:[%s10163_s22 + $0x90] sm:$0xff] }
 0x7ae   : > { %v5864_v47 = vmul.f32 %v7522_v54, %v10512_v24  ;;  %7527 = vrcp.f32 %v10531_v26  ;;  %v5602_v48 = vmul.f32 1.442695, %v5555_v0  ;;  %5442 = vadd.xlane.f32.xlu1 %v5441_v33  ;;  %vm5869_vm15 = vweird.f32 %v7522_v54 }
 0x7af   : > { %v5856_v20 = vsel %vm5855_vm13, %v7512_v16, %v5852_v36  ;;  %v5524_v38 = vadd.f32 %v5492_v15, %v5460_v31  ;;  %v5238_v7 = vsub.f32 %v5110_v21, %v5206_v39  ;;  %v5493_v16 = vld [vmem:[%s10163_s22 + $0x88] sm:$0xff]  ;;  %vm5870_vm3 = vmor %vm5868_vm0, %vm5869_vm15  ;;  %v5887_v57 = vand.u32 2147483647, %v10531_v26 }
 0x7b0   : > { %v5861_v37 = vsel %vm5858_vm14, %v5860_v59, %v5856_v20  ;;  %v5865_v56 = vsub.f32 1.0, %v5864_v47  ;;  %7529 = vpow2.f32 %v5602_v48  ;;  %v5889_v43 = vand.u32 2147483648, %v10531_v26 }
 0x7b1   : > { %6161 = vst.msk [vmem:[%s10225_s26 + $0x60] sm:$0xff] %vm6148_vm5, %v5861_v37  ;;  %v5556_v60 = vsub.f32 0.0, %v5524_v38  ;;  %v5288_v35 = vmul.f32 1.442695, %v5238_v7  ;;  %vm5883_vm4 = vweird.f32 %v10531_v26  ;;  %vm5888_vm7 = vcmp.eq.f32.partialorder %v5887_v57, 8.507059e+37 }
 0x7b2   : > { %v7524_v46 = vpop.eup %7523  ;;  %v5866_v1 = vmul.f32 %v7522_v54, %v5865_v56  ;;  %5436 = vadd.xlane.f32.xlu2 %v5435_v19  ;;  %v5890_v39 = vor.u32 1.1754944e-38, %v5889_v43  ;;  %v5112_v20 = vmul.f32 0.5, %v10180_v17 }
 0x7b3   : > { %v7526_v22 = vpop.eup %7525  ;;  %v5461_v10 = vmul.f32 %v7524_v46, %v10507_v53  ;;  %v5604_v32 = vmul.f32 1.442695, %v5556_v60  ;;  %7531 = vpow2.f32 %v5288_v35 }
 0x7b4   : > { %v7528_v58 = vpop.eup %7527  ;;  %v5867_v9 = vadd.f32 %v7522_v54, %v5866_v1  ;;  %v5163_v21 = vmul.f32 0.6931472, %v7526_v22  ;;  %v5058_v30 = vpop.xlane.xlu0 %5057 }
 0x7b5   : > { %v5879_v34 = vmul.f32 %v7528_v58, %v10531_v26  ;;  %v5525_v61 = vadd.f32 %v5493_v16, %v5461_v10  ;;  %7533 = vlog2.f32 %v5058_v30  ;;  %vm5884_vm2 = vweird.f32 %v7528_v58 }
 0x7b6   : > { %v5871_v23 = vsel %vm5870_vm3, %v7522_v54, %v5867_v9  ;;  %7535 = vpow2.f32 %v5604_v32  ;;  %v5207_v53 = vmul.f32 0.5, %v5163_v21  ;;  %v7530_v24 = vpop.eup %7529  ;;  %vm5885_vm6 = vmor %vm5883_vm4, %vm5884_vm2  ;;  %v10567_v7 = vpop.xlane.xlu2 %5409 }
 0x7b7   : > { %v5876_v13 = vsel %vm5873_vm1, %v5875_v29, %v5871_v23  ;;  %v5880_v27 = vsub.f32 1.0, %v5879_v34  ;;  %v5557_v49 = vsub.f32 0.0, %v5525_v61  ;;  %v5651_v40 = vadd.f32 1.0, %v7530_v24 }
 0x7b8   : > { %6162 = vst.msk [vmem:[%s10225_s26 + $0x68] sm:$0xff] %vm6148_vm5, %v5876_v13  ;;  %v5239_v25 = vsub.f32 %v5111_v3, %v5207_v53  ;;  %v5113_v3 = vmul.f32 0.5, %v10192_v42 }
 0x7b9   : > { %v5881_v14 = vmul.f32 %v7528_v58, %v5880_v27  ;;  %v5606_v45 = vmul.f32 1.442695, %v5557_v49  ;;  %v7532_v44 = vpop.eup %7531  ;;  %7537 = vrcp.f32 %v5651_v40  ;;  %v5902_v46 = vand.u32 2147483647, %v5651_v40 }
 0x7ba   : > { %v5462_v54 = vmul.f32 %v7532_v44, %v10533_v11  ;;  %v5290_v36 = vmul.f32 1.442695, %v5239_v25  ;;  %v5904_v10 = vand.u32 2147483648, %v5651_v40  ;;  %vm5898_vm9 = vweird.f32 %v5651_v40 }
 0x7bb   : > { %v7534_v55 = vpop.eup %7533  ;;  %v5882_v0 = vadd.f32 %v7528_v58, %v5881_v14  ;;  %7539 = vpow2.f32 %v5606_v45  ;;  %v5061_v15 = vpop.xlane.xlu1 %5060  ;;  %vm10575_vm10 = vcmp.eq.f32.partialorder %v5902_v46, 8.507059e+37 }
 0x7bc   : > { %v7536_v31 = vpop.eup %7535  ;;  %v5165_v59 = vmul.f32 0.6931472, %v7534_v55  ;;  %7541 = vlog2.f32 %v5061_v15  ;;  %v5526_v26 = vadd.f32 %v5494_v5, %v5462_v54  ;;  %v5905_v53 = vor.u32 1.1754944e-38, %v5904_v10 }
 0x7bd   : > { %v5886_v47 = vsel %vm5885_vm6, %v7528_v58, %v5882_v0  ;;  %v10561_v33 = vadd.f32 1.0, %v7536_v31  ;;  %7543 = vpow2.f32 %v5290_v36  ;;  %v5495_v58 = vld [vmem:[%s10163_s22 + $0x98] sm:$0xff] }
 0x7be   : > { %v5891_v48 = vsel %vm5888_vm7, %v5890_v39, %v5886_v47  ;;  %v5208_v37 = vmul.f32 0.5, %v5165_v59  ;;  %v5558_v56 = vsub.f32 0.0, %v5526_v26  ;;  %v5496_v47 = vld [vmem:[%s10163_s22 + $0xa0] sm:$0xff] }
 0x7bf   : > { %6163 = vst.msk [vmem:[%s10225_s26 + $0x70] sm:$0xff] %vm6148_vm5, %v5891_v48  ;;  %7545 = vrcp.f32 %v10561_v33  ;;  %v7538_v11 = vpop.eup %7537  ;;  %v5917_v13 = vand.u32 2147483647, %v10561_v33  ;;  %vm5913_vm13 = vweird.f32 %v10561_v33 }
 0x7c0   : > { %v5240_v38 = vsub.f32 %v5112_v20, %v5208_v37  ;;  %v5894_v51 = vmul.f32 %v7538_v11, %v5651_v40  ;;  %v5608_v60 = vmul.f32 1.442695, %v5558_v56  ;;  %vm5899_vm8 = vweird.f32 %v7538_v11 }
 0x7c1   : > { %v7540_v63 = vpop.eup %7539  ;;  %vm5900_vm11 = vmor %vm5898_vm9, %vm5899_vm8  ;;  %vm5918_vm15 = vcmp.eq.f32.partialorder %v5917_v13, 8.507059e+37 }
 0x7c2   : > { %v7542_v19 = vpop.eup %7541  ;;  %v10569_v1 = vadd.f32 1.0, %v7540_v63  ;;  %v5895_v16 = vsub.f32 1.0, %v5894_v51  ;;  %v5292_v35 = vmul.f32 1.442695, %v5240_v38  ;;  %v5497_v63 = vld [vmem:[%s10163_s22 + $0xa8] sm:$0xff]  ;;  %v5413_v51 = vpop.xlane.xlu0 %5412 }
 0x7c3   : > { %v7544_v17 = vpop.eup %7543  ;;  %v5167_v22 = vmul.f32 0.6931472, %v7542_v19  ;;  %v5114_v19 = vmul.f32 0.5, %v10210_v2 }
 0x7c4   : > { %7547 = vrcp.f32 %v10569_v1  ;;  %v5896_v32 = vmul.f32 %v7538_v11, %v5895_v16  ;;  %v5463_v21 = vmul.f32 %v7544_v17, %v10550_v4  ;;  %v5919_v4 = vand.u32 2147483648, %v10561_v33 }
 0x7c5   : > { %v7546_v9 = vpop.eup %7545  ;;  %7549 = vpow2.f32 %v5608_v60  ;;  %v5209_v30 = vmul.f32 0.5, %v5167_v22  ;;  %v5932_v39 = vand.u32 2147483647, %v10569_v1  ;;  %v5934_v59 = vand.u32 2147483648, %v10569_v1 }
 0x7c6   : > { %v5909_v34 = vmul.f32 %v7546_v9, %v10561_v33  ;;  %v5897_v61 = vadd.f32 %v7538_v11, %v5896_v32  ;;  %v5527_v42 = vadd.f32 %v5495_v58, %v5463_v21  ;;  %7551 = vpow2.f32 %v5292_v35 }
 0x7c7   : > { %v5241_v23 = vsub.f32 %v5113_v3, %v5209_v30  ;;  %vm5914_vm12 = vweird.f32 %v7546_v9  ;;  %v5920_v36 = vor.u32 1.1754944e-38, %v5919_v4  ;;  %vm5928_vm3 = vweird.f32 %v10569_v1 }
 0x7c8   : > { %v5910_v24 = vsub.f32 1.0, %v5909_v34  ;;  %v5064_v27 = vpop.xlane.xlu2 %5063  ;;  %v5901_v49 = vsel %vm5900_vm11, %v7538_v11, %v5897_v61  ;;  %v5559_v57 = vsub.f32 0.0, %v5527_v42  ;;  %vm5915_vm14 = vmor %vm5913_vm13, %vm5914_vm12  ;;  %v5935_v46 = vor.u32 1.1754944e-38, %v5934_v59 }
 0x7c9   : > { %v5294_v43 = vmul.f32 1.442695, %v5241_v23  ;;  %7553 = vlog2.f32 %v5064_v27  ;;  %v5906_v25 = vsel %vm10575_vm10, %v5905_v53, %v5901_v49  ;;  %vm5933_vm2 = vcmp.eq.f32.partialorder %v5932_v39, 8.507059e+37 }
 0x7ca   : > { %v7548_v40 = vpop.eup %7547  ;;  %v5911_v14 = vmul.f32 %v7546_v9, %v5910_v24  ;;  %6164 = vst.msk [vmem:[%s10225_s26 + $0x78] sm:$0xff] %vm6148_vm5, %v5906_v25  ;;  %v5610_v5 = vmul.f32 1.442695, %v5559_v57  ;;  %v5416_v13 = vpop.xlane.xlu1 %5415 }
 0x7cb   : > { %v7550_v45 = vpop.eup %7549  ;;  %v5924_v44 = vmul.f32 %v7548_v40, %v10569_v1  ;;  %7555 = vpow2.f32 %v5294_v43  ;;  %vm5929_vm0 = vweird.f32 %v7548_v40 }
 0x7cc   : > { %v5912_v55 = vadd.f32 %v7546_v9, %v5911_v14  ;;  %v10589_v0 = vadd.f32 1.0, %v7550_v45  ;;  %v7552_v54 = vpop.eup %7551  ;;  %7557 = vpow2.f32 %v5610_v5  ;;  %vm5930_vm1 = vmor %vm5928_vm3, %vm5929_vm0  ;;  %v5498_v45 = vld [vmem:[%s10163_s22 + $0xb0] sm:$0xff] }
 0x7cd   : > { %v5925_v15 = vsub.f32 1.0, %v5924_v44  ;;  %v5464_v48 = vmul.f32 %v7552_v54, %v10567_v7 }
 0x7ce   : > { %v5916_v31 = vsel %vm5915_vm14, %v7546_v9, %v5912_v55  ;;  %7559 = vrcp.f32 %v10589_v0  ;;  %v5947_v29 = vand.u32 2147483647, %v10589_v0  ;;  %v5949_v34 = vand.u32 2147483648, %v10589_v0 }
 0x7cf   : > { %v7554_v26 = vpop.eup %7553  ;;  %v5921_v33 = vsel %vm5918_vm15, %v5920_v36, %v5916_v31  ;;  %v5926_v20 = vmul.f32 %v7548_v40, %v5925_v15  ;;  %v5528_v38 = vadd.f32 %v5496_v47, %v5464_v48  ;;  %vm5943_vm6 = vweird.f32 %v10589_v0 }
 0x7d0   : > { %6165 = vst.msk [vmem:[%s10225_s26 + $0x80] sm:$0xff] %vm6148_vm5, %v5921_v33  ;;  %v5169_v37 = vmul.f32 0.6931472, %v7554_v26  ;;  %v5950_v24 = vor.u32 1.1754944e-38, %v5949_v34  ;;  %vm5948_vm8 = vcmp.eq.f32.partialorder %v5947_v29, 8.507059e+37 }
 0x7d1   : > { %v7556_v11 = vpop.eup %7555  ;;  %v5927_v56 = vadd.f32 %v7548_v40, %v5926_v20  ;;  %v5560_v7 = vsub.f32 0.0, %v5528_v38 }
 0x7d2   : > { %v5465_v60 = vmul.f32 %v7556_v11, %v5413_v51  ;;  %v5210_v17 = vmul.f32 0.5, %v5169_v37  ;;  %v7558_v16 = vpop.eup %7557 }
 0x7d3   : > { %v5931_v35 = vsel %vm5930_vm1, %v7548_v40, %v5927_v56  ;;  %v5655_v10 = vadd.f32 1.0, %v7558_v16  ;;  %v5612_v32 = vmul.f32 1.442695, %v5560_v7 }
 0x7d4   : > { %v7560_v22 = vpop.eup %7559  ;;  %v5936_v3 = vsel %vm5933_vm2, %v5935_v46, %v5931_v35  ;;  %v5529_v58 = vadd.f32 %v5497_v63, %v5465_v60  ;;  %v5242_v9 = vsub.f32 %v5114_v19, %v5210_v17  ;;  %v5070_v39 = vpop.xlane.xlu1 %5069 }
 0x7d5   : > { %6166 = vst.msk [vmem:[%s10225_s26 + $0x88] sm:$0xff] %vm6148_vm5, %v5936_v3  ;;  %v5939_v1 = vmul.f32 %v7560_v22, %v10589_v0  ;;  %7561 = vrcp.f32 %v5655_v10  ;;  %vm5944_vm4 = vweird.f32 %v7560_v22  ;;  %v5964_v14 = vand.u32 2147483648, %v5655_v10 }
 0x7d6   : > { %7563 = vpow2.f32 %v5612_v32  ;;  %v5561_v21 = vsub.f32 0.0, %v5529_v58  ;;  %v5296_v30 = vmul.f32 1.442695, %v5242_v9  ;;  %vm5945_vm7 = vmor %vm5943_vm6, %vm5944_vm4  ;;  %v5962_v55 = vand.u32 2147483647, %v5655_v10 }
 0x7d7   : > { %v5940_v2 = vsub.f32 1.0, %v5939_v1  ;;  %vm5958_vm10 = vweird.f32 %v5655_v10  ;;  %v5965_v31 = vor.u32 1.1754944e-38, %v5964_v14 }
 0x7d8   : > { %v5614_v42 = vmul.f32 1.442695, %v5561_v21  ;;  %7565 = vpow2.f32 %v5296_v30  ;;  %vm5963_vm12 = vcmp.eq.f32.partialorder %v5962_v55, 8.507059e+37 }
 0x7d9   : > { %v5941_v61 = vmul.f32 %v7560_v22, %v5940_v2 }
 0x7da   : > { %7567 = vpow2.f32 %v5614_v42 }
 0x7db   : > { %v5942_v23 = vadd.f32 %v7560_v22, %v5941_v61  ;;  %v7562_v53 = vpop.eup %7561 }
 0x7dc   : > { %v7564_v4 = vpop.eup %7563  ;;  %v5954_v49 = vmul.f32 %v7562_v53, %v5655_v10  ;;  %vm5959_vm9 = vweird.f32 %v7562_v53  ;;  %v5067_v10 = vpop.xlane.xlu0 %5066 }
 0x7dd   : > { %v5946_v27 = vsel %vm5945_vm7, %v7560_v22, %v5942_v23  ;;  %v5656_v43 = vadd.f32 1.0, %v7564_v4  ;;  %vm5960_vm11 = vmor %vm5958_vm10, %vm5959_vm9  ;;  %v5116_v23 = vmul.f32 0.5, %v10250_v8  ;;  %v5119_v8 = vmul.f32 0.5, %v10320_v41 }
 0x7de   : > { %v5951_v57 = vsel %vm5948_vm8, %v5950_v24, %v5946_v27  ;;  %v7566_v40 = vpop.eup %7565  ;;  %v5955_v25 = vsub.f32 1.0, %v5954_v49  ;;  %v5073_v2 = vpop.xlane.xlu2 %5072 }
 0x7df   : > { %6167 = vst.msk [vmem:[%s10225_s26 + $0x90] sm:$0xff] %vm6148_vm5, %v5951_v57  ;;  %7569 = vrcp.f32 %v5656_v43  ;;  %v5466_v0 = vmul.f32 %v7566_v40, %v5416_v13  ;;  %v5977_v56 = vand.u32 2147483647, %v5656_v43  ;;  %v5979_v38 = vand.u32 2147483648, %v5656_v43 }
 0x7e0   : > { %v7568_v44 = vpop.eup %7567  ;;  %v5956_v5 = vmul.f32 %v7562_v53, %v5955_v25  ;;  %vm5973_vm14 = vweird.f32 %v5656_v43 }
 0x7e1   : > { %v5657_v54 = vadd.f32 1.0, %v7568_v44  ;;  %v5530_v15 = vadd.f32 %v5498_v45, %v5466_v0  ;;  %vm5978_vm0 = vcmp.eq.f32.partialorder %v5977_v56, 8.507059e+37  ;;  %v5980_v17 = vor.u32 1.1754944e-38, %v5979_v38 }
 0x7e2   : > { %v5957_v36 = vadd.f32 %v7562_v53, %v5956_v5 }
 0x7e3   : > { %7571 = vrcp.f32 %v5657_v54  ;;  %v5562_v47 = vsub.f32 0.0, %v5530_v15  ;;  %v5994_v16 = vand.u32 2147483648, %v5657_v54  ;;  %v5992_v3 = vand.u32 2147483647, %v5657_v54 }
 0x7e4   : > { %v5961_v59 = vsel %vm5960_vm11, %v7562_v53, %v5957_v36  ;;  %7573 = vlog2.f32 %v5070_v39  ;;  %vm5988_vm1 = vweird.f32 %v5657_v54 }
 0x7e5   : > { %v7570_v26 = vpop.eup %7569  ;;  %v5966_v33 = vsel %vm5963_vm12, %v5965_v31, %v5961_v59  ;;  %v5616_v48 = vmul.f32 1.442695, %v5562_v47  ;;  %v5995_v30 = vor.u32 1.1754944e-38, %v5994_v16  ;;  %vm5993_vm4 = vcmp.eq.f32.partialorder %v5992_v3, 8.507059e+37 }
 0x7e6   : > { %6168 = vst.msk [vmem:[%s10225_s26 + $0x98] sm:$0xff] %vm6148_vm5, %v5966_v33  ;;  %v5969_v20 = vmul.f32 %v7570_v26, %v5656_v43  ;;  %vm5974_vm13 = vweird.f32 %v7570_v26  ;;  %v5076_v53 = vpop.xlane.xlu0 %5075 }
 0x7e7   : > { %7575 = vpow2.f32 %v5616_v48  ;;  %vm5975_vm15 = vmor %vm5973_vm14, %vm5974_vm13 }
 0x7e8   : > { %v5970_v37 = vsub.f32 1.0, %v5969_v20 }
 0x7e9   : > { %v7572_v11 = vpop.eup %7571 }
 0x7ea   : > { %v5971_v63 = vmul.f32 %v7570_v26, %v5970_v37  ;;  %v5984_v51 = vmul.f32 %v7572_v11, %v5657_v54  ;;  %v7574_v19 = vpop.eup %7573  ;;  %vm5989_vm3 = vweird.f32 %v7572_v11 }
 0x7eb   : > { %v5173_v32 = vmul.f32 0.6931472, %v7574_v19  ;;  %vm5990_vm2 = vmor %vm5988_vm1, %vm5989_vm3  ;;  %v5500_v19 = vld [vmem:[%s10163_s22 + $0xc0] sm:$0xff] }
 0x7ec   : > { %v5972_v46 = vadd.f32 %v7570_v26, %v5971_v63  ;;  %v5985_v60 = vsub.f32 1.0, %v5984_v51 }
 0x7ed   : > { %v7576_v35 = vpop.eup %7575  ;;  %v5212_v61 = vmul.f32 0.5, %v5173_v32 }
 0x7ee   : > { %v5976_v7 = vsel %vm5975_vm15, %v7570_v26, %v5972_v46  ;;  %v5986_v22 = vmul.f32 %v7572_v11, %v5985_v60  ;;  %v5079_v58 = vpop.xlane.xlu1 %5078  ;;  %v5658_v1 = vadd.f32 1.0, %v7576_v35  ;;  %v5117_v26 = vmul.f32 0.5, %v10275_v28 }
 0x7ef   : > { %v5981_v9 = vsel %vm5978_vm0, %v5980_v17, %v5976_v7  ;;  %7577 = vlog2.f32 %v5079_v58  ;;  %v5244_v13 = vsub.f32 %v5116_v23, %v5212_v61  ;;  %v5120_v28 = vmul.f32 0.5, %v10342_v52  ;;  %v5503_v52 = vld [vmem:[%s10163_s22 + $0xd8] sm:$0xff] }
 0x7f0   : > { %6169 = vst.msk [vmem:[%s10225_s26 + $0xa0] sm:$0xff] %vm6148_vm5, %v5981_v9  ;;  %v5987_v21 = vadd.f32 %v7572_v11, %v5986_v22  ;;  %7579 = vrcp.f32 %v5658_v1  ;;  %v6009_v25 = vand.u32 2147483648, %v5658_v1  ;;  %v6007_v5 = vand.u32 2147483647, %v5658_v1 }
 0x7f1   : > { %7581 = vlog2.f32 %v5073_v2  ;;  %v5300_v14 = vmul.f32 1.442695, %v5244_v13  ;;  %vm6003_vm7 = vweird.f32 %v5658_v1  ;;  %v5118_v9 = vmul.f32 0.5, %v10298_v6 }
 0x7f2   : > { %v5991_v29 = vsel %vm5990_vm2, %v7572_v11, %v5987_v21  ;;  %7583 = vlog2.f32 %v5067_v10  ;;  %v6010_v15 = vor.u32 1.1754944e-38, %v6009_v25  ;;  %vm6008_vm9 = vcmp.eq.f32.partialorder %v6007_v5, 8.507059e+37 }
 0x7f3   : > { %v5996_v34 = vsel %vm5993_vm4, %v5995_v30, %v5991_v29  ;;  %v5115_v11 = vmul.f32 0.5, %v10239_v50 }
 0x7f4   : > { %6170 = vst.msk [vmem:[%s10225_s26 + $0xa8] sm:$0xff] %vm6148_vm5, %v5996_v34 }
 0x7f5   : > { %v7578_v42 = vpop.eup %7577 }
 0x7f6   : > { %v7580_v24 = vpop.eup %7579  ;;  %v5082_v4 = vpop.xlane.xlu2 %5081  ;;  %v5179_v57 = vmul.f32 0.6931472, %v7578_v42 }
 0x7f7   : > { %v7582_v27 = vpop.eup %7581  ;;  %v5999_v49 = vmul.f32 %v7580_v24, %v5658_v1  ;;  %7585 = vlog2.f32 %v5082_v4  ;;  %vm6004_vm6 = vweird.f32 %v7580_v24  ;;  %v5122_v4 = vmul.f32 0.5, %v10394_v62 }
 0x7f8   : > { %v7584_v40 = vpop.eup %7583  ;;  %v5175_v45 = vmul.f32 0.6931472, %v7582_v27  ;;  %v5215_v55 = vmul.f32 0.5, %v5179_v57  ;;  %7587 = vlog2.f32 %v5076_v53  ;;  %vm6005_vm8 = vmor %vm6003_vm7, %vm6004_vm6 }
 0x7f9   : > { %v6000_v43 = vsub.f32 1.0, %v5999_v49  ;;  %v5171_v54 = vmul.f32 0.6931472, %v7584_v40  ;;  %7589 = vpow2.f32 %v5300_v14 }
 0x7fa   : > { %v5213_v31 = vmul.f32 0.5, %v5175_v45  ;;  %v5247_v47 = vsub.f32 %v5119_v8, %v5215_v55  ;;  %v5121_v45 = vmul.f32 0.5, %v10368_v18  ;;  %v5499_v55 = vld [vmem:[%s10163_s22 + $0xb8] sm:$0xff] }
 0x7fb   : > { %v6001_v44 = vmul.f32 %v7580_v24, %v6000_v43  ;;  %v5211_v20 = vmul.f32 0.5, %v5171_v54  ;;  %v5123_v54 = vmul.f32 0.5, %v10421_v12 }
 0x7fc   : > { %v5245_v48 = vsub.f32 %v5117_v26, %v5213_v31  ;;  %v5306_v56 = vmul.f32 1.442695, %v5247_v47 }
 0x7fd   : > { %v6002_v0 = vadd.f32 %v7580_v24, %v6001_v44  ;;  %v7586_v39 = vpop.eup %7585  ;;  %v5243_v63 = vsub.f32 %v5115_v11, %v5211_v20 }
 0x7fe   : > { %v5085_v36 = vpop.xlane.xlu0 %5084  ;;  %v7588_v41 = vpop.eup %7587  ;;  %v5181_v37 = vmul.f32 0.6931472, %v7586_v39  ;;  %v5302_v60 = vmul.f32 1.442695, %v5245_v48 }
 0x7ff   : > { %v6006_v59 = vsel %vm6005_vm8, %v7580_v24, %v6002_v0  ;;  %v7590_v38 = vpop.eup %7589  ;;  %v5177_v51 = vmul.f32 0.6931472, %v7588_v41  ;;  %7591 = vlog2.f32 %v5085_v36  ;;  %v5298_v22 = vmul.f32 1.442695, %v5243_v63  ;;  %v5501_v24 = vld [vmem:[%s10163_s22 + $0xc8] sm:$0xff]  ;;  %v5504_v41 = vld [vmem:[%s10163_s22 + $0xe0] sm:$0xff] }
 0x800   : > { %v6011_v33 = vsel %vm6008_vm9, %v6010_v15, %v6006_v59  ;;  %v5216_v17 = vmul.f32 0.5, %v5181_v37  ;;  %7593 = vpow2.f32 %v5306_v56 }
 0x801   : > { %6171 = vst.msk [vmem:[%s10225_s26 + $0xb0] sm:$0xff] %vm6148_vm5, %v6011_v33  ;;  %v5214_v3 = vmul.f32 0.5, %v5177_v51 }
 0x802   : > { %v5248_v50 = vsub.f32 %v5120_v28, %v5216_v17 }
 0x803   : > { %v5246_v21 = vsub.f32 %v5118_v9, %v5214_v3 }
 0x804   : > { %v5308_v29 = vmul.f32 1.442695, %v5248_v50 }
 0x805   : > { %v7592_v58 = vpop.eup %7591  ;;  %v5304_v27 = vmul.f32 1.442695, %v5246_v21 }
 0x806   : > { %v5422_v46 = vpop.xlane.xlu0 %5421  ;;  %v7594_v2 = vpop.eup %7593  ;;  %v5183_v34 = vmul.f32 0.6931472, %v7592_v58 }
 0x807   : > { %v5468_v16 = vmul.f32 %v7590_v38, %v5422_v46  ;;  %v5502_v46 = vld [vmem:[%s10163_s22 + $0xd0] sm:$0xff] }
 0x808   : > { %v5217_v43 = vmul.f32 0.5, %v5183_v34 }
 0x809   : > { %v5088_v35 = vpop.xlane.xlu1 %5087  ;;  %v5532_v7 = vadd.f32 %v5500_v19, %v5468_v16 }
 0x80a   : > { %7595 = vlog2.f32 %v5088_v35  ;;  %v5249_v47 = vsub.f32 %v5121_v45, %v5217_v43 }
 0x80b   : > { %7597 = vpow2.f32 %v5302_v60  ;;  %v5564_v10 = vsub.f32 0.0, %v5532_v7 }
 0x80c   : > { %v5310_v56 = vmul.f32 1.442695, %v5249_v47  ;;  %v5505_v47 = vld [vmem:[%s10163_s22 + $0xe8] sm:$0xff] }
 0x80d   : > { %v5091_v1 = vpop.xlane.xlu2 %5090  ;;  %v5620_v32 = vmul.f32 1.442695, %v5564_v10  ;;  %v5506_v10 = vld [vmem:[%s10163_s22 + $0xf0] sm:$0xff] }
 0x80e   : > { %7599 = vlog2.f32 %v5091_v1  ;;  %v5431_v30 = vpop.xlane.xlu0 %5430 }
 0x80f   : > { %7601 = vpow2.f32 %v5298_v22  ;;  %v5471_v61 = vmul.f32 %v7594_v2, %v5431_v30 }
 0x810   : > { %7603 = vpow2.f32 %v5620_v32  ;;  %v7596_v42 = vpop.eup %7595 }
 0x811   : > { %v7598_v23 = vpop.eup %7597  ;;  %v5185_v53 = vmul.f32 0.6931472, %v7596_v42  ;;  %v5425_v13 = vpop.xlane.xlu1 %5424  ;;  %v5535_v6 = vadd.f32 %v5503_v52, %v5471_v61  ;;  %7605 = vpow2.f32 %v5308_v29 }
 0x812   : > { %v5469_v49 = vmul.f32 %v7598_v23, %v5425_v13  ;;  %7607 = vpow2.f32 %v5304_v27 }
 0x813   : > { %v5218_v40 = vmul.f32 0.5, %v5185_v53  ;;  %v5567_v25 = vsub.f32 0.0, %v5535_v6 }
 0x814   : > { %v7600_v57 = vpop.eup %7599  ;;  %v5533_v44 = vadd.f32 %v5501_v24, %v5469_v49 }
 0x815   : > { %v7602_v14 = vpop.eup %7601  ;;  %v5187_v5 = vmul.f32 0.6931472, %v7600_v57  ;;  %v5419_v8 = vpop.xlane.xlu2 %5418  ;;  %v5250_v36 = vsub.f32 %v5122_v4, %v5218_v40  ;;  %v5626_v62 = vmul.f32 1.442695, %v5567_v25  ;;  %v5507_v40 = vld [vmem:[%s10163_s22 + $0xf8] sm:$0xff] }
 0x816   : > { %v7604_v0 = vpop.eup %7603  ;;  %v5467_v15 = vmul.f32 %v7602_v14, %v5419_v8  ;;  %v5565_v39 = vsub.f32 0.0, %v5533_v44  ;;  %v5440_v58 = vpop.xlane.xlu0 %5439 }
 0x817   : > { %v10631_v31 = vadd.f32 1.0, %v7604_v0  ;;  %v5219_v59 = vmul.f32 0.5, %v5187_v5  ;;  %v5312_v26 = vmul.f32 1.442695, %v5250_v36  ;;  %7609 = vpow2.f32 %v5626_v62  ;;  %v7606_v33 = vpop.eup %7605 }
 0x818   : > { %v5531_v18 = vadd.f32 %v5499_v55, %v5467_v15  ;;  %v5622_v20 = vmul.f32 1.442695, %v5565_v39  ;;  %v7608_v51 = vpop.eup %7607 }
 0x819   : > { %7611 = vrcp.f32 %v10631_v31  ;;  %v5251_v12 = vsub.f32 %v5123_v54, %v5219_v59  ;;  %v5434_v48 = vpop.xlane.xlu1 %5433  ;;  %v6037_v52 = vand.u32 2147483647, %v10631_v31  ;;  %v6039_v30 = vand.u32 2147483648, %v10631_v31 }
 0x81a   : > { %7613 = vpow2.f32 %v5312_v26  ;;  %v5563_v37 = vsub.f32 0.0, %v5531_v18  ;;  %v5472_v11 = vmul.f32 %v7606_v33, %v5434_v48  ;;  %vm6033_vm11 = vweird.f32 %v10631_v31 }
 0x81b   : > { %7615 = vpow2.f32 %v5622_v20  ;;  %v5314_v38 = vmul.f32 1.442695, %v5251_v12  ;;  %v6040_v43 = vor.u32 1.1754944e-38, %v6039_v30  ;;  %vm6038_vm13 = vcmp.eq.f32.partialorder %v6037_v52, 8.507059e+37 }
 0x81c   : > { %v5618_v63 = vmul.f32 1.442695, %v5563_v37  ;;  %v5536_v19 = vadd.f32 %v5504_v41, %v5472_v11 }
 0x81d   : > { %v5428_v60 = vpop.xlane.xlu2 %5427  ;;  %v7610_v17 = vpop.eup %7609  ;;  %7617 = vpow2.f32 %v5314_v38 }
 0x81e   : > { %v5470_v16 = vmul.f32 %v7608_v51, %v5428_v60  ;;  %v10636_v35 = vadd.f32 1.0, %v7610_v17  ;;  %v5568_v7 = vsub.f32 0.0, %v5536_v19  ;;  %7619 = vpow2.f32 %v5618_v63 }
 0x81f   : > { %v7612_v28 = vpop.eup %7611  ;;  %7621 = vpow2.f32 %v5310_v56 }
 0x820   : > { %v7614_v22 = vpop.eup %7613  ;;  %v6029_v3 = vmul.f32 %v7612_v28, %v10631_v31  ;;  %v5534_v50 = vadd.f32 %v5502_v46, %v5470_v16  ;;  %7623 = vrcp.f32 %v10636_v35  ;;  %v5628_v32 = vmul.f32 1.442695, %v5568_v7 }
 0x821   : > { %v7616_v9 = vpop.eup %7615  ;;  %v5474_v2 = vmul.f32 %v7614_v22, %v5440_v58  ;;  %vm6034_vm10 = vweird.f32 %v7612_v28  ;;  %v5443_v24 = vpop.xlane.xlu1 %5442  ;;  %v6082_v5 = vand.u32 2147483647, %v10636_v35  ;;  %v6084_v55 = vand.u32 2147483648, %v10636_v35 }
 0x822   : > { %v6030_v1 = vsub.f32 1.0, %v6029_v3  ;;  %v5566_v21 = vsub.f32 0.0, %v5534_v50  ;;  %v10643_v29 = vadd.f32 1.0, %v7616_v9  ;;  %7625 = vpow2.f32 %v5628_v32  ;;  %vm6035_vm12 = vmor %vm6033_vm11, %vm6034_vm10 }
 0x823   : > { %v7618_v34 = vpop.eup %7617  ;;  %v5538_v42 = vadd.f32 %v5506_v10, %v5474_v2  ;;  %vm6078_vm14 = vweird.f32 %v10636_v35  ;;  %vm10663_vm0 = vcmp.eq.f32.partialorder %v6082_v5, 8.507059e+37  ;;  %v6085_v20 = vor.u32 1.1754944e-38, %v6084_v55 }
 0x824   : > { %v6031_v61 = vmul.f32 %v7612_v28, %v6030_v1  ;;  %v5624_v23 = vmul.f32 1.442695, %v5566_v21  ;;  %v7620_v53 = vpop.eup %7619  ;;  %7627 = vrcp.f32 %v10643_v29  ;;  %v5475_v49 = vmul.f32 %v7618_v34, %v5443_v24 }
 0x825   : > { %v7622_v13 = vpop.eup %7621  ;;  %v10647_v4 = vadd.f32 1.0, %v7620_v53  ;;  %v5570_v27 = vsub.f32 0.0, %v5538_v42  ;;  %v5437_v45 = vpop.xlane.xlu2 %5436  ;;  %v6054_v18 = vand.u32 2147483648, %v10643_v29  ;;  %v6052_v56 = vand.u32 2147483647, %v10643_v29 }
 0x826   : > { %v6032_v6 = vadd.f32 %v7612_v28, %v6031_v61  ;;  %v7624_v57 = vpop.eup %7623  ;;  %7629 = vpow2.f32 %v5624_v23  ;;  %v5539_v36 = vadd.f32 %v5507_v40, %v5475_v49  ;;  %v5473_v31 = vmul.f32 %v7622_v13, %v5437_v45 }
 0x827   : > { %v6074_v14 = vmul.f32 %v7624_v57, %v10636_v35  ;;  %7631 = vrcp.f32 %v10647_v4  ;;  %v5632_v54 = vmul.f32 1.442695, %v5570_v27  ;;  %vm6079_vm15 = vweird.f32 %v7624_v57 }
 0x828   : > { %v6036_v25 = vsel %vm6035_vm12, %v7612_v28, %v6032_v6  ;;  %v7626_v8 = vpop.eup %7625  ;;  %v5571_v37 = vsub.f32 0.0, %v5539_v36  ;;  %vm6080_vm1 = vmor %vm6078_vm14, %vm6079_vm15  ;;  %v5537_v63 = vadd.f32 %v5505_v47, %v5473_v31  ;;  %vm6048_vm2 = vweird.f32 %v10643_v29 }
 0x829   : > { %v6041_v44 = vsel %vm6038_vm13, %v6040_v43, %v6036_v25  ;;  %v6075_v0 = vsub.f32 1.0, %v6074_v14  ;;  %v10658_v15 = vadd.f32 1.0, %v7626_v8  ;;  %7633 = vpow2.f32 %v5632_v54 }
 0x82a   : > { %6173 = vst.msk [vmem:[%s10225_s26 + $0xc0] sm:$0xff] %vm6148_vm5, %v6041_v44  ;;  %v7628_v62 = vpop.eup %7627  ;;  %v5634_v46 = vmul.f32 1.442695, %v5571_v37  ;;  %v6055_v60 = vor.u32 1.1754944e-38, %v6054_v18  ;;  %v6022_v35 = vand.u32 2147483647, %v10647_v4  ;;  %vm6018_vm8 = vweird.f32 %v10647_v4 }
 0x82b   : > { %v6044_v39 = vmul.f32 %v7628_v62, %v10643_v29  ;;  %v6076_v59 = vmul.f32 %v7624_v57, %v6075_v0  ;;  %7635 = vrcp.f32 %v10658_v15  ;;  %vm6049_vm3 = vweird.f32 %v7628_v62 }
 0x82c   : > { %v7630_v26 = vpop.eup %7629  ;;  %v6024_v22 = vand.u32 2147483648, %v10647_v4  ;;  %vm6050_vm4 = vmor %vm6048_vm2, %vm6049_vm3  ;;  %v5569_v58 = vsub.f32 0.0, %v5537_v63  ;;  %vm6053_vm7 = vcmp.eq.f32.partialorder %v6052_v56, 8.507059e+37  ;;  %v6097_v30 = vand.u32 2147483647, %v10658_v15 }
 0x82d   : > { %v7632_v12 = vpop.eup %7631  ;;  %v6045_v41 = vsub.f32 1.0, %v6044_v39  ;;  %v6077_v48 = vadd.f32 %v7624_v57, %v6076_v59  ;;  %v10668_v11 = vadd.f32 1.0, %v7630_v26  ;;  %vm6023_vm10 = vcmp.eq.f32.partialorder %v6022_v35, 8.507059e+37 }
 0x82e   : > { %v6014_v38 = vmul.f32 %v7632_v12, %v10647_v4  ;;  %vm6019_vm6 = vweird.f32 %v7632_v12  ;;  %v6025_v29 = vor.u32 1.1754944e-38, %v6024_v22  ;;  %v6099_v34 = vand.u32 2147483648, %v10658_v15 }
 0x82f   : > { %v6046_v51 = vmul.f32 %v7628_v62, %v6045_v41  ;;  %v6081_v19 = vsel %vm6080_vm1, %v7624_v57, %v6077_v48  ;;  %7637 = vrcp.f32 %v10668_v11  ;;  %v7634_v28 = vpop.eup %7633  ;;  %vm6020_vm9 = vmor %vm6018_vm8, %vm6019_vm6  ;;  %v5630_v23 = vmul.f32 1.442695, %v5569_v58 }
 0x830   : > { %v6086_v17 = vsel %vm10663_vm0, %v6085_v20, %v6081_v19  ;;  %v6015_v16 = vsub.f32 1.0, %v6014_v38  ;;  %7639 = vpow2.f32 %v5634_v46  ;;  %v10684_v10 = vadd.f32 1.0, %v7634_v28 }
 0x831   : > { %v6047_v7 = vadd.f32 %v7628_v62, %v6046_v51  ;;  %6176 = vst.msk [vmem:[%s10225_s26 + $0xd8] sm:$0xff] %vm6148_vm5, %v6086_v17  ;;  %v7636_v3 = vpop.eup %7635  ;;  %vm6093_vm12 = vweird.f32 %v10658_v15  ;;  %vm6098_vm13 = vcmp.eq.f32.partialorder %v6097_v30, 8.507059e+37  ;;  %v6100_v57 = vor.u32 1.1754944e-38, %v6099_v34 }
 0x832   : > { %v6016_v50 = vmul.f32 %v7632_v12, %v6015_v16  ;;  %v6089_v1 = vmul.f32 %v7636_v3, %v10658_v15  ;;  %7641 = vrcp.f32 %v10684_v10  ;;  %vm6094_vm11 = vweird.f32 %v7636_v3 }
 0x833   : > { %v6051_v9 = vsel %vm6050_vm4, %v7628_v62, %v6047_v7  ;;  %7643 = vpow2.f32 %v5630_v23  ;;  %vm6095_vm14 = vmor %vm6093_vm12, %vm6094_vm11  ;;  %v6067_v43 = vand.u32 2147483647, %v10668_v11  ;;  %v6069_v40 = vand.u32 2147483648, %v10668_v11 }
 0x834   : > { %v6056_v32 = vsel %vm6053_vm7, %v6055_v60, %v6051_v9  ;;  %v6017_v2 = vadd.f32 %v7632_v12, %v6016_v50  ;;  %v6090_v52 = vsub.f32 1.0, %v6089_v1  ;;  %vm6063_vm0 = vweird.f32 %v10668_v11 }
 0x835   : > { %v7638_v21 = vpop.eup %7637  ;;  %6174 = vst.msk [vmem:[%s10225_s26 + $0xc8] sm:$0xff] %vm6148_vm5, %v6056_v32  ;;  %v6127_v0 = vand.u32 2147483647, %v10684_v10  ;;  %v6129_v54 = vand.u32 2147483648, %v10684_v10  ;;  %vm6068_vm1 = vcmp.eq.f32.partialorder %v6067_v43, 8.507059e+37  ;;  %v6070_v36 = vor.u32 1.1754944e-38, %v6069_v40 }
 0x836   : > { %v6021_v61 = vsel %vm6020_vm9, %v7632_v12, %v6017_v2  ;;  %v6059_v42 = vmul.f32 %v7638_v21, %v10668_v11  ;;  %v7640_v53 = vpop.eup %7639  ;;  %v6091_v24 = vmul.f32 %v7636_v3, %v6090_v52  ;;  %vm6064_vm15 = vweird.f32 %v7638_v21 }
 0x837   : > { %v6026_v13 = vsel %vm6023_vm10, %v6025_v29, %v6021_v61  ;;  %v5667_v6 = vadd.f32 1.0, %v7640_v53  ;;  %vm6065_vm3 = vmor %vm6063_vm0, %vm6064_vm15  ;;  %vm6123_vm4 = vweird.f32 %v10684_v10  ;;  %v6130_v18 = vor.u32 1.1754944e-38, %v6129_v54 }
 0x838   : > { %6172 = vst.msk [vmem:[%s10225_s26 + $0xb8] sm:$0xff] %vm6148_vm5, %v6026_v13  ;;  %v6060_v4 = vsub.f32 1.0, %v6059_v42  ;;  %v6092_v27 = vadd.f32 %v7636_v3, %v6091_v24  ;;  %v7642_v49 = vpop.eup %7641  ;;  %vm6128_vm7 = vcmp.eq.f32.partialorder %v6127_v0, 8.507059e+37 }
 0x839   : > { %7645 = vrcp.f32 %v5667_v6  ;;  %v6119_v14 = vmul.f32 %v7642_v49, %v10684_v10  ;;  %v7644_v8 = vpop.eup %7643  ;;  %vm6124_vm2 = vweird.f32 %v7642_v49  ;;  %v6144_v41 = vand.u32 2147483648, %v5667_v6 }
 0x83a   : > { %v6096_v25 = vsel %vm6095_vm14, %v7636_v3, %v6092_v27  ;;  %v6061_v45 = vmul.f32 %v7638_v21, %v6060_v4  ;;  %v5665_v31 = vadd.f32 1.0, %v7644_v8  ;;  %vm6125_vm6 = vmor %vm6123_vm4, %vm6124_vm2  ;;  %v6142_v37 = vand.u32 2147483647, %v5667_v6 }
 0x83b   : > { %v6101_v44 = vsel %vm6098_vm13, %v6100_v57, %v6096_v25  ;;  %v6120_v5 = vsub.f32 1.0, %v6119_v14  ;;  %vm6138_vm9 = vweird.f32 %v5667_v6  ;;  %v6145_v38 = vor.u32 1.1754944e-38, %v6144_v41 }
 0x83c   : > { %6177 = vst.msk [vmem:[%s10225_s26 + $0xe0] sm:$0xff] %vm6148_vm5, %v6101_v44  ;;  %v6062_v55 = vadd.f32 %v7638_v21, %v6061_v45  ;;  %7647 = vrcp.f32 %v5665_v31  ;;  %vm6143_vm11 = vcmp.eq.f32.partialorder %v6142_v37, 8.507059e+37  ;;  %v6114_v60 = vand.u32 2147483648, %v5665_v31 }
 0x83d   : > { %v6121_v62 = vmul.f32 %v7642_v49, %v6120_v5  ;;  %v6112_v16 = vand.u32 2147483647, %v5665_v31  ;;  %vm6108_vm13 = vweird.f32 %v5665_v31 }
 0x83e   : > { %v6066_v15 = vsel %vm6065_vm3, %v7638_v21, %v6062_v55  ;;  %v6115_v7 = vor.u32 1.1754944e-38, %v6114_v60 }
 0x83f   : > { %v7646_v39 = vpop.eup %7645  ;;  %v6071_v59 = vsel %vm6068_vm1, %v6070_v36, %v6066_v15  ;;  %v6122_v47 = vadd.f32 %v7642_v49, %v6121_v62  ;;  %vm6113_vm15 = vcmp.eq.f32.partialorder %v6112_v16, 8.507059e+37 }
 0x840   : > { %v6134_v26 = vmul.f32 %v7646_v39, %v5667_v6  ;;  %6175 = vst.msk [vmem:[%s10225_s26 + $0xd0] sm:$0xff] %vm6148_vm5, %v6071_v59  ;;  %vm6139_vm8 = vweird.f32 %v7646_v39 }
 0x841   : > { %v6126_v33 = vsel %vm6125_vm6, %v7642_v49, %v6122_v47  ;;  %vm6140_vm10 = vmor %vm6138_vm9, %vm6139_vm8 }
 0x842   : > { %v6135_v20 = vsub.f32 1.0, %v6134_v26  ;;  %v6131_v12 = vsel %vm6128_vm7, %v6130_v18, %v6126_v33  ;;  %v7648_v11 = vpop.eup %7647 }
 0x843   : > { %6179 = vst.msk [vmem:[%s10225_s26 + $0xf0] sm:$0xff] %vm6148_vm5, %v6131_v12  ;;  %v6104_v63 = vmul.f32 %v7648_v11, %v5665_v31  ;;  %vm6109_vm12 = vweird.f32 %v7648_v11 }
 0x844   : > { %v6136_v48 = vmul.f32 %v7646_v39, %v6135_v20  ;;  %vm6110_vm14 = vmor %vm6108_vm13, %vm6109_vm12 }
 0x845   : > { %v6105_v46 = vsub.f32 1.0, %v6104_v63 }
 0x846   : > { %v6137_v56 = vadd.f32 %v7646_v39, %v6136_v48 }
 0x847   : > { %v6106_v17 = vmul.f32 %v7648_v11, %v6105_v46 }
 0x848   : > { %v6141_v51 = vsel %vm6140_vm10, %v7646_v39, %v6137_v56 }
 0x849   : > { %v6146_v19 = vsel %vm6143_vm11, %v6145_v38, %v6141_v51  ;;  %v6107_v28 = vadd.f32 %v7648_v11, %v6106_v17 }
 0x84a   : > { %6180 = vst.msk [vmem:[%s10225_s26 + $0xf8] sm:$0xff] %vm6148_vm5, %v6146_v19 }
 0x84b   : > { %v6111_v35 = vsel %vm6110_vm14, %v7648_v11, %v6107_v28 }
 0x84c   : > { %v6116_v22 = vsel %vm6113_vm15, %v6115_v7, %v6111_v35 }
 0x84d   : > { %6178 = vst.msk [vmem:[%s10225_s26 + $0xe8] sm:$0xff] %vm6148_vm5, %v6116_v22 }
 0x84e PF: > { %s16_s21 = sadd.s32 1, %s7657_s21  }
 0x84f   : > { %p13_p4 = scmp.ge.s32.totalorder %s16_s21, 6  }
 0x851   :  { %15 = sbr.rel (!%p13_p4) target bundleno = 1 (0x1), region = 80 }

</bundles_post_ra>
